<compile_context>
chip_gen: v7x
topology: tpu7x:2x2x1
jax: 0.10.0
libtpu: 0.0.40
codegen_flags: <defaults>
</compile_context>

<pallas_src>
import functools

import jax
import jax.numpy as jnp
from jax.experimental import pallas as pl
from jax.experimental.pallas import tpu as pltpu

LOG_STD_MAX = 2.0
LOG_STD_MIN = -5.0


# ----------------------------------------------------------------------------
# Fused actor kernel.  Grid axis 0 = branch (0: mean, 1: logstd).
# ----------------------------------------------------------------------------
def _actor_kernel(
    # ---- shared inputs (same block for both branches) ----
    nodef_ref, adj_ref, emb_ref, x_ref,
    gw0_ref, gb0_ref, gw1_ref, gb1_ref, gw2_ref, gb2_ref,
    wih0_ref, whh0_ref, lb0_ref, wihh1_ref, lb1_ref,
    # ---- per-branch stacked weights (leading dim indexed by the grid) ----
    wq_ref, bq_ref, wkv_ref, bkv_ref, wo_ref, bo_ref,
    mw1_ref, mb1_ref, mw2_ref, mb2_ref, mw3_ref, mb3_ref, mw4_ref, mb4_ref,
    # ---- output + scratch ----
    out_ref, qscr_ref,
    *, n_heads, n_dec_layers):
  f32 = jnp.float32
  bsz, seqlen, _ = x_ref.shape
  hidden = whh0_ref.shape[0]
  n_nodes = nodef_ref.shape[0]
  n_q = bsz * seqlen

  # branch flag as float (0.0 -> mean branch, 1.0 -> logstd branch)
  branch_flag = pl.program_id(0).astype(f32)

  # ---------------- GNN: 3 dense graph-conv layers ---------------------------
  a = adj_ref[...]
  h = nodef_ref[...]
  for w_ref, b_ref in ((gw0_ref, gb0_ref), (gw1_ref, gb1_ref), (gw2_ref, gb2_ref)):
    m = jnp.dot(a, h, preferred_element_type=f32)
    h = jnp.maximum(
        jnp.dot(m, w_ref[...], preferred_element_type=f32) + b_ref[...], 0.0)
  # per-node cell feature = [gnn feature | cell-type embedding]  -> (N, D)
  mem2 = jnp.concatenate([h, emb_ref[...]], axis=-1)
  d = mem2.shape[-1]
  n_cells = n_nodes // bsz

  # ---------------- LSTM encoder (2 layers, statically unrolled) -------------
  x2 = x_ref[...].reshape(n_q, x_ref.shape[2])
  # hoisted layer-0 input projection: one wide matmul instead of seqlen tiny ones
  g0_all = (jnp.dot(x2, wih0_ref[...], preferred_element_type=f32)
            + lb0_ref[...]).reshape(bsz, seqlen, 4 * hidden)
  # hoisted weight loads / bias broadcast (no per-iteration re-broadcast)
  whh0 = whh0_ref[...]
  wihh1 = wihh1_ref[...]
  b1b = jnp.broadcast_to(lb1_ref[...], (bsz, 4 * hidden))

  def lstm_cell(g, c):
    i = jax.nn.sigmoid(g[:, 0 * hidden:1 * hidden])
    f = jax.nn.sigmoid(g[:, 1 * hidden:2 * hidden])
    gg = jnp.tanh(g[:, 2 * hidden:3 * hidden])
    o = jax.nn.sigmoid(g[:, 3 * hidden:4 * hidden])
    c_new = f * c + i * gg
    return o * jnp.tanh(c_new), c_new

  h0 = jnp.zeros((bsz, hidden), f32)
  c0 = jnp.zeros((bsz, hidden), f32)
  h1 = jnp.zeros((bsz, hidden), f32)
  c1 = jnp.zeros((bsz, hidden), f32)
  for t in range(seqlen):  # static unroll; seqlen is small
    g0 = g0_all[:, t, :] + jnp.dot(h0, whh0, preferred_element_type=f32)
    h0, c0 = lstm_cell(g0, c0)
    g1 = jnp.dot(jnp.concatenate([h0, h1], axis=-1), wihh1,
                 preferred_element_type=f32) + b1b
    h1, c1 = lstm_cell(g1, c1)
    qscr_ref[:, t, :] = h1          # VMEM scratch; read back once below
  q2 = qscr_ref[...].reshape(n_q, hidden)                     # (B*S, D)

  # ---------------- self-attention decoder (3 layers, 4 heads) ---------------
  hd = d // n_heads
  scale = 1.0 / float(hd) ** 0.5
  # K/V projections for ALL layers fused into one wide matmul on the fixed memory
  kv_all = jnp.dot(mem2, wkv_ref[0], preferred_element_type=f32) + bkv_ref[0]

  for l in range(n_dec_layers):
    wo_l = wo_ref[0, l]                                        # (D, D)
    bo_l = bo_ref[0, l]                                        # (1, D)
    qp = (jnp.dot(q2, wq_ref[0, l], preferred_element_type=f32)
          + bq_ref[0, l]).reshape(bsz, seqlen, d)              # (B, S, D)
    kp = kv_all[:, (2 * l) * d:(2 * l + 1) * d].reshape(bsz, n_cells, d)
    vp = kv_all[:, (2 * l + 1) * d:(2 * l + 2) * d].reshape(bsz, n_cells, d)

    attn = jnp.zeros((n_q, d), f32)
    for hh in range(n_heads):
      sl = slice(hh * hd, (hh + 1) * hd)
      sc = jnp.einsum('bsk,bck->bsc', qp[:, :, sl], kp[:, :, sl],
                      preferred_element_type=f32) * scale      # (B, S, C)
      sc = sc - jnp.max(sc, axis=-1, keepdims=True)
      p = jnp.exp(sc)
      p = p * pl.reciprocal(jnp.sum(p, axis=-1, keepdims=True), approx=True)
      ctx = jnp.einsum('bsc,bck->bsk', p, vp[:, :, sl],
                       preferred_element_type=f32)             # (B, S, hd)
      # accumulate through the per-head slice of W_o -> no lane concat needed
      attn = attn + jnp.dot(ctx.reshape(n_q, hd), wo_l[sl, :],
                            preferred_element_type=f32)
    q2 = q2 + attn + bo_l                                      # residual

  # ---------------- MLP head (branch-selected weights) -----------------------
  hm = jnp.maximum(
      jnp.dot(q2, mw1_ref[0], preferred_element_type=f32) + mb1_ref[0], 0.0)
  hm = jnp.maximum(
      jnp.dot(hm, mw2_ref[0], preferred_element_type=f32) + mb2_ref[0], 0.0)
  hm = jnp.maximum(
      jnp.dot(hm, mw3_ref[0], preferred_element_type=f32) + mb3_ref[0], 0.0)
  raw = jnp.dot(hm, mw4_ref[0], preferred_element_type=f32) + mb4_ref[0]
  squashed = LOG_STD_MIN + 0.5 * (LOG_STD_MAX - LOG_STD_MIN) * (jnp.tanh(raw) + 1.0)
  out = raw + branch_flag * (squashed - raw)   # mean branch keeps raw, logstd squashed
  out_ref[0] = out.reshape(bsz, seqlen, 1)


# ----------------------------------------------------------------------------
# Parameter initialization (deterministic, synthetic).
# ----------------------------------------------------------------------------
def init_params(key, *, node_feat_dim=16, gnn_dim=32, libcells=810, emb_dim=32,
                lstm_in=16, hidden=64, net_arch=(256, 128, 64), n_dec_layers=3):
  keys = iter(jax.random.split(key, 32))

  def dense(shape, scale=0.1):
    return jax.random.normal(next(keys), shape, jnp.float32) * scale

  params = {}
  params["gnn"] = {
      "w0": dense((node_feat_dim, gnn_dim)), "b0": jnp.zeros((1, gnn_dim), jnp.float32),
      "w1": dense((gnn_dim, gnn_dim)),       "b1": jnp.zeros((1, gnn_dim), jnp.float32),
      "w2": dense((gnn_dim, gnn_dim)),       "b2": jnp.zeros((1, gnn_dim), jnp.float32),
  }
  params["embedding"] = dense((libcells, emb_dim), scale=1.0)
  params["lstm"] = {
      "wih0": dense((lstm_in, 4 * hidden)),
      "whh0": dense((hidden, 4 * hidden)),
      "b0": jnp.zeros((1, 4 * hidden), jnp.float32),
      # layer-1 input + recurrent weights stacked: [wih1; whh1]
      "wihh1": dense((2 * hidden, 4 * hidden)),
      "b1": jnp.zeros((1, 4 * hidden), jnp.float32),
  }
  # Decoder weights: leading dim 2 = (mean branch, logstd branch).
  # K/V projections of all layers fused side-by-side into one (hidden, 2*L*hidden).
  params["dec"] = {
      "wq": dense((2, n_dec_layers, hidden, hidden)),
      "bq": jnp.zeros((2, n_dec_layers, 1, hidden), jnp.float32),
      "wkv": dense((2, hidden, 2 * n_dec_layers * hidden)),
      "bkv": jnp.zeros((2, 1, 2 * n_dec_layers * hidden), jnp.float32),
      "wo": dense((2, n_dec_layers, hidden, hidden)),
      "bo": jnp.zeros((2, n_dec_layers, 1, hidden), jnp.float32),
  }
  d0, d1, d2 = net_arch
  params["mlp"] = {
      "w1": dense((2, hidden, d0)), "b1": jnp.zeros((2, 1, d0), jnp.float32),
      "w2": dense((2, d0, d1)),     "b2": jnp.zeros((2, 1, d1), jnp.float32),
      "w3": dense((2, d1, d2)),     "b3": jnp.zeros((2, 1, d2), jnp.float32),
      "w4": dense((2, d2, 1)),      "b4": jnp.zeros((2, 1, 1), jnp.float32),
  }
  return params


# ----------------------------------------------------------------------------
# Full MOSACActor.forward (one fused pallas_call).
# ----------------------------------------------------------------------------
def mosac_actor_forward(params, node_feats, adj, celltype, delta_strength):
  # Embedding lookup (gather) kept in plain JAX glue.
  emb = jnp.take(params["embedding"], celltype, axis=0)        # (N, 32)
  bsz, seqlen, _ = delta_strength.shape
  hidden = params["lstm"]["whh0"].shape[0]
  n_dec_layers = params["dec"]["wq"].shape[1]

  shared = (node_feats, adj, emb, delta_strength,
            params["gnn"]["w0"], params["gnn"]["b0"],
            params["gnn"]["w1"], params["gnn"]["b1"],
            params["gnn"]["w2"], params["gnn"]["b2"],
            params["lstm"]["wih0"], params["lstm"]["whh0"], params["lstm"]["b0"],
            params["lstm"]["wihh1"], params["lstm"]["b1"])
  branch = (params["dec"]["wq"], params["dec"]["bq"],
            params["dec"]["wkv"], params["dec"]["bkv"],
            params["dec"]["wo"], params["dec"]["bo"],
            params["mlp"]["w1"], params["mlp"]["b1"],
            params["mlp"]["w2"], params["mlp"]["b2"],
            params["mlp"]["w3"], params["mlp"]["b3"],
            params["mlp"]["w4"], params["mlp"]["b4"])

  def shared_spec(arr):
    nd = arr.ndim
    return pl.BlockSpec(arr.shape, lambda b, _nd=nd: (0,) * _nd)

  def branch_spec(arr):
    nd = arr.ndim
    return pl.BlockSpec((1,) + arr.shape[1:],
                        lambda b, _nd=nd: (b,) + (0,) * (_nd - 1))

  out = pl.pallas_call(
      functools.partial(_actor_kernel, n_heads=4, n_dec_layers=n_dec_layers),
      out_shape=jax.ShapeDtypeStruct((2, bsz, seqlen, 1), jnp.float32),
      grid=(2,),
      in_specs=[shared_spec(a) for a in shared] + [branch_spec(a) for a in branch],
      out_specs=pl.BlockSpec((1, bsz, seqlen, 1), lambda b: (b, 0, 0, 0)),
      scratch_shapes=[pltpu.VMEM((bsz, seqlen, hidden), jnp.float32)],
      compiler_params=pltpu.CompilerParams(dimension_semantics=("parallel",)),
  )(*shared, *branch)

  action_mean = out[0]          # (B, S, 1)
  action_logstd = out[1]        # (B, S, 1)
  return action_mean, action_logstd


# ----------------------------------------------------------------------------
# Demo
# ----------------------------------------------------------------------------
if __name__ == "__main__":
  key = jax.random.PRNGKey(0)
  k_param, k_delta, k_nodes, k_adj, k_cell = jax.random.split(key, 5)

  batch = 2
  seqlen = 8
  delta_feature_dim = 16      # = np.prod(action_dim) = cells per batch element
  node_feat_dim = 16
  libcells = 810
  n_nodes = batch * delta_feature_dim

  params = init_params(k_param, node_feat_dim=node_feat_dim,
                       lstm_in=delta_feature_dim, libcells=libcells)

  delta_strength = jax.random.normal(
      k_delta, (batch, seqlen, delta_feature_dim), jnp.float32)
  node_feats = jax.random.normal(k_nodes, (n_nodes, node_feat_dim), jnp.float32)

  # Synthetic dense adjacency with self-loops, row-normalized.
  raw = (jax.random.uniform(k_adj, (n_nodes, n_nodes)) > 0.7).astype(jnp.float32)
  adj = raw + jnp.eye(n_nodes, dtype=jnp.float32)
  adj = adj / jnp.sum(adj, axis=-1, keepdims=True)

  celltype = jax.random.randint(k_cell, (n_nodes,), 0, libcells, dtype=jnp.int32)

  fwd = jax.jit(mosac_actor_forward)
  action_mean, action_logstd = fwd(params, node_feats, adj, celltype, delta_strength)
  jax.block_until_ready((action_mean, action_logstd))

  assert action_mean.shape == (batch, seqlen, 1)
  assert action_logstd.shape == (batch, seqlen, 1)
  assert bool(jnp.all(action_logstd >= LOG_STD_MIN - 1e-5))
  assert bool(jnp.all(action_logstd <= LOG_STD_MAX + 1e-5))
  assert bool(jnp.all(jnp.isfinite(action_mean)))
  print("KERNEL_OK")
</pallas_src>

<mosaic_0001>
module attributes {stable_mosaic.version = 11 : i64} {
  func.func @_actor_kernel(%arg0: i32, %arg1: memref<32x16xf32, #tpu.memory_space<vmem>>, %arg2: memref<32x32xf32, #tpu.memory_space<vmem>>, %arg3: memref<32x32xf32, #tpu.memory_space<vmem>>, %arg4: memref<2x8x16xf32, #tpu.memory_space<vmem>>, %arg5: memref<16x32xf32, #tpu.memory_space<vmem>>, %arg6: memref<1x32xf32, #tpu.memory_space<vmem>>, %arg7: memref<32x32xf32, #tpu.memory_space<vmem>>, %arg8: memref<1x32xf32, #tpu.memory_space<vmem>>, %arg9: memref<32x32xf32, #tpu.memory_space<vmem>>, %arg10: memref<1x32xf32, #tpu.memory_space<vmem>>, %arg11: memref<16x256xf32, #tpu.memory_space<vmem>>, %arg12: memref<64x256xf32, #tpu.memory_space<vmem>>, %arg13: memref<1x256xf32, #tpu.memory_space<vmem>>, %arg14: memref<128x256xf32, #tpu.memory_space<vmem>>, %arg15: memref<1x256xf32, #tpu.memory_space<vmem>>, %arg16: memref<1x3x64x64xf32, #tpu.memory_space<vmem>>, %arg17: memref<1x3x1x64xf32, #tpu.memory_space<vmem>>, %arg18: memref<1x64x384xf32, #tpu.memory_space<vmem>>, %arg19: memref<1x1x384xf32, #tpu.memory_space<vmem>>, %arg20: memref<1x3x64x64xf32, #tpu.memory_space<vmem>>, %arg21: memref<1x3x1x64xf32, #tpu.memory_space<vmem>>, %arg22: memref<1x64x256xf32, #tpu.memory_space<vmem>>, %arg23: memref<1x1x256xf32, #tpu.memory_space<vmem>>, %arg24: memref<1x256x128xf32, #tpu.memory_space<vmem>>, %arg25: memref<1x1x128xf32, #tpu.memory_space<vmem>>, %arg26: memref<1x128x64xf32, #tpu.memory_space<vmem>>, %arg27: memref<1x1x64xf32, #tpu.memory_space<vmem>>, %arg28: memref<1x64x1xf32, #tpu.memory_space<vmem>>, %arg29: memref<1x1x1xf32, #tpu.memory_space<vmem>>, %arg30: memref<1x2x8x1xf32, #tpu.memory_space<vmem>>, %arg31: memref<2x8x64xf32, #tpu.memory_space<vmem>>) attributes {dimension_semantics = [#tpu.dimension_semantics<parallel>], iteration_bounds = array<i64: 2>, scalar_prefetch = 0 : i64, scratch_operands = 1 : i64, tpu.core_type = #tpu.core_type<tc>, window_params = [{pipeline_mode = #tpu.pipeline_mode<synchronous>, transform_indices = @transform_0, window_bounds = array<i64: 32, 16>}, {pipeline_mode = #tpu.pipeline_mode<synchronous>, transform_indices = @transform_1, window_bounds = array<i64: 32, 32>}, {pipeline_mode = #tpu.pipeline_mode<synchronous>, transform_indices = @transform_2, window_bounds = array<i64: 32, 32>}, {pipeline_mode = #tpu.pipeline_mode<synchronous>, transform_indices = @transform_3, window_bounds = array<i64: 2, 8, 16>}, {pipeline_mode = #tpu.pipeline_mode<synchronous>, transform_indices = @transform_4, window_bounds = array<i64: 16, 32>}, {pipeline_mode = #tpu.pipeline_mode<synchronous>, transform_indices = @transform_5, window_bounds = array<i64: 1, 32>}, {pipeline_mode = #tpu.pipeline_mode<synchronous>, transform_indices = @transform_6, window_bounds = array<i64: 32, 32>}, {pipeline_mode = #tpu.pipeline_mode<synchronous>, transform_indices = @transform_7, window_bounds = array<i64: 1, 32>}, {pipeline_mode = #tpu.pipeline_mode<synchronous>, transform_indices = @transform_8, window_bounds = array<i64: 32, 32>}, {pipeline_mode = #tpu.pipeline_mode<synchronous>, transform_indices = @transform_9, window_bounds = array<i64: 1, 32>}, {pipeline_mode = #tpu.pipeline_mode<synchronous>, transform_indices = @transform_10, window_bounds = array<i64: 16, 256>}, {pipeline_mode = #tpu.pipeline_mode<synchronous>, transform_indices = @transform_11, window_bounds = array<i64: 64, 256>}, {pipeline_mode = #tpu.pipeline_mode<synchronous>, transform_indices = @transform_12, window_bounds = array<i64: 1, 256>}, {pipeline_mode = #tpu.pipeline_mode<synchronous>, transform_indices = @transform_13, window_bounds = array<i64: 128, 256>}, {pipeline_mode = #tpu.pipeline_mode<synchronous>, transform_indices = @transform_14, window_bounds = array<i64: 1, 256>}, {transform_indices = @transform_15, window_bounds = array<i64: 1, 3, 64, 64>}, {transform_indices = @transform_16, window_bounds = array<i64: 1, 3, 1, 64>}, {transform_indices = @transform_17, window_bounds = array<i64: 1, 64, 384>}, {transform_indices = @transform_18, window_bounds = array<i64: 1, 1, 384>}, {transform_indices = @transform_19, window_bounds = array<i64: 1, 3, 64, 64>}, {transform_indices = @transform_20, window_bounds = array<i64: 1, 3, 1, 64>}, {transform_indices = @transform_21, window_bounds = array<i64: 1, 64, 256>}, {transform_indices = @transform_22, window_bounds = array<i64: 1, 1, 256>}, {transform_indices = @transform_23, window_bounds = array<i64: 1, 256, 128>}, {transform_indices = @transform_24, window_bounds = array<i64: 1, 1, 128>}, {transform_indices = @transform_25, window_bounds = array<i64: 1, 128, 64>}, {transform_indices = @transform_26, window_bounds = array<i64: 1, 1, 64>}, {transform_indices = @transform_27, window_bounds = array<i64: 1, 64, 1>}, {transform_indices = @transform_28, window_bounds = array<i64: 1, 1, 1>}, {transform_indices = @transform_29, window_bounds = array<i64: 1, 2, 8, 1>}]} {
    %0 = arith.sitofp %arg0 : i32 to f32
    %c0 = arith.constant 0 : index
    %c0_0 = arith.constant 0 : index
    %1 = vector.load %arg2[%c0, %c0_0] : memref<32x32xf32, #tpu.memory_space<vmem>>, vector<32x32xf32>
    %c0_1 = arith.constant 0 : index
    %c0_2 = arith.constant 0 : index
    %2 = vector.load %arg1[%c0_1, %c0_2] : memref<32x16xf32, #tpu.memory_space<vmem>>, vector<32x16xf32>
    %cst = arith.constant dense<0.000000e+00> : vector<32x16xf32>
    %3 = tpu.matmul %1, %2, %cst {dimension_numbers = #tpu.dot_dimension_numbers<[1], [0], [0], [1], [0, 0, 1, 1], [], []>} : vector<32x32xf32>, vector<32x16xf32>, vector<32x16xf32> -> vector<32x16xf32>
    %c0_3 = arith.constant 0 : index
    %c0_4 = arith.constant 0 : index
    %4 = vector.load %arg5[%c0_3, %c0_4] : memref<16x32xf32, #tpu.memory_space<vmem>>, vector<16x32xf32>
    %cst_5 = arith.constant dense<0.000000e+00> : vector<32x32xf32>
    %5 = tpu.matmul %3, %4, %cst_5 {dimension_numbers = #tpu.dot_dimension_numbers<[1], [0], [0], [1], [0, 0, 1, 1], [], []>} : vector<32x16xf32>, vector<16x32xf32>, vector<32x32xf32> -> vector<32x32xf32>
    %c0_6 = arith.constant 0 : index
    %c0_7 = arith.constant 0 : index
    %6 = vector.load %arg6[%c0_6, %c0_7] : memref<1x32xf32, #tpu.memory_space<vmem>>, vector<1x32xf32>
    %7 = vector.broadcast %6 : vector<1x32xf32> to vector<32x32xf32>
    %8 = arith.addf %5, %7 : vector<32x32xf32>
    %cst_8 = arith.constant 0.000000e+00 : f32
    %9 = vector.broadcast %cst_8 : f32 to vector<32x32xf32>
    %10 = arith.maximumf %8, %9 : vector<32x32xf32>
    %cst_9 = arith.constant dense<0.000000e+00> : vector<32x32xf32>
    %11 = tpu.matmul %1, %10, %cst_9 {dimension_numbers = #tpu.dot_dimension_numbers<[1], [0], [0], [1], [0, 0, 1, 1], [], []>} : vector<32x32xf32>, vector<32x32xf32>, vector<32x32xf32> -> vector<32x32xf32>
    %c0_10 = arith.constant 0 : index
    %c0_11 = arith.constant 0 : index
    %12 = vector.load %arg7[%c0_10, %c0_11] : memref<32x32xf32, #tpu.memory_space<vmem>>, vector<32x32xf32>
    %cst_12 = arith.constant dense<0.000000e+00> : vector<32x32xf32>
    %13 = tpu.matmul %11, %12, %cst_12 {dimension_numbers = #tpu.dot_dimension_numbers<[1], [0], [0], [1], [0, 0, 1, 1], [], []>} : vector<32x32xf32>, vector<32x32xf32>, vector<32x32xf32> -> vector<32x32xf32>
    %c0_13 = arith.constant 0 : index
    %c0_14 = arith.constant 0 : index
    %14 = vector.load %arg8[%c0_13, %c0_14] : memref<1x32xf32, #tpu.memory_space<vmem>>, vector<1x32xf32>
    %15 = vector.broadcast %14 : vector<1x32xf32> to vector<32x32xf32>
    %16 = arith.addf %13, %15 : vector<32x32xf32>
    %cst_15 = arith.constant 0.000000e+00 : f32
    %17 = vector.broadcast %cst_15 : f32 to vector<32x32xf32>
    %18 = arith.maximumf %16, %17 : vector<32x32xf32>
    %cst_16 = arith.constant dense<0.000000e+00> : vector<32x32xf32>
    %19 = tpu.matmul %1, %18, %cst_16 {dimension_numbers = #tpu.dot_dimension_numbers<[1], [0], [0], [1], [0, 0, 1, 1], [], []>} : vector<32x32xf32>, vector<32x32xf32>, vector<32x32xf32> -> vector<32x32xf32>
    %c0_17 = arith.constant 0 : index
    %c0_18 = arith.constant 0 : index
    %20 = vector.load %arg9[%c0_17, %c0_18] : memref<32x32xf32, #tpu.memory_space<vmem>>, vector<32x32xf32>
    %cst_19 = arith.constant dense<0.000000e+00> : vector<32x32xf32>
    %21 = tpu.matmul %19, %20, %cst_19 {dimension_numbers = #tpu.dot_dimension_numbers<[1], [0], [0], [1], [0, 0, 1, 1], [], []>} : vector<32x32xf32>, vector<32x32xf32>, vector<32x32xf32> -> vector<32x32xf32>
    %c0_20 = arith.constant 0 : index
    %c0_21 = arith.constant 0 : index
    %22 = vector.load %arg10[%c0_20, %c0_21] : memref<1x32xf32, #tpu.memory_space<vmem>>, vector<1x32xf32>
    %23 = vector.broadcast %22 : vector<1x32xf32> to vector<32x32xf32>
    %24 = arith.addf %21, %23 : vector<32x32xf32>
    %cst_22 = arith.constant 0.000000e+00 : f32
    %25 = vector.broadcast %cst_22 : f32 to vector<32x32xf32>
    %26 = arith.maximumf %24, %25 : vector<32x32xf32>
    %c0_23 = arith.constant 0 : index
    %c0_24 = arith.constant 0 : index
    %27 = vector.load %arg3[%c0_23, %c0_24] : memref<32x32xf32, #tpu.memory_space<vmem>>, vector<32x32xf32>
    %28 = tpu.concatenate %26, %27 in 1 : vector<32x32xf32>, vector<32x32xf32> -> vector<32x64xf32>
    %c0_25 = arith.constant 0 : index
    %c0_26 = arith.constant 0 : index
    %c0_27 = arith.constant 0 : index
    %29 = vector.load %arg4[%c0_25, %c0_26, %c0_27] : memref<2x8x16xf32, #tpu.memory_space<vmem>>, vector<2x8x16xf32>
    %30 = vector.shape_cast %29 : vector<2x8x16xf32> to vector<16x16xf32>
    %c0_28 = arith.constant 0 : index
    %c0_29 = arith.constant 0 : index
    %31 = vector.load %arg11[%c0_28, %c0_29] : memref<16x256xf32, #tpu.memory_space<vmem>>, vector<16x256xf32>
    %cst_30 = arith.constant dense<0.000000e+00> : vector<16x256xf32>
    %32 = tpu.matmul %30, %31, %cst_30 {dimension_numbers = #tpu.dot_dimension_numbers<[1], [0], [0], [1], [0, 0, 1, 1], [], []>} : vector<16x16xf32>, vector<16x256xf32>, vector<16x256xf32> -> vector<16x256xf32>
    %c0_31 = arith.constant 0 : index
    %c0_32 = arith.constant 0 : index
    %33 = vector.load %arg13[%c0_31, %c0_32] : memref<1x256xf32, #tpu.memory_space<vmem>>, vector<1x256xf32>
    %34 = vector.broadcast %33 : vector<1x256xf32> to vector<16x256xf32>
    %35 = arith.addf %32, %34 : vector<16x256xf32>
    %36 = vector.shape_cast %35 : vector<16x256xf32> to vector<2x8x256xf32>
    %c0_33 = arith.constant 0 : index
    %c0_34 = arith.constant 0 : index
    %37 = vector.load %arg12[%c0_33, %c0_34] : memref<64x256xf32, #tpu.memory_space<vmem>>, vector<64x256xf32>
    %c0_35 = arith.constant 0 : index
    %c0_36 = arith.constant 0 : index
    %38 = vector.load %arg14[%c0_35, %c0_36] : memref<128x256xf32, #tpu.memory_space<vmem>>, vector<128x256xf32>
    %c0_37 = arith.constant 0 : index
    %c0_38 = arith.constant 0 : index
    %39 = vector.load %arg15[%c0_37, %c0_38] : memref<1x256xf32, #tpu.memory_space<vmem>>, vector<1x256xf32>
    %40 = vector.shape_cast %39 : vector<1x256xf32> to vector<1x256xf32>
    %41 = vector.broadcast %40 : vector<1x256xf32> to vector<2x256xf32>
    %cst_39 = arith.constant 0.000000e+00 : f32
    %42 = vector.broadcast %cst_39 : f32 to vector<2x64xf32>
    %cst_40 = arith.constant 0.000000e+00 : f32
    %43 = vector.broadcast %cst_40 : f32 to vector<2x64xf32>
    %cst_41 = arith.constant 0.000000e+00 : f32
    %44 = vector.broadcast %cst_41 : f32 to vector<2x64xf32>
    %cst_42 = arith.constant 0.000000e+00 : f32
    %45 = vector.broadcast %cst_42 : f32 to vector<2x64xf32>
    %46 = vector.extract_strided_slice %36 {offsets = [0, 0, 0], sizes = [2, 1, 256], strides = [1, 1, 1]} : vector<2x8x256xf32> to vector<2x1x256xf32>
    %47 = vector.shape_cast %46 : vector<2x1x256xf32> to vector<2x256xf32>
    %cst_43 = arith.constant dense<0.000000e+00> : vector<2x256xf32>
    %48 = tpu.matmul %42, %37, %cst_43 {dimension_numbers = #tpu.dot_dimension_numbers<[1], [0], [0], [1], [0, 0, 1, 1], [], []>} : vector<2x64xf32>, vector<64x256xf32>, vector<2x256xf32> -> vector<2x256xf32>
    %49 = arith.addf %47, %48 : vector<2x256xf32>
    %50 = vector.extract_strided_slice %49 {offsets = [0, 0], sizes = [2, 64], strides = [1, 1]} : vector<2x256xf32> to vector<2x64xf32>
    %51 = arith.negf %50 : vector<2x64xf32>
    %52 = math.exp %51 : vector<2x64xf32>
    %cst_44 = arith.constant 1.000000e+00 : f32
    %53 = vector.broadcast %cst_44 : f32 to vector<2x64xf32>
    %54 = arith.addf %53, %52 : vector<2x64xf32>
    %55 = arith.divf %53, %54 : vector<2x64xf32>
    %56 = vector.extract_strided_slice %49 {offsets = [0, 64], sizes = [2, 64], strides = [1, 1]} : vector<2x256xf32> to vector<2x64xf32>
    %57 = arith.negf %56 : vector<2x64xf32>
    %58 = math.exp %57 : vector<2x64xf32>
    %cst_45 = arith.constant 1.000000e+00 : f32
    %59 = vector.broadcast %cst_45 : f32 to vector<2x64xf32>
    %60 = arith.addf %59, %58 : vector<2x64xf32>
    %61 = arith.divf %59, %60 : vector<2x64xf32>
    %62 = vector.extract_strided_slice %49 {offsets = [0, 128], sizes = [2, 64], strides = [1, 1]} : vector<2x256xf32> to vector<2x64xf32>
    %63 = math.tanh %62 : vector<2x64xf32>
    %64 = vector.extract_strided_slice %49 {offsets = [0, 192], sizes = [2, 64], strides = [1, 1]} : vector<2x256xf32> to vector<2x64xf32>
    %65 = arith.negf %64 : vector<2x64xf32>
    %66 = math.exp %65 : vector<2x64xf32>
    %cst_46 = arith.constant 1.000000e+00 : f32
    %67 = vector.broadcast %cst_46 : f32 to vector<2x64xf32>
    %68 = arith.addf %67, %66 : vector<2x64xf32>
    %69 = arith.divf %67, %68 : vector<2x64xf32>
    %70 = arith.mulf %61, %43 : vector<2x64xf32>
    %71 = arith.mulf %55, %63 : vector<2x64xf32>
    %72 = arith.addf %70, %71 : vector<2x64xf32>
    %73 = math.tanh %72 : vector<2x64xf32>
    %74 = arith.mulf %69, %73 : vector<2x64xf32>
    %75 = tpu.concatenate %74, %44 in 1 : vector<2x64xf32>, vector<2x64xf32> -> vector<2x128xf32>
    %cst_47 = arith.constant dense<0.000000e+00> : vector<2x256xf32>
    %76 = tpu.matmul %75, %38, %cst_47 {dimension_numbers = #tpu.dot_dimension_numbers<[1], [0], [0], [1], [0, 0, 1, 1], [], []>} : vector<2x128xf32>, vector<128x256xf32>, vector<2x256xf32> -> vector<2x256xf32>
    %77 = arith.addf %76, %41 : vector<2x256xf32>
    %78 = vector.extract_strided_slice %77 {offsets = [0, 0], sizes = [2, 64], strides = [1, 1]} : vector<2x256xf32> to vector<2x64xf32>
    %79 = arith.negf %78 : vector<2x64xf32>
    %80 = math.exp %79 : vector<2x64xf32>
    %cst_48 = arith.constant 1.000000e+00 : f32
    %81 = vector.broadcast %cst_48 : f32 to vector<2x64xf32>
    %82 = arith.addf %81, %80 : vector<2x64xf32>
    %83 = arith.divf %81, %82 : vector<2x64xf32>
    %84 = vector.extract_strided_slice %77 {offsets = [0, 64], sizes = [2, 64], strides = [1, 1]} : vector<2x256xf32> to vector<2x64xf32>
    %85 = arith.negf %84 : vector<2x64xf32>
    %86 = math.exp %85 : vector<2x64xf32>
    %cst_49 = arith.constant 1.000000e+00 : f32
    %87 = vector.broadcast %cst_49 : f32 to vector<2x64xf32>
    %88 = arith.addf %87, %86 : vector<2x64xf32>
    %89 = arith.divf %87, %88 : vector<2x64xf32>
    %90 = vector.extract_strided_slice %77 {offsets = [0, 128], sizes = [2, 64], strides = [1, 1]} : vector<2x256xf32> to vector<2x64xf32>
    %91 = math.tanh %90 : vector<2x64xf32>
    %92 = vector.extract_strided_slice %77 {offsets = [0, 192], sizes = [2, 64], strides = [1, 1]} : vector<2x256xf32> to vector<2x64xf32>
    %93 = arith.negf %92 : vector<2x64xf32>
    %94 = math.exp %93 : vector<2x64xf32>
    %cst_50 = arith.constant 1.000000e+00 : f32
    %95 = vector.broadcast %cst_50 : f32 to vector<2x64xf32>
    %96 = arith.addf %95, %94 : vector<2x64xf32>
    %97 = arith.divf %95, %96 : vector<2x64xf32>
    %98 = arith.mulf %89, %45 : vector<2x64xf32>
    %99 = arith.mulf %83, %91 : vector<2x64xf32>
    %100 = arith.addf %98, %99 : vector<2x64xf32>
    %101 = math.tanh %100 : vector<2x64xf32>
    %102 = arith.mulf %97, %101 : vector<2x64xf32>
    %c0_51 = arith.constant 0 : index
    %c0_52 = arith.constant 0 : index
    %c0_53 = arith.constant 0 : index
    %103 = vector.load %arg31[%c0_51, %c0_52, %c0_53] : memref<2x8x64xf32, #tpu.memory_space<vmem>>, vector<2x1x64xf32>
    %104 = vector.shape_cast %103 : vector<2x1x64xf32> to vector<2x64xf32>
    %105 = vector.shape_cast %102 : vector<2x64xf32> to vector<2x1x64xf32>
    tpu.vector_store %arg31[%c0_51, %c0_52, %c0_53], %105 {strides = array<i32>} : memref<2x8x64xf32, #tpu.memory_space<vmem>>, vector<2x1x64xf32>,
    %106 = vector.extract_strided_slice %36 {offsets = [0, 1, 0], sizes = [2, 1, 256], strides = [1, 1, 1]} : vector<2x8x256xf32> to vector<2x1x256xf32>
    %107 = vector.shape_cast %106 : vector<2x1x256xf32> to vector<2x256xf32>
    %cst_54 = arith.constant dense<0.000000e+00> : vector<2x256xf32>
    %108 = tpu.matmul %74, %37, %cst_54 {dimension_numbers = #tpu.dot_dimension_numbers<[1], [0], [0], [1], [0, 0, 1, 1], [], []>} : vector<2x64xf32>, vector<64x256xf32>, vector<2x256xf32> -> vector<2x256xf32>
    %109 = arith.addf %107, %108 : vector<2x256xf32>
    %110 = vector.extract_strided_slice %109 {offsets = [0, 0], sizes = [2, 64], strides = [1, 1]} : vector<2x256xf32> to vector<2x64xf32>
    %111 = arith.negf %110 : vector<2x64xf32>
    %112 = math.exp %111 : vector<2x64xf32>
    %cst_55 = arith.constant 1.000000e+00 : f32
    %113 = vector.broadcast %cst_55 : f32 to vector<2x64xf32>
    %114 = arith.addf %113, %112 : vector<2x64xf32>
    %115 = arith.divf %113, %114 : vector<2x64xf32>
    %116 = vector.extract_strided_slice %109 {offsets = [0, 64], sizes = [2, 64], strides = [1, 1]} : vector<2x256xf32> to vector<2x64xf32>
    %117 = arith.negf %116 : vector<2x64xf32>
    %118 = math.exp %117 : vector<2x64xf32>
    %cst_56 = arith.constant 1.000000e+00 : f32
    %119 = vector.broadcast %cst_56 : f32 to vector<2x64xf32>
    %120 = arith.addf %119, %118 : vector<2x64xf32>
    %121 = arith.divf %119, %120 : vector<2x64xf32>
    %122 = vector.extract_strided_slice %109 {offsets = [0, 128], sizes = [2, 64], strides = [1, 1]} : vector<2x256xf32> to vector<2x64xf32>
    %123 = math.tanh %122 : vector<2x64xf32>
    %124 = vector.extract_strided_slice %109 {offsets = [0, 192], sizes = [2, 64], strides = [1, 1]} : vector<2x256xf32> to vector<2x64xf32>
    %125 = arith.negf %124 : vector<2x64xf32>
    %126 = math.exp %125 : vector<2x64xf32>
    %cst_57 = arith.constant 1.000000e+00 : f32
    %127 = vector.broadcast %cst_57 : f32 to vector<2x64xf32>
    %128 = arith.addf %127, %126 : vector<2x64xf32>
    %129 = arith.divf %127, %128 : vector<2x64xf32>
    %130 = arith.mulf %121, %72 : vector<2x64xf32>
    %131 = arith.mulf %115, %123 : vector<2x64xf32>
    %132 = arith.addf %130, %131 : vector<2x64xf32>
    %133 = math.tanh %132 : vector<2x64xf32>
    %134 = arith.mulf %129, %133 : vector<2x64xf32>
    %135 = tpu.concatenate %134, %102 in 1 : vector<2x64xf32>, vector<2x64xf32> -> vector<2x128xf32>
    %cst_58 = arith.constant dense<0.000000e+00> : vector<2x256xf32>
    %136 = tpu.matmul %135, %38, %cst_58 {dimension_numbers = #tpu.dot_dimension_numbers<[1], [0], [0], [1], [0, 0, 1, 1], [], []>} : vector<2x128xf32>, vector<128x256xf32>, vector<2x256xf32> -> vector<2x256xf32>
    %137 = arith.addf %136, %41 : vector<2x256xf32>
    %138 = vector.extract_strided_slice %137 {offsets = [0, 0], sizes = [2, 64], strides = [1, 1]} : vector<2x256xf32> to vector<2x64xf32>
    %139 = arith.negf %138 : vector<2x64xf32>
    %140 = math.exp %139 : vector<2x64xf32>
    %cst_59 = arith.constant 1.000000e+00 : f32
    %141 = vector.broadcast %cst_59 : f32 to vector<2x64xf32>
    %142 = arith.addf %141, %140 : vector<2x64xf32>
    %143 = arith.divf %141, %142 : vector<2x64xf32>
    %144 = vector.extract_strided_slice %137 {offsets = [0, 64], sizes = [2, 64], strides = [1, 1]} : vector<2x256xf32> to vector<2x64xf32>
    %145 = arith.negf %144 : vector<2x64xf32>
    %146 = math.exp %145 : vector<2x64xf32>
    %cst_60 = arith.constant 1.000000e+00 : f32
    %147 = vector.broadcast %cst_60 : f32 to vector<2x64xf32>
    %148 = arith.addf %147, %146 : vector<2x64xf32>
    %149 = arith.divf %147, %148 : vector<2x64xf32>
    %150 = vector.extract_strided_slice %137 {offsets = [0, 128], sizes = [2, 64], strides = [1, 1]} : vector<2x256xf32> to vector<2x64xf32>
    %151 = math.tanh %150 : vector<2x64xf32>
    %152 = vector.extract_strided_slice %137 {offsets = [0, 192], sizes = [2, 64], strides = [1, 1]} : vector<2x256xf32> to vector<2x64xf32>
    %153 = arith.negf %152 : vector<2x64xf32>
    %154 = math.exp %153 : vector<2x64xf32>
    %cst_61 = arith.constant 1.000000e+00 : f32
    %155 = vector.broadcast %cst_61 : f32 to vector<2x64xf32>
    %156 = arith.addf %155, %154 : vector<2x64xf32>
    %157 = arith.divf %155, %156 : vector<2x64xf32>
    %158 = arith.mulf %149, %100 : vector<2x64xf32>
    %159 = arith.mulf %143, %151 : vector<2x64xf32>
    %160 = arith.addf %158, %159 : vector<2x64xf32>
    %161 = math.tanh %160 : vector<2x64xf32>
    %162 = arith.mulf %157, %161 : vector<2x64xf32>
    %c0_62 = arith.constant 0 : index
    %c1 = arith.constant 1 : index
    %c0_63 = arith.constant 0 : index
    %163 = vector.load %arg31[%c0_62, %c1, %c0_63] : memref<2x8x64xf32, #tpu.memory_space<vmem>>, vector<2x1x64xf32>
    %164 = vector.shape_cast %163 : vector<2x1x64xf32> to vector<2x64xf32>
    %165 = vector.shape_cast %162 : vector<2x64xf32> to vector<2x1x64xf32>
    tpu.vector_store %arg31[%c0_62, %c1, %c0_63], %165 {strides = array<i32>} : memref<2x8x64xf32, #tpu.memory_space<vmem>>, vector<2x1x64xf32>,
    %166 = vector.extract_strided_slice %36 {offsets = [0, 2, 0], sizes = [2, 1, 256], strides = [1, 1, 1]} : vector<2x8x256xf32> to vector<2x1x256xf32>
    %167 = vector.shape_cast %166 : vector<2x1x256xf32> to vector<2x256xf32>
    %cst_64 = arith.constant dense<0.000000e+00> : vector<2x256xf32>
    %168 = tpu.matmul %134, %37, %cst_64 {dimension_numbers = #tpu.dot_dimension_numbers<[1], [0], [0], [1], [0, 0, 1, 1], [], []>} : vector<2x64xf32>, vector<64x256xf32>, vector<2x256xf32> -> vector<2x256xf32>
    %169 = arith.addf %167, %168 : vector<2x256xf32>
    %170 = vector.extract_strided_slice %169 {offsets = [0, 0], sizes = [2, 64], strides = [1, 1]} : vector<2x256xf32> to vector<2x64xf32>
    %171 = arith.negf %170 : vector<2x64xf32>
    %172 = math.exp %171 : vector<2x64xf32>
    %cst_65 = arith.constant 1.000000e+00 : f32
    %173 = vector.broadcast %cst_65 : f32 to vector<2x64xf32>
    %174 = arith.addf %173, %172 : vector<2x64xf32>
    %175 = arith.divf %173, %174 : vector<2x64xf32>
    %176 = vector.extract_strided_slice %169 {offsets = [0, 64], sizes = [2, 64], strides = [1, 1]} : vector<2x256xf32> to vector<2x64xf32>
    %177 = arith.negf %176 : vector<2x64xf32>
    %178 = math.exp %177 : vector<2x64xf32>
    %cst_66 = arith.constant 1.000000e+00 : f32
    %179 = vector.broadcast %cst_66 : f32 to vector<2x64xf32>
    %180 = arith.addf %179, %178 : vector<2x64xf32>
    %181 = arith.divf %179, %180 : vector<2x64xf32>
    %182 = vector.extract_strided_slice %169 {offsets = [0, 128], sizes = [2, 64], strides = [1, 1]} : vector<2x256xf32> to vector<2x64xf32>
    %183 = math.tanh %182 : vector<2x64xf32>
    %184 = vector.extract_strided_slice %169 {offsets = [0, 192], sizes = [2, 64], strides = [1, 1]} : vector<2x256xf32> to vector<2x64xf32>
    %185 = arith.negf %184 : vector<2x64xf32>
    %186 = math.exp %185 : vector<2x64xf32>
    %cst_67 = arith.constant 1.000000e+00 : f32
    %187 = vector.broadcast %cst_67 : f32 to vector<2x64xf32>
    %188 = arith.addf %187, %186 : vector<2x64xf32>
    %189 = arith.divf %187, %188 : vector<2x64xf32>
    %190 = arith.mulf %181, %132 : vector<2x64xf32>
    %191 = arith.mulf %175, %183 : vector<2x64xf32>
    %192 = arith.addf %190, %191 : vector<2x64xf32>
    %193 = math.tanh %192 : vector<2x64xf32>
    %194 = arith.mulf %189, %193 : vector<2x64xf32>
    %195 = tpu.concatenate %194, %162 in 1 : vector<2x64xf32>, vector<2x64xf32> -> vector<2x128xf32>
    %cst_68 = arith.constant dense<0.000000e+00> : vector<2x256xf32>
    %196 = tpu.matmul %195, %38, %cst_68 {dimension_numbers = #tpu.dot_dimension_numbers<[1], [0], [0], [1], [0, 0, 1, 1], [], []>} : vector<2x128xf32>, vector<128x256xf32>, vector<2x256xf32> -> vector<2x256xf32>
    %197 = arith.addf %196, %41 : vector<2x256xf32>
    %198 = vector.extract_strided_slice %197 {offsets = [0, 0], sizes = [2, 64], strides = [1, 1]} : vector<2x256xf32> to vector<2x64xf32>
    %199 = arith.negf %198 : vector<2x64xf32>
    %200 = math.exp %199 : vector<2x64xf32>
    %cst_69 = arith.constant 1.000000e+00 : f32
    %201 = vector.broadcast %cst_69 : f32 to vector<2x64xf32>
    %202 = arith.addf %201, %200 : vector<2x64xf32>
    %203 = arith.divf %201, %202 : vector<2x64xf32>
    %204 = vector.extract_strided_slice %197 {offsets = [0, 64], sizes = [2, 64], strides = [1, 1]} : vector<2x256xf32> to vector<2x64xf32>
    %205 = arith.negf %204 : vector<2x64xf32>
    %206 = math.exp %205 : vector<2x64xf32>
    %cst_70 = arith.constant 1.000000e+00 : f32
    %207 = vector.broadcast %cst_70 : f32 to vector<2x64xf32>
    %208 = arith.addf %207, %206 : vector<2x64xf32>
    %209 = arith.divf %207, %208 : vector<2x64xf32>
    %210 = vector.extract_strided_slice %197 {offsets = [0, 128], sizes = [2, 64], strides = [1, 1]} : vector<2x256xf32> to vector<2x64xf32>
    %211 = math.tanh %210 : vector<2x64xf32>
    %212 = vector.extract_strided_slice %197 {offsets = [0, 192], sizes = [2, 64], strides = [1, 1]} : vector<2x256xf32> to vector<2x64xf32>
    %213 = arith.negf %212 : vector<2x64xf32>
    %214 = math.exp %213 : vector<2x64xf32>
    %cst_71 = arith.constant 1.000000e+00 : f32
    %215 = vector.broadcast %cst_71 : f32 to vector<2x64xf32>
    %216 = arith.addf %215, %214 : vector<2x64xf32>
    %217 = arith.divf %215, %216 : vector<2x64xf32>
    %218 = arith.mulf %209, %160 : vector<2x64xf32>
    %219 = arith.mulf %203, %211 : vector<2x64xf32>
    %220 = arith.addf %218, %219 : vector<2x64xf32>
    %221 = math.tanh %220 : vector<2x64xf32>
    %222 = arith.mulf %217, %221 : vector<2x64xf32>
    %c0_72 = arith.constant 0 : index
    %c2 = arith.constant 2 : index
    %c0_73 = arith.constant 0 : index
    %223 = vector.load %arg31[%c0_72, %c2, %c0_73] : memref<2x8x64xf32, #tpu.memory_space<vmem>>, vector<2x1x64xf32>
    %224 = vector.shape_cast %223 : vector<2x1x64xf32> to vector<2x64xf32>
    %225 = vector.shape_cast %222 : vector<2x64xf32> to vector<2x1x64xf32>
    tpu.vector_store %arg31[%c0_72, %c2, %c0_73], %225 {strides = array<i32>} : memref<2x8x64xf32, #tpu.memory_space<vmem>>, vector<2x1x64xf32>,
    %226 = vector.extract_strided_slice %36 {offsets = [0, 3, 0], sizes = [2, 1, 256], strides = [1, 1, 1]} : vector<2x8x256xf32> to vector<2x1x256xf32>
    %227 = vector.shape_cast %226 : vector<2x1x256xf32> to vector<2x256xf32>
    %cst_74 = arith.constant dense<0.000000e+00> : vector<2x256xf32>
    %228 = tpu.matmul %194, %37, %cst_74 {dimension_numbers = #tpu.dot_dimension_numbers<[1], [0], [0], [1], [0, 0, 1, 1], [], []>} : vector<2x64xf32>, vector<64x256xf32>, vector<2x256xf32> -> vector<2x256xf32>
    %229 = arith.addf %227, %228 : vector<2x256xf32>
    %230 = vector.extract_strided_slice %229 {offsets = [0, 0], sizes = [2, 64], strides = [1, 1]} : vector<2x256xf32> to vector<2x64xf32>
    %231 = arith.negf %230 : vector<2x64xf32>
    %232 = math.exp %231 : vector<2x64xf32>
    %cst_75 = arith.constant 1.000000e+00 : f32
    %233 = vector.broadcast %cst_75 : f32 to vector<2x64xf32>
    %234 = arith.addf %233, %232 : vector<2x64xf32>
    %235 = arith.divf %233, %234 : vector<2x64xf32>
    %236 = vector.extract_strided_slice %229 {offsets = [0, 64], sizes = [2, 64], strides = [1, 1]} : vector<2x256xf32> to vector<2x64xf32>
    %237 = arith.negf %236 : vector<2x64xf32>
    %238 = math.exp %237 : vector<2x64xf32>
    %cst_76 = arith.constant 1.000000e+00 : f32
    %239 = vector.broadcast %cst_76 : f32 to vector<2x64xf32>
    %240 = arith.addf %239, %238 : vector<2x64xf32>
    %241 = arith.divf %239, %240 : vector<2x64xf32>
    %242 = vector.extract_strided_slice %229 {offsets = [0, 128], sizes = [2, 64], strides = [1, 1]} : vector<2x256xf32> to vector<2x64xf32>
    %243 = math.tanh %242 : vector<2x64xf32>
    %244 = vector.extract_strided_slice %229 {offsets = [0, 192], sizes = [2, 64], strides = [1, 1]} : vector<2x256xf32> to vector<2x64xf32>
    %245 = arith.negf %244 : vector<2x64xf32>
    %246 = math.exp %245 : vector<2x64xf32>
    %cst_77 = arith.constant 1.000000e+00 : f32
    %247 = vector.broadcast %cst_77 : f32 to vector<2x64xf32>
    %248 = arith.addf %247, %246 : vector<2x64xf32>
    %249 = arith.divf %247, %248 : vector<2x64xf32>
    %250 = arith.mulf %241, %192 : vector<2x64xf32>
    %251 = arith.mulf %235, %243 : vector<2x64xf32>
    %252 = arith.addf %250, %251 : vector<2x64xf32>
    %253 = math.tanh %252 : vector<2x64xf32>
    %254 = arith.mulf %249, %253 : vector<2x64xf32>
    %255 = tpu.concatenate %254, %222 in 1 : vector<2x64xf32>, vector<2x64xf32> -> vector<2x128xf32>
    %cst_78 = arith.constant dense<0.000000e+00> : vector<2x256xf32>
    %256 = tpu.matmul %255, %38, %cst_78 {dimension_numbers = #tpu.dot_dimension_numbers<[1], [0], [0], [1], [0, 0, 1, 1], [], []>} : vector<2x128xf32>, vector<128x256xf32>, vector<2x256xf32> -> vector<2x256xf32>
    %257 = arith.addf %256, %41 : vector<2x256xf32>
    %258 = vector.extract_strided_slice %257 {offsets = [0, 0], sizes = [2, 64], strides = [1, 1]} : vector<2x256xf32> to vector<2x64xf32>
    %259 = arith.negf %258 : vector<2x64xf32>
    %260 = math.exp %259 : vector<2x64xf32>
    %cst_79 = arith.constant 1.000000e+00 : f32
    %261 = vector.broadcast %cst_79 : f32 to vector<2x64xf32>
    %262 = arith.addf %261, %260 : vector<2x64xf32>
    %263 = arith.divf %261, %262 : vector<2x64xf32>
    %264 = vector.extract_strided_slice %257 {offsets = [0, 64], sizes = [2, 64], strides = [1, 1]} : vector<2x256xf32> to vector<2x64xf32>
    %265 = arith.negf %264 : vector<2x64xf32>
    %266 = math.exp %265 : vector<2x64xf32>
    %cst_80 = arith.constant 1.000000e+00 : f32
    %267 = vector.broadcast %cst_80 : f32 to vector<2x64xf32>
    %268 = arith.addf %267, %266 : vector<2x64xf32>
    %269 = arith.divf %267, %268 : vector<2x64xf32>
    %270 = vector.extract_strided_slice %257 {offsets = [0, 128], sizes = [2, 64], strides = [1, 1]} : vector<2x256xf32> to vector<2x64xf32>
    %271 = math.tanh %270 : vector<2x64xf32>
    %272 = vector.extract_strided_slice %257 {offsets = [0, 192], sizes = [2, 64], strides = [1, 1]} : vector<2x256xf32> to vector<2x64xf32>
    %273 = arith.negf %272 : vector<2x64xf32>
    %274 = math.exp %273 : vector<2x64xf32>
    %cst_81 = arith.constant 1.000000e+00 : f32
    %275 = vector.broadcast %cst_81 : f32 to vector<2x64xf32>
    %276 = arith.addf %275, %274 : vector<2x64xf32>
    %277 = arith.divf %275, %276 : vector<2x64xf32>
    %278 = arith.mulf %269, %220 : vector<2x64xf32>
    %279 = arith.mulf %263, %271 : vector<2x64xf32>
    %280 = arith.addf %278, %279 : vector<2x64xf32>
    %281 = math.tanh %280 : vector<2x64xf32>
    %282 = arith.mulf %277, %281 : vector<2x64xf32>
    %c0_82 = arith.constant 0 : index
    %c3 = arith.constant 3 : index
    %c0_83 = arith.constant 0 : index
    %283 = vector.load %arg31[%c0_82, %c3, %c0_83] : memref<2x8x64xf32, #tpu.memory_space<vmem>>, vector<2x1x64xf32>
    %284 = vector.shape_cast %283 : vector<2x1x64xf32> to vector<2x64xf32>
    %285 = vector.shape_cast %282 : vector<2x64xf32> to vector<2x1x64xf32>
    tpu.vector_store %arg31[%c0_82, %c3, %c0_83], %285 {strides = array<i32>} : memref<2x8x64xf32, #tpu.memory_space<vmem>>, vector<2x1x64xf32>,
    %286 = vector.extract_strided_slice %36 {offsets = [0, 4, 0], sizes = [2, 1, 256], strides = [1, 1, 1]} : vector<2x8x256xf32> to vector<2x1x256xf32>
    %287 = vector.shape_cast %286 : vector<2x1x256xf32> to vector<2x256xf32>
    %cst_84 = arith.constant dense<0.000000e+00> : vector<2x256xf32>
    %288 = tpu.matmul %254, %37, %cst_84 {dimension_numbers = #tpu.dot_dimension_numbers<[1], [0], [0], [1], [0, 0, 1, 1], [], []>} : vector<2x64xf32>, vector<64x256xf32>, vector<2x256xf32> -> vector<2x256xf32>
    %289 = arith.addf %287, %288 : vector<2x256xf32>
    %290 = vector.extract_strided_slice %289 {offsets = [0, 0], sizes = [2, 64], strides = [1, 1]} : vector<2x256xf32> to vector<2x64xf32>
    %291 = arith.negf %290 : vector<2x64xf32>
    %292 = math.exp %291 : vector<2x64xf32>
    %cst_85 = arith.constant 1.000000e+00 : f32
    %293 = vector.broadcast %cst_85 : f32 to vector<2x64xf32>
    %294 = arith.addf %293, %292 : vector<2x64xf32>
    %295 = arith.divf %293, %294 : vector<2x64xf32>
    %296 = vector.extract_strided_slice %289 {offsets = [0, 64], sizes = [2, 64], strides = [1, 1]} : vector<2x256xf32> to vector<2x64xf32>
    %297 = arith.negf %296 : vector<2x64xf32>
    %298 = math.exp %297 : vector<2x64xf32>
    %cst_86 = arith.constant 1.000000e+00 : f32
    %299 = vector.broadcast %cst_86 : f32 to vector<2x64xf32>
    %300 = arith.addf %299, %298 : vector<2x64xf32>
    %301 = arith.divf %299, %300 : vector<2x64xf32>
    %302 = vector.extract_strided_slice %289 {offsets = [0, 128], sizes = [2, 64], strides = [1, 1]} : vector<2x256xf32> to vector<2x64xf32>
    %303 = math.tanh %302 : vector<2x64xf32>
    %304 = vector.extract_strided_slice %289 {offsets = [0, 192], sizes = [2, 64], strides = [1, 1]} : vector<2x256xf32> to vector<2x64xf32>
    %305 = arith.negf %304 : vector<2x64xf32>
    %306 = math.exp %305 : vector<2x64xf32>
    %cst_87 = arith.constant 1.000000e+00 : f32
    %307 = vector.broadcast %cst_87 : f32 to vector<2x64xf32>
    %308 = arith.addf %307, %306 : vector<2x64xf32>
    %309 = arith.divf %307, %308 : vector<2x64xf32>
    %310 = arith.mulf %301, %252 : vector<2x64xf32>
    %311 = arith.mulf %295, %303 : vector<2x64xf32>
    %312 = arith.addf %310, %311 : vector<2x64xf32>
    %313 = math.tanh %312 : vector<2x64xf32>
    %314 = arith.mulf %309, %313 : vector<2x64xf32>
    %315 = tpu.concatenate %314, %282 in 1 : vector<2x64xf32>, vector<2x64xf32> -> vector<2x128xf32>
    %cst_88 = arith.constant dense<0.000000e+00> : vector<2x256xf32>
    %316 = tpu.matmul %315, %38, %cst_88 {dimension_numbers = #tpu.dot_dimension_numbers<[1], [0], [0], [1], [0, 0, 1, 1], [], []>} : vector<2x128xf32>, vector<128x256xf32>, vector<2x256xf32> -> vector<2x256xf32>
    %317 = arith.addf %316, %41 : vector<2x256xf32>
    %318 = vector.extract_strided_slice %317 {offsets = [0, 0], sizes = [2, 64], strides = [1, 1]} : vector<2x256xf32> to vector<2x64xf32>
    %319 = arith.negf %318 : vector<2x64xf32>
    %320 = math.exp %319 : vector<2x64xf32>
    %cst_89 = arith.constant 1.000000e+00 : f32
    %321 = vector.broadcast %cst_89 : f32 to vector<2x64xf32>
    %322 = arith.addf %321, %320 : vector<2x64xf32>
    %323 = arith.divf %321, %322 : vector<2x64xf32>
    %324 = vector.extract_strided_slice %317 {offsets = [0, 64], sizes = [2, 64], strides = [1, 1]} : vector<2x256xf32> to vector<2x64xf32>
    %325 = arith.negf %324 : vector<2x64xf32>
    %326 = math.exp %325 : vector<2x64xf32>
    %cst_90 = arith.constant 1.000000e+00 : f32
    %327 = vector.broadcast %cst_90 : f32 to vector<2x64xf32>
    %328 = arith.addf %327, %326 : vector<2x64xf32>
    %329 = arith.divf %327, %328 : vector<2x64xf32>
    %330 = vector.extract_strided_slice %317 {offsets = [0, 128], sizes = [2, 64], strides = [1, 1]} : vector<2x256xf32> to vector<2x64xf32>
    %331 = math.tanh %330 : vector<2x64xf32>
    %332 = vector.extract_strided_slice %317 {offsets = [0, 192], sizes = [2, 64], strides = [1, 1]} : vector<2x256xf32> to vector<2x64xf32>
    %333 = arith.negf %332 : vector<2x64xf32>
    %334 = math.exp %333 : vector<2x64xf32>
    %cst_91 = arith.constant 1.000000e+00 : f32
    %335 = vector.broadcast %cst_91 : f32 to vector<2x64xf32>
    %336 = arith.addf %335, %334 : vector<2x64xf32>
    %337 = arith.divf %335, %336 : vector<2x64xf32>
    %338 = arith.mulf %329, %280 : vector<2x64xf32>
    %339 = arith.mulf %323, %331 : vector<2x64xf32>
    %340 = arith.addf %338, %339 : vector<2x64xf32>
    %341 = math.tanh %340 : vector<2x64xf32>
    %342 = arith.mulf %337, %341 : vector<2x64xf32>
    %c0_92 = arith.constant 0 : index
    %c4 = arith.constant 4 : index
    %c0_93 = arith.constant 0 : index
    %343 = vector.load %arg31[%c0_92, %c4, %c0_93] : memref<2x8x64xf32, #tpu.memory_space<vmem>>, vector<2x1x64xf32>
    %344 = vector.shape_cast %343 : vector<2x1x64xf32> to vector<2x64xf32>
    %345 = vector.shape_cast %342 : vector<2x64xf32> to vector<2x1x64xf32>
    tpu.vector_store %arg31[%c0_92, %c4, %c0_93], %345 {strides = array<i32>} : memref<2x8x64xf32, #tpu.memory_space<vmem>>, vector<2x1x64xf32>,
    %346 = vector.extract_strided_slice %36 {offsets = [0, 5, 0], sizes = [2, 1, 256], strides = [1, 1, 1]} : vector<2x8x256xf32> to vector<2x1x256xf32>
    %347 = vector.shape_cast %346 : vector<2x1x256xf32> to vector<2x256xf32>
    %cst_94 = arith.constant dense<0.000000e+00> : vector<2x256xf32>
    %348 = tpu.matmul %314, %37, %cst_94 {dimension_numbers = #tpu.dot_dimension_numbers<[1], [0], [0], [1], [0, 0, 1, 1], [], []>} : vector<2x64xf32>, vector<64x256xf32>, vector<2x256xf32> -> vector<2x256xf32>
    %349 = arith.addf %347, %348 : vector<2x256xf32>
    %350 = vector.extract_strided_slice %349 {offsets = [0, 0], sizes = [2, 64], strides = [1, 1]} : vector<2x256xf32> to vector<2x64xf32>
    %351 = arith.negf %350 : vector<2x64xf32>
    %352 = math.exp %351 : vector<2x64xf32>
    %cst_95 = arith.constant 1.000000e+00 : f32
    %353 = vector.broadcast %cst_95 : f32 to vector<2x64xf32>
    %354 = arith.addf %353, %352 : vector<2x64xf32>
    %355 = arith.divf %353, %354 : vector<2x64xf32>
    %356 = vector.extract_strided_slice %349 {offsets = [0, 64], sizes = [2, 64], strides = [1, 1]} : vector<2x256xf32> to vector<2x64xf32>
    %357 = arith.negf %356 : vector<2x64xf32>
    %358 = math.exp %357 : vector<2x64xf32>
    %cst_96 = arith.constant 1.000000e+00 : f32
    %359 = vector.broadcast %cst_96 : f32 to vector<2x64xf32>
    %360 = arith.addf %359, %358 : vector<2x64xf32>
    %361 = arith.divf %359, %360 : vector<2x64xf32>
    %362 = vector.extract_strided_slice %349 {offsets = [0, 128], sizes = [2, 64], strides = [1, 1]} : vector<2x256xf32> to vector<2x64xf32>
    %363 = math.tanh %362 : vector<2x64xf32>
    %364 = vector.extract_strided_slice %349 {offsets = [0, 192], sizes = [2, 64], strides = [1, 1]} : vector<2x256xf32> to vector<2x64xf32>
    %365 = arith.negf %364 : vector<2x64xf32>
    %366 = math.exp %365 : vector<2x64xf32>
    %cst_97 = arith.constant 1.000000e+00 : f32
    %367 = vector.broadcast %cst_97 : f32 to vector<2x64xf32>
    %368 = arith.addf %367, %366 : vector<2x64xf32>
    %369 = arith.divf %367, %368 : vector<2x64xf32>
    %370 = arith.mulf %361, %312 : vector<2x64xf32>
    %371 = arith.mulf %355, %363 : vector<2x64xf32>
    %372 = arith.addf %370, %371 : vector<2x64xf32>
    %373 = math.tanh %372 : vector<2x64xf32>
    %374 = arith.mulf %369, %373 : vector<2x64xf32>
    %375 = tpu.concatenate %374, %342 in 1 : vector<2x64xf32>, vector<2x64xf32> -> vector<2x128xf32>
    %cst_98 = arith.constant dense<0.000000e+00> : vector<2x256xf32>
    %376 = tpu.matmul %375, %38, %cst_98 {dimension_numbers = #tpu.dot_dimension_numbers<[1], [0], [0], [1], [0, 0, 1, 1], [], []>} : vector<2x128xf32>, vector<128x256xf32>, vector<2x256xf32> -> vector<2x256xf32>
    %377 = arith.addf %376, %41 : vector<2x256xf32>
    %378 = vector.extract_strided_slice %377 {offsets = [0, 0], sizes = [2, 64], strides = [1, 1]} : vector<2x256xf32> to vector<2x64xf32>
    %379 = arith.negf %378 : vector<2x64xf32>
    %380 = math.exp %379 : vector<2x64xf32>
    %cst_99 = arith.constant 1.000000e+00 : f32
    %381 = vector.broadcast %cst_99 : f32 to vector<2x64xf32>
    %382 = arith.addf %381, %380 : vector<2x64xf32>
    %383 = arith.divf %381, %382 : vector<2x64xf32>
    %384 = vector.extract_strided_slice %377 {offsets = [0, 64], sizes = [2, 64], strides = [1, 1]} : vector<2x256xf32> to vector<2x64xf32>
    %385 = arith.negf %384 : vector<2x64xf32>
    %386 = math.exp %385 : vector<2x64xf32>
    %cst_100 = arith.constant 1.000000e+00 : f32
    %387 = vector.broadcast %cst_100 : f32 to vector<2x64xf32>
    %388 = arith.addf %387, %386 : vector<2x64xf32>
    %389 = arith.divf %387, %388 : vector<2x64xf32>
    %390 = vector.extract_strided_slice %377 {offsets = [0, 128], sizes = [2, 64], strides = [1, 1]} : vector<2x256xf32> to vector<2x64xf32>
    %391 = math.tanh %390 : vector<2x64xf32>
    %392 = vector.extract_strided_slice %377 {offsets = [0, 192], sizes = [2, 64], strides = [1, 1]} : vector<2x256xf32> to vector<2x64xf32>
    %393 = arith.negf %392 : vector<2x64xf32>
    %394 = math.exp %393 : vector<2x64xf32>
    %cst_101 = arith.constant 1.000000e+00 : f32
    %395 = vector.broadcast %cst_101 : f32 to vector<2x64xf32>
    %396 = arith.addf %395, %394 : vector<2x64xf32>
    %397 = arith.divf %395, %396 : vector<2x64xf32>
    %398 = arith.mulf %389, %340 : vector<2x64xf32>
    %399 = arith.mulf %383, %391 : vector<2x64xf32>
    %400 = arith.addf %398, %399 : vector<2x64xf32>
    %401 = math.tanh %400 : vector<2x64xf32>
    %402 = arith.mulf %397, %401 : vector<2x64xf32>
    %c0_102 = arith.constant 0 : index
    %c5 = arith.constant 5 : index
    %c0_103 = arith.constant 0 : index
    %403 = vector.load %arg31[%c0_102, %c5, %c0_103] : memref<2x8x64xf32, #tpu.memory_space<vmem>>, vector<2x1x64xf32>
    %404 = vector.shape_cast %403 : vector<2x1x64xf32> to vector<2x64xf32>
    %405 = vector.shape_cast %402 : vector<2x64xf32> to vector<2x1x64xf32>
    tpu.vector_store %arg31[%c0_102, %c5, %c0_103], %405 {strides = array<i32>} : memref<2x8x64xf32, #tpu.memory_space<vmem>>, vector<2x1x64xf32>,
    %406 = vector.extract_strided_slice %36 {offsets = [0, 6, 0], sizes = [2, 1, 256], strides = [1, 1, 1]} : vector<2x8x256xf32> to vector<2x1x256xf32>
    %407 = vector.shape_cast %406 : vector<2x1x256xf32> to vector<2x256xf32>
    %cst_104 = arith.constant dense<0.000000e+00> : vector<2x256xf32>
    %408 = tpu.matmul %374, %37, %cst_104 {dimension_numbers = #tpu.dot_dimension_numbers<[1], [0], [0], [1], [0, 0, 1, 1], [], []>} : vector<2x64xf32>, vector<64x256xf32>, vector<2x256xf32> -> vector<2x256xf32>
    %409 = arith.addf %407, %408 : vector<2x256xf32>
    %410 = vector.extract_strided_slice %409 {offsets = [0, 0], sizes = [2, 64], strides = [1, 1]} : vector<2x256xf32> to vector<2x64xf32>
    %411 = arith.negf %410 : vector<2x64xf32>
    %412 = math.exp %411 : vector<2x64xf32>
    %cst_105 = arith.constant 1.000000e+00 : f32
    %413 = vector.broadcast %cst_105 : f32 to vector<2x64xf32>
    %414 = arith.addf %413, %412 : vector<2x64xf32>
    %415 = arith.divf %413, %414 : vector<2x64xf32>
    %416 = vector.extract_strided_slice %409 {offsets = [0, 64], sizes = [2, 64], strides = [1, 1]} : vector<2x256xf32> to vector<2x64xf32>
    %417 = arith.negf %416 : vector<2x64xf32>
    %418 = math.exp %417 : vector<2x64xf32>
    %cst_106 = arith.constant 1.000000e+00 : f32
    %419 = vector.broadcast %cst_106 : f32 to vector<2x64xf32>
    %420 = arith.addf %419, %418 : vector<2x64xf32>
    %421 = arith.divf %419, %420 : vector<2x64xf32>
    %422 = vector.extract_strided_slice %409 {offsets = [0, 128], sizes = [2, 64], strides = [1, 1]} : vector<2x256xf32> to vector<2x64xf32>
    %423 = math.tanh %422 : vector<2x64xf32>
    %424 = vector.extract_strided_slice %409 {offsets = [0, 192], sizes = [2, 64], strides = [1, 1]} : vector<2x256xf32> to vector<2x64xf32>
    %425 = arith.negf %424 : vector<2x64xf32>
    %426 = math.exp %425 : vector<2x64xf32>
    %cst_107 = arith.constant 1.000000e+00 : f32
    %427 = vector.broadcast %cst_107 : f32 to vector<2x64xf32>
    %428 = arith.addf %427, %426 : vector<2x64xf32>
    %429 = arith.divf %427, %428 : vector<2x64xf32>
    %430 = arith.mulf %421, %372 : vector<2x64xf32>
    %431 = arith.mulf %415, %423 : vector<2x64xf32>
    %432 = arith.addf %430, %431 : vector<2x64xf32>
    %433 = math.tanh %432 : vector<2x64xf32>
    %434 = arith.mulf %429, %433 : vector<2x64xf32>
    %435 = tpu.concatenate %434, %402 in 1 : vector<2x64xf32>, vector<2x64xf32> -> vector<2x128xf32>
    %cst_108 = arith.constant dense<0.000000e+00> : vector<2x256xf32>
    %436 = tpu.matmul %435, %38, %cst_108 {dimension_numbers = #tpu.dot_dimension_numbers<[1], [0], [0], [1], [0, 0, 1, 1], [], []>} : vector<2x128xf32>, vector<128x256xf32>, vector<2x256xf32> -> vector<2x256xf32>
    %437 = arith.addf %436, %41 : vector<2x256xf32>
    %438 = vector.extract_strided_slice %437 {offsets = [0, 0], sizes = [2, 64], strides = [1, 1]} : vector<2x256xf32> to vector<2x64xf32>
    %439 = arith.negf %438 : vector<2x64xf32>
    %440 = math.exp %439 : vector<2x64xf32>
    %cst_109 = arith.constant 1.000000e+00 : f32
    %441 = vector.broadcast %cst_109 : f32 to vector<2x64xf32>
    %442 = arith.addf %441, %440 : vector<2x64xf32>
    %443 = arith.divf %441, %442 : vector<2x64xf32>
    %444 = vector.extract_strided_slice %437 {offsets = [0, 64], sizes = [2, 64], strides = [1, 1]} : vector<2x256xf32> to vector<2x64xf32>
    %445 = arith.negf %444 : vector<2x64xf32>
    %446 = math.exp %445 : vector<2x64xf32>
    %cst_110 = arith.constant 1.000000e+00 : f32
    %447 = vector.broadcast %cst_110 : f32 to vector<2x64xf32>
    %448 = arith.addf %447, %446 : vector<2x64xf32>
    %449 = arith.divf %447, %448 : vector<2x64xf32>
    %450 = vector.extract_strided_slice %437 {offsets = [0, 128], sizes = [2, 64], strides = [1, 1]} : vector<2x256xf32> to vector<2x64xf32>
    %451 = math.tanh %450 : vector<2x64xf32>
    %452 = vector.extract_strided_slice %437 {offsets = [0, 192], sizes = [2, 64], strides = [1, 1]} : vector<2x256xf32> to vector<2x64xf32>
    %453 = arith.negf %452 : vector<2x64xf32>
    %454 = math.exp %453 : vector<2x64xf32>
    %cst_111 = arith.constant 1.000000e+00 : f32
    %455 = vector.broadcast %cst_111 : f32 to vector<2x64xf32>
    %456 = arith.addf %455, %454 : vector<2x64xf32>
    %457 = arith.divf %455, %456 : vector<2x64xf32>
    %458 = arith.mulf %449, %400 : vector<2x64xf32>
    %459 = arith.mulf %443, %451 : vector<2x64xf32>
    %460 = arith.addf %458, %459 : vector<2x64xf32>
    %461 = math.tanh %460 : vector<2x64xf32>
    %462 = arith.mulf %457, %461 : vector<2x64xf32>
    %c0_112 = arith.constant 0 : index
    %c6 = arith.constant 6 : index
    %c0_113 = arith.constant 0 : index
    %463 = vector.load %arg31[%c0_112, %c6, %c0_113] : memref<2x8x64xf32, #tpu.memory_space<vmem>>, vector<2x1x64xf32>
    %464 = vector.shape_cast %463 : vector<2x1x64xf32> to vector<2x64xf32>
    %465 = vector.shape_cast %462 : vector<2x64xf32> to vector<2x1x64xf32>
    tpu.vector_store %arg31[%c0_112, %c6, %c0_113], %465 {strides = array<i32>} : memref<2x8x64xf32, #tpu.memory_space<vmem>>, vector<2x1x64xf32>,
    %466 = vector.extract_strided_slice %36 {offsets = [0, 7, 0], sizes = [2, 1, 256], strides = [1, 1, 1]} : vector<2x8x256xf32> to vector<2x1x256xf32>
    %467 = vector.shape_cast %466 : vector<2x1x256xf32> to vector<2x256xf32>
    %cst_114 = arith.constant dense<0.000000e+00> : vector<2x256xf32>
    %468 = tpu.matmul %434, %37, %cst_114 {dimension_numbers = #tpu.dot_dimension_numbers<[1], [0], [0], [1], [0, 0, 1, 1], [], []>} : vector<2x64xf32>, vector<64x256xf32>, vector<2x256xf32> -> vector<2x256xf32>
    %469 = arith.addf %467, %468 : vector<2x256xf32>
    %470 = vector.extract_strided_slice %469 {offsets = [0, 0], sizes = [2, 64], strides = [1, 1]} : vector<2x256xf32> to vector<2x64xf32>
    %471 = arith.negf %470 : vector<2x64xf32>
    %472 = math.exp %471 : vector<2x64xf32>
    %cst_115 = arith.constant 1.000000e+00 : f32
    %473 = vector.broadcast %cst_115 : f32 to vector<2x64xf32>
    %474 = arith.addf %473, %472 : vector<2x64xf32>
    %475 = arith.divf %473, %474 : vector<2x64xf32>
    %476 = vector.extract_strided_slice %469 {offsets = [0, 64], sizes = [2, 64], strides = [1, 1]} : vector<2x256xf32> to vector<2x64xf32>
    %477 = arith.negf %476 : vector<2x64xf32>
    %478 = math.exp %477 : vector<2x64xf32>
    %cst_116 = arith.constant 1.000000e+00 : f32
    %479 = vector.broadcast %cst_116 : f32 to vector<2x64xf32>
    %480 = arith.addf %479, %478 : vector<2x64xf32>
    %481 = arith.divf %479, %480 : vector<2x64xf32>
    %482 = vector.extract_strided_slice %469 {offsets = [0, 128], sizes = [2, 64], strides = [1, 1]} : vector<2x256xf32> to vector<2x64xf32>
    %483 = math.tanh %482 : vector<2x64xf32>
    %484 = vector.extract_strided_slice %469 {offsets = [0, 192], sizes = [2, 64], strides = [1, 1]} : vector<2x256xf32> to vector<2x64xf32>
    %485 = arith.negf %484 : vector<2x64xf32>
    %486 = math.exp %485 : vector<2x64xf32>
    %cst_117 = arith.constant 1.000000e+00 : f32
    %487 = vector.broadcast %cst_117 : f32 to vector<2x64xf32>
    %488 = arith.addf %487, %486 : vector<2x64xf32>
    %489 = arith.divf %487, %488 : vector<2x64xf32>
    %490 = arith.mulf %481, %432 : vector<2x64xf32>
    %491 = arith.mulf %475, %483 : vector<2x64xf32>
    %492 = arith.addf %490, %491 : vector<2x64xf32>
    %493 = math.tanh %492 : vector<2x64xf32>
    %494 = arith.mulf %489, %493 : vector<2x64xf32>
    %495 = tpu.concatenate %494, %462 in 1 : vector<2x64xf32>, vector<2x64xf32> -> vector<2x128xf32>
    %cst_118 = arith.constant dense<0.000000e+00> : vector<2x256xf32>
    %496 = tpu.matmul %495, %38, %cst_118 {dimension_numbers = #tpu.dot_dimension_numbers<[1], [0], [0], [1], [0, 0, 1, 1], [], []>} : vector<2x128xf32>, vector<128x256xf32>, vector<2x256xf32> -> vector<2x256xf32>
    %497 = arith.addf %496, %41 : vector<2x256xf32>
    %498 = vector.extract_strided_slice %497 {offsets = [0, 0], sizes = [2, 64], strides = [1, 1]} : vector<2x256xf32> to vector<2x64xf32>
    %499 = arith.negf %498 : vector<2x64xf32>
    %500 = math.exp %499 : vector<2x64xf32>
    %cst_119 = arith.constant 1.000000e+00 : f32
    %501 = vector.broadcast %cst_119 : f32 to vector<2x64xf32>
    %502 = arith.addf %501, %500 : vector<2x64xf32>
    %503 = arith.divf %501, %502 : vector<2x64xf32>
    %504 = vector.extract_strided_slice %497 {offsets = [0, 64], sizes = [2, 64], strides = [1, 1]} : vector<2x256xf32> to vector<2x64xf32>
    %505 = arith.negf %504 : vector<2x64xf32>
    %506 = math.exp %505 : vector<2x64xf32>
    %cst_120 = arith.constant 1.000000e+00 : f32
    %507 = vector.broadcast %cst_120 : f32 to vector<2x64xf32>
    %508 = arith.addf %507, %506 : vector<2x64xf32>
    %509 = arith.divf %507, %508 : vector<2x64xf32>
    %510 = vector.extract_strided_slice %497 {offsets = [0, 128], sizes = [2, 64], strides = [1, 1]} : vector<2x256xf32> to vector<2x64xf32>
    %511 = math.tanh %510 : vector<2x64xf32>
    %512 = vector.extract_strided_slice %497 {offsets = [0, 192], sizes = [2, 64], strides = [1, 1]} : vector<2x256xf32> to vector<2x64xf32>
    %513 = arith.negf %512 : vector<2x64xf32>
    %514 = math.exp %513 : vector<2x64xf32>
    %cst_121 = arith.constant 1.000000e+00 : f32
    %515 = vector.broadcast %cst_121 : f32 to vector<2x64xf32>
    %516 = arith.addf %515, %514 : vector<2x64xf32>
    %517 = arith.divf %515, %516 : vector<2x64xf32>
    %518 = arith.mulf %509, %460 : vector<2x64xf32>
    %519 = arith.mulf %503, %511 : vector<2x64xf32>
    %520 = arith.addf %518, %519 : vector<2x64xf32>
    %521 = math.tanh %520 : vector<2x64xf32>
    %522 = arith.mulf %517, %521 : vector<2x64xf32>
    %c0_122 = arith.constant 0 : index
    %c7 = arith.constant 7 : index
    %c0_123 = arith.constant 0 : index
    %523 = vector.load %arg31[%c0_122, %c7, %c0_123] : memref<2x8x64xf32, #tpu.memory_space<vmem>>, vector<2x1x64xf32>
    %524 = vector.shape_cast %523 : vector<2x1x64xf32> to vector<2x64xf32>
    %525 = vector.shape_cast %522 : vector<2x64xf32> to vector<2x1x64xf32>
    tpu.vector_store %arg31[%c0_122, %c7, %c0_123], %525 {strides = array<i32>} : memref<2x8x64xf32, #tpu.memory_space<vmem>>, vector<2x1x64xf32>,
    %c0_124 = arith.constant 0 : index
    %c0_125 = arith.constant 0 : index
    %c0_126 = arith.constant 0 : index
    %526 = vector.load %arg31[%c0_124, %c0_125, %c0_126] : memref<2x8x64xf32, #tpu.memory_space<vmem>>, vector<2x8x64xf32>
    %527 = vector.shape_cast %526 : vector<2x8x64xf32> to vector<16x64xf32>
    %c0_127 = arith.constant 0 : index
    %c0_128 = arith.constant 0 : index
    %c0_129 = arith.constant 0 : index
    %528 = vector.load %arg18[%c0_127, %c0_128, %c0_129] : memref<1x64x384xf32, #tpu.memory_space<vmem>>, vector<1x64x384xf32>
    %529 = vector.shape_cast %528 : vector<1x64x384xf32> to vector<64x384xf32>
    %cst_130 = arith.constant dense<0.000000e+00> : vector<32x384xf32>
    %530 = tpu.matmul %28, %529, %cst_130 {dimension_numbers = #tpu.dot_dimension_numbers<[1], [0], [0], [1], [0, 0, 1, 1], [], []>} : vector<32x64xf32>, vector<64x384xf32>, vector<32x384xf32> -> vector<32x384xf32>
    %c0_131 = arith.constant 0 : index
    %c0_132 = arith.constant 0 : index
    %c0_133 = arith.constant 0 : index
    %531 = vector.load %arg19[%c0_131, %c0_132, %c0_133] : memref<1x1x384xf32, #tpu.memory_space<vmem>>, vector<1x1x384xf32>
    %532 = vector.shape_cast %531 : vector<1x1x384xf32> to vector<1x384xf32>
    %533 = vector.broadcast %532 : vector<1x384xf32> to vector<32x384xf32>
    %534 = arith.addf %530, %533 : vector<32x384xf32>
    %c0_134 = arith.constant 0 : index
    %c0_135 = arith.constant 0 : index
    %c0_136 = arith.constant 0 : index
    %c0_137 = arith.constant 0 : index
    %535 = vector.load %arg20[%c0_134, %c0_135, %c0_136, %c0_137] : memref<1x3x64x64xf32, #tpu.memory_space<vmem>>, vector<1x1x64x64xf32>
    %536 = vector.shape_cast %535 : vector<1x1x64x64xf32> to vector<64x64xf32>
    %c0_138 = arith.constant 0 : index
    %c0_139 = arith.constant 0 : index
    %c0_140 = arith.constant 0 : index
    %c0_141 = arith.constant 0 : index
    %537 = vector.load %arg21[%c0_138, %c0_139, %c0_140, %c0_141] : memref<1x3x1x64xf32, #tpu.memory_space<vmem>>, vector<1x1x1x64xf32>
    %538 = vector.shape_cast %537 : vector<1x1x1x64xf32> to vector<1x64xf32>
    %c0_142 = arith.constant 0 : index
    %c0_143 = arith.constant 0 : index
    %c0_144 = arith.constant 0 : index
    %c0_145 = arith.constant 0 : index
    %539 = vector.load %arg16[%c0_142, %c0_143, %c0_144, %c0_145] : memref<1x3x64x64xf32, #tpu.memory_space<vmem>>, vector<1x1x64x64xf32>
    %540 = vector.shape_cast %539 : vector<1x1x64x64xf32> to vector<64x64xf32>
    %cst_146 = arith.constant dense<0.000000e+00> : vector<16x64xf32>
    %541 = tpu.matmul %527, %540, %cst_146 {dimension_numbers = #tpu.dot_dimension_numbers<[1], [0], [0], [1], [0, 0, 1, 1], [], []>} : vector<16x64xf32>, vector<64x64xf32>, vector<16x64xf32> -> vector<16x64xf32>
    %c0_147 = arith.constant 0 : index
    %c0_148 = arith.constant 0 : index
    %c0_149 = arith.constant 0 : index
    %c0_150 = arith.constant 0 : index
    %542 = vector.load %arg17[%c0_147, %c0_148, %c0_149, %c0_150] : memref<1x3x1x64xf32, #tpu.memory_space<vmem>>, vector<1x1x1x64xf32>
    %543 = vector.shape_cast %542 : vector<1x1x1x64xf32> to vector<1x64xf32>
    %544 = vector.broadcast %543 : vector<1x64xf32> to vector<16x64xf32>
    %545 = arith.addf %541, %544 : vector<16x64xf32>
    %546 = vector.shape_cast %545 : vector<16x64xf32> to vector<2x8x64xf32>
    %547 = vector.extract_strided_slice %534 {offsets = [0, 0], sizes = [32, 64], strides = [1, 1]} : vector<32x384xf32> to vector<32x64xf32>
    %548 = vector.shape_cast %547 : vector<32x64xf32> to vector<2x16x64xf32>
    %549 = vector.extract_strided_slice %534 {offsets = [0, 64], sizes = [32, 64], strides = [1, 1]} : vector<32x384xf32> to vector<32x64xf32>
    %550 = vector.shape_cast %549 : vector<32x64xf32> to vector<2x16x64xf32>
    %cst_151 = arith.constant 0.000000e+00 : f32
    %551 = vector.broadcast %cst_151 : f32 to vector<16x64xf32>
    %552 = vector.extract_strided_slice %546 {offsets = [0, 0, 0], sizes = [2, 8, 16], strides = [1, 1, 1]} : vector<2x8x64xf32> to vector<2x8x16xf32>
    %553 = vector.extract_strided_slice %548 {offsets = [0, 0, 0], sizes = [2, 16, 16], strides = [1, 1, 1]} : vector<2x16x64xf32> to vector<2x16x16xf32>
    "tpu.trace_start"() <{level = 10 : i32, message = "bsk,bck->bsc"}> : () -> ()
    %cst_152 = arith.constant dense<0.000000e+00> : vector<2x8x16xf32>
    %554 = tpu.matmul %552, %553, %cst_152 {dimension_numbers = #tpu.dot_dimension_numbers<[2], [2], [1], [1], [0, 0, 0, 1, 1, 1], [0], [0]>} : vector<2x8x16xf32>, vector<2x16x16xf32>, vector<2x8x16xf32> -> vector<2x8x16xf32>
    "tpu.trace_stop"() : () -> ()
    %cst_153 = arith.constant 2.500000e-01 : f32
    %555 = vector.broadcast %cst_153 : f32 to vector<2x8x16xf32>
    %556 = arith.mulf %554, %555 : vector<2x8x16xf32>
    %cst_154 = arith.constant dense<0xFF800000> : vector<2x8xf32>
    %557 = vector.multi_reduction <maximumf>, %556, %cst_154 [2] : vector<2x8x16xf32> to vector<2x8xf32>
    %558 = vector.shape_cast %557 : vector<2x8xf32> to vector<2x8x1xf32>
    %559 = vector.broadcast %558 : vector<2x8x1xf32> to vector<2x8x16xf32>
    %560 = arith.subf %556, %559 : vector<2x8x16xf32>
    %561 = math.exp %560 : vector<2x8x16xf32>
    %cst_155 = arith.constant dense<0.000000e+00> : vector<2x8xf32>
    %562 = vector.multi_reduction <add>, %561, %cst_155 [2] : vector<2x8x16xf32> to vector<2x8xf32>
    %563 = vector.shape_cast %562 : vector<2x8xf32> to vector<2x8x1xf32>
    %564 = tpu.reciprocal %563 {approx = true} : vector<2x8x1xf32> -> vector<2x8x1xf32>
    %565 = vector.broadcast %564 : vector<2x8x1xf32> to vector<2x8x16xf32>
    %566 = arith.mulf %561, %565 : vector<2x8x16xf32>
    %567 = vector.extract_strided_slice %550 {offsets = [0, 0, 0], sizes = [2, 16, 16], strides = [1, 1, 1]} : vector<2x16x64xf32> to vector<2x16x16xf32>
    "tpu.trace_start"() <{level = 10 : i32, message = "bsc,bck->bsk"}> : () -> ()
    %cst_156 = arith.constant dense<0.000000e+00> : vector<2x8x16xf32>
    %568 = tpu.matmul %566, %567, %cst_156 {dimension_numbers = #tpu.dot_dimension_numbers<[2], [1], [1], [2], [0, 0, 0, 1, 1, 2], [0], [0]>} : vector<2x8x16xf32>, vector<2x16x16xf32>, vector<2x8x16xf32> -> vector<2x8x16xf32>
    "tpu.trace_stop"() : () -> ()
    %569 = vector.shape_cast %568 : vector<2x8x16xf32> to vector<16x16xf32>
    %570 = vector.extract_strided_slice %536 {offsets = [0, 0], sizes = [16, 64], strides = [1, 1]} : vector<64x64xf32> to vector<16x64xf32>
    %cst_157 = arith.constant dense<0.000000e+00> : vector<16x64xf32>
    %571 = tpu.matmul %569, %570, %cst_157 {dimension_numbers = #tpu.dot_dimension_numbers<[1], [0], [0], [1], [0, 0, 1, 1], [], []>} : vector<16x16xf32>, vector<16x64xf32>, vector<16x64xf32> -> vector<16x64xf32>
    %572 = arith.addf %551, %571 : vector<16x64xf32>
    %573 = vector.extract_strided_slice %546 {offsets = [0, 0, 16], sizes = [2, 8, 16], strides = [1, 1, 1]} : vector<2x8x64xf32> to vector<2x8x16xf32>
    %574 = vector.extract_strided_slice %548 {offsets = [0, 0, 16], sizes = [2, 16, 16], strides = [1, 1, 1]} : vector<2x16x64xf32> to vector<2x16x16xf32>
    "tpu.trace_start"() <{level = 10 : i32, message = "bsk,bck->bsc"}> : () -> ()
    %cst_158 = arith.constant dense<0.000000e+00> : vector<2x8x16xf32>
    %575 = tpu.matmul %573, %574, %cst_158 {dimension_numbers = #tpu.dot_dimension_numbers<[2], [2], [1], [1], [0, 0, 0, 1, 1, 1], [0], [0]>} : vector<2x8x16xf32>, vector<2x16x16xf32>, vector<2x8x16xf32> -> vector<2x8x16xf32>
    "tpu.trace_stop"() : () -> ()
    %cst_159 = arith.constant 2.500000e-01 : f32
    %576 = vector.broadcast %cst_159 : f32 to vector<2x8x16xf32>
    %577 = arith.mulf %575, %576 : vector<2x8x16xf32>
    %cst_160 = arith.constant dense<0xFF800000> : vector<2x8xf32>
    %578 = vector.multi_reduction <maximumf>, %577, %cst_160 [2] : vector<2x8x16xf32> to vector<2x8xf32>
    %579 = vector.shape_cast %578 : vector<2x8xf32> to vector<2x8x1xf32>
    %580 = vector.broadcast %579 : vector<2x8x1xf32> to vector<2x8x16xf32>
    %581 = arith.subf %577, %580 : vector<2x8x16xf32>
    %582 = math.exp %581 : vector<2x8x16xf32>
    %cst_161 = arith.constant dense<0.000000e+00> : vector<2x8xf32>
    %583 = vector.multi_reduction <add>, %582, %cst_161 [2] : vector<2x8x16xf32> to vector<2x8xf32>
    %584 = vector.shape_cast %583 : vector<2x8xf32> to vector<2x8x1xf32>
    %585 = tpu.reciprocal %584 {approx = true} : vector<2x8x1xf32> -> vector<2x8x1xf32>
    %586 = vector.broadcast %585 : vector<2x8x1xf32> to vector<2x8x16xf32>
    %587 = arith.mulf %582, %586 : vector<2x8x16xf32>
    %588 = vector.extract_strided_slice %550 {offsets = [0, 0, 16], sizes = [2, 16, 16], strides = [1, 1, 1]} : vector<2x16x64xf32> to vector<2x16x16xf32>
    "tpu.trace_start"() <{level = 10 : i32, message = "bsc,bck->bsk"}> : () -> ()
    %cst_162 = arith.constant dense<0.000000e+00> : vector<2x8x16xf32>
    %589 = tpu.matmul %587, %588, %cst_162 {dimension_numbers = #tpu.dot_dimension_numbers<[2], [1], [1], [2], [0, 0, 0, 1, 1, 2], [0], [0]>} : vector<2x8x16xf32>, vector<2x16x16xf32>, vector<2x8x16xf32> -> vector<2x8x16xf32>
    "tpu.trace_stop"() : () -> ()
    %590 = vector.shape_cast %589 : vector<2x8x16xf32> to vector<16x16xf32>
    %591 = vector.extract_strided_slice %536 {offsets = [16, 0], sizes = [16, 64], strides = [1, 1]} : vector<64x64xf32> to vector<16x64xf32>
    %cst_163 = arith.constant dense<0.000000e+00> : vector<16x64xf32>
    %592 = tpu.matmul %590, %591, %cst_163 {dimension_numbers = #tpu.dot_dimension_numbers<[1], [0], [0], [1], [0, 0, 1, 1], [], []>} : vector<16x16xf32>, vector<16x64xf32>, vector<16x64xf32> -> vector<16x64xf32>
    %593 = arith.addf %572, %592 : vector<16x64xf32>
    %594 = vector.extract_strided_slice %546 {offsets = [0, 0, 32], sizes = [2, 8, 16], strides = [1, 1, 1]} : vector<2x8x64xf32> to vector<2x8x16xf32>
    %595 = vector.extract_strided_slice %548 {offsets = [0, 0, 32], sizes = [2, 16, 16], strides = [1, 1, 1]} : vector<2x16x64xf32> to vector<2x16x16xf32>
    "tpu.trace_start"() <{level = 10 : i32, message = "bsk,bck->bsc"}> : () -> ()
    %cst_164 = arith.constant dense<0.000000e+00> : vector<2x8x16xf32>
    %596 = tpu.matmul %594, %595, %cst_164 {dimension_numbers = #tpu.dot_dimension_numbers<[2], [2], [1], [1], [0, 0, 0, 1, 1, 1], [0], [0]>} : vector<2x8x16xf32>, vector<2x16x16xf32>, vector<2x8x16xf32> -> vector<2x8x16xf32>
    "tpu.trace_stop"() : () -> ()
    %cst_165 = arith.constant 2.500000e-01 : f32
    %597 = vector.broadcast %cst_165 : f32 to vector<2x8x16xf32>
    %598 = arith.mulf %596, %597 : vector<2x8x16xf32>
    %cst_166 = arith.constant dense<0xFF800000> : vector<2x8xf32>
    %599 = vector.multi_reduction <maximumf>, %598, %cst_166 [2] : vector<2x8x16xf32> to vector<2x8xf32>
    %600 = vector.shape_cast %599 : vector<2x8xf32> to vector<2x8x1xf32>
    %601 = vector.broadcast %600 : vector<2x8x1xf32> to vector<2x8x16xf32>
    %602 = arith.subf %598, %601 : vector<2x8x16xf32>
    %603 = math.exp %602 : vector<2x8x16xf32>
    %cst_167 = arith.constant dense<0.000000e+00> : vector<2x8xf32>
    %604 = vector.multi_reduction <add>, %603, %cst_167 [2] : vector<2x8x16xf32> to vector<2x8xf32>
    %605 = vector.shape_cast %604 : vector<2x8xf32> to vector<2x8x1xf32>
    %606 = tpu.reciprocal %605 {approx = true} : vector<2x8x1xf32> -> vector<2x8x1xf32>
    %607 = vector.broadcast %606 : vector<2x8x1xf32> to vector<2x8x16xf32>
    %608 = arith.mulf %603, %607 : vector<2x8x16xf32>
    %609 = vector.extract_strided_slice %550 {offsets = [0, 0, 32], sizes = [2, 16, 16], strides = [1, 1, 1]} : vector<2x16x64xf32> to vector<2x16x16xf32>
    "tpu.trace_start"() <{level = 10 : i32, message = "bsc,bck->bsk"}> : () -> ()
    %cst_168 = arith.constant dense<0.000000e+00> : vector<2x8x16xf32>
    %610 = tpu.matmul %608, %609, %cst_168 {dimension_numbers = #tpu.dot_dimension_numbers<[2], [1], [1], [2], [0, 0, 0, 1, 1, 2], [0], [0]>} : vector<2x8x16xf32>, vector<2x16x16xf32>, vector<2x8x16xf32> -> vector<2x8x16xf32>
    "tpu.trace_stop"() : () -> ()
    %611 = vector.shape_cast %610 : vector<2x8x16xf32> to vector<16x16xf32>
    %612 = vector.extract_strided_slice %536 {offsets = [32, 0], sizes = [16, 64], strides = [1, 1]} : vector<64x64xf32> to vector<16x64xf32>
    %cst_169 = arith.constant dense<0.000000e+00> : vector<16x64xf32>
    %613 = tpu.matmul %611, %612, %cst_169 {dimension_numbers = #tpu.dot_dimension_numbers<[1], [0], [0], [1], [0, 0, 1, 1], [], []>} : vector<16x16xf32>, vector<16x64xf32>, vector<16x64xf32> -> vector<16x64xf32>
    %614 = arith.addf %593, %613 : vector<16x64xf32>
    %615 = vector.extract_strided_slice %546 {offsets = [0, 0, 48], sizes = [2, 8, 16], strides = [1, 1, 1]} : vector<2x8x64xf32> to vector<2x8x16xf32>
    %616 = vector.extract_strided_slice %548 {offsets = [0, 0, 48], sizes = [2, 16, 16], strides = [1, 1, 1]} : vector<2x16x64xf32> to vector<2x16x16xf32>
    "tpu.trace_start"() <{level = 10 : i32, message = "bsk,bck->bsc"}> : () -> ()
    %cst_170 = arith.constant dense<0.000000e+00> : vector<2x8x16xf32>
    %617 = tpu.matmul %615, %616, %cst_170 {dimension_numbers = #tpu.dot_dimension_numbers<[2], [2], [1], [1], [0, 0, 0, 1, 1, 1], [0], [0]>} : vector<2x8x16xf32>, vector<2x16x16xf32>, vector<2x8x16xf32> -> vector<2x8x16xf32>
    "tpu.trace_stop"() : () -> ()
    %cst_171 = arith.constant 2.500000e-01 : f32
    %618 = vector.broadcast %cst_171 : f32 to vector<2x8x16xf32>
    %619 = arith.mulf %617, %618 : vector<2x8x16xf32>
    %cst_172 = arith.constant dense<0xFF800000> : vector<2x8xf32>
    %620 = vector.multi_reduction <maximumf>, %619, %cst_172 [2] : vector<2x8x16xf32> to vector<2x8xf32>
    %621 = vector.shape_cast %620 : vector<2x8xf32> to vector<2x8x1xf32>
    %622 = vector.broadcast %621 : vector<2x8x1xf32> to vector<2x8x16xf32>
    %623 = arith.subf %619, %622 : vector<2x8x16xf32>
    %624 = math.exp %623 : vector<2x8x16xf32>
    %cst_173 = arith.constant dense<0.000000e+00> : vector<2x8xf32>
    %625 = vector.multi_reduction <add>, %624, %cst_173 [2] : vector<2x8x16xf32> to vector<2x8xf32>
    %626 = vector.shape_cast %625 : vector<2x8xf32> to vector<2x8x1xf32>
    %627 = tpu.reciprocal %626 {approx = true} : vector<2x8x1xf32> -> vector<2x8x1xf32>
    %628 = vector.broadcast %627 : vector<2x8x1xf32> to vector<2x8x16xf32>
    %629 = arith.mulf %624, %628 : vector<2x8x16xf32>
    %630 = vector.extract_strided_slice %550 {offsets = [0, 0, 48], sizes = [2, 16, 16], strides = [1, 1, 1]} : vector<2x16x64xf32> to vector<2x16x16xf32>
    "tpu.trace_start"() <{level = 10 : i32, message = "bsc,bck->bsk"}> : () -> ()
    %cst_174 = arith.constant dense<0.000000e+00> : vector<2x8x16xf32>
    %631 = tpu.matmul %629, %630, %cst_174 {dimension_numbers = #tpu.dot_dimension_numbers<[2], [1], [1], [2], [0, 0, 0, 1, 1, 2], [0], [0]>} : vector<2x8x16xf32>, vector<2x16x16xf32>, vector<2x8x16xf32> -> vector<2x8x16xf32>
    "tpu.trace_stop"() : () -> ()
    %632 = vector.shape_cast %631 : vector<2x8x16xf32> to vector<16x16xf32>
    %633 = vector.extract_strided_slice %536 {offsets = [48, 0], sizes = [16, 64], strides = [1, 1]} : vector<64x64xf32> to vector<16x64xf32>
    %cst_175 = arith.constant dense<0.000000e+00> : vector<16x64xf32>
    %634 = tpu.matmul %632, %633, %cst_175 {dimension_numbers = #tpu.dot_dimension_numbers<[1], [0], [0], [1], [0, 0, 1, 1], [], []>} : vector<16x16xf32>, vector<16x64xf32>, vector<16x64xf32> -> vector<16x64xf32>
    %635 = arith.addf %614, %634 : vector<16x64xf32>
    %636 = arith.addf %527, %635 : vector<16x64xf32>
    %637 = vector.broadcast %538 : vector<1x64xf32> to vector<16x64xf32>
    %638 = arith.addf %636, %637 : vector<16x64xf32>
    %c0_176 = arith.constant 0 : index
    %c1_177 = arith.constant 1 : index
    %c0_178 = arith.constant 0 : index
    %c0_179 = arith.constant 0 : index
    %639 = vector.load %arg20[%c0_176, %c1_177, %c0_178, %c0_179] : memref<1x3x64x64xf32, #tpu.memory_space<vmem>>, vector<1x1x64x64xf32>
    %640 = vector.shape_cast %639 : vector<1x1x64x64xf32> to vector<64x64xf32>
    %c0_180 = arith.constant 0 : index
    %c1_181 = arith.constant 1 : index
    %c0_182 = arith.constant 0 : index
    %c0_183 = arith.constant 0 : index
    %641 = vector.load %arg21[%c0_180, %c1_181, %c0_182, %c0_183] : memref<1x3x1x64xf32, #tpu.memory_space<vmem>>, vector<1x1x1x64xf32>
    %642 = vector.shape_cast %641 : vector<1x1x1x64xf32> to vector<1x64xf32>
    %c0_184 = arith.constant 0 : index
    %c1_185 = arith.constant 1 : index
    %c0_186 = arith.constant 0 : index
    %c0_187 = arith.constant 0 : index
    %643 = vector.load %arg16[%c0_184, %c1_185, %c0_186, %c0_187] : memref<1x3x64x64xf32, #tpu.memory_space<vmem>>, vector<1x1x64x64xf32>
    %644 = vector.shape_cast %643 : vector<1x1x64x64xf32> to vector<64x64xf32>
    %cst_188 = arith.constant dense<0.000000e+00> : vector<16x64xf32>
    %645 = tpu.matmul %638, %644, %cst_188 {dimension_numbers = #tpu.dot_dimension_numbers<[1], [0], [0], [1], [0, 0, 1, 1], [], []>} : vector<16x64xf32>, vector<64x64xf32>, vector<16x64xf32> -> vector<16x64xf32>
    %c0_189 = arith.constant 0 : index
    %c1_190 = arith.constant 1 : index
    %c0_191 = arith.constant 0 : index
    %c0_192 = arith.constant 0 : index
    %646 = vector.load %arg17[%c0_189, %c1_190, %c0_191, %c0_192] : memref<1x3x1x64xf32, #tpu.memory_space<vmem>>, vector<1x1x1x64xf32>
    %647 = vector.shape_cast %646 : vector<1x1x1x64xf32> to vector<1x64xf32>
    %648 = vector.broadcast %647 : vector<1x64xf32> to vector<16x64xf32>
    %649 = arith.addf %645, %648 : vector<16x64xf32>
    %650 = vector.shape_cast %649 : vector<16x64xf32> to vector<2x8x64xf32>
    %651 = vector.extract_strided_slice %534 {offsets = [0, 128], sizes = [32, 64], strides = [1, 1]} : vector<32x384xf32> to vector<32x64xf32>
    %652 = vector.shape_cast %651 : vector<32x64xf32> to vector<2x16x64xf32>
    %653 = vector.extract_strided_slice %534 {offsets = [0, 192], sizes = [32, 64], strides = [1, 1]} : vector<32x384xf32> to vector<32x64xf32>
    %654 = vector.shape_cast %653 : vector<32x64xf32> to vector<2x16x64xf32>
    %cst_193 = arith.constant 0.000000e+00 : f32
    %655 = vector.broadcast %cst_193 : f32 to vector<16x64xf32>
    %656 = vector.extract_strided_slice %650 {offsets = [0, 0, 0], sizes = [2, 8, 16], strides = [1, 1, 1]} : vector<2x8x64xf32> to vector<2x8x16xf32>
    %657 = vector.extract_strided_slice %652 {offsets = [0, 0, 0], sizes = [2, 16, 16], strides = [1, 1, 1]} : vector<2x16x64xf32> to vector<2x16x16xf32>
    "tpu.trace_start"() <{level = 10 : i32, message = "bsk,bck->bsc"}> : () -> ()
    %cst_194 = arith.constant dense<0.000000e+00> : vector<2x8x16xf32>
    %658 = tpu.matmul %656, %657, %cst_194 {dimension_numbers = #tpu.dot_dimension_numbers<[2], [2], [1], [1], [0, 0, 0, 1, 1, 1], [0], [0]>} : vector<2x8x16xf32>, vector<2x16x16xf32>, vector<2x8x16xf32> -> vector<2x8x16xf32>
    "tpu.trace_stop"() : () -> ()
    %cst_195 = arith.constant 2.500000e-01 : f32
    %659 = vector.broadcast %cst_195 : f32 to vector<2x8x16xf32>
    %660 = arith.mulf %658, %659 : vector<2x8x16xf32>
    %cst_196 = arith.constant dense<0xFF800000> : vector<2x8xf32>
    %661 = vector.multi_reduction <maximumf>, %660, %cst_196 [2] : vector<2x8x16xf32> to vector<2x8xf32>
    %662 = vector.shape_cast %661 : vector<2x8xf32> to vector<2x8x1xf32>
    %663 = vector.broadcast %662 : vector<2x8x1xf32> to vector<2x8x16xf32>
    %664 = arith.subf %660, %663 : vector<2x8x16xf32>
    %665 = math.exp %664 : vector<2x8x16xf32>
    %cst_197 = arith.constant dense<0.000000e+00> : vector<2x8xf32>
    %666 = vector.multi_reduction <add>, %665, %cst_197 [2] : vector<2x8x16xf32> to vector<2x8xf32>
    %667 = vector.shape_cast %666 : vector<2x8xf32> to vector<2x8x1xf32>
    %668 = tpu.reciprocal %667 {approx = true} : vector<2x8x1xf32> -> vector<2x8x1xf32>
    %669 = vector.broadcast %668 : vector<2x8x1xf32> to vector<2x8x16xf32>
    %670 = arith.mulf %665, %669 : vector<2x8x16xf32>
    %671 = vector.extract_strided_slice %654 {offsets = [0, 0, 0], sizes = [2, 16, 16], strides = [1, 1, 1]} : vector<2x16x64xf32> to vector<2x16x16xf32>
    "tpu.trace_start"() <{level = 10 : i32, message = "bsc,bck->bsk"}> : () -> ()
    %cst_198 = arith.constant dense<0.000000e+00> : vector<2x8x16xf32>
    %672 = tpu.matmul %670, %671, %cst_198 {dimension_numbers = #tpu.dot_dimension_numbers<[2], [1], [1], [2], [0, 0, 0, 1, 1, 2], [0], [0]>} : vector<2x8x16xf32>, vector<2x16x16xf32>, vector<2x8x16xf32> -> vector<2x8x16xf32>
    "tpu.trace_stop"() : () -> ()
    %673 = vector.shape_cast %672 : vector<2x8x16xf32> to vector<16x16xf32>
    %674 = vector.extract_strided_slice %640 {offsets = [0, 0], sizes = [16, 64], strides = [1, 1]} : vector<64x64xf32> to vector<16x64xf32>
    %cst_199 = arith.constant dense<0.000000e+00> : vector<16x64xf32>
    %675 = tpu.matmul %673, %674, %cst_199 {dimension_numbers = #tpu.dot_dimension_numbers<[1], [0], [0], [1], [0, 0, 1, 1], [], []>} : vector<16x16xf32>, vector<16x64xf32>, vector<16x64xf32> -> vector<16x64xf32>
    %676 = arith.addf %655, %675 : vector<16x64xf32>
    %677 = vector.extract_strided_slice %650 {offsets = [0, 0, 16], sizes = [2, 8, 16], strides = [1, 1, 1]} : vector<2x8x64xf32> to vector<2x8x16xf32>
    %678 = vector.extract_strided_slice %652 {offsets = [0, 0, 16], sizes = [2, 16, 16], strides = [1, 1, 1]} : vector<2x16x64xf32> to vector<2x16x16xf32>
    "tpu.trace_start"() <{level = 10 : i32, message = "bsk,bck->bsc"}> : () -> ()
    %cst_200 = arith.constant dense<0.000000e+00> : vector<2x8x16xf32>
    %679 = tpu.matmul %677, %678, %cst_200 {dimension_numbers = #tpu.dot_dimension_numbers<[2], [2], [1], [1], [0, 0, 0, 1, 1, 1], [0], [0]>} : vector<2x8x16xf32>, vector<2x16x16xf32>, vector<2x8x16xf32> -> vector<2x8x16xf32>
    "tpu.trace_stop"() : () -> ()
    %cst_201 = arith.constant 2.500000e-01 : f32
    %680 = vector.broadcast %cst_201 : f32 to vector<2x8x16xf32>
    %681 = arith.mulf %679, %680 : vector<2x8x16xf32>
    %cst_202 = arith.constant dense<0xFF800000> : vector<2x8xf32>
    %682 = vector.multi_reduction <maximumf>, %681, %cst_202 [2] : vector<2x8x16xf32> to vector<2x8xf32>
    %683 = vector.shape_cast %682 : vector<2x8xf32> to vector<2x8x1xf32>
    %684 = vector.broadcast %683 : vector<2x8x1xf32> to vector<2x8x16xf32>
    %685 = arith.subf %681, %684 : vector<2x8x16xf32>
    %686 = math.exp %685 : vector<2x8x16xf32>
    %cst_203 = arith.constant dense<0.000000e+00> : vector<2x8xf32>
    %687 = vector.multi_reduction <add>, %686, %cst_203 [2] : vector<2x8x16xf32> to vector<2x8xf32>
    %688 = vector.shape_cast %687 : vector<2x8xf32> to vector<2x8x1xf32>
    %689 = tpu.reciprocal %688 {approx = true} : vector<2x8x1xf32> -> vector<2x8x1xf32>
    %690 = vector.broadcast %689 : vector<2x8x1xf32> to vector<2x8x16xf32>
    %691 = arith.mulf %686, %690 : vector<2x8x16xf32>
    %692 = vector.extract_strided_slice %654 {offsets = [0, 0, 16], sizes = [2, 16, 16], strides = [1, 1, 1]} : vector<2x16x64xf32> to vector<2x16x16xf32>
    "tpu.trace_start"() <{level = 10 : i32, message = "bsc,bck->bsk"}> : () -> ()
    %cst_204 = arith.constant dense<0.000000e+00> : vector<2x8x16xf32>
    %693 = tpu.matmul %691, %692, %cst_204 {dimension_numbers = #tpu.dot_dimension_numbers<[2], [1], [1], [2], [0, 0, 0, 1, 1, 2], [0], [0]>} : vector<2x8x16xf32>, vector<2x16x16xf32>, vector<2x8x16xf32> -> vector<2x8x16xf32>
    "tpu.trace_stop"() : () -> ()
    %694 = vector.shape_cast %693 : vector<2x8x16xf32> to vector<16x16xf32>
    %695 = vector.extract_strided_slice %640 {offsets = [16, 0], sizes = [16, 64], strides = [1, 1]} : vector<64x64xf32> to vector<16x64xf32>
    %cst_205 = arith.constant dense<0.000000e+00> : vector<16x64xf32>
    %696 = tpu.matmul %694, %695, %cst_205 {dimension_numbers = #tpu.dot_dimension_numbers<[1], [0], [0], [1], [0, 0, 1, 1], [], []>} : vector<16x16xf32>, vector<16x64xf32>, vector<16x64xf32> -> vector<16x64xf32>
    %697 = arith.addf %676, %696 : vector<16x64xf32>
    %698 = vector.extract_strided_slice %650 {offsets = [0, 0, 32], sizes = [2, 8, 16], strides = [1, 1, 1]} : vector<2x8x64xf32> to vector<2x8x16xf32>
    %699 = vector.extract_strided_slice %652 {offsets = [0, 0, 32], sizes = [2, 16, 16], strides = [1, 1, 1]} : vector<2x16x64xf32> to vector<2x16x16xf32>
    "tpu.trace_start"() <{level = 10 : i32, message = "bsk,bck->bsc"}> : () -> ()
    %cst_206 = arith.constant dense<0.000000e+00> : vector<2x8x16xf32>
    %700 = tpu.matmul %698, %699, %cst_206 {dimension_numbers = #tpu.dot_dimension_numbers<[2], [2], [1], [1], [0, 0, 0, 1, 1, 1], [0], [0]>} : vector<2x8x16xf32>, vector<2x16x16xf32>, vector<2x8x16xf32> -> vector<2x8x16xf32>
    "tpu.trace_stop"() : () -> ()
    %cst_207 = arith.constant 2.500000e-01 : f32
    %701 = vector.broadcast %cst_207 : f32 to vector<2x8x16xf32>
    %702 = arith.mulf %700, %701 : vector<2x8x16xf32>
    %cst_208 = arith.constant dense<0xFF800000> : vector<2x8xf32>
    %703 = vector.multi_reduction <maximumf>, %702, %cst_208 [2] : vector<2x8x16xf32> to vector<2x8xf32>
    %704 = vector.shape_cast %703 : vector<2x8xf32> to vector<2x8x1xf32>
    %705 = vector.broadcast %704 : vector<2x8x1xf32> to vector<2x8x16xf32>
    %706 = arith.subf %702, %705 : vector<2x8x16xf32>
    %707 = math.exp %706 : vector<2x8x16xf32>
    %cst_209 = arith.constant dense<0.000000e+00> : vector<2x8xf32>
    %708 = vector.multi_reduction <add>, %707, %cst_209 [2] : vector<2x8x16xf32> to vector<2x8xf32>
    %709 = vector.shape_cast %708 : vector<2x8xf32> to vector<2x8x1xf32>
    %710 = tpu.reciprocal %709 {approx = true} : vector<2x8x1xf32> -> vector<2x8x1xf32>
    %711 = vector.broadcast %710 : vector<2x8x1xf32> to vector<2x8x16xf32>
    %712 = arith.mulf %707, %711 : vector<2x8x16xf32>
    %713 = vector.extract_strided_slice %654 {offsets = [0, 0, 32], sizes = [2, 16, 16], strides = [1, 1, 1]} : vector<2x16x64xf32> to vector<2x16x16xf32>
    "tpu.trace_start"() <{level = 10 : i32, message = "bsc,bck->bsk"}> : () -> ()
    %cst_210 = arith.constant dense<0.000000e+00> : vector<2x8x16xf32>
    %714 = tpu.matmul %712, %713, %cst_210 {dimension_numbers = #tpu.dot_dimension_numbers<[2], [1], [1], [2], [0, 0, 0, 1, 1, 2], [0], [0]>} : vector<2x8x16xf32>, vector<2x16x16xf32>, vector<2x8x16xf32> -> vector<2x8x16xf32>
    "tpu.trace_stop"() : () -> ()
    %715 = vector.shape_cast %714 : vector<2x8x16xf32> to vector<16x16xf32>
    %716 = vector.extract_strided_slice %640 {offsets = [32, 0], sizes = [16, 64], strides = [1, 1]} : vector<64x64xf32> to vector<16x64xf32>
    %cst_211 = arith.constant dense<0.000000e+00> : vector<16x64xf32>
    %717 = tpu.matmul %715, %716, %cst_211 {dimension_numbers = #tpu.dot_dimension_numbers<[1], [0], [0], [1], [0, 0, 1, 1], [], []>} : vector<16x16xf32>, vector<16x64xf32>, vector<16x64xf32> -> vector<16x64xf32>
    %718 = arith.addf %697, %717 : vector<16x64xf32>
    %719 = vector.extract_strided_slice %650 {offsets = [0, 0, 48], sizes = [2, 8, 16], strides = [1, 1, 1]} : vector<2x8x64xf32> to vector<2x8x16xf32>
    %720 = vector.extract_strided_slice %652 {offsets = [0, 0, 48], sizes = [2, 16, 16], strides = [1, 1, 1]} : vector<2x16x64xf32> to vector<2x16x16xf32>
    "tpu.trace_start"() <{level = 10 : i32, message = "bsk,bck->bsc"}> : () -> ()
    %cst_212 = arith.constant dense<0.000000e+00> : vector<2x8x16xf32>
    %721 = tpu.matmul %719, %720, %cst_212 {dimension_numbers = #tpu.dot_dimension_numbers<[2], [2], [1], [1], [0, 0, 0, 1, 1, 1], [0], [0]>} : vector<2x8x16xf32>, vector<2x16x16xf32>, vector<2x8x16xf32> -> vector<2x8x16xf32>
    "tpu.trace_stop"() : () -> ()
    %cst_213 = arith.constant 2.500000e-01 : f32
    %722 = vector.broadcast %cst_213 : f32 to vector<2x8x16xf32>
    %723 = arith.mulf %721, %722 : vector<2x8x16xf32>
    %cst_214 = arith.constant dense<0xFF800000> : vector<2x8xf32>
    %724 = vector.multi_reduction <maximumf>, %723, %cst_214 [2] : vector<2x8x16xf32> to vector<2x8xf32>
    %725 = vector.shape_cast %724 : vector<2x8xf32> to vector<2x8x1xf32>
    %726 = vector.broadcast %725 : vector<2x8x1xf32> to vector<2x8x16xf32>
    %727 = arith.subf %723, %726 : vector<2x8x16xf32>
    %728 = math.exp %727 : vector<2x8x16xf32>
    %cst_215 = arith.constant dense<0.000000e+00> : vector<2x8xf32>
    %729 = vector.multi_reduction <add>, %728, %cst_215 [2] : vector<2x8x16xf32> to vector<2x8xf32>
    %730 = vector.shape_cast %729 : vector<2x8xf32> to vector<2x8x1xf32>
    %731 = tpu.reciprocal %730 {approx = true} : vector<2x8x1xf32> -> vector<2x8x1xf32>
    %732 = vector.broadcast %731 : vector<2x8x1xf32> to vector<2x8x16xf32>
    %733 = arith.mulf %728, %732 : vector<2x8x16xf32>
    %734 = vector.extract_strided_slice %654 {offsets = [0, 0, 48], sizes = [2, 16, 16], strides = [1, 1, 1]} : vector<2x16x64xf32> to vector<2x16x16xf32>
    "tpu.trace_start"() <{level = 10 : i32, message = "bsc,bck->bsk"}> : () -> ()
    %cst_216 = arith.constant dense<0.000000e+00> : vector<2x8x16xf32>
    %735 = tpu.matmul %733, %734, %cst_216 {dimension_numbers = #tpu.dot_dimension_numbers<[2], [1], [1], [2], [0, 0, 0, 1, 1, 2], [0], [0]>} : vector<2x8x16xf32>, vector<2x16x16xf32>, vector<2x8x16xf32> -> vector<2x8x16xf32>
    "tpu.trace_stop"() : () -> ()
    %736 = vector.shape_cast %735 : vector<2x8x16xf32> to vector<16x16xf32>
    %737 = vector.extract_strided_slice %640 {offsets = [48, 0], sizes = [16, 64], strides = [1, 1]} : vector<64x64xf32> to vector<16x64xf32>
    %cst_217 = arith.constant dense<0.000000e+00> : vector<16x64xf32>
    %738 = tpu.matmul %736, %737, %cst_217 {dimension_numbers = #tpu.dot_dimension_numbers<[1], [0], [0], [1], [0, 0, 1, 1], [], []>} : vector<16x16xf32>, vector<16x64xf32>, vector<16x64xf32> -> vector<16x64xf32>
    %739 = arith.addf %718, %738 : vector<16x64xf32>
    %740 = arith.addf %638, %739 : vector<16x64xf32>
    %741 = vector.broadcast %642 : vector<1x64xf32> to vector<16x64xf32>
    %742 = arith.addf %740, %741 : vector<16x64xf32>
    %c0_218 = arith.constant 0 : index
    %c2_219 = arith.constant 2 : index
    %c0_220 = arith.constant 0 : index
    %c0_221 = arith.constant 0 : index
    %743 = vector.load %arg20[%c0_218, %c2_219, %c0_220, %c0_221] : memref<1x3x64x64xf32, #tpu.memory_space<vmem>>, vector<1x1x64x64xf32>
    %744 = vector.shape_cast %743 : vector<1x1x64x64xf32> to vector<64x64xf32>
    %c0_222 = arith.constant 0 : index
    %c2_223 = arith.constant 2 : index
    %c0_224 = arith.constant 0 : index
    %c0_225 = arith.constant 0 : index
    %745 = vector.load %arg21[%c0_222, %c2_223, %c0_224, %c0_225] : memref<1x3x1x64xf32, #tpu.memory_space<vmem>>, vector<1x1x1x64xf32>
    %746 = vector.shape_cast %745 : vector<1x1x1x64xf32> to vector<1x64xf32>
    %c0_226 = arith.constant 0 : index
    %c2_227 = arith.constant 2 : index
    %c0_228 = arith.constant 0 : index
    %c0_229 = arith.constant 0 : index
    %747 = vector.load %arg16[%c0_226, %c2_227, %c0_228, %c0_229] : memref<1x3x64x64xf32, #tpu.memory_space<vmem>>, vector<1x1x64x64xf32>
    %748 = vector.shape_cast %747 : vector<1x1x64x64xf32> to vector<64x64xf32>
    %cst_230 = arith.constant dense<0.000000e+00> : vector<16x64xf32>
    %749 = tpu.matmul %742, %748, %cst_230 {dimension_numbers = #tpu.dot_dimension_numbers<[1], [0], [0], [1], [0, 0, 1, 1], [], []>} : vector<16x64xf32>, vector<64x64xf32>, vector<16x64xf32> -> vector<16x64xf32>
    %c0_231 = arith.constant 0 : index
    %c2_232 = arith.constant 2 : index
    %c0_233 = arith.constant 0 : index
    %c0_234 = arith.constant 0 : index
    %750 = vector.load %arg17[%c0_231, %c2_232, %c0_233, %c0_234] : memref<1x3x1x64xf32, #tpu.memory_space<vmem>>, vector<1x1x1x64xf32>
    %751 = vector.shape_cast %750 : vector<1x1x1x64xf32> to vector<1x64xf32>
    %752 = vector.broadcast %751 : vector<1x64xf32> to vector<16x64xf32>
    %753 = arith.addf %749, %752 : vector<16x64xf32>
    %754 = vector.shape_cast %753 : vector<16x64xf32> to vector<2x8x64xf32>
    %755 = vector.extract_strided_slice %534 {offsets = [0, 256], sizes = [32, 64], strides = [1, 1]} : vector<32x384xf32> to vector<32x64xf32>
    %756 = vector.shape_cast %755 : vector<32x64xf32> to vector<2x16x64xf32>
    %757 = vector.extract_strided_slice %534 {offsets = [0, 320], sizes = [32, 64], strides = [1, 1]} : vector<32x384xf32> to vector<32x64xf32>
    %758 = vector.shape_cast %757 : vector<32x64xf32> to vector<2x16x64xf32>
    %cst_235 = arith.constant 0.000000e+00 : f32
    %759 = vector.broadcast %cst_235 : f32 to vector<16x64xf32>
    %760 = vector.extract_strided_slice %754 {offsets = [0, 0, 0], sizes = [2, 8, 16], strides = [1, 1, 1]} : vector<2x8x64xf32> to vector<2x8x16xf32>
    %761 = vector.extract_strided_slice %756 {offsets = [0, 0, 0], sizes = [2, 16, 16], strides = [1, 1, 1]} : vector<2x16x64xf32> to vector<2x16x16xf32>
    "tpu.trace_start"() <{level = 10 : i32, message = "bsk,bck->bsc"}> : () -> ()
    %cst_236 = arith.constant dense<0.000000e+00> : vector<2x8x16xf32>
    %762 = tpu.matmul %760, %761, %cst_236 {dimension_numbers = #tpu.dot_dimension_numbers<[2], [2], [1], [1], [0, 0, 0, 1, 1, 1], [0], [0]>} : vector<2x8x16xf32>, vector<2x16x16xf32>, vector<2x8x16xf32> -> vector<2x8x16xf32>
    "tpu.trace_stop"() : () -> ()
    %cst_237 = arith.constant 2.500000e-01 : f32
    %763 = vector.broadcast %cst_237 : f32 to vector<2x8x16xf32>
    %764 = arith.mulf %762, %763 : vector<2x8x16xf32>
    %cst_238 = arith.constant dense<0xFF800000> : vector<2x8xf32>
    %765 = vector.multi_reduction <maximumf>, %764, %cst_238 [2] : vector<2x8x16xf32> to vector<2x8xf32>
    %766 = vector.shape_cast %765 : vector<2x8xf32> to vector<2x8x1xf32>
    %767 = vector.broadcast %766 : vector<2x8x1xf32> to vector<2x8x16xf32>
    %768 = arith.subf %764, %767 : vector<2x8x16xf32>
    %769 = math.exp %768 : vector<2x8x16xf32>
    %cst_239 = arith.constant dense<0.000000e+00> : vector<2x8xf32>
    %770 = vector.multi_reduction <add>, %769, %cst_239 [2] : vector<2x8x16xf32> to vector<2x8xf32>
    %771 = vector.shape_cast %770 : vector<2x8xf32> to vector<2x8x1xf32>
    %772 = tpu.reciprocal %771 {approx = true} : vector<2x8x1xf32> -> vector<2x8x1xf32>
    %773 = vector.broadcast %772 : vector<2x8x1xf32> to vector<2x8x16xf32>
    %774 = arith.mulf %769, %773 : vector<2x8x16xf32>
    %775 = vector.extract_strided_slice %758 {offsets = [0, 0, 0], sizes = [2, 16, 16], strides = [1, 1, 1]} : vector<2x16x64xf32> to vector<2x16x16xf32>
    "tpu.trace_start"() <{level = 10 : i32, message = "bsc,bck->bsk"}> : () -> ()
    %cst_240 = arith.constant dense<0.000000e+00> : vector<2x8x16xf32>
    %776 = tpu.matmul %774, %775, %cst_240 {dimension_numbers = #tpu.dot_dimension_numbers<[2], [1], [1], [2], [0, 0, 0, 1, 1, 2], [0], [0]>} : vector<2x8x16xf32>, vector<2x16x16xf32>, vector<2x8x16xf32> -> vector<2x8x16xf32>
    "tpu.trace_stop"() : () -> ()
    %777 = vector.shape_cast %776 : vector<2x8x16xf32> to vector<16x16xf32>
    %778 = vector.extract_strided_slice %744 {offsets = [0, 0], sizes = [16, 64], strides = [1, 1]} : vector<64x64xf32> to vector<16x64xf32>
    %cst_241 = arith.constant dense<0.000000e+00> : vector<16x64xf32>
    %779 = tpu.matmul %777, %778, %cst_241 {dimension_numbers = #tpu.dot_dimension_numbers<[1], [0], [0], [1], [0, 0, 1, 1], [], []>} : vector<16x16xf32>, vector<16x64xf32>, vector<16x64xf32> -> vector<16x64xf32>
    %780 = arith.addf %759, %779 : vector<16x64xf32>
    %781 = vector.extract_strided_slice %754 {offsets = [0, 0, 16], sizes = [2, 8, 16], strides = [1, 1, 1]} : vector<2x8x64xf32> to vector<2x8x16xf32>
    %782 = vector.extract_strided_slice %756 {offsets = [0, 0, 16], sizes = [2, 16, 16], strides = [1, 1, 1]} : vector<2x16x64xf32> to vector<2x16x16xf32>
    "tpu.trace_start"() <{level = 10 : i32, message = "bsk,bck->bsc"}> : () -> ()
    %cst_242 = arith.constant dense<0.000000e+00> : vector<2x8x16xf32>
    %783 = tpu.matmul %781, %782, %cst_242 {dimension_numbers = #tpu.dot_dimension_numbers<[2], [2], [1], [1], [0, 0, 0, 1, 1, 1], [0], [0]>} : vector<2x8x16xf32>, vector<2x16x16xf32>, vector<2x8x16xf32> -> vector<2x8x16xf32>
    "tpu.trace_stop"() : () -> ()
    %cst_243 = arith.constant 2.500000e-01 : f32
    %784 = vector.broadcast %cst_243 : f32 to vector<2x8x16xf32>
    %785 = arith.mulf %783, %784 : vector<2x8x16xf32>
    %cst_244 = arith.constant dense<0xFF800000> : vector<2x8xf32>
    %786 = vector.multi_reduction <maximumf>, %785, %cst_244 [2] : vector<2x8x16xf32> to vector<2x8xf32>
    %787 = vector.shape_cast %786 : vector<2x8xf32> to vector<2x8x1xf32>
    %788 = vector.broadcast %787 : vector<2x8x1xf32> to vector<2x8x16xf32>
    %789 = arith.subf %785, %788 : vector<2x8x16xf32>
    %790 = math.exp %789 : vector<2x8x16xf32>
    %cst_245 = arith.constant dense<0.000000e+00> : vector<2x8xf32>
    %791 = vector.multi_reduction <add>, %790, %cst_245 [2] : vector<2x8x16xf32> to vector<2x8xf32>
    %792 = vector.shape_cast %791 : vector<2x8xf32> to vector<2x8x1xf32>
    %793 = tpu.reciprocal %792 {approx = true} : vector<2x8x1xf32> -> vector<2x8x1xf32>
    %794 = vector.broadcast %793 : vector<2x8x1xf32> to vector<2x8x16xf32>
    %795 = arith.mulf %790, %794 : vector<2x8x16xf32>
    %796 = vector.extract_strided_slice %758 {offsets = [0, 0, 16], sizes = [2, 16, 16], strides = [1, 1, 1]} : vector<2x16x64xf32> to vector<2x16x16xf32>
    "tpu.trace_start"() <{level = 10 : i32, message = "bsc,bck->bsk"}> : () -> ()
    %cst_246 = arith.constant dense<0.000000e+00> : vector<2x8x16xf32>
    %797 = tpu.matmul %795, %796, %cst_246 {dimension_numbers = #tpu.dot_dimension_numbers<[2], [1], [1], [2], [0, 0, 0, 1, 1, 2], [0], [0]>} : vector<2x8x16xf32>, vector<2x16x16xf32>, vector<2x8x16xf32> -> vector<2x8x16xf32>
    "tpu.trace_stop"() : () -> ()
    %798 = vector.shape_cast %797 : vector<2x8x16xf32> to vector<16x16xf32>
    %799 = vector.extract_strided_slice %744 {offsets = [16, 0], sizes = [16, 64], strides = [1, 1]} : vector<64x64xf32> to vector<16x64xf32>
    %cst_247 = arith.constant dense<0.000000e+00> : vector<16x64xf32>
    %800 = tpu.matmul %798, %799, %cst_247 {dimension_numbers = #tpu.dot_dimension_numbers<[1], [0], [0], [1], [0, 0, 1, 1], [], []>} : vector<16x16xf32>, vector<16x64xf32>, vector<16x64xf32> -> vector<16x64xf32>
    %801 = arith.addf %780, %800 : vector<16x64xf32>
    %802 = vector.extract_strided_slice %754 {offsets = [0, 0, 32], sizes = [2, 8, 16], strides = [1, 1, 1]} : vector<2x8x64xf32> to vector<2x8x16xf32>
    %803 = vector.extract_strided_slice %756 {offsets = [0, 0, 32], sizes = [2, 16, 16], strides = [1, 1, 1]} : vector<2x16x64xf32> to vector<2x16x16xf32>
    "tpu.trace_start"() <{level = 10 : i32, message = "bsk,bck->bsc"}> : () -> ()
    %cst_248 = arith.constant dense<0.000000e+00> : vector<2x8x16xf32>
    %804 = tpu.matmul %802, %803, %cst_248 {dimension_numbers = #tpu.dot_dimension_numbers<[2], [2], [1], [1], [0, 0, 0, 1, 1, 1], [0], [0]>} : vector<2x8x16xf32>, vector<2x16x16xf32>, vector<2x8x16xf32> -> vector<2x8x16xf32>
    "tpu.trace_stop"() : () -> ()
    %cst_249 = arith.constant 2.500000e-01 : f32
    %805 = vector.broadcast %cst_249 : f32 to vector<2x8x16xf32>
    %806 = arith.mulf %804, %805 : vector<2x8x16xf32>
    %cst_250 = arith.constant dense<0xFF800000> : vector<2x8xf32>
    %807 = vector.multi_reduction <maximumf>, %806, %cst_250 [2] : vector<2x8x16xf32> to vector<2x8xf32>
    %808 = vector.shape_cast %807 : vector<2x8xf32> to vector<2x8x1xf32>
    %809 = vector.broadcast %808 : vector<2x8x1xf32> to vector<2x8x16xf32>
    %810 = arith.subf %806, %809 : vector<2x8x16xf32>
    %811 = math.exp %810 : vector<2x8x16xf32>
    %cst_251 = arith.constant dense<0.000000e+00> : vector<2x8xf32>
    %812 = vector.multi_reduction <add>, %811, %cst_251 [2] : vector<2x8x16xf32> to vector<2x8xf32>
    %813 = vector.shape_cast %812 : vector<2x8xf32> to vector<2x8x1xf32>
    %814 = tpu.reciprocal %813 {approx = true} : vector<2x8x1xf32> -> vector<2x8x1xf32>
    %815 = vector.broadcast %814 : vector<2x8x1xf32> to vector<2x8x16xf32>
    %816 = arith.mulf %811, %815 : vector<2x8x16xf32>
    %817 = vector.extract_strided_slice %758 {offsets = [0, 0, 32], sizes = [2, 16, 16], strides = [1, 1, 1]} : vector<2x16x64xf32> to vector<2x16x16xf32>
    "tpu.trace_start"() <{level = 10 : i32, message = "bsc,bck->bsk"}> : () -> ()
    %cst_252 = arith.constant dense<0.000000e+00> : vector<2x8x16xf32>
    %818 = tpu.matmul %816, %817, %cst_252 {dimension_numbers = #tpu.dot_dimension_numbers<[2], [1], [1], [2], [0, 0, 0, 1, 1, 2], [0], [0]>} : vector<2x8x16xf32>, vector<2x16x16xf32>, vector<2x8x16xf32> -> vector<2x8x16xf32>
    "tpu.trace_stop"() : () -> ()
    %819 = vector.shape_cast %818 : vector<2x8x16xf32> to vector<16x16xf32>
    %820 = vector.extract_strided_slice %744 {offsets = [32, 0], sizes = [16, 64], strides = [1, 1]} : vector<64x64xf32> to vector<16x64xf32>
    %cst_253 = arith.constant dense<0.000000e+00> : vector<16x64xf32>
    %821 = tpu.matmul %819, %820, %cst_253 {dimension_numbers = #tpu.dot_dimension_numbers<[1], [0], [0], [1], [0, 0, 1, 1], [], []>} : vector<16x16xf32>, vector<16x64xf32>, vector<16x64xf32> -> vector<16x64xf32>
    %822 = arith.addf %801, %821 : vector<16x64xf32>
    %823 = vector.extract_strided_slice %754 {offsets = [0, 0, 48], sizes = [2, 8, 16], strides = [1, 1, 1]} : vector<2x8x64xf32> to vector<2x8x16xf32>
    %824 = vector.extract_strided_slice %756 {offsets = [0, 0, 48], sizes = [2, 16, 16], strides = [1, 1, 1]} : vector<2x16x64xf32> to vector<2x16x16xf32>
    "tpu.trace_start"() <{level = 10 : i32, message = "bsk,bck->bsc"}> : () -> ()
    %cst_254 = arith.constant dense<0.000000e+00> : vector<2x8x16xf32>
    %825 = tpu.matmul %823, %824, %cst_254 {dimension_numbers = #tpu.dot_dimension_numbers<[2], [2], [1], [1], [0, 0, 0, 1, 1, 1], [0], [0]>} : vector<2x8x16xf32>, vector<2x16x16xf32>, vector<2x8x16xf32> -> vector<2x8x16xf32>
    "tpu.trace_stop"() : () -> ()
    %cst_255 = arith.constant 2.500000e-01 : f32
    %826 = vector.broadcast %cst_255 : f32 to vector<2x8x16xf32>
    %827 = arith.mulf %825, %826 : vector<2x8x16xf32>
    %cst_256 = arith.constant dense<0xFF800000> : vector<2x8xf32>
    %828 = vector.multi_reduction <maximumf>, %827, %cst_256 [2] : vector<2x8x16xf32> to vector<2x8xf32>
    %829 = vector.shape_cast %828 : vector<2x8xf32> to vector<2x8x1xf32>
    %830 = vector.broadcast %829 : vector<2x8x1xf32> to vector<2x8x16xf32>
    %831 = arith.subf %827, %830 : vector<2x8x16xf32>
    %832 = math.exp %831 : vector<2x8x16xf32>
    %cst_257 = arith.constant dense<0.000000e+00> : vector<2x8xf32>
    %833 = vector.multi_reduction <add>, %832, %cst_257 [2] : vector<2x8x16xf32> to vector<2x8xf32>
    %834 = vector.shape_cast %833 : vector<2x8xf32> to vector<2x8x1xf32>
    %835 = tpu.reciprocal %834 {approx = true} : vector<2x8x1xf32> -> vector<2x8x1xf32>
    %836 = vector.broadcast %835 : vector<2x8x1xf32> to vector<2x8x16xf32>
    %837 = arith.mulf %832, %836 : vector<2x8x16xf32>
    %838 = vector.extract_strided_slice %758 {offsets = [0, 0, 48], sizes = [2, 16, 16], strides = [1, 1, 1]} : vector<2x16x64xf32> to vector<2x16x16xf32>
    "tpu.trace_start"() <{level = 10 : i32, message = "bsc,bck->bsk"}> : () -> ()
    %cst_258 = arith.constant dense<0.000000e+00> : vector<2x8x16xf32>
    %839 = tpu.matmul %837, %838, %cst_258 {dimension_numbers = #tpu.dot_dimension_numbers<[2], [1], [1], [2], [0, 0, 0, 1, 1, 2], [0], [0]>} : vector<2x8x16xf32>, vector<2x16x16xf32>, vector<2x8x16xf32> -> vector<2x8x16xf32>
    "tpu.trace_stop"() : () -> ()
    %840 = vector.shape_cast %839 : vector<2x8x16xf32> to vector<16x16xf32>
    %841 = vector.extract_strided_slice %744 {offsets = [48, 0], sizes = [16, 64], strides = [1, 1]} : vector<64x64xf32> to vector<16x64xf32>
    %cst_259 = arith.constant dense<0.000000e+00> : vector<16x64xf32>
    %842 = tpu.matmul %840, %841, %cst_259 {dimension_numbers = #tpu.dot_dimension_numbers<[1], [0], [0], [1], [0, 0, 1, 1], [], []>} : vector<16x16xf32>, vector<16x64xf32>, vector<16x64xf32> -> vector<16x64xf32>
    %843 = arith.addf %822, %842 : vector<16x64xf32>
    %844 = arith.addf %742, %843 : vector<16x64xf32>
    %845 = vector.broadcast %746 : vector<1x64xf32> to vector<16x64xf32>
    %846 = arith.addf %844, %845 : vector<16x64xf32>
    %c0_260 = arith.constant 0 : index
    %c0_261 = arith.constant 0 : index
    %c0_262 = arith.constant 0 : index
    %847 = vector.load %arg22[%c0_260, %c0_261, %c0_262] : memref<1x64x256xf32, #tpu.memory_space<vmem>>, vector<1x64x256xf32>
    %848 = vector.shape_cast %847 : vector<1x64x256xf32> to vector<64x256xf32>
    %cst_263 = arith.constant dense<0.000000e+00> : vector<16x256xf32>
    %849 = tpu.matmul %846, %848, %cst_263 {dimension_numbers = #tpu.dot_dimension_numbers<[1], [0], [0], [1], [0, 0, 1, 1], [], []>} : vector<16x64xf32>, vector<64x256xf32>, vector<16x256xf32> -> vector<16x256xf32>
    %c0_264 = arith.constant 0 : index
    %c0_265 = arith.constant 0 : index
    %c0_266 = arith.constant 0 : index
    %850 = vector.load %arg23[%c0_264, %c0_265, %c0_266] : memref<1x1x256xf32, #tpu.memory_space<vmem>>, vector<1x1x256xf32>
    %851 = vector.shape_cast %850 : vector<1x1x256xf32> to vector<1x256xf32>
    %852 = vector.broadcast %851 : vector<1x256xf32> to vector<16x256xf32>
    %853 = arith.addf %849, %852 : vector<16x256xf32>
    %cst_267 = arith.constant 0.000000e+00 : f32
    %854 = vector.broadcast %cst_267 : f32 to vector<16x256xf32>
    %855 = arith.maximumf %853, %854 : vector<16x256xf32>
    %c0_268 = arith.constant 0 : index
    %c0_269 = arith.constant 0 : index
    %c0_270 = arith.constant 0 : index
    %856 = vector.load %arg24[%c0_268, %c0_269, %c0_270] : memref<1x256x128xf32, #tpu.memory_space<vmem>>, vector<1x256x128xf32>
    %857 = vector.shape_cast %856 : vector<1x256x128xf32> to vector<256x128xf32>
    %cst_271 = arith.constant dense<0.000000e+00> : vector<16x128xf32>
    %858 = tpu.matmul %855, %857, %cst_271 {dimension_numbers = #tpu.dot_dimension_numbers<[1], [0], [0], [1], [0, 0, 1, 1], [], []>} : vector<16x256xf32>, vector<256x128xf32>, vector<16x128xf32> -> vector<16x128xf32>
    %c0_272 = arith.constant 0 : index
    %c0_273 = arith.constant 0 : index
    %c0_274 = arith.constant 0 : index
    %859 = vector.load %arg25[%c0_272, %c0_273, %c0_274] : memref<1x1x128xf32, #tpu.memory_space<vmem>>, vector<1x1x128xf32>
    %860 = vector.shape_cast %859 : vector<1x1x128xf32> to vector<1x128xf32>
    %861 = vector.broadcast %860 : vector<1x128xf32> to vector<16x128xf32>
    %862 = arith.addf %858, %861 : vector<16x128xf32>
    %cst_275 = arith.constant 0.000000e+00 : f32
    %863 = vector.broadcast %cst_275 : f32 to vector<16x128xf32>
    %864 = arith.maximumf %862, %863 : vector<16x128xf32>
    %c0_276 = arith.constant 0 : index
    %c0_277 = arith.constant 0 : index
    %c0_278 = arith.constant 0 : index
    %865 = vector.load %arg26[%c0_276, %c0_277, %c0_278] : memref<1x128x64xf32, #tpu.memory_space<vmem>>, vector<1x128x64xf32>
    %866 = vector.shape_cast %865 : vector<1x128x64xf32> to vector<128x64xf32>
    %cst_279 = arith.constant dense<0.000000e+00> : vector<16x64xf32>
    %867 = tpu.matmul %864, %866, %cst_279 {dimension_numbers = #tpu.dot_dimension_numbers<[1], [0], [0], [1], [0, 0, 1, 1], [], []>} : vector<16x128xf32>, vector<128x64xf32>, vector<16x64xf32> -> vector<16x64xf32>
    %c0_280 = arith.constant 0 : index
    %c0_281 = arith.constant 0 : index
    %c0_282 = arith.constant 0 : index
    %868 = vector.load %arg27[%c0_280, %c0_281, %c0_282] : memref<1x1x64xf32, #tpu.memory_space<vmem>>, vector<1x1x64xf32>
    %869 = vector.shape_cast %868 : vector<1x1x64xf32> to vector<1x64xf32>
    %870 = vector.broadcast %869 : vector<1x64xf32> to vector<16x64xf32>
    %871 = arith.addf %867, %870 : vector<16x64xf32>
    %cst_283 = arith.constant 0.000000e+00 : f32
    %872 = vector.broadcast %cst_283 : f32 to vector<16x64xf32>
    %873 = arith.maximumf %871, %872 : vector<16x64xf32>
    %c0_284 = arith.constant 0 : index
    %c0_285 = arith.constant 0 : index
    %c0_286 = arith.constant 0 : index
    %874 = vector.load %arg28[%c0_284, %c0_285, %c0_286] : memref<1x64x1xf32, #tpu.memory_space<vmem>>, vector<1x64x1xf32>
    %875 = vector.shape_cast %874 : vector<1x64x1xf32> to vector<64x1xf32>
    %cst_287 = arith.constant dense<0.000000e+00> : vector<16x1xf32>
    %876 = tpu.matmul %873, %875, %cst_287 {dimension_numbers = #tpu.dot_dimension_numbers<[1], [0], [0], [1], [0, 0, 1, 1], [], []>} : vector<16x64xf32>, vector<64x1xf32>, vector<16x1xf32> -> vector<16x1xf32>
    %c0_288 = arith.constant 0 : index
    %c0_289 = arith.constant 0 : index
    %c0_290 = arith.constant 0 : index
    %877 = vector.load %arg29[%c0_288, %c0_289, %c0_290] : memref<1x1x1xf32, #tpu.memory_space<vmem>>, vector<1x1x1xf32>
    %878 = vector.shape_cast %877 : vector<1x1x1xf32> to vector<1x1xf32>
    %879 = vector.broadcast %878 : vector<1x1xf32> to vector<16x1xf32>
    %880 = arith.addf %876, %879 : vector<16x1xf32>
    %881 = math.tanh %880 : vector<16x1xf32>
    %cst_291 = arith.constant 1.000000e+00 : f32
    %882 = vector.broadcast %cst_291 : f32 to vector<16x1xf32>
    %883 = arith.addf %881, %882 : vector<16x1xf32>
    %cst_292 = arith.constant 3.500000e+00 : f32
    %884 = vector.broadcast %cst_292 : f32 to vector<16x1xf32>
    %885 = arith.mulf %884, %883 : vector<16x1xf32>
    %cst_293 = arith.constant -5.000000e+00 : f32
    %886 = vector.broadcast %cst_293 : f32 to vector<16x1xf32>
    %887 = arith.addf %886, %885 : vector<16x1xf32>
    %888 = arith.subf %887, %880 : vector<16x1xf32>
    %889 = vector.broadcast %0 : f32 to vector<16x1xf32>
    %890 = arith.mulf %889, %888 : vector<16x1xf32>
    %891 = arith.addf %880, %890 : vector<16x1xf32>
    %892 = vector.shape_cast %891 : vector<16x1xf32> to vector<2x8x1xf32>
    %c0_294 = arith.constant 0 : index
    %c0_295 = arith.constant 0 : index
    %c0_296 = arith.constant 0 : index
    %c0_297 = arith.constant 0 : index
    %893 = vector.load %arg30[%c0_294, %c0_295, %c0_296, %c0_297] : memref<1x2x8x1xf32, #tpu.memory_space<vmem>>, vector<1x2x8x1xf32>
    %894 = vector.shape_cast %893 : vector<1x2x8x1xf32> to vector<2x8x1xf32>
    %895 = vector.shape_cast %892 : vector<2x8x1xf32> to vector<1x2x8x1xf32>
    tpu.vector_store %arg30[%c0_294, %c0_295, %c0_296, %c0_297], %895 {strides = array<i32>} : memref<1x2x8x1xf32, #tpu.memory_space<vmem>>, vector<1x2x8x1xf32>,
    return
  }
  func.func @transform_0(%arg0: i32) -> (i32, i32) {
    %c0_i32 = arith.constant 0 : i32
    %c0_i32_0 = arith.constant 0 : i32
    %c0_i32_1 = arith.constant 0 : i32
    return %c0_i32, %c0_i32_0 : i32, i32
  }
  func.func @transform_1(%arg0: i32) -> (i32, i32) {
    %c0_i32 = arith.constant 0 : i32
    %c0_i32_0 = arith.constant 0 : i32
    %c0_i32_1 = arith.constant 0 : i32
    return %c0_i32, %c0_i32_0 : i32, i32
  }
  func.func @transform_2(%arg0: i32) -> (i32, i32) {
    %c0_i32 = arith.constant 0 : i32
    %c0_i32_0 = arith.constant 0 : i32
    %c0_i32_1 = arith.constant 0 : i32
    return %c0_i32, %c0_i32_0 : i32, i32
  }
  func.func @transform_3(%arg0: i32) -> (i32, i32, i32) {
    %c0_i32 = arith.constant 0 : i32
    %c0_i32_0 = arith.constant 0 : i32
    %c0_i32_1 = arith.constant 0 : i32
    %c0_i32_2 = arith.constant 0 : i32
    return %c0_i32, %c0_i32_0, %c0_i32_1 : i32, i32, i32
  }
  func.func @transform_4(%arg0: i32) -> (i32, i32) {
    %c0_i32 = arith.constant 0 : i32
    %c0_i32_0 = arith.constant 0 : i32
    %c0_i32_1 = arith.constant 0 : i32
    return %c0_i32, %c0_i32_0 : i32, i32
  }
  func.func @transform_5(%arg0: i32) -> (i32, i32) {
    %c0_i32 = arith.constant 0 : i32
    %c0_i32_0 = arith.constant 0 : i32
    %c0_i32_1 = arith.constant 0 : i32
    return %c0_i32, %c0_i32_0 : i32, i32
  }
  func.func @transform_6(%arg0: i32) -> (i32, i32) {
    %c0_i32 = arith.constant 0 : i32
    %c0_i32_0 = arith.constant 0 : i32
    %c0_i32_1 = arith.constant 0 : i32
    return %c0_i32, %c0_i32_0 : i32, i32
  }
  func.func @transform_7(%arg0: i32) -> (i32, i32) {
    %c0_i32 = arith.constant 0 : i32
    %c0_i32_0 = arith.constant 0 : i32
    %c0_i32_1 = arith.constant 0 : i32
    return %c0_i32, %c0_i32_0 : i32, i32
  }
  func.func @transform_8(%arg0: i32) -> (i32, i32) {
    %c0_i32 = arith.constant 0 : i32
    %c0_i32_0 = arith.constant 0 : i32
    %c0_i32_1 = arith.constant 0 : i32
    return %c0_i32, %c0_i32_0 : i32, i32
  }
  func.func @transform_9(%arg0: i32) -> (i32, i32) {
    %c0_i32 = arith.constant 0 : i32
    %c0_i32_0 = arith.constant 0 : i32
    %c0_i32_1 = arith.constant 0 : i32
    return %c0_i32, %c0_i32_0 : i32, i32
  }
  func.func @transform_10(%arg0: i32) -> (i32, i32) {
    %c0_i32 = arith.constant 0 : i32
    %c0_i32_0 = arith.constant 0 : i32
    %c0_i32_1 = arith.constant 0 : i32
    return %c0_i32, %c0_i32_0 : i32, i32
  }
  func.func @transform_11(%arg0: i32) -> (i32, i32) {
    %c0_i32 = arith.constant 0 : i32
    %c0_i32_0 = arith.constant 0 : i32
    %c0_i32_1 = arith.constant 0 : i32
    return %c0_i32, %c0_i32_0 : i32, i32
  }
  func.func @transform_12(%arg0: i32) -> (i32, i32) {
    %c0_i32 = arith.constant 0 : i32
    %c0_i32_0 = arith.constant 0 : i32
    %c0_i32_1 = arith.constant 0 : i32
    return %c0_i32, %c0_i32_0 : i32, i32
  }
  func.func @transform_13(%arg0: i32) -> (i32, i32) {
    %c0_i32 = arith.constant 0 : i32
    %c0_i32_0 = arith.constant 0 : i32
    %c0_i32_1 = arith.constant 0 : i32
    return %c0_i32, %c0_i32_0 : i32, i32
  }
  func.func @transform_14(%arg0: i32) -> (i32, i32) {
    %c0_i32 = arith.constant 0 : i32
    %c0_i32_0 = arith.constant 0 : i32
    %c0_i32_1 = arith.constant 0 : i32
    return %c0_i32, %c0_i32_0 : i32, i32
  }
  func.func @transform_15(%arg0: i32) -> (i32, i32, i32, i32) {
    %c0_i32 = arith.constant 0 : i32
    %c0_i32_0 = arith.constant 0 : i32
    %c0_i32_1 = arith.constant 0 : i32
    %c0_i32_2 = arith.constant 0 : i32
    return %arg0, %c0_i32, %c0_i32_0, %c0_i32_1 : i32, i32, i32, i32
  }
  func.func @transform_16(%arg0: i32) -> (i32, i32, i32, i32) {
    %c0_i32 = arith.constant 0 : i32
    %c0_i32_0 = arith.constant 0 : i32
    %c0_i32_1 = arith.constant 0 : i32
    %c0_i32_2 = arith.constant 0 : i32
    return %arg0, %c0_i32, %c0_i32_0, %c0_i32_1 : i32, i32, i32, i32
  }
  func.func @transform_17(%arg0: i32) -> (i32, i32, i32) {
    %c0_i32 = arith.constant 0 : i32
    %c0_i32_0 = arith.constant 0 : i32
    %c0_i32_1 = arith.constant 0 : i32
    return %arg0, %c0_i32, %c0_i32_0 : i32, i32, i32
  }
  func.func @transform_18(%arg0: i32) -> (i32, i32, i32) {
    %c0_i32 = arith.constant 0 : i32
    %c0_i32_0 = arith.constant 0 : i32
    %c0_i32_1 = arith.constant 0 : i32
    return %arg0, %c0_i32, %c0_i32_0 : i32, i32, i32
  }
  func.func @transform_19(%arg0: i32) -> (i32, i32, i32, i32) {
    %c0_i32 = arith.constant 0 : i32
    %c0_i32_0 = arith.constant 0 : i32
    %c0_i32_1 = arith.constant 0 : i32
    %c0_i32_2 = arith.constant 0 : i32
    return %arg0, %c0_i32, %c0_i32_0, %c0_i32_1 : i32, i32, i32, i32
  }
  func.func @transform_20(%arg0: i32) -> (i32, i32, i32, i32) {
    %c0_i32 = arith.constant 0 : i32
    %c0_i32_0 = arith.constant 0 : i32
    %c0_i32_1 = arith.constant 0 : i32
    %c0_i32_2 = arith.constant 0 : i32
    return %arg0, %c0_i32, %c0_i32_0, %c0_i32_1 : i32, i32, i32, i32
  }
  func.func @transform_21(%arg0: i32) -> (i32, i32, i32) {
    %c0_i32 = arith.constant 0 : i32
    %c0_i32_0 = arith.constant 0 : i32
    %c0_i32_1 = arith.constant 0 : i32
    return %arg0, %c0_i32, %c0_i32_0 : i32, i32, i32
  }
  func.func @transform_22(%arg0: i32) -> (i32, i32, i32) {
    %c0_i32 = arith.constant 0 : i32
    %c0_i32_0 = arith.constant 0 : i32
    %c0_i32_1 = arith.constant 0 : i32
    return %arg0, %c0_i32, %c0_i32_0 : i32, i32, i32
  }
  func.func @transform_23(%arg0: i32) -> (i32, i32, i32) {
    %c0_i32 = arith.constant 0 : i32
    %c0_i32_0 = arith.constant 0 : i32
    %c0_i32_1 = arith.constant 0 : i32
    return %arg0, %c0_i32, %c0_i32_0 : i32, i32, i32
  }
  func.func @transform_24(%arg0: i32) -> (i32, i32, i32) {
    %c0_i32 = arith.constant 0 : i32
    %c0_i32_0 = arith.constant 0 : i32
    %c0_i32_1 = arith.constant 0 : i32
    return %arg0, %c0_i32, %c0_i32_0 : i32, i32, i32
  }
  func.func @transform_25(%arg0: i32) -> (i32, i32, i32) {
    %c0_i32 = arith.constant 0 : i32
    %c0_i32_0 = arith.constant 0 : i32
    %c0_i32_1 = arith.constant 0 : i32
    return %arg0, %c0_i32, %c0_i32_0 : i32, i32, i32
  }
  func.func @transform_26(%arg0: i32) -> (i32, i32, i32) {
    %c0_i32 = arith.constant 0 : i32
    %c0_i32_0 = arith.constant 0 : i32
    %c0_i32_1 = arith.constant 0 : i32
    return %arg0, %c0_i32, %c0_i32_0 : i32, i32, i32
  }
  func.func @transform_27(%arg0: i32) -> (i32, i32, i32) {
    %c0_i32 = arith.constant 0 : i32
    %c0_i32_0 = arith.constant 0 : i32
    %c0_i32_1 = arith.constant 0 : i32
    return %arg0, %c0_i32, %c0_i32_0 : i32, i32, i32
  }
  func.func @transform_28(%arg0: i32) -> (i32, i32, i32) {
    %c0_i32 = arith.constant 0 : i32
    %c0_i32_0 = arith.constant 0 : i32
    %c0_i32_1 = arith.constant 0 : i32
    return %arg0, %c0_i32, %c0_i32_0 : i32, i32, i32
  }
  func.func @transform_29(%arg0: i32) -> (i32, i32, i32, i32) {
    %c0_i32 = arith.constant 0 : i32
    %c0_i32_0 = arith.constant 0 : i32
    %c0_i32_1 = arith.constant 0 : i32
    %c0_i32_2 = arith.constant 0 : i32
    return %arg0, %c0_i32, %c0_i32_0, %c0_i32_1 : i32, i32, i32, i32
  }
}

</mosaic_0001>

<bundles_post_ra>
// kernel: mosac_actor_forward.1
= control target key start
LH: loop header
LB: loop body
LE: loop exit
PB: predicated region body
PF: predicated region fallthrough
CT: control target
= control target key end

     0   :  { %s14634_s6 = smov 1   ;;  %s14635_s10 = smov 2   ;;  %s16826_s0 = inlined_call_operand.smem [shape: u32[30], index: -1, kind: input, shape index: {}] }
   0x1   :  { %s14705_s5 = sld [smem:[%s16826_s0]]   ;;  %s14636_s14 = smov 3  }
   0x2   :  { %s14710_s9 = sld [smem:[%s16826_s0 + %s14634_s6]]   ;;  %s14637_s18 = smov 4  }
   0x3   :  { %s14715_s13 = sld [smem:[%s16826_s0 + %s14635_s10]]   ;;  %s14638_s22 = smov 5  }
   0x4   :  { %s14720_s17 = sld [smem:[%s16826_s0 + %s14636_s14]]   ;;  %s14639_s26 = smov 6  }
   0x5   :  { %s14725_s21 = sld [smem:[%s16826_s0 + %s14637_s18]]   ;;  %s14640_s30 = smov 7  }
   0x6   :  { %s14730_s25 = sld [smem:[%s16826_s0 + %s14638_s22]]   ;;  %s14641_s4 = smov 8  }
   0x7   :  { %16868 = sst [smem:[#allocation41_spill]] %s14705_s5  ;;  %s14642_s10 = smov 9  }
   0x8   :  { %s14735_s29 = sld [smem:[%s16826_s0 + %s14639_s26]]   ;;  %s14643_s15 = smov 10  }
   0x9   :  { %16869 = sst [smem:[#allocation42_spill]] %s14715_s13  ;;  %s14644_s20 = smov 11  }
   0xa   :  { %16870 = sst [smem:[#allocation43_spill]] %s14720_s17  ;;  %s14645_s26 = smov 12  }
   0xb   :  { %s14740_s3 = sld [smem:[%s16826_s0 + %s14640_s30]]   ;;  %s14646_s1 = smov 13  }
   0xc   :  { %16871 = sst [smem:[#allocation44_spill]] %s14730_s25  ;;  %s14647_s7 = smov 14  }
   0xd   :  { %s14745_s8 = sld [smem:[%s16826_s0 + %s14641_s4]]   ;;  %s14649_s22 = smov 16  }
   0xe   :  { %16872 = sst [smem:[#allocation45_spill]] %s14735_s29  ;;  %s14650_s28 = smov 17  }
   0xf   :  { %s14750_s14 = sld [smem:[%s16826_s0 + %s14642_s10]]  }
  0x10   :  { %s14755_s19 = sld [smem:[%s16826_s0 + %s14643_s15]]   ;;  %s14648_s15 = smov 15  }
  0x11   :  { %s14760_s24 = sld [smem:[%s16826_s0 + %s14644_s20]]  }
  0x12   :  { %s14765_s30 = sld [smem:[%s16826_s0 + %s14645_s26]]  }
  0x13   :  { %16873 = sst [smem:[#allocation46_spill]] %s14745_s8 }
  0x14   :  { %s14770_s6 = sld [smem:[%s16826_s0 + %s14646_s1]]  }
  0x15   :  { %s14775_s12 = sld [smem:[%s16826_s0 + %s14647_s7]]   ;;  %s14651_s7 = smov 18  }
  0x16   :  { %16874 = sst [smem:[#allocation47_spill]] %s14755_s19 }
  0x17   :  { %s14780_s20 = sld [smem:[%s16826_s0 + %s14648_s15]]   ;;  %s14652_s15 = smov 19  }
  0x18   :  { %16875 = sst [smem:[#allocation48_spill]] %s14765_s30 }
  0x19   :  { %s14785_s27 = sld [smem:[%s16826_s0 + %s14649_s22]]   ;;  %s14653_s22 = smov 20  }
  0x1a   :  { %16876 = sst [smem:[#allocation49_spill]] %s14770_s6 }
  0x1b   :  { %s14790_s4 = sld [smem:[%s16826_s0 + %s14650_s28]]   ;;  %s14654_s28 = smov 21  }
  0x1c   :  { %s14795_s13 = sld [smem:[%s16826_s0 + %s14651_s7]]   ;;  %s14655_s7 = smov 22  }
  0x1d   :  { %16877 = sst [smem:[#allocation50_spill]] %s14780_s20 }
  0x1e   :  { %s14800_s20 = sld [smem:[%s16826_s0 + %s14652_s15]]   ;;  %s14656_s15 = smov 23  }
  0x1f   :  { %16878 = sst [smem:[#allocation51_spill]] %s14785_s27 }
  0x20   :  { %s14805_s6 = sld [smem:[%s16826_s0 + %s14653_s22]]   ;;  %s14657_s22 = smov 24  }
  0x21   :  { %16879 = sst [smem:[#allocation52_spill]] %s14790_s4 }
  0x22   :  { %16880 = sst [smem:[#allocation53_spill]] %s14795_s13 }
  0x23   :  { %s14810_s4 = sld [smem:[%s16826_s0 + %s14654_s28]]   ;;  %s14658_s28 = smov 25  }
  0x24   :  { %16881 = sst [smem:[#allocation54_spill]] %s14800_s20 }
  0x25   :  { %s14815_s25 = sld [smem:[%s16826_s0 + %s14655_s7]]   ;;  %s14659_s7 = smov 26  }
  0x26   :  { %16882 = sst [smem:[#allocation55_spill]] %s14805_s6 }
  0x27   :  { %s14820_s20 = sld [smem:[%s16826_s0 + %s14656_s15]]   ;;  %s14660_s15 = smov 27  }
  0x28   :  { %s14825_s5 = sld [smem:[%s16826_s0 + %s14657_s22]]   ;;  %s14661_s22 = smov 28  }
  0x29   :  { %16883 = sst [smem:[#allocation56_spill]] %s14810_s4 }
  0x2a   :  { %s14830_s4 = sld [smem:[%s16826_s0 + %s14658_s28]]   ;;  %s14662_s28 = smov 29  }
  0x2b   :  { %s14835_s13 = sld [smem:[%s16826_s0 + %s14659_s7]]  }
  0x2d   :  { %16884 = sst [smem:[#allocation57_spill]] %s14820_s20 }
  0x2e   :  { %16885 = sst [smem:[#allocation58_spill]] %s14825_s5 }
  0x2f   :  { %s14840_s20 = sld [smem:[%s16826_s0 + %s14660_s15]]  }
  0x30   :  { %16886 = sst [smem:[#allocation59_spill]] %s14830_s4 }
  0x31   :  { %s14845_s5 = sld [smem:[%s16826_s0 + %s14661_s22]]  }
  0x32   :  { %s14850_s4 = sld [smem:[%s16826_s0 + %s14662_s28]]  }
  0x35   :  { %16887 = sst [smem:[#allocation60_spill]] %s14840_s20 }
  0x37   :  { %16888 = sst [smem:[#allocation61_spill]] %s14845_s5 }
  0x38   :  { %16889 = sst [smem:[#allocation62_spill]] %s14850_s4 }
  0x39   :  { %64 = vsyncpa [#allocation4], 0 }
  0x3a   :  { %65 = vsyncpa [#allocation6], 0 }
  0x3b   :  { %66 = vsyncpa [#allocation9], 0 }
  0x3c   :  { %67 = vsyncpa [#allocation12], 0 }
  0x3d   :  { %68 = vsyncpa [#allocation15], 0 }
  0x3e   :  { %69 = vsyncpa [#allocation18], 0 }
  0x3f   :  { %70 = vsyncpa [#allocation21], 0 }
  0x40   :  { %72 = vsyncpa [#allocation21 + $0x1], 0 }
  0x41   :  { %73 = vsyncpa [#allocation24], 0 }
  0x42   :  { %75 = vsyncpa [#allocation24 + $0x1], 0 }
  0x43   :  { %76 = vsyncpa [#allocation27], 0 }
  0x44   :  { %78 = vsyncpa [#allocation27 + $0x1], 0 }
  0x45   :  { %79 = vsyncpa [#allocation30], 0 }
  0x46   :  { %81 = vsyncpa [#allocation30 + $0x1], 0  ;;  %s14852_s7 = smov 0   ;;  %s14854_s10 = smov 0  }
  0x47   :  { %s14856_s0 = smov 0   ;;  %s14858_s11 = smov 0  }
  0x48 LB: > { %s16890_s6 = sld [smem:[#allocation55_spill]]  ;;  %s16891_s27 = sld [smem:[#allocation51_spill]]  ;;  %s14628_s0 = sphi %s14856_s0, %s16961_s0   ;;  %s14624_s10 = sphi %s14854_s10, %s16960_s10   ;;  %s14620_s7 = sphi %s14852_s7, %s16959_s7   ;;  %s14632_s11 = sphi %s14858_s11, %s16958_s11  }
  0x49   : > { %s16892_s30 = sld [smem:[#allocation48_spill]]  ;;  %s16893_s29 = sld [smem:[#allocation45_spill]] }
  0x4a   : > { %s16894_s19 = sld [smem:[#allocation47_spill]]  ;;  %s16895_s17 = sld [smem:[#allocation43_spill]] }
  0x4b   : > { %s16896_s8 = sld [smem:[#allocation46_spill]]  ;;  %16897 = sst [smem:[#allocation63_spill]] %s14624_s10 }
  0x4c   : > { %16898 = sst [smem:[#allocation64_spill]] %s14628_s0  ;;  %s14873_s15 = sadd.s32 4294967295, %s14632_s11  }
  0x4d   : > { %16899 = sst [smem:[#allocation65_spill]] %s14873_s15  ;;  %p11061_p0 = scmp.ge.s32.totalorder %s14632_s11, 1 }
  0x4e   : > { %p16833_p1 = scmp.eq.s32.totalorder %s14873_s15, 0  ;;  %p797_p2 = scmp.lt.s32.totalorder %s14632_s11, 3 }
  0x4f   : > { %s14663_s18 = smov [#allocation5]   ;;  %s14664_s23 = smov [#allocation8]  }
  0x50   : > { %p14878_p3 = pnand %p11061_p0, %p797_p2  ;;  %s828_s22 = sshll.u32 %s14663_s18, 4  ;;  %s14882_s22 = int_to_ptr.vmem [resolvable:$true] %s828_s22 }
  0x51   : > { %s857_s26 = sshll.u32 %s14664_s23, 4  ;;  %s14665_s1 = smov [#allocation11]   ;;  %s14892_s26 = int_to_ptr.vmem [resolvable:$true] %s857_s26 }
  0x52   : > { %s16900_s16 = scalar_select %p14878_p3, 1, 0 }
  0x53   : > { %p13273_p4 = pneg %p14878_p3  ;;  %s881_s2 = sshll.u32 %s14665_s1, 4  ;;  %s14894_s2 = int_to_ptr.vmem [resolvable:$true] %s881_s2 }
  0x54   : > { %s14044_s4 = scalar_lea.hbm %s16895_s17, 256 }
  0x55   : > { %p14888_p5 = pnand %p13273_p4, %p16833_p1  ;;  %p14045_p6 = scmp.ne.s32.totalorder %s16895_s17, %s14044_s4 }
  0x56   : > { %p14051_p10 = scmp.lt.u32.totalorder %s14044_s4, %s16895_s17 }
  0x57   : > { %s16901_s28 = scalar_select %p14888_p5, 1, 0 }
  0x58   : > { %p14900_p7 = pneg %p14888_p5 }
  0x5a   : > { %s16902_s18 = scalar_select %p14900_p7, 1, 0 }
  0x5b   : > { %p14047_p8 = pnand %p14900_p7, %p14045_p6 }
  0x5d   : > { %p14048_p9 = pneg %p14047_p8 }
  0x5f   : > { %p14053_p11 = pnand %p14051_p10, %p14048_p9 }
  0x61   : > { %14056 = shalt.err (!%p14053_p11)
}
  0x62   : > { %s14057_s23 = scalar_lea.vmem %s14882_s22, 256  ;;  %p14065_p2 = scmp.lt.s32.totalorder %s14882_s22, %s14882_s22 }
  0x63   : > { %p14058_p12 = scmp.ne.s32.totalorder %s14882_s22, %s14057_s23  ;;  %p14066_p4 = scmp.lt.s32.totalorder %s14057_s23, %s14057_s23 }
  0x65   : > { %p14060_p13 = pnand %p14058_p12, %p14900_p7  ;;  %p14067_p1 = por %p14066_p4, %p14065_p2 }
  0x67   : > { %p14061_p0 = pneg %p14060_p13 }
  0x69   : > { %p14068_p3 = pnand %p14067_p1, %p14061_p0 }
  0x6b   : > { %14071 = shalt.err (!%p14068_p3)
}
  0x6c   : > { %s16835_s1 = smov 128   ;;  %s16837_s4 = smov 8  }
  0x6d   : > { %13279 = dma.hbm_to_vmem [thread:$0]  (!%p14888_p5), %s16895_s17, 256, %s14882_s22, [#allocation6], %s16835_s1, %s16835_s1, %s16837_s4  }
  0x6e   : > { %s14072_s5 = scalar_lea.hbm %s16893_s29, 512 }
  0x6f   : > { %p14073_p6 = scmp.ne.s32.totalorder %s16893_s29, %s14072_s5  ;;  %p14079_p3 = scmp.lt.u32.totalorder %s14072_s5, %s16893_s29 }
  0x71   : > { %p14075_p8 = pnand %p14073_p6, %p14900_p7 }
  0x73   : > { %p14076_p1 = pneg %p14075_p8 }
  0x75   : > { %p14081_p9 = pnand %p14079_p3, %p14076_p1 }
  0x77   : > { %14084 = shalt.err (!%p14081_p9)
}
  0x78   : > { %s14085_s23 = scalar_lea.vmem %s14892_s26, 512  ;;  %p14093_p13 = scmp.lt.s32.totalorder %s14892_s26, %s14892_s26 }
  0x79   : > { %p14086_p10 = scmp.ne.s32.totalorder %s14892_s26, %s14085_s23  ;;  %p14094_p0 = scmp.lt.s32.totalorder %s14085_s23, %s14085_s23 }
  0x7b   : > { %p14088_p11 = pnand %p14086_p10, %p14900_p7  ;;  %p14095_p2 = por %p14094_p0, %p14093_p13 }
  0x7d   : > { %p14089_p12 = pneg %p14088_p11 }
  0x7f   : > { %p14096_p4 = pnand %p14095_p2, %p14089_p12 }
  0x81   : > { %14099 = shalt.err (!%p14096_p4)
}
  0x82   : > { %13285 = dma.hbm_to_vmem [thread:$0]  (!%p14888_p5), %s16893_s29, 512, %s14892_s26, [#allocation9], %s16835_s1, %s16835_s1, %s16837_s4  }
  0x83   : > { %s14100_s5 = scalar_lea.hbm %s16896_s8, 512 }
  0x84   : > { %p14101_p6 = scmp.ne.s32.totalorder %s16896_s8, %s14100_s5  ;;  %p14107_p3 = scmp.lt.u32.totalorder %s14100_s5, %s16896_s8 }
  0x86   : > { %p14103_p8 = pnand %p14101_p6, %p14900_p7 }
  0x88   : > { %p14104_p1 = pneg %p14103_p8 }
  0x8a   : > { %p14109_p9 = pnand %p14107_p3, %p14104_p1 }
  0x8c   : > { %14112 = shalt.err (!%p14109_p9)
}
  0x8d   : > { %s14113_s22 = scalar_lea.vmem %s14894_s2, 512  ;;  %p14121_p13 = scmp.lt.s32.totalorder %s14894_s2, %s14894_s2 }
  0x8e   : > { %p14114_p10 = scmp.ne.s32.totalorder %s14894_s2, %s14113_s22  ;;  %p14122_p0 = scmp.lt.s32.totalorder %s14113_s22, %s14113_s22 }
  0x90   : > { %p14116_p11 = pnand %p14114_p10, %p14900_p7  ;;  %p14123_p2 = por %p14122_p0, %p14121_p13 }
  0x92   : > { %p14117_p12 = pneg %p14116_p11 }
  0x94   : > { %p14124_p4 = pnand %p14123_p2, %p14117_p12 }
  0x96   : > { %14127 = shalt.err (!%p14124_p4)
}
  0x97   : > { %13291 = dma.hbm_to_vmem [thread:$0]  (!%p14888_p5), %s16896_s8, 512, %s14894_s2, [#allocation12], %s16835_s1, %s16835_s1, %s16837_s4  }
  0x98   : > { %s14668_s26 = smov [#allocation14]   ;;  %s14128_s5 = scalar_lea.hbm %s16894_s19, 512 }
  0x99   : > { %s905_s23 = sshll.u32 %s14668_s26, 4  ;;  %p14129_p6 = scmp.ne.s32.totalorder %s16894_s19, %s14128_s5  ;;  %s906_s23 = int_to_ptr.vmem [resolvable:$true] %s905_s23 }
  0x9a   : > { %p14135_p3 = scmp.lt.u32.totalorder %s14128_s5, %s16894_s19 }
  0x9b   : > { %p14131_p8 = pnand %p14129_p6, %p14900_p7 }
  0x9d   : > { %p14132_p1 = pneg %p14131_p8 }
  0x9f   : > { %p14137_p9 = pnand %p14135_p3, %p14132_p1 }
  0xa1   : > { %14140 = shalt.err (!%p14137_p9)
}
  0xa2   : > { %s14141_s22 = scalar_lea.vmem %s906_s23, 512  ;;  %p14149_p13 = scmp.lt.s32.totalorder %s906_s23, %s906_s23 }
  0xa3   : > { %p14142_p10 = scmp.ne.s32.totalorder %s906_s23, %s14141_s22  ;;  %p14150_p0 = scmp.lt.s32.totalorder %s14141_s22, %s14141_s22 }
  0xa5   : > { %p14144_p11 = pnand %p14142_p10, %p14900_p7  ;;  %p14151_p2 = por %p14150_p0, %p14149_p13 }
  0xa7   : > { %p14145_p12 = pneg %p14144_p11 }
  0xa9   : > { %p14152_p4 = pnand %p14151_p2, %p14145_p12 }
  0xab   : > { %14155 = shalt.err (!%p14152_p4)
}
  0xac   : > { %s16839_s2 = smov 256   ;;  %s16841_s26 = smov 16  }
  0xad   : > { %13297 = dma.hbm_to_vmem [thread:$0]  (!%p14888_p5), %s16894_s19, 512, %s906_s23, [#allocation15], %s16839_s2, %s16839_s2, %s16841_s26  }
  0xae   : > { %s14671_s5 = smov [#allocation17]   ;;  %s14156_s22 = scalar_lea.hbm %s16892_s30, 32 }
  0xaf   : > { %s932_s1 = sshll.u32 %s14671_s5, 4  ;;  %p14157_p6 = scmp.ne.s32.totalorder %s16892_s30, %s14156_s22  ;;  %s933_s1 = int_to_ptr.vmem [resolvable:$true] %s932_s1 }
  0xb0   : > { %p14163_p3 = scmp.lt.u32.totalorder %s14156_s22, %s16892_s30 }
  0xb1   : > { %p14159_p8 = pnand %p14157_p6, %p14900_p7 }
  0xb3   : > { %p14160_p1 = pneg %p14159_p8 }
  0xb5   : > { %p14165_p9 = pnand %p14163_p3, %p14160_p1 }
  0xb7   : > { %14168 = shalt.err (!%p14165_p9)
}
  0xb8   : > { %s14169_s4 = scalar_lea.vmem %s933_s1, 32  ;;  %p14177_p13 = scmp.lt.s32.totalorder %s933_s1, %s933_s1 }
  0xb9   : > { %p14170_p10 = scmp.ne.s32.totalorder %s933_s1, %s14169_s4  ;;  %p14178_p0 = scmp.lt.s32.totalorder %s14169_s4, %s14169_s4 }
  0xbb   : > { %p14172_p11 = pnand %p14170_p10, %p14900_p7  ;;  %p14179_p2 = por %p14178_p0, %p14177_p13 }
  0xbd   : > { %p14173_p12 = pneg %p14172_p11 }
  0xbf   : > { %p14180_p4 = pnand %p14179_p2, %p14173_p12 }
  0xc1   : > { %14183 = shalt.err (!%p14180_p4)
}
  0xc2   : > { %13303 = dma.hbm_to_vmem [thread:$0]  (!%p14888_p5), %s16892_s30, 32, %s933_s1, [#allocation18]  }
  0xc3   : > { %s14980_s4 = sadd.s32 1, %s14632_s11   ;;  %s435_s5 = sadd.s32 1, %s14628_s0 }
  0xc4   : > { %16903 = sst [smem:[#allocation66_spill]] %s14980_s4  ;;  %s432_s23 = ssub.s32 %s14632_s11, %s14980_s4 }
  0xc5   : > { %p433_p6 = scmp.eq.s32.totalorder %s432_s23, 0  ;;  %p442_p8 = scmp.ne.s32.totalorder %s14628_s0, %s14624_s10 }
  0xc6   : > { %p443_p1 = scmp.eq.s32.totalorder %s14632_s11, 0  ;;  %p448_p3 = scmp.ne.s32.totalorder %s14624_s10, %s14620_s7 }
  0xc7   : > { %s14991_s22 = scalar_select %p433_p6, %s14628_s0, %s435_s5  }
  0xc8   : > { %p444_p9 = por %p443_p1, %p442_p8  ;;  %p16905_p10 = scmp.eq.s32.totalorder %s14873_s15, 0 }
  0xc9   : > { %16904 = sst [smem:[#allocation67_spill]] %s14991_s22  ;;  %p13340_p12 = scmp.lt.s32.totalorder %s14632_s11, 2 }
  0xca   : > { %p14995_p11 = por %p16905_p10, %p448_p3  ;;  %s15001_s1 = sand.u32 1, %s14632_s11  }
  0xcb   : > { %s15004_s26 = sand.u32 1, %s14628_s0   ;;  %p15009_p13 = pnand %p13340_p12, %p444_p9 }
  0xcc   : > { %s16906_s2 = scalar_select %p14995_p11, 1, 0 }
  0xcd   : > { %s15007_s23 = smul.u32 3, %s15004_s26  ;;  %p15028_p2 = pneg %p15009_p13 }
  0xce   : > { %16907 = sst [smem:[#allocation68_spill]] %s16906_s2  ;;  %s15014_s5 = smul.u32 48, %s14632_s11 }
  0xcf   : > { %s16908_s7 = scalar_select %p15009_p13, 1, 0 }
  0xd0   : > { %s15018_s8 = scalar_lea.hbm %s16891_s27, %s15014_s5  ;;  %s969_s17 = scalar_lea.vmem [#allocation20], %s15007_s23 }
  0xd1   : > { %s976_s19 = sshll.u32 %s969_s17, 4  ;;  %s14184_s30 = scalar_lea.hbm %s15018_s8, 48  ;;  %s15021_s19 = int_to_ptr.vmem [resolvable:$true] %s976_s19 }
  0xd2   : > { %p14185_p0 = scmp.ne.s32.totalorder %s15018_s8, %s14184_s30  ;;  %s14189_s0 = scalar_lea.hbm %s16891_s27, 96 }
  0xd3   : > { %s16909_s22 = scalar_select %p15028_p2, 1, 0 }
  0xd4   : > { %p14187_p4 = pnand %p15028_p2, %p14185_p0  ;;  %p14190_p8 = scmp.lt.u32.totalorder %s15018_s8, %s16891_s27 }
  0xd5   : > { %p14191_p1 = scmp.lt.u32.totalorder %s14189_s0, %s14184_s30  ;;  %p14193_p9 = scmp.lt.u32.totalorder %s14184_s30, %s15018_s8 }
  0xd6   : > { %p14188_p6 = pneg %p14187_p4 }
  0xd7   : > { %p14192_p3 = por %p14191_p1, %p14190_p8 }
  0xd9   : > { %p14194_p10 = por %p14193_p9, %p14192_p3 }
  0xdb   : > { %p14195_p12 = pnand %p14194_p10, %p14188_p6 }
  0xdd   : > { %14198 = shalt.err (!%p14195_p12)
}
  0xde   : > { %s14199_s17 = scalar_lea.vmem %s15021_s19, 48  ;;  %s14672_s29 = smov [#allocation20]  }
  0xdf   : > { %p14200_p11 = scmp.ne.s32.totalorder %s15021_s19, %s14199_s17  ;;  %s14204_s4 = sshll.u32 %s14672_s29, 4  ;;  %s14205_s4 = int_to_ptr.vmem [resolvable:$false] %s14204_s4 }
  0xe0   : > { %s14206_s20 = scalar_lea.vmem %s14205_s4, 96  ;;  %p14207_p0 = scmp.lt.s32.totalorder %s15021_s19, %s14205_s4 }
  0xe1   : > { %p14202_p5 = pnand %p14200_p11, %p15028_p2  ;;  %p14208_p4 = scmp.lt.s32.totalorder %s14206_s20, %s14199_s17 }
  0xe3   : > { %p14203_p7 = pneg %p14202_p5  ;;  %p14209_p8 = por %p14208_p4, %p14207_p0 }
  0xe5   : > { %p14210_p1 = pnand %p14209_p8, %p14203_p7 }
  0xe7   : > { %14213 = shalt.err (!%p14210_p1)
}
  0xe8   : > { %s14673_s30 = smov 1   ;;  %s16910_s0 = smov 16  }
  0xe9   : > { %s16911_s27 = scalar_lea.sflag [#allocation21], %s15001_s1  ;;  %s15054_s29 = scalar_lea.hbm %s16890_s6, %s15014_s5 }
  0xea   : > { %13310 = dma.hbm_to_vmem [thread:$0]  (!%p15009_p13), %s15018_s8, 48, %s15021_s19, %s16911_s27, %s16910_s0, %s16910_s0, %s14673_s30  }
  0xeb   : > { %s1025_s20 = scalar_lea.vmem [#allocation23], %s15007_s23  ;;  %s11080_s17 = sshll.u32 %s15004_s26, 1 }
  0xec   : > { %s1032_s4 = sshll.u32 %s1025_s20, 4  ;;  %s1022_s2 = scalar_lea.sflag [#allocation24], %s15001_s1  ;;  %s15057_s4 = int_to_ptr.vmem [resolvable:$true] %s1032_s4 }
  0xed   : > { %s14214_s10 = scalar_lea.hbm %s15054_s29, 48  ;;  %s14219_s15 = scalar_lea.hbm %s16890_s6, 96 }
  0xee   : > { %p14215_p5 = scmp.ne.s32.totalorder %s15054_s29, %s14214_s10  ;;  %p14220_p6 = scmp.lt.u32.totalorder %s15054_s29, %s16890_s6 }
  0xef   : > { %p14221_p3 = scmp.lt.u32.totalorder %s14219_s15, %s14214_s10  ;;  %p14223_p10 = scmp.lt.u32.totalorder %s14214_s10, %s15054_s29 }
  0xf0   : > { %p14217_p7 = pnand %p14215_p5, %p15028_p2 }
  0xf1   : > { %p14222_p9 = por %p14221_p3, %p14220_p6 }
  0xf2   : > { %p14218_p11 = pneg %p14217_p7 }
  0xf3   : > { %p14224_p12 = por %p14223_p10, %p14222_p9 }
  0xf5   : > { %p14225_p0 = pnand %p14224_p12, %p14218_p11 }
  0xf7   : > { %14228 = shalt.err (!%p14225_p0)
}
  0xf8   : > { %s14229_s8 = scalar_lea.vmem %s15057_s4, 48  ;;  %s14674_s19 = smov [#allocation23]  }
  0xf9   : > { %p14230_p4 = scmp.ne.s32.totalorder %s15057_s4, %s14229_s8  ;;  %s14234_s27 = sshll.u32 %s14674_s19, 4  ;;  %s14235_s27 = int_to_ptr.vmem [resolvable:$false] %s14234_s27 }
  0xfa   : > { %s14236_s20 = scalar_lea.vmem %s14235_s27, 96  ;;  %p14237_p5 = scmp.lt.s32.totalorder %s15057_s4, %s14235_s27 }
  0xfb   : > { %p14232_p8 = pnand %p14230_p4, %p15028_p2  ;;  %p14238_p7 = scmp.lt.s32.totalorder %s14236_s20, %s14229_s8 }
  0xfd   : > { %p14233_p1 = pneg %p14232_p8  ;;  %p14239_p6 = por %p14238_p7, %p14237_p5 }
  0xff   : > { %p14240_p3 = pnand %p14239_p6, %p14233_p1 }
 0x101   : > { %14243 = shalt.err (!%p14240_p3)
}
 0x102   : > { %13316 = dma.hbm_to_vmem [thread:$0]  (!%p15009_p13), %s15054_s29, 48, %s15057_s4, %s1022_s2, %s16910_s0, %s16910_s0, %s14673_s30  }
 0x103   : > { %s11381_s10 = sshll.u32 %s14632_s11, 5  ;;  %s1067_s8 = scalar_lea.vmem [#allocation26], %s11080_s17 }
 0x104   : > { %s15085_s15 = scalar_lea.hbm %s14815_s25, %s11381_s10  ;;  %s1075_s19 = sshll.u32 %s1067_s8, 4  ;;  %s1076_s19 = int_to_ptr.vmem [resolvable:$true] %s1075_s19 }
 0x105   : > { %s1064_s27 = scalar_lea.sflag [#allocation27], %s15001_s1  ;;  %s14244_s20 = scalar_lea.hbm %s15085_s15, 32 }
 0x106   : > { %p14245_p11 = scmp.ne.s32.totalorder %s15085_s15, %s14244_s20  ;;  %s14249_s6 = scalar_lea.hbm %s14815_s25, 64 }
 0x107   : > { %p14250_p12 = scmp.lt.u32.totalorder %s15085_s15, %s14815_s25  ;;  %p14251_p0 = scmp.lt.u32.totalorder %s14249_s6, %s14244_s20 }
 0x108   : > { %p14247_p9 = pnand %p14245_p11, %p15028_p2  ;;  %p14253_p8 = scmp.lt.u32.totalorder %s14244_s20, %s15085_s15 }
 0x109   : > { %p14252_p4 = por %p14251_p0, %p14250_p12 }
 0x10a   : > { %p14248_p10 = pneg %p14247_p9 }
 0x10b   : > { %p14254_p1 = por %p14253_p8, %p14252_p4 }
 0x10d   : > { %p14255_p5 = pnand %p14254_p1, %p14248_p10 }
 0x10f   : > { %14258 = shalt.err (!%p14255_p5)
}
 0x110   : > { %s14259_s30 = scalar_lea.vmem %s1076_s19, 32  ;;  %s14675_s29 = smov [#allocation26]  }
 0x111   : > { %p14260_p7 = scmp.ne.s32.totalorder %s1076_s19, %s14259_s30  ;;  %s14264_s4 = sshll.u32 %s14675_s29, 4  ;;  %s14265_s4 = int_to_ptr.vmem [resolvable:$false] %s14264_s4 }
 0x112   : > { %s14266_s17 = scalar_lea.vmem %s14265_s4, 64  ;;  %p14267_p11 = scmp.lt.s32.totalorder %s1076_s19, %s14265_s4 }
 0x113   : > { %p14262_p6 = pnand %p14260_p7, %p15028_p2  ;;  %p14268_p9 = scmp.lt.s32.totalorder %s14266_s17, %s14259_s30 }
 0x115   : > { %p14263_p3 = pneg %p14262_p6  ;;  %p14269_p13 = por %p14268_p9, %p14267_p11 }
 0x117   : > { %p14270_p0 = pnand %p14269_p13, %p14263_p3 }
 0x119   : > { %14273 = shalt.err (!%p14270_p0)
}
 0x11a   : > { %p16912_p12 = scmp.ne.s32.totalorder %s16908_s7, 0  ;;  %s14676_s6 = smov [#allocation3]  }
 0x11b   : > { %s812_s10 = sshll.u32 %s14676_s6, 4  ;;  %s14677_s8 = smov [#allocation7]   ;;  %s813_s10 = int_to_ptr.vmem [resolvable:$true] %s812_s10 }
 0x11c   : > { %13322 = dma.hbm_to_vmem [thread:$0]  (!%p16912_p12), %s15085_s15, 32, %s1076_s19, %s1064_s27  }
 0x11d   : > { %s841_s20 = sshll.u32 %s14677_s8, 4  ;;  %s14274_s29 = scalar_lea.hbm %s14710_s9, 512  ;;  %s842_s20 = int_to_ptr.vmem [resolvable:$true] %s841_s20 }
 0x11e   : > { %p14275_p10 = scmp.ne.s32.totalorder %s14710_s9, %s14274_s29  ;;  %p16913_p4 = scmp.ne.s32.totalorder %s16902_s18, 0 }
 0x11f   : > { %p14281_p1 = scmp.lt.u32.totalorder %s14274_s29, %s14710_s9 }
 0x120   : > { %p14277_p13 = pnand %p14275_p10, %p16913_p4 }
 0x122   : > { %p14278_p8 = pneg %p14277_p13 }
 0x124   : > { %p14283_p5 = pnand %p14281_p1, %p14278_p8 }
 0x126   : > { %14286 = shalt.err (!%p14283_p5)
}
 0x127   : > { %s14287_s30 = scalar_lea.vmem %s813_s10, 512  ;;  %p14295_p11 = scmp.lt.s32.totalorder %s813_s10, %s813_s10 }
 0x128   : > { %p14288_p7 = scmp.ne.s32.totalorder %s813_s10, %s14287_s30  ;;  %p14296_p9 = scmp.lt.s32.totalorder %s14287_s30, %s14287_s30 }
 0x12a   : > { %p14290_p6 = pnand %p14288_p7, %p16913_p4  ;;  %p14297_p0 = por %p14296_p9, %p14295_p11 }
 0x12c   : > { %p14291_p3 = pneg %p14290_p6 }
 0x12e   : > { %p14298_p12 = pnand %p14297_p0, %p14291_p3 }
 0x130   : > { %14301 = shalt.err (!%p14298_p12)
}
 0x131   : > { %p16914_p2 = scmp.ne.s32.totalorder %s16901_s28, 0  ;;  %s16915_s15 = smov 8  }
 0x132   : > { %s16916_s19 = smov 128   ;;  %s14302_s4 = scalar_lea.hbm %s14725_s21, 256 }
 0x133   : > { %13276 = dma.hbm_to_vmem [thread:$0]  (!%p16914_p2), %s14710_s9, 512, %s813_s10, [#allocation4], %s16916_s19, %s16916_s19, %s16915_s15  }
 0x134   : > { %p14303_p10 = scmp.ne.s32.totalorder %s14725_s21, %s14302_s4  ;;  %p14309_p1 = scmp.lt.u32.totalorder %s14302_s4, %s14725_s21 }
 0x136   : > { %p14305_p13 = pnand %p14303_p10, %p16913_p4 }
 0x138   : > { %p14306_p8 = pneg %p14305_p13 }
 0x13a   : > { %p14311_p5 = pnand %p14309_p1, %p14306_p8 }
 0x13c   : > { %14314 = shalt.err (!%p14311_p5)
}
 0x13d   : > { %s14315_s17 = scalar_lea.vmem %s842_s20, 256  ;;  %p14323_p3 = scmp.lt.s32.totalorder %s842_s20, %s842_s20 }
 0x13e   : > { %p14316_p12 = scmp.ne.s32.totalorder %s842_s20, %s14315_s17  ;;  %p14324_p11 = scmp.lt.s32.totalorder %s14315_s17, %s14315_s17 }
 0x140   : > { %p14318_p7 = pnand %p14316_p12, %p16913_p4  ;;  %p14325_p9 = por %p14324_p11, %p14323_p3 }
 0x142   : > { %p14319_p6 = pneg %p14318_p7 }
 0x144   : > { %p14326_p0 = pnand %p14325_p9, %p14319_p6 }
 0x146   : > { %14329 = shalt.err (!%p14326_p0)
}
 0x147   : > { %13282 = dma.hbm_to_vmem [thread:$0]  (!%p16914_p2), %s14725_s21, 256, %s842_s20, [#allocation6], %s16916_s19, %s16916_s19, %s16915_s15  }
 0x148   : > { %s14678_s6 = smov [#allocation10]   ;;  %s14679_s8 = smov [#allocation13]  }
 0x149   : > { %s871_s10 = sshll.u32 %s14678_s6, 4  ;;  %s895_s29 = sshll.u32 %s14679_s8, 4  ;;  %s872_s10 = int_to_ptr.vmem [resolvable:$true] %s871_s10  ;;  %s896_s29 = int_to_ptr.vmem [resolvable:$true] %s895_s29 }
 0x14a   : > { %s14330_s30 = scalar_lea.hbm %s14740_s3, 16 }
 0x14b   : > { %p14331_p10 = scmp.ne.s32.totalorder %s14740_s3, %s14330_s30  ;;  %p14337_p1 = scmp.lt.u32.totalorder %s14330_s30, %s14740_s3 }
 0x14d   : > { %p14333_p13 = pnand %p14331_p10, %p16913_p4 }
 0x14f   : > { %p14334_p8 = pneg %p14333_p13 }
 0x151   : > { %p14339_p5 = pnand %p14337_p1, %p14334_p8 }
 0x153   : > { %14342 = shalt.err (!%p14339_p5)
}
 0x154   : > { %s14343_s4 = scalar_lea.vmem %s872_s10, 16  ;;  %s14350_s20 = scalar_lea.vmem %s872_s10, 32 }
 0x155   : > { %p14344_p12 = scmp.ne.s32.totalorder %s872_s10, %s14343_s4  ;;  %p14351_p3 = scmp.lt.s32.totalorder %s872_s10, %s872_s10 }
 0x156   : > { %p14352_p11 = scmp.lt.s32.totalorder %s14350_s20, %s14343_s4 }
 0x157   : > { %p14346_p7 = pnand %p14344_p12, %p16913_p4 }
 0x158   : > { %p14353_p9 = por %p14352_p11, %p14351_p3 }
 0x159   : > { %p14347_p6 = pneg %p14346_p7 }
 0x15b   : > { %p14354_p0 = pnand %p14353_p9, %p14347_p6 }
 0x15d   : > { %14357 = shalt.err (!%p14354_p0)
}
 0x15e   : > { %13288 = dma.hbm_to_vmem [thread:$0]  (!%p16914_p2), %s14740_s3, 16, %s872_s10, [#allocation9]  }
 0x15f   : > { %s14358_s15 = scalar_lea.hbm %s14750_s14, 16 }
 0x160   : > { %p14359_p10 = scmp.ne.s32.totalorder %s14750_s14, %s14358_s15  ;;  %p14365_p1 = scmp.lt.u32.totalorder %s14358_s15, %s14750_s14 }
 0x162   : > { %p14361_p13 = pnand %p14359_p10, %p16913_p4 }
 0x164   : > { %p14362_p8 = pneg %p14361_p13 }
 0x166   : > { %p14367_p5 = pnand %p14365_p1, %p14362_p8 }
 0x168   : > { %14370 = shalt.err (!%p14367_p5)
}
 0x169   : > { %s14371_s19 = scalar_lea.vmem %s896_s29, 16  ;;  %s14378_s17 = scalar_lea.vmem %s896_s29, 32 }
 0x16a   : > { %p14372_p12 = scmp.ne.s32.totalorder %s896_s29, %s14371_s19  ;;  %p14379_p3 = scmp.lt.s32.totalorder %s896_s29, %s896_s29 }
 0x16b   : > { %p14380_p11 = scmp.lt.s32.totalorder %s14378_s17, %s14371_s19 }
 0x16c   : > { %p14374_p7 = pnand %p14372_p12, %p16913_p4 }
 0x16d   : > { %p14381_p9 = por %p14380_p11, %p14379_p3 }
 0x16e   : > { %p14375_p6 = pneg %p14374_p7 }
 0x170   : > { %p14382_p0 = pnand %p14381_p9, %p14375_p6 }
 0x172   : > { %14385 = shalt.err (!%p14382_p0)
}
 0x173   : > { %13294 = dma.hbm_to_vmem [thread:$0]  (!%p16914_p2), %s14750_s14, 16, %s896_s29, [#allocation12]  }
 0x174   : > { %s14680_s6 = smov [#allocation16]   ;;  %s14681_s8 = smov [#allocation19]  }
 0x175   : > { %s918_s10 = sshll.u32 %s14680_s6, 4  ;;  %s946_s30 = sshll.u32 %s14681_s8, 4  ;;  %s919_s10 = int_to_ptr.vmem [resolvable:$true] %s918_s10  ;;  %s947_s30 = int_to_ptr.vmem [resolvable:$true] %s946_s30 }
 0x176   : > { %s14386_s4 = scalar_lea.hbm %s14760_s24, 2048 }
 0x177   : > { %p14387_p10 = scmp.ne.s32.totalorder %s14760_s24, %s14386_s4  ;;  %p14393_p1 = scmp.lt.u32.totalorder %s14386_s4, %s14760_s24 }
 0x179   : > { %p14389_p13 = pnand %p14387_p10, %p16913_p4 }
 0x17b   : > { %p14390_p8 = pneg %p14389_p13 }
 0x17d   : > { %p14395_p5 = pnand %p14393_p1, %p14390_p8 }
 0x17f   : > { %14398 = shalt.err (!%p14395_p5)
}
 0x180   : > { %s14399_s20 = scalar_lea.vmem %s919_s10, 2048  ;;  %p14407_p3 = scmp.lt.s32.totalorder %s919_s10, %s919_s10 }
 0x181   : > { %p14400_p12 = scmp.ne.s32.totalorder %s919_s10, %s14399_s20  ;;  %p14408_p11 = scmp.lt.s32.totalorder %s14399_s20, %s14399_s20 }
 0x183   : > { %p14402_p7 = pnand %p14400_p12, %p16913_p4  ;;  %p14409_p9 = por %p14408_p11, %p14407_p3 }
 0x185   : > { %p14403_p6 = pneg %p14402_p7 }
 0x187   : > { %p14410_p0 = pnand %p14409_p9, %p14403_p6 }
 0x189   : > { %14413 = shalt.err (!%p14410_p0)
}
 0x18a   : > { %s16917_s29 = smov 256   ;;  %s14414_s15 = scalar_lea.hbm %s14775_s12, 32 }
 0x18b   : > { %13300 = dma.hbm_to_vmem [thread:$0]  (!%p16914_p2), %s14760_s24, 2048, %s919_s10, [#allocation15], %s16917_s29, %s16917_s29, %s16910_s0  }
 0x18c   : > { %p14415_p10 = scmp.ne.s32.totalorder %s14775_s12, %s14414_s15  ;;  %p14421_p1 = scmp.lt.u32.totalorder %s14414_s15, %s14775_s12 }
 0x18e   : > { %p14417_p13 = pnand %p14415_p10, %p16913_p4 }
 0x190   : > { %p14418_p8 = pneg %p14417_p13 }
 0x192   : > { %p14423_p5 = pnand %p14421_p1, %p14418_p8 }
 0x194   : > { %14426 = shalt.err (!%p14423_p5)
}
 0x195   : > { %s14427_s19 = scalar_lea.vmem %s947_s30, 32  ;;  %p14435_p3 = scmp.lt.s32.totalorder %s947_s30, %s947_s30 }
 0x196   : > { %p14428_p12 = scmp.ne.s32.totalorder %s947_s30, %s14427_s19  ;;  %p14436_p11 = scmp.lt.s32.totalorder %s14427_s19, %s14427_s19 }
 0x198   : > { %p14430_p7 = pnand %p14428_p12, %p16913_p4  ;;  %p14437_p9 = por %p14436_p11, %p14435_p3 }
 0x19a   : > { %p14431_p6 = pneg %p14430_p7 }
 0x19c   : > { %p14438_p0 = pnand %p14437_p9, %p14431_p6 }
 0x19e   : > { %14441 = shalt.err (!%p14438_p0)
}
 0x19f   : > { %s16918_s17 = sld [smem:[#allocation53_spill]]  ;;  %s998_s18 = scalar_lea.vmem [#allocation22], %s15007_s23 }
 0x1a0   : > { %13306 = dma.hbm_to_vmem [thread:$0]  (!%p16914_p2), %s14775_s12, 32, %s947_s30, [#allocation18]  }
 0x1a1   : > { %s1006_s10 = sshll.u32 %s998_s18, 4  ;;  %s11077_s8 = sshll.u32 %s15004_s26, 7  ;;  %s1007_s10 = int_to_ptr.vmem [resolvable:$true] %s1006_s10 }
 0x1a2   : > { %p16919_p10 = scmp.ne.s32.totalorder %s16909_s22, 0 }
 0x1a5   : > { %s15176_s6 = scalar_lea.hbm %s16918_s17, %s15014_s5  ;;  %s14447_s4 = scalar_lea.hbm %s16918_s17, 96 }
 0x1a6   : > { %s14442_s28 = scalar_lea.hbm %s15176_s6, 48  ;;  %p14448_p1 = scmp.lt.u32.totalorder %s15176_s6, %s16918_s17 }
 0x1a7   : > { %p14443_p4 = scmp.ne.s32.totalorder %s15176_s6, %s14442_s28  ;;  %p14449_p5 = scmp.lt.u32.totalorder %s14447_s4, %s14442_s28 }
 0x1a8   : > { %p14451_p2 = scmp.lt.u32.totalorder %s14442_s28, %s15176_s6 }
 0x1a9   : > { %p14445_p13 = pnand %p14443_p4, %p16919_p10  ;;  %p14450_p12 = por %p14449_p5, %p14448_p1 }
 0x1ab   : > { %p14446_p8 = pneg %p14445_p13  ;;  %p14452_p7 = por %p14451_p2, %p14450_p12 }
 0x1ad   : > { %p14453_p6 = pnand %p14452_p7, %p14446_p8 }
 0x1af   : > { %14456 = shalt.err (!%p14453_p6)
}
 0x1b0   : > { %s14457_s5 = scalar_lea.vmem %s1007_s10, 48  ;;  %s14682_s23 = smov [#allocation22]  }
 0x1b1   : > { %p14458_p3 = scmp.ne.s32.totalorder %s1007_s10, %s14457_s5  ;;  %s14462_s30 = sshll.u32 %s14682_s23, 4  ;;  %s14463_s30 = int_to_ptr.vmem [resolvable:$false] %s14462_s30 }
 0x1b2   : > { %s14464_s20 = scalar_lea.vmem %s14463_s30, 96  ;;  %p14465_p0 = scmp.lt.s32.totalorder %s1007_s10, %s14463_s30 }
 0x1b3   : > { %p14460_p11 = pnand %p14458_p3, %p16919_p10  ;;  %p14466_p4 = scmp.lt.s32.totalorder %s14464_s20, %s14457_s5 }
 0x1b5   : > { %p14461_p9 = pneg %p14460_p11  ;;  %p14467_p13 = por %p14466_p4, %p14465_p0 }
 0x1b7   : > { %p14468_p1 = pnand %p14467_p13, %p14461_p9 }
 0x1b9   : > { %14471 = shalt.err (!%p14468_p1)
}
 0x1ba   : > { %p16920_p5 = scmp.ne.s32.totalorder %s16908_s7, 0  ;;  %s16921_s15 = scalar_lea.sflag [#allocation21], %s15001_s1 }
 0x1bb   : > { %s16922_s19 = sld [smem:[#allocation56_spill]]  ;;  %s11380_s18 = sshll.u32 %s14632_s11, 11 }
 0x1bc   : > { %13313 = dma.hbm_to_vmem [thread:$0]  (!%p16920_p5), %s15176_s6, 48, %s1007_s10, %s16921_s15  }
 0x1bd   : > { %s1046_s4 = scalar_lea.vmem [#allocation25], %s11077_s8 }
 0x1be   : > { %s1053_s5 = sshll.u32 %s1046_s4, 4  ;;  %s15201_s5 = int_to_ptr.vmem [resolvable:$true] %s1053_s5 }
 0x1c1   : > { %s15197_s28 = scalar_lea.hbm %s16922_s19, %s11380_s18  ;;  %s14477_s30 = scalar_lea.hbm %s16922_s19, 4096 }
 0x1c2   : > { %s14472_s23 = scalar_lea.hbm %s15197_s28, 2048  ;;  %p14478_p7 = scmp.lt.u32.totalorder %s15197_s28, %s16922_s19 }
 0x1c3   : > { %p14473_p8 = scmp.ne.s32.totalorder %s15197_s28, %s14472_s23  ;;  %p14479_p6 = scmp.lt.u32.totalorder %s14477_s30, %s14472_s23 }
 0x1c4   : > { %p14481_p11 = scmp.lt.u32.totalorder %s14472_s23, %s15197_s28 }
 0x1c5   : > { %p14475_p12 = pnand %p14473_p8, %p16919_p10  ;;  %p14480_p3 = por %p14479_p6, %p14478_p7 }
 0x1c7   : > { %p14476_p2 = pneg %p14475_p12  ;;  %p14482_p9 = por %p14481_p11, %p14480_p3 }
 0x1c9   : > { %p14483_p0 = pnand %p14482_p9, %p14476_p2 }
 0x1cb   : > { %14486 = shalt.err (!%p14483_p0)
}
 0x1cc   : > { %s14487_s6 = scalar_lea.vmem %s15201_s5, 2048  ;;  %s14683_s10 = smov [#allocation25]  }
 0x1cd   : > { %p14488_p4 = scmp.ne.s32.totalorder %s15201_s5, %s14487_s6  ;;  %s14492_s8 = sshll.u32 %s14683_s10, 4  ;;  %s14493_s8 = int_to_ptr.vmem [resolvable:$false] %s14492_s8 }
 0x1ce   : > { %s14494_s20 = scalar_lea.vmem %s14493_s8, 4096  ;;  %p14495_p8 = scmp.lt.s32.totalorder %s15201_s5, %s14493_s8 }
 0x1cf   : > { %p14490_p13 = pnand %p14488_p4, %p16919_p10  ;;  %p14496_p12 = scmp.lt.s32.totalorder %s14494_s20, %s14487_s6 }
 0x1d1   : > { %p14491_p1 = pneg %p14490_p13  ;;  %p14497_p7 = por %p14496_p12, %p14495_p8 }
 0x1d3   : > { %p14498_p6 = pnand %p14497_p7, %p14491_p1 }
 0x1d5   : > { %14501 = shalt.err (!%p14498_p6)
}
 0x1d6   : > { %s16923_s15 = sld [smem:[#allocation58_spill]]  ;;  %s11083_s18 = sshll.u32 %s14632_s11, 4 }
 0x1d7   : > { %13319 = dma.hbm_to_vmem [thread:$0]  (!%p16920_p5), %s15197_s28, 2048, %s15201_s5, %s1022_s2, %s16917_s29, %s16917_s29, %s16910_s0  }
 0x1d8   : > { %s1093_s4 = scalar_lea.vmem [#allocation28], %s15004_s26 }
 0x1d9   : > { %s1100_s23 = sshll.u32 %s1093_s4, 4  ;;  %s1101_s23 = int_to_ptr.vmem [resolvable:$true] %s1100_s23 }
 0x1dc   : > { %s1098_s30 = scalar_lea.hbm %s16923_s15, %s11083_s18  ;;  %s14507_s10 = scalar_lea.hbm %s16923_s15, 32 }
 0x1dd   : > { %s14502_s6 = scalar_lea.hbm %s1098_s30, 16  ;;  %p14508_p9 = scmp.lt.u32.totalorder %s1098_s30, %s16923_s15 }
 0x1de   : > { %p14503_p2 = scmp.ne.s32.totalorder %s1098_s30, %s14502_s6  ;;  %p14509_p0 = scmp.lt.u32.totalorder %s14507_s10, %s14502_s6 }
 0x1df   : > { %p14511_p13 = scmp.lt.u32.totalorder %s14502_s6, %s1098_s30 }
 0x1e0   : > { %p14505_p3 = pnand %p14503_p2, %p16919_p10  ;;  %p14510_p4 = por %p14509_p0, %p14508_p9 }
 0x1e2   : > { %p14506_p11 = pneg %p14505_p3  ;;  %p14512_p1 = por %p14511_p13, %p14510_p4 }
 0x1e4   : > { %p14513_p8 = pnand %p14512_p1, %p14506_p11 }
 0x1e6   : > { %14516 = shalt.err (!%p14513_p8)
}
 0x1e7   : > { %s14517_s2 = scalar_lea.vmem %s1101_s23, 16  ;;  %s14684_s0 = smov [#allocation28]  }
 0x1e8   : > { %p14518_p12 = scmp.ne.s32.totalorder %s1101_s23, %s14517_s2  ;;  %s14522_s29 = sshll.u32 %s14684_s0, 4  ;;  %s14523_s29 = int_to_ptr.vmem [resolvable:$false] %s14522_s29 }
 0x1e9   : > { %s14524_s28 = scalar_lea.vmem %s14523_s29, 32  ;;  %p14525_p2 = scmp.lt.s32.totalorder %s1101_s23, %s14523_s29 }
 0x1ea   : > { %p14520_p7 = pnand %p14518_p12, %p16919_p10  ;;  %p14526_p3 = scmp.lt.s32.totalorder %s14524_s28, %s14517_s2 }
 0x1ec   : > { %p14521_p6 = pneg %p14520_p7  ;;  %p14527_p5 = por %p14526_p3, %p14525_p2 }
 0x1ee   : > { %p14528_p0 = pnand %p14527_p5, %p14521_p6 }
 0x1f0   : > { %14531 = shalt.err (!%p14528_p0)
}
 0x1f1   : > { %p16924_p9 = scmp.ne.s32.totalorder %s16908_s7, 0  ;;  %s15243_s5 = scalar_lea.hbm %s14835_s13, %s11083_s18 }
 0x1f2   : > { %s1118_s8 = scalar_lea.vmem [#allocation29], %s15004_s26  ;;  %s1116_s4 = scalar_lea.sflag [#allocation30], %s15004_s26 }
 0x1f3   : > { %13325 = dma.hbm_to_vmem [thread:$0]  (!%p16924_p9), %s1098_s30, 16, %s1101_s23, %s1064_s27  }
 0x1f4   : > { %s1125_s20 = sshll.u32 %s1118_s8, 4  ;;  %s14532_s1 = scalar_lea.hbm %s15243_s5, 16  ;;  %s1126_s20 = int_to_ptr.vmem [resolvable:$true] %s1125_s20 }
 0x1f5   : > { %p14533_p5 = scmp.ne.s32.totalorder %s15243_s5, %s14532_s1  ;;  %s14537_s6 = scalar_lea.hbm %s14835_s13, 32 }
 0x1f6   : > { %p14538_p13 = scmp.lt.u32.totalorder %s15243_s5, %s14835_s13  ;;  %p14539_p1 = scmp.lt.u32.totalorder %s14537_s6, %s14532_s1 }
 0x1f7   : > { %p14535_p11 = pnand %p14533_p5, %p16919_p10  ;;  %p14541_p12 = scmp.lt.u32.totalorder %s14532_s1, %s15243_s5 }
 0x1f8   : > { %p14540_p8 = por %p14539_p1, %p14538_p13 }
 0x1f9   : > { %p14536_p4 = pneg %p14535_p11 }
 0x1fa   : > { %p14542_p7 = por %p14541_p12, %p14540_p8 }
 0x1fc   : > { %p14543_p6 = pnand %p14542_p7, %p14536_p4 }
 0x1fe   : > { %14546 = shalt.err (!%p14543_p6)
}
 0x1ff   : > { %s14547_s11 = scalar_lea.vmem %s1126_s20, 16  ;;  %s14685_s26 = smov [#allocation29]  }
 0x200   : > { %p14548_p2 = scmp.ne.s32.totalorder %s1126_s20, %s14547_s11  ;;  %s14552_s27 = sshll.u32 %s14685_s26, 4  ;;  %s14553_s27 = int_to_ptr.vmem [resolvable:$false] %s14552_s27 }
 0x201   : > { %s14554_s18 = scalar_lea.vmem %s14553_s27, 32  ;;  %p14555_p5 = scmp.lt.s32.totalorder %s1126_s20, %s14553_s27 }
 0x202   : > { %p14550_p3 = pnand %p14548_p2, %p16919_p10  ;;  %p14556_p11 = scmp.lt.s32.totalorder %s14554_s18, %s14547_s11 }
 0x204   : > { %p14551_p0 = pneg %p14550_p3  ;;  %p14557_p9 = por %p14556_p11, %p14555_p5 }
 0x206   : > { %p14558_p1 = pnand %p14557_p9, %p14551_p0 }
 0x208   : > { %14561 = shalt.err (!%p14558_p1)
}
 0x209   : > { %p16925_p13 = scmp.ne.s32.totalorder %s16908_s7, 0  ;;  %p16926_p4 = scmp.ne.s32.totalorder %s16900_s16, 0 }
 0x20a   : > { %s16927_s23 = sld [smem:[#allocation65_spill]] (!%p16926_p4) }
 0x20b   : > { %13328 = dma.hbm_to_vmem [thread:$0]  (!%p16925_p13), %s15243_s5, 16, %s1126_s20, %s1116_s4  }
 0x20c   : > { %1148 = sbr.rel (%p16926_p4) target bundleno = 16725 (0x4155), region = 136 }
 0x210   : > { %p16928_p8 = scmp.eq.s32.totalorder (!%p16926_p4), %s16927_s23, 0 }
 0x213   : > { %14579 = dma.done.wait (%p16928_p8), [#allocation4], 512   ;;  %p16929_p10 = pmov %p16928_p8 }
 0x214   : > { %p16930_p12 = pmov %p16928_p8 }
 0x215   : > { %14581 = vsyncadd (%p16929_p10), [#allocation4], 4294966784 }
 0x216   : > { %14583 = dma.done.wait (%p16930_p12), [#allocation6], 512   ;;  %p16931_p7 = pmov %p16928_p8 }
 0x218   : > { %14585 = vsyncadd (%p16931_p7), [#allocation6], 4294966784  ;;  %p16932_p9 = pmov %p16931_p7 }
 0x219   : > { %p16933_p6 = pmov %p16931_p7 }
 0x21a   : > { %14587 = dma.done.wait (%p16932_p9), [#allocation9], 528  }
 0x21b   : > { %14589 = vsyncadd (%p16933_p6), [#allocation9], 4294966768  ;;  %p16934_p2 = pmov %p16933_p6 }
 0x21d   : > { %14591 = dma.done.wait (%p16934_p2), [#allocation12], 528   ;;  %p16935_p3 = pmov %p16934_p2 }
 0x21e   : > { %p16936_p0 = pmov %p16934_p2 }
 0x21f   : > { %14593 = vsyncadd (%p16935_p3), [#allocation12], 4294966768 }
 0x220   : > { %14595 = dma.done.wait (%p16936_p0), [#allocation15], 2560   ;;  %p16937_p5 = pmov %p16936_p0 }
 0x221   : > { %p16938_p11 = pmov %p16936_p0 }
 0x222   : > { %14597 = vsyncadd (%p16937_p5), [#allocation15], 4294964736 }
 0x223   : > { %14599 = dma.done.wait (%p16938_p11), [#allocation18], 64   ;;  %p16939_p1 = pmov %p16936_p0 }
 0x224   : > { %s16940_s16 = sld [smem:[#allocation63_spill]]  ;;  %s16941_s22 = sld [smem:[#allocation68_spill]] }
 0x225   : > { %14601 = vsyncadd (%p16939_p1), [#allocation18], 4294967232  ;;  %s1194_s7 = sand.u32 1, %s16927_s23  }
 0x226   : > { %s1195_s2 = scalar_lea.sflag [#allocation21], %s1194_s7 }
 0x22a   : > { %s15288_s30 = sand.u32 1, %s16940_s16   ;;  %p16942_p13 = scmp.ne.s32.totalorder %s16941_s22, 0 }
 0x22b   : > { %s15291_s10 = smul.u32 3, %s15288_s30 }
 0x22d   : > { %s15294_s0 = scalar_lea.vmem [#allocation20], %s15291_s10 }
 0x22e   : > { %14603 = dma.done.wait (%p16942_p13), %s1195_s2, 96  }
 0x22f   : > { %14605 = vsyncadd (%p16942_p13), %s1195_s2, 4294967200  ;;  %s1207_s29 = scalar_lea.vmem [#allocation22], %s15291_s10  ;;  %s1213_s28 = scalar_lea.sflag [#allocation24], %s1194_s7 }
 0x230   : > { %s15302_s5 = scalar_lea.vmem [#allocation23], %s15291_s10 }
 0x231   : > { %14607 = dma.done.wait (%p16942_p13), %s1213_s28, 2096  }
 0x232   : > { %14609 = vsyncadd (%p16942_p13), %s1213_s28, 4294965200  ;;  %s11097_s8 = sshll.u32 %s15288_s30, 7  ;;  %s11098_s20 = sshll.u32 %s15288_s30, 1 }
 0x233   : > { %s15310_s4 = scalar_lea.vmem [#allocation25], %s11097_s8  ;;  %s1231_s1 = scalar_lea.sflag [#allocation27], %s1194_s7 }
 0x234   : > { %s15312_s6 = scalar_lea.vmem [#allocation26], %s11098_s20 }
 0x235   : > { %14611 = dma.done.wait (%p16942_p13), %s1231_s1, 48  }
 0x236   : > { %14613 = vsyncadd (%p16942_p13), %s1231_s1, 4294967248  ;;  %s1242_s11 = scalar_lea.vmem [#allocation28], %s15288_s30  ;;  %s1248_s26 = scalar_lea.sflag [#allocation30], %s15288_s30 }
 0x237   : > { %14615 = dma.done.wait (%p16942_p13), %s1248_s26, 16  }
 0x238   : > { %14617 = vsyncadd (%p16942_p13), %s1248_s26, 4294967280  ;;  %s16943_s18 = sld [smem:[#allocation41_spill]]  ;;  %vm1433_vm0 = vcmask 261120   ;;  %v1425_v5 = vld [vmem:[#allocation3] sm:$0xff]  ;;  %v1531_v7 = vld [vmem:[#allocation7] sm:$0xff]  ;;  %vm1540_vm1 = vcmask 130048  }
 0x239   : > { %11740 = vmatprep.mubr.msk.f32.mxu0 %vm1433_vm0, %v1425_v5  ;;  %v1532_v8 = vld [vmem:[#allocation7 + $0x8] sm:$0xff]  ;;  %v15330_v10 = vld [vmem:[#allocation3 + $0x8] sm:$0xff]  ;;  %v15332_v11 = vld [vmem:[#allocation3 + $0x10] sm:$0xff]  ;;  %s16944_s16 = sld [smem:[#allocation44_spill]]  ;;  %s16945_s22 = sld [smem:[#allocation49_spill]]  ;;  %vm2355_vm2 = vcmask 1041409  }
 0x23a   : > { %v12373_v9 = vpack.c.bf16 %v1532_v8, %v1531_v7  ;;  %v15338_v12 = vld [vmem:[#allocation3 + $0x18] sm:$0xff]  ;;  %v1727_v17 = vld [vmem:[#allocation8] sm:$0xff]  ;;  %v1728_v18 = vld [vmem:[#allocation8 + $0x8] sm:$0xff]  ;;  %s14687_s7 = smov 64   ;;  %vm2221_vm3 = vcmask 523264   ;;  %vm2632_vm4 = vcmask 1042434  }
 0x23b   : > { %v1729_v19 = vld [vmem:[#allocation8 + $0x10] sm:$0xff]  ;;  %v12385_v20 = vpack.c.bf16 %v1728_v18, %v1727_v17  ;;  %v1730_v21 = vld [vmem:[#allocation8 + $0x18] sm:$0xff]  ;;  %v1924_v42 = vld [vmem:[#allocation11] sm:$0xff]  ;;  %vm2919_vm5 = vcmask 1043459   ;;  %vm3207_vm6 = vcmask 1044484   ;;  %vm3495_vm7 = vcmask 1045509  }
 0x23c   : > { %12374 = vmatprep.subr.bf16.mxu1 %v12373_v9  ;;  %v12389_v22 = vpack.c.bf16 %v1730_v21, %v1729_v19  ;;  %v1925_v43 = vld [vmem:[#allocation11 + $0x8] sm:$0xff]  ;;  %v1926_v44 = vld [vmem:[#allocation11 + $0x10] sm:$0xff]  ;;  %v1927_v46 = vld [vmem:[#allocation11 + $0x18] sm:$0xff]  ;;  %vm3783_vm8 = vcmask 1046534   ;;  %vm4071_vm9 = vcmask 1047559   ;;  %s16946_s2 = sld [smem:[#allocation52_spill]] }
 0x23d   : > { %12376 = vmatpush3.bf16.msra.mxu1 %v12373_v9  ;;  %v12401_v45 = vpack.c.bf16 %v1925_v43, %v1924_v42  ;;  %v12405_v47 = vpack.c.bf16 %v1927_v46, %v1926_v44  ;;  %v11123_v48 = vld [vmem:[#allocation10] ss:$0 sm:$0xff]  ;;  %v2162_v63 = vld [vmem:[#allocation16 + $0x8] sm:$0xff]  ;;  %v14686_v9 = vmov 0.0   ;;  %v2165_v19 = vld [vmem:[#allocation16 + $0x20] sm:$0xff]  ;;  %p1386_p4 = scmp.lt.s32.totalorder %s16927_s23, 1 }
 0x23e   : > { %v1429_v0 = vld [vmem:[%s16943_s18] sm:$0xff]  ;;  %v1430_v1 = vld [vmem:[%s16943_s18 + $0x8] sm:$0xff]  ;;  %v1431_v2 = vld [vmem:[%s16943_s18 + $0x10] sm:$0xff]  ;;  %s16947_s1 = sld [smem:[#allocation42_spill]]  ;;  %s14689_s26 = smov 32   ;;  %vm4371_vm10 = vcmask 1040384  }
 0x23f   : > { %v12365_v3 = vpack.c.bf16 %v1430_v1, %v1429_v0  ;;  %v1432_v4 = vld [vmem:[%s16943_s18 + $0x18] sm:$0xff]  ;;  %v11114_v23 = vld [vmem:[%s16944_s16] ss:$0 sm:$0xff]  ;;  %v2164_v0 = vld [vmem:[#allocation16 + $0x18] sm:$0xff]  ;;  %s15924_s28 = scalar_select %p1386_p4, %s16927_s23, 1  ;;  %vm2491_vm11 = vcmask 516096  }
 0x240   : > { %v12369_v6 = vpack.c.bf16 %v1432_v4, %v1431_v2  ;;  %v15365_v1 = vpack.c.bf16 %v2164_v0, %v2162_v63  ;;  %v2063_v2 = vld [vmem:[#allocation14 + $0x8] sm:$0xff]  ;;  %v2060_v8 = vld [vmem:[#allocation5] sm:$0xff]  ;;  %s16948_s16 = sld [smem:[#allocation50_spill]]  ;;  %vm16126_vm12 = vmpackc.low %vm1540_vm1, %vm1540_vm1  ;;  %vm14691_vm13 = vmmov 0   ;;  %s14692_s10 = smov 112   ;;  %vm10650_vm14 = vcmask 7168  }
 0x241   : > { %12366 = vmatprep.subr.bf16.mxu0 %v12365_v3  ;;  %v2170_v21 = vld [vmem:[#allocation16 + $0x48] sm:$0xff]  ;;  %s15927_s8 = smul.u32 192, %s15924_s28 }
 0x242   : > { %12368 = vmatpush3.bf16.msra.mxu0 %v12365_v3  ;;  %v2065_v3 = vld [vmem:[#allocation14 + $0x18] sm:$0xff] }
 0x243   : > { %12370 = vmatprep.subr.bf16.mxu0 %v12369_v6  ;;  %v12409_v4 = vpack.c.bf16 %v2065_v3, %v2063_v2  ;;  %s15931_s20 = scalar_lea.vmem %s16946_s2, %s15927_s8 }
 0x246   : > { %12372 = vmatpush3.bf16.msra.mxu0 %v12369_v6  ;;  %v2064_v6 = vld [vmem:[#allocation14 + $0x10] sm:$0xff]  ;;  %s16036_s2 = scalar_lea.vmem %s16948_s16, %s15927_s8  ;;  %s16951_s16 = sld [smem:[#allocation54_spill]] }
 0x247   : > { %12386 = vmatprep.subr.bf16.mxu0 %v12385_v20 }
 0x249   : > { %11741 = vmatmul.mubr.msk.f32.vlgmr.msra.gmra.mrb[0].mxu0 %vm1433_vm0, %v15330_v10 }
 0x24a   : > { %11743 = vmatprep.mubr.msk.f32.mxu0 %vm1433_vm0, %v15332_v11  ;;  %12388 = vmatpush3.bf16.msra.mxu0 %v12385_v20  ;;  %v2167_v20 = vld [vmem:[#allocation16 + $0x30] sm:$0xff] }
 0x24b   : > { %12390 = vmatprep.subr.bf16.mxu0 %v12389_v22 }
 0x24c   : > { %s16263_s27 = scalar_lea.vmem %s16951_s16, %s15927_s8  ;;  %s14695_s8 = smov 80  }
 0x24d   : > { %11744 = vmatmul.mubr.msk.f32.gmra.mrb[2].mxu0 %vm1433_vm0, %v15338_v12  ;;  %s14696_s16 = smov 16  }
 0x24e   : > { %12392 = vmatpush3.bf16.msra.mxu0 %v12389_v22  ;;  %v2172_v22 = vld [vmem:[#allocation16 + $0x58] sm:$0xff] }
 0x24f   : > { %12402 = vmatprep.subr.bf16.mxu0 %v12401_v45 }
 0x31c   : > { %v11742_v13 = vpop.f32.mrb[0].mxu0 }
 0x31d   : > { %v1512_v14 = vpop.f32.mrb[1].mxu0 }
 0x31e   : > { %11750 = vmatprep.mubr.msk.f32.mxu1 %vm1540_vm1, %v1512_v14  ;;  %v2168_v14 = vld [vmem:[#allocation16 + $0x38] sm:$0xff] }
 0x31f   : > { %11751 = vmatmul.mubr.msk.f32.vlgmr.msra.gmra.mrb[0].mxu1 %vm1540_vm1, %v11742_v13  ;;  %v2166_v13 = vld [vmem:[#allocation16 + $0x28] sm:$0xff] }
 0x320   : > { %v11745_v15 = vpop.f32.mrb[2].mxu0  ;;  %v15375_v18 = vpack.c.bf16 %v2168_v14, %v2166_v13 }
 0x321   : > { %v1522_v16 = vpop.f32.mrb[3].mxu0 }
 0x322   : > { %11753 = vmatprep.mubr.msk.f32.mxu1 %vm1540_vm1, %v1522_v16 }
 0x323   : > { %11754 = vmatmul.mubr.msk.f32.gmra.mrb[2].mxu1 %vm1540_vm1, %v11745_v15 }
 0x324   : > { %11764 = vmatprep.mubr.msk.f32.mxu1 %vm1433_vm0, %v1425_v5 }
 0x3f2   : > { %v11752_v24 = vpop.f32.mrb[0].mxu1 }
 0x3f3   : > { %v1625_v25 = vadd.f32 %v11752_v24, %v11114_v23  ;;  %v1619_v26 = vpop.f32.mrb[1].mxu1 }
 0x3f4   : > { %v1620_v27 = vadd.f32 %v11114_v23, %v1619_v26  ;;  %v15383_v26 = vpack.c.bf16 %v2172_v22, %v2170_v21  ;;  %v2177_v21 = vld [vmem:[%s16945_s22] sm:$0xff] }
 0x3f5   : > { %v1639_v28 = vmax.f32 %v1625_v25, 0.0 }
 0x3f6   : > { %v1638_v29 = vmax.f32 %v1620_v27, 0.0  ;;  %v11755_v30 = vpop.f32.mrb[2].mxu1  ;;  %v2169_v27 = vld [vmem:[#allocation16 + $0x40] sm:$0xff] }
 0x3f7   : > { %v1635_v31 = vadd.f32 %v11755_v30, %v11114_v23  ;;  %v1629_v32 = vpop.f32.mrb[3].mxu1  ;;  %v2176_v30 = vld [vmem:[#allocation16 + $0x78] sm:$0xff] }
 0x3f8   : > { %v12377_v33 = vpack.c.bf16 %v1639_v28, %v1638_v29  ;;  %v1630_v34 = vadd.f32 %v11114_v23, %v1629_v32  ;;  %v15380_v23 = vpack.c.bf16 %v2167_v20, %v2165_v19  ;;  %v2171_v28 = vld [vmem:[#allocation16 + $0x50] sm:$0xff]  ;;  %v2174_v29 = vld [vmem:[#allocation16 + $0x68] sm:$0xff] }
 0x3f9   : > { %v1641_v35 = vmax.f32 %v1635_v31, 0.0  ;;  %v15388_v31 = vpack.c.bf16 %v2171_v28, %v2169_v27  ;;  %v15392_v32 = vpack.c.bf16 %v2176_v30, %v2174_v29  ;;  %v2178_v19 = vld [vmem:[%s16945_s22 + $0x8] sm:$0xff]  ;;  %v2180_v20 = vld [vmem:[%s16945_s22 + $0x18] sm:$0xff]  ;;  %v2181_v30 = vld [vmem:[%s16945_s22 + $0x20] sm:$0xff] }
 0x3fa   : > { %v1640_v36 = vmax.f32 %v1630_v34, 0.0  ;;  %12378 = vmatprep.subr.bf16.mxu1 %v12377_v33  ;;  %v2175_v34 = vld [vmem:[#allocation16 + $0x70] sm:$0xff]  ;;  %v15456_v22 = vpack.c.bf16 %v2180_v20, %v2178_v19  ;;  %v2184_v27 = vld [vmem:[%s16945_s22 + $0x38] sm:$0xff]  ;;  %v2203_v19 = vld [vmem:[%s16945_s22 + $0xd0] sm:$0xff] }
 0x3fb   : > { %12380 = vmatpush3.bf16.msra.mxu1 %v12377_v33  ;;  %v2173_v33 = vld [vmem:[#allocation16 + $0x60] sm:$0xff]  ;;  %v2206_v20 = vld [vmem:[%s16945_s22 + $0xe8] sm:$0xff] }
 0x3fc   : > { %v12381_v37 = vpack.c.bf16 %v1641_v35, %v1640_v36  ;;  %v15395_v35 = vpack.c.bf16 %v2175_v34, %v2173_v33  ;;  %v2183_v33 = vld [vmem:[%s16945_s22 + $0x30] sm:$0xff]  ;;  %v2186_v34 = vld [vmem:[%s16945_s22 + $0x48] sm:$0xff] }
 0x3fe   : > { %12382 = vmatprep.subr.bf16.mxu1 %v12381_v37 }
 0x3ff   : > { %12384 = vmatpush3.bf16.msra.mxu1 %v12381_v37 }
 0x402   : > { %11765 = vmatmul.mubr.msk.f32.vlgmr.msra.gmra.mrb[4].mxu1 %vm1433_vm0, %v15330_v10 }
 0x403   : > { %11767 = vmatprep.mubr.msk.f32.mxu1 %vm1433_vm0, %v15332_v11 }
 0x406   : > { %11768 = vmatmul.mubr.msk.f32.gmra.mrb[6].mxu1 %vm1433_vm0, %v15338_v12 }
 0x407   : > { %11792 = vmatprep.mubr.msk.f32.mxu1 %vm1433_vm0, %v1425_v5  ;;  %v2062_v5 = vld [vmem:[#allocation14] sm:$0xff] }
 0x408   : > { %v12411_v7 = vpack.c.bf16 %v2064_v6, %v2062_v5 }
 0x4d5   : > { %v11766_v38 = vpop.f32.mrb[4].mxu1 }
 0x4d6   : > { %v1708_v39 = vpop.f32.mrb[5].mxu1 }
 0x4d7   : > { %11778 = vmatprep.mubr.msk.f32.mxu0 %vm1433_vm0, %v1708_v39 }
 0x4d8   : > { %11779 = vmatmul.mubr.msk.f32.vlgmr.msra.gmra.mrb[4].mxu0 %vm1433_vm0, %v11766_v38 }
 0x4d9   : > { %v11769_v40 = vpop.f32.mrb[6].mxu1  ;;  %12404 = vmatpush3.bf16.msra.mxu0 %v12401_v45 }
 0x4da   : > { %v1718_v41 = vpop.f32.mrb[7].mxu1  ;;  %12406 = vmatprep.subr.bf16.mxu0 %v12405_v47 }
 0x4db   : > { %11781 = vmatprep.mubr.msk.f32.mxu0 %vm1433_vm0, %v1718_v41  ;;  %v2068_v41 = vlaneseq }
 0x4dc   : > { %11782 = vmatmul.mubr.msk.f32.gmra.mrb[6].mxu0 %vm1433_vm0, %v11769_v40  ;;  %v11132_v40 = vld [vmem:[#allocation13] ss:$0 sm:$0xff] }
 0x4dd   : > { %12408 = vmatpush3.bf16.msra.mxu0 %v12405_v47  ;;  %v15413_v45 = vshrl.u32 %v2068_v41, 7  ;;  %v2190_v41 = vld [vmem:[%s16945_s22 + $0x68] sm:$0xff] }
 0x4de   : > { %12414 = vmatprep.subr.bf16.mxu0 %v15365_v1 }
 0x5ab   : > { %v11780_v49 = vpop.f32.mrb[4].mxu0 }
 0x5ac   : > { %v1822_v50 = vadd.f32 %v11780_v49, %v11123_v48  ;;  %v1816_v51 = vpop.f32.mrb[5].mxu0 }
 0x5ad   : > { %v1817_v52 = vadd.f32 %v11123_v48, %v1816_v51  ;;  %v2066_v51 = vld [vmem:[#allocation17] sm:$0x3] }
 0x5ae   : > { %v1836_v53 = vmax.f32 %v1822_v50, 0.0  ;;  %v15420_v50 = vsub.s32 0, %v15413_v45 }
 0x5af   : > { %v1835_v54 = vmax.f32 %v1817_v52, 0.0  ;;  %v11783_v55 = vpop.f32.mrb[6].mxu0 }
 0x5b0   : > { %v1832_v56 = vadd.f32 %v11783_v55, %v11123_v48  ;;  %v1826_v57 = vpop.f32.mrb[7].mxu0  ;;  %v2071_v52 = vrot.slane %v2066_v51, %v15420_v50 }
 0x5b1   : > { %v12393_v58 = vpack.c.bf16 %v1836_v53, %v1835_v54  ;;  %v1827_v59 = vadd.f32 %v11123_v48, %v1826_v57 }
 0x5b2   : > { %v1838_v60 = vmax.f32 %v1832_v56, 0.0 }
 0x5b3   : > { %v1837_v61 = vmax.f32 %v1827_v59, 0.0  ;;  %12394 = vmatprep.subr.bf16.mxu1 %v12393_v58  ;;  %v15429_v59 = vsub.s32 1, %v15413_v45 }
 0x5b4   : > { %12396 = vmatpush3.bf16.msra.mxu1 %v12393_v58 }
 0x5b5   : > { %v12397_v62 = vpack.c.bf16 %v1838_v60, %v1837_v61  ;;  %v2075_v63 = vrot.slane %v2066_v51, %v15429_v59  ;;  %v2189_v51 = vld [vmem:[%s16945_s22 + $0x60] sm:$0xff] }
 0x5b7   : > { %12398 = vmatprep.subr.bf16.mxu1 %v12397_v62 }
 0x5b8   : > { %12400 = vmatpush3.bf16.msra.mxu1 %v12397_v62 }
 0x5b9   : > { %12410 = vmatprep.subr.bf16.mxu1 %v12409_v4 }
 0x5bb   : > { %11793 = vmatmul.mubr.msk.f32.vlgmr.msra.gmra.mrb[8].mxu1 %vm1433_vm0, %v15330_v10  ;;  %v2061_v10 = vld [vmem:[#allocation5 + $0x8] sm:$0xff] }
 0x5bc   : > { %11795 = vmatprep.mubr.msk.f32.mxu1 %vm1433_vm0, %v15332_v11  ;;  %12412 = vmatpush1.bf16.msra.mxu1 %v12411_v7  ;;  %v2161_v11 = vld [vmem:[#allocation16] sm:$0xff] }
 0x5bd   : > { %12430 = vmatprep.subr.bf16.mxu1 %v15456_v22 }
 0x5bf   : > { %11796 = vmatmul.mubr.msk.f32.gmra.mrb[10].mxu1 %vm1433_vm0, %v15338_v12  ;;  %v2163_v12 = vld [vmem:[#allocation16 + $0x10] sm:$0xff] }
 0x5c0   : > { %2148 = vmatprep.mubr.f32.mxu1 %v14686_v9  ;;  %v15373_v16 = vpack.c.bf16 %v2163_v12, %v2161_v11 }
 0x5c3   : > { %11137 = vmatmul.mubr.msk.f32.vlgmr.msra.gmra.mrb[12].mxu1 %vm1540_vm1, %v2060_v8 }
 0x5c4   : > { %2154 = vmatprep.mubr.f32.mxu1 %v14686_v9 }
 0x5c7   : > { %11138 = vmatmul.mubr.msk.f32.gmra.mrb[14].mxu1 %vm1540_vm1, %v2061_v10 }
 0x5c8   : > { %2425 = vmatprep.mubr.f32.mxu1 %v14686_v9 }
 0x68e   : > { %v11794_v15 = vpop.f32.mrb[8].mxu1 }
 0x68f   : > { %v1905_v17 = vpop.f32.mrb[9].mxu1 }
 0x690   : > { %11806 = vmatprep.mubr.msk.f32.mxu0 %vm1433_vm0, %v1905_v17 }
 0x691   : > { %11807 = vmatmul.mubr.msk.f32.vlgmr.msra.gmra.mrb[8].mxu0 %vm1433_vm0, %v11794_v15 }
 0x692   : > { %12416 = vmatpush1.bf16.msra.mxu0 %v15373_v16  ;;  %v11797_v24 = vpop.f32.mrb[10].mxu1 }
 0x693   : > { %12418 = vmatprep.subr.bf16.mxu0 %v15375_v18  ;;  %v1915_v25 = vpop.f32.mrb[11].mxu1 }
 0x694   : > { %11809 = vmatprep.mubr.msk.f32.mxu0 %vm1433_vm0, %v1915_v25  ;;  %v2182_v25 = vld [vmem:[%s16945_s22 + $0x28] sm:$0xff] }
 0x695   : > { %11810 = vmatmul.mubr.msk.f32.gmra.mrb[10].mxu0 %vm1433_vm0, %v11797_v24  ;;  %v2179_v24 = vld [vmem:[%s16945_s22 + $0x10] sm:$0xff]  ;;  %v15463_v29 = vpack.c.bf16 %v2184_v27, %v2182_v25  ;;  %v2205_v27 = vld [vmem:[%s16945_s22 + $0xe0] sm:$0xff] }
 0x696   : > { %12420 = vmatpush1.bf16.msra.mxu0 %v15380_v23  ;;  %2289 = vmatprep.mubr.f32.mxu0 %v14686_v9  ;;  %v2150_v36 = vpop.f32.mrb[12].mxu1  ;;  %v15461_v28 = vpack.c.bf16 %v2179_v24, %v2177_v21  ;;  %v2208_v21 = vld [vmem:[%s16945_s22 + $0xf8] sm:$0xff] }
 0x697   : > { %12422 = vmatprep.subr.bf16.mxu0 %v15383_v26  ;;  %v2152_v37 = vpop.f32.mrb[13].mxu1  ;;  %v15423_v53 = vadd.f32 %v2150_v36, %v2071_v52  ;;  %v2188_v36 = vld [vmem:[%s16945_s22 + $0x58] sm:$0xff]  ;;  %v15525_v25 = vpack.c.bf16 %v2208_v21, %v2206_v20 }
 0x698   : > { %v15433_v0 = vadd.f32 %v2152_v37, %v2075_v63  ;;  %12432 = vmatpush1.bf16.msra.mxu1 %v15461_v28  ;;  %v15472_v37 = vpack.c.bf16 %v2183_v33, %v2181_v30  ;;  %v2207_v30 = vld [vmem:[%s16945_s22 + $0xf0] sm:$0xff] }
 0x699   : > { %12434 = vmatprep.subr.bf16.mxu1 %v15463_v29  ;;  %v15530_v33 = vpack.c.bf16 %v2207_v30, %v2205_v27 }
 0x69a   : > { %12424 = vmatpush1.bf16.msra.mxu0 %v15388_v31  ;;  %v2156_v38 = vpop.f32.mrb[14].mxu1 }
 0x69b   : > { %12426 = vmatprep.subr.bf16.mxu0 %v15392_v32  ;;  %v2158_v39 = vpop.f32.mrb[15].mxu1  ;;  %v15425_v54 = vadd.f32 %v2156_v38, %v2071_v52  ;;  %v15475_v38 = vpack.c.bf16 %v2188_v36, %v2186_v34  ;;  %v2191_v52 = vld [vmem:[%s16945_s22 + $0x70] sm:$0xff] }
 0x69c   : > { %v15435_v2 = vadd.f32 %v2158_v39, %v2075_v63  ;;  %v2185_v39 = vld [vmem:[%s16945_s22 + $0x40] sm:$0xff]  ;;  %12436 = vmatpush1.bf16.msra.mxu1 %v15472_v37  ;;  %v2200_v63 = vld [vmem:[%s16945_s22 + $0xb8] sm:$0xff] }
 0x69d   : > { %12438 = vmatprep.subr.bf16.mxu1 %v15475_v38 }
 0x69e   : > { %12428 = vmatpush1.bf16.msra.mxu0 %v15395_v35 }
 0x69f   : > { %12462 = vmatprep.subr.bf16.mxu0 %v15365_v1 }
 0x6a1   : > { %2290 = vmatmul.mubr.f32.vlgmr.msra.gmra.mrb[12].mxu0 %v14686_v9 }
 0x6a2   : > { %12464 = vmatpush1.bf16.msra.mxu0 %v15373_v16  ;;  %2560 = vmatprep.mubr.f32.mxu0 %v14686_v9 }
 0x6a3   : > { %12466 = vmatprep.subr.bf16.mxu0 %v15375_v18 }
 0x6a6   : > { %12468 = vmatpush1.bf16.msra.mxu0 %v15380_v23 }
 0x6a7   : > { %12470 = vmatprep.subr.bf16.mxu0 %v15383_v26 }
 0x6aa   : > { %12472 = vmatpush1.bf16.msra.mxu0 %v15388_v31 }
 0x6ab   : > { %12474 = vmatprep.subr.bf16.mxu0 %v15392_v32 }
 0x6ae   : > { %12476 = vmatpush1.bf16.msra.mxu0 %v15395_v35 }
 0x6af   : > { %12478 = vmatprep.subr.bf16.mxu0 %v15456_v22 }
 0x764   : > { %v11808_v42 = vpop.f32.mrb[8].mxu0 }
 0x765   : > { %v15409_v43 = vadd.f32 %v11808_v42, %v11132_v40  ;;  %v15411_v44 = vpop.f32.mrb[9].mxu0  ;;  %v2192_v42 = vld [vmem:[%s16945_s22 + $0x78] sm:$0xff] }
 0x768   : > { %v11811_v46 = vpop.f32.mrb[10].mxu0 }
 0x769   : > { %v15415_v47 = vadd.f32 %v11811_v46, %v11132_v40  ;;  %v2023_v48 = vpop.f32.mrb[11].mxu0 }
 0x76a   : > { %v15417_v49 = vadd.f32 %v11132_v40, %v2023_v48  ;;  %v2187_v40 = vld [vmem:[%s16945_s22 + $0x50] sm:$0xff]  ;;  %v15485_v48 = vpack.c.bf16 %v2192_v42, %v2190_v41 }
 0x76b   : > { %v15482_v46 = vpack.c.bf16 %v2187_v40, %v2185_v39 }
 0x76d   : > { %12440 = vmatpush1.bf16.msra.mxu1 %v15482_v46 }
 0x76e   : > { %12442 = vmatprep.subr.bf16.mxu1 %v15485_v48 }
 0x774   : > { %v2291_v55 = vpop.f32.mrb[12].mxu0 }
 0x775   : > { %v2298_v56 = vrot.slane %v2291_v55, 1  ;;  %v2304_v57 = vadd.f32 %v2291_v55, %v15423_v53  ;;  %v2293_v58 = vpop.f32.mrb[13].mxu0  ;;  %v2194_v55 = vld [vmem:[%s16945_s22 + $0x88] sm:$0xff] }
 0x776   : > { %v2299_v3 = vrot.slane %v2293_v58, 1  ;;  %v15438_v4 = vadd.f32 %v2293_v58, %v15433_v0 }
 0x777   : > { %v2306_v60 = vadd.f32 %v2298_v56, %v15425_v54  ;;  %v11139_v61 = vmul.f32 -1.442695, %v2304_v57  ;;  %v2196_v56 = vld [vmem:[%s16945_s22 + $0x98] sm:$0xff]  ;;  %v15492_v57 = vpack.c.bf16 %v2191_v52, %v2189_v51 }
 0x778   : > { %v15441_v6 = vadd.f32 %v2299_v3, %v15435_v2  ;;  %v15495_v58 = vpack.c.bf16 %v2196_v56, %v2194_v55  ;;  %v11141_v36 = vmul.f32 -1.442695, %v15438_v4 }
 0x779   : > { %13655 = vpow2.f32 %v11139_v61  ;;  %v11140_v62 = vmul.f32 -1.442695, %v2306_v60  ;;  %v2193_v60 = vld [vmem:[%s16945_s22 + $0x80] sm:$0xff]  ;;  %v2195_v61 = vld [vmem:[%s16945_s22 + $0x90] sm:$0xff]  ;;  %12444 = vmatpush1.bf16.msra.mxu1 %v15492_v57 }
 0x77a   : > { %v15502_v3 = vpack.c.bf16 %v2195_v61, %v2193_v60  ;;  %12446 = vmatprep.subr.bf16.mxu1 %v15495_v58  ;;  %v11142_v34 = vmul.f32 -1.442695, %v15441_v6 }
 0x77b   : > { %13657 = vpow2.f32 %v11140_v62  ;;  %v2198_v62 = vld [vmem:[%s16945_s22 + $0xa8] sm:$0xff] }
 0x77c   : > { %13659 = vtanh.f32 %v15438_v4 }
 0x77d   : > { %12448 = vmatpush1.bf16.msra.mxu1 %v15502_v3 }
 0x783   : > { %v13656_v5 = vpop.eup %13655 }
 0x784   : > { %v2314_v7 = vadd.f32 1.0, %v13656_v5  ;;  %v15505_v5 = vpack.c.bf16 %v2200_v63, %v2198_v62 }
 0x785   : > { %v13658_v8 = vpop.eup %13657 }
 0x786   : > { %v2315_v10 = vadd.f32 1.0, %v13658_v8  ;;  %13661 = vrcp.f32 %v2314_v7  ;;  %v13660_v11 = vpop.eup %13659  ;;  %v2197_v7 = vld [vmem:[%s16945_s22 + $0xa0] sm:$0xff]  ;;  %v2199_v8 = vld [vmem:[%s16945_s22 + $0xb0] sm:$0xff]  ;;  %12450 = vmatprep.subr.bf16.mxu1 %v15505_v5 }
 0x787   : > { %13663 = vtanh.f32 %v15441_v6 }
 0x788   : > { %13665 = vrcp.f32 %v2315_v10  ;;  %v2202_v10 = vld [vmem:[%s16945_s22 + $0xc8] sm:$0xff] }
 0x789   : > { %13667 = vpow2.f32 %v11142_v34 }
 0x78a   : > { %13669 = vpow2.f32 %v11141_v36 }
 0x790   : > { %v15445_v12 = vpop.eup %13661 }
 0x791   : > { %v13664_v13 = vpop.eup %13663  ;;  %v2336_v14 = vmul.f32 %v15445_v12, %v13660_v11  ;;  %v2204_v11 = vld [vmem:[%s16945_s22 + $0xd8] sm:$0xff]  ;;  %v2334_v56 = vmul.f32 0.0, %v15445_v12 }
 0x792   : > { %v15448_v15 = vpop.eup %13665 }
 0x793   : > { %v2337_v17 = vmul.f32 %v15448_v15, %v13664_v13  ;;  %v15512_v13 = vpack.c.bf16 %v2199_v8, %v2197_v7  ;;  %v13668_v39 = vpop.eup %13667  ;;  %v2335_v42 = vmul.f32 0.0, %v15448_v15 }
 0x794   : > { %v2329_v40 = vadd.f32 1.0, %v13668_v39  ;;  %v13670_v41 = vpop.eup %13669 }
 0x795   : > { %2342 = vrot.lane.b32.xlu0 %v2337_v17, %s14687_s7  ;;  %v2201_v17 = vld [vmem:[%s16945_s22 + $0xc0] sm:$0xff]  ;;  %12452 = vmatpush1.bf16.msra.mxu1 %v15512_v13  ;;  %v2328_v55 = vadd.f32 1.0, %v13670_v41 }
 0x796   : > { %v15522_v24 = vpack.c.bf16 %v2203_v19, %v2201_v17  ;;  %13671 = vrcp.f32 %v2329_v40 }
 0x799   : > { %2340 = vrot.lane.b32.xlu0 %v2336_v14, %s14687_s7  ;;  %v15515_v14 = vpack.c.bf16 %v2204_v11, %v2202_v10  ;;  %v2209_v11 = vld [vmem:[#allocation19] sm:$0x3] }
 0x79a   : > { %v15576_v17 = vrot.slane %v2209_v11, %v15420_v50 }
 0x79b   : > { %12454 = vmatprep.subr.bf16.mxu1 %v15515_v14 }
 0x79c   : > { %12456 = vmatpush1.bf16.msra.mxu1 %v15522_v24 }
 0x79d   : > { %12458 = vmatprep.subr.bf16.mxu1 %v15525_v25 }
 0x7a0   : > { %12460 = vmatpush1.bf16.msra.mxu1 %v15530_v33  ;;  %v13672_v4 = vpop.eup %13671 }
 0x7a1   : > { %12510 = vmatprep.subr.bf16.mxu1 %v15365_v1 }
 0x807   : > { %v2343_v51 = vpop.permute.xlu0 %2342 }
 0x808   : > { %v15538_v52 = vadd.f32 %v2343_v51, %v2335_v42  ;;  %v15582_v51 = vrot.slane %v2209_v11, %v15429_v59 }
 0x80a   : > { %13673 = vtanh.f32 %v15538_v52 }
 0x80b   : > { %v2341_v60 = vpop.permute.xlu0 %2340  ;;  %13675 = vrcp.f32 %v2328_v55 }
 0x80c   : > { %v15542_v6 = vadd.f32 %v2341_v60, %v2334_v56 }
 0x80e   : > { %13677 = vtanh.f32 %v15542_v6 }
 0x814   : > { %v13674_v61 = vpop.eup %13673 }
 0x815   : > { %v2351_v62 = vmul.f32 %v13674_v61, %v13672_v4  ;;  %v13676_v63 = vpop.eup %13675 }
 0x817   : > { %v2354_v8 = vrot.slane %v2351_v62, 7 }
 0x818   : > { %v13678_v15 = vpop.eup %13677 }
 0x819   : > { %v2350_v7 = vmul.f32 %v13678_v15, %v13676_v63 }
 0x81b   : > { %v2356_v10 = vsel %vm2355_vm2, %v2354_v8, %v2350_v7 }
 0x81c   : > { %2357 = vrot.lane.b32.xlu1 %v2356_v10, %s14687_s7 }
 0x88e   : > { %v2358_v12 = vpop.permute.xlu1 %2357 }
 0x88f   : > { %11143 = vmatmul.mubr.msk.f32.vlgmr.msra.gmra.mrb[16].mxu1 %vm2221_vm3, %v2358_v12  ;;  %11146 = vmatmul.mubr.msk.f32.vlgmr.msra.gmra.mrb[14].mxu0 %vm2221_vm3, %v2358_v12 }
 0x890   : > { %12512 = vmatpush1.bf16.msra.mxu1 %v15373_v16  ;;  %2845 = vmatprep.mubr.f32.mxu1 %v14686_v9 }
 0x891   : > { %12514 = vmatprep.subr.bf16.mxu1 %v15375_v18  ;;  %12480 = vmatpush1.bf16.msra.mxu0 %v15461_v28 }
 0x892   : > { %12482 = vmatprep.subr.bf16.mxu0 %v15463_v29  ;;  %2707 = vmatprep.mubr.f32.mxu0 %v14686_v9 }
 0x894   : > { %12516 = vmatpush1.bf16.msra.mxu1 %v15380_v23 }
 0x895   : > { %12518 = vmatprep.subr.bf16.mxu1 %v15383_v26  ;;  %12484 = vmatpush1.bf16.msra.mxu0 %v15472_v37 }
 0x896   : > { %12486 = vmatprep.subr.bf16.mxu0 %v15475_v38 }
 0x898   : > { %12520 = vmatpush1.bf16.msra.mxu1 %v15388_v31 }
 0x899   : > { %12522 = vmatprep.subr.bf16.mxu1 %v15392_v32  ;;  %12488 = vmatpush1.bf16.msra.mxu0 %v15482_v46 }
 0x89a   : > { %12490 = vmatprep.subr.bf16.mxu0 %v15485_v48 }
 0x89c   : > { %12524 = vmatpush1.bf16.msra.mxu1 %v15395_v35 }
 0x89d   : > { %12492 = vmatpush1.bf16.msra.mxu0 %v15492_v57  ;;  %12526 = vmatprep.subr.bf16.mxu1 %v15456_v22 }
 0x89e   : > { %12494 = vmatprep.subr.bf16.mxu0 %v15495_v58 }
 0x8a1   : > { %12496 = vmatpush1.bf16.msra.mxu0 %v15502_v3 }
 0x8a2   : > { %12498 = vmatprep.subr.bf16.mxu0 %v15505_v5 }
 0x8a5   : > { %12500 = vmatpush1.bf16.msra.mxu0 %v15512_v13 }
 0x8a6   : > { %12502 = vmatprep.subr.bf16.mxu0 %v15515_v14 }
 0x8a9   : > { %12504 = vmatpush1.bf16.msra.mxu0 %v15522_v24 }
 0x8aa   : > { %12506 = vmatprep.subr.bf16.mxu0 %v15525_v25 }
 0x8ad   : > { %12508 = vmatpush1.bf16.msra.mxu0 %v15530_v33 }
 0x8ae   : > { %12558 = vmatprep.subr.bf16.mxu0 %v15365_v1 }
 0x962   : > { %v2427_v19 = vpop.f32.mrb[16].mxu1  ;;  %v2562_v20 = vpop.f32.mrb[14].mxu0 }
 0x963   : > { %v2428_v21 = vadd.f32 %v2427_v19, %v15576_v17  ;;  %v2569_v27 = vrot.slane %v2562_v20, 7  ;;  %v2577_v30 = vadd.f32 %v2562_v20, %v15425_v54  ;;  %v2429_v34 = vpop.f32.mrb[17].mxu1  ;;  %v2564_v36 = vpop.f32.mrb[15].mxu0  ;;  %v2608_v20 = vrot.slane %v15538_v52, 7 }
 0x964   : > { %v2570_v55 = vrot.slane %v2564_v36, 7  ;;  %v15585_v56 = vadd.f32 %v2429_v34, %v15582_v51  ;;  %v2578_v4 = vadd.f32 %v2564_v36, %v15435_v2 }
 0x965   : > { %v11144_v39 = vmul.f32 -1.442695, %v2428_v21  ;;  %v2575_v40 = vadd.f32 %v2569_v27, %v15423_v53  ;;  %v11148_v41 = vmul.f32 -1.442695, %v2577_v30  ;;  %v2607_v27 = vrot.slane %v15542_v6, 7 }
 0x966   : > { %v2576_v60 = vadd.f32 %v2570_v55, %v15433_v0  ;;  %v11150_v55 = vmul.f32 -1.442695, %v2578_v4 }
 0x967   : > { %13679 = vpow2.f32 %v11144_v39  ;;  %v11147_v42 = vmul.f32 -1.442695, %v2575_v40 }
 0x968   : > { %13681 = vpow2.f32 %v11148_v41 }
 0x969   : > { %13683 = vpow2.f32 %v11147_v42  ;;  %v11149_v42 = vmul.f32 -1.442695, %v2576_v60 }
 0x96a   : > { %13685 = vtanh.f32 %v15585_v56 }
 0x96b   : > { %13687 = vtanh.f32 %v2576_v60 }
 0x96c   : > { %13689 = vtanh.f32 %v2578_v4 }
 0x971   : > { %v13680_v61 = vpop.eup %13679 }
 0x972   : > { %v13682_v62 = vpop.eup %13681  ;;  %v2435_v63 = vadd.f32 1.0, %v13680_v61 }
 0x973   : > { %v13684_v15 = vpop.eup %13683  ;;  %v2586_v7 = vadd.f32 1.0, %v13682_v62 }
 0x974   : > { %13691 = vrcp.f32 %v2435_v63  ;;  %v2585_v8 = vadd.f32 1.0, %v13684_v15  ;;  %v13686_v10 = vpop.eup %13685 }
 0x975   : > { %13693 = vrcp.f32 %v2586_v7  ;;  %v13688_v12 = vpop.eup %13687 }
 0x976   : > { %13695 = vrcp.f32 %v2585_v8  ;;  %v13690_v11 = vpop.eup %13689 }
 0x977   : > { %13697 = vpow2.f32 %v11149_v42 }
 0x978   : > { %13699 = vpow2.f32 %v11150_v55 }
 0x97e   : > { %v15590_v19 = vpop.eup %13691 }
 0x97f   : > { %v13694_v21 = vpop.eup %13693  ;;  %v15595_v30 = vmul.f32 %v15590_v19, %v13686_v10 }
 0x980   : > { %v13696_v34 = vpop.eup %13695  ;;  %v2614_v36 = vmul.f32 %v13694_v21, %v13690_v11  ;;  %v2612_v39 = vmul.f32 %v13694_v21, %v2608_v20 }
 0x981   : > { %v2613_v40 = vmul.f32 %v13696_v34, %v13688_v12  ;;  %v2611_v41 = vmul.f32 %v13696_v34, %v2607_v27  ;;  %v13698_v52 = vpop.eup %13697 }
 0x982   : > { %2619 = vrot.lane.b32.xlu0 %v2614_v36, %s14687_s7  ;;  %v13700_v61 = vpop.eup %13699  ;;  %v2599_v62 = vadd.f32 1.0, %v13698_v52 }
 0x983   : > { %2617 = vrot.lane.b32.xlu1 %v2613_v40, %s14687_s7  ;;  %v2600_v6 = vadd.f32 1.0, %v13700_v61 }
 0x984   : > { %13701 = vrcp.f32 %v2599_v62 }
 0x985   : > { %13703 = vrcp.f32 %v2600_v6 }
 0x98e   : > { %v13702_v60 = vpop.eup %13701 }
 0x98f   : > { %v13704_v4 = vpop.eup %13703 }
 0x9f4   : > { %v2620_v63 = vpop.permute.xlu0 %2619 }
 0x9f5   : > { %v15599_v15 = vadd.f32 %v2620_v63, %v2612_v39  ;;  %v2618_v7 = vpop.permute.xlu1 %2617 }
 0x9f6   : > { %v15601_v8 = vadd.f32 %v2618_v7, %v2611_v41 }
 0x9f7   : > { %13705 = vtanh.f32 %v15599_v15 }
 0x9f8   : > { %13707 = vtanh.f32 %v15601_v8 }
 0xa01   : > { %v13706_v10 = vpop.eup %13705 }
 0xa02   : > { %v13708_v12 = vpop.eup %13707  ;;  %v2628_v11 = vmul.f32 %v13706_v10, %v13704_v4 }
 0xa03   : > { %v2627_v20 = vmul.f32 %v13708_v12, %v13702_v60 }
 0xa04   : > { %v2631_v21 = vrot.slane %v2628_v11, 7 }
 0xa05   : > { %v2775_v27 = vrot.slane %v2627_v20, 1 }
 0xa06   : > { %v2633_v34 = vsel %vm2632_vm4, %v2631_v21, %v2627_v20 }
 0xa07   : > { %v2776_v36 = vsel %vm2355_vm2, %v2628_v11, %v2775_v27 }
 0xa08   : > { %2777 = vrot.lane.b32.xlu1 %v2776_v36, %s14687_s7  ;;  %v2894_v36 = vrot.slane %v15601_v8, 7  ;;  %v11145_v8 = vmul.f32 -1.442695, %v15585_v56  ;;  %v2445_v56 = vmul.f32 0.0, %v15590_v19 }
 0xa7a   : > { %v2778_v39 = vpop.permute.xlu1 %2777 }
 0xa7b   : > { %11153 = vmatmul.mubr.msk.f32.vlgmr.msra.gmra.mrb[18].mxu1 %vm2221_vm3, %v2778_v39 }
 0xa7c   : > { %12528 = vmatpush1.bf16.msra.mxu1 %v15461_v28  ;;  %2994 = vmatprep.mubr.f32.mxu1 %v14686_v9 }
 0xa7d   : > { %12530 = vmatprep.subr.bf16.mxu1 %v15463_v29 }
 0xa80   : > { %12532 = vmatpush1.bf16.msra.mxu1 %v15472_v37 }
 0xa81   : > { %12534 = vmatprep.subr.bf16.mxu1 %v15475_v38 }
 0xa84   : > { %12536 = vmatpush1.bf16.msra.mxu1 %v15482_v46 }
 0xa85   : > { %12538 = vmatprep.subr.bf16.mxu1 %v15485_v48 }
 0xa88   : > { %12540 = vmatpush1.bf16.msra.mxu1 %v15492_v57 }
 0xa89   : > { %12542 = vmatprep.subr.bf16.mxu1 %v15495_v58 }
 0xa8c   : > { %12544 = vmatpush1.bf16.msra.mxu1 %v15502_v3 }
 0xa8d   : > { %12546 = vmatprep.subr.bf16.mxu1 %v15505_v5 }
 0xa90   : > { %12548 = vmatpush1.bf16.msra.mxu1 %v15512_v13 }
 0xa91   : > { %12550 = vmatprep.subr.bf16.mxu1 %v15515_v14 }
 0xa94   : > { %12552 = vmatpush1.bf16.msra.mxu1 %v15522_v24 }
 0xa95   : > { %12554 = vmatprep.subr.bf16.mxu1 %v15525_v25 }
 0xa98   : > { %12556 = vmatpush1.bf16.msra.mxu1 %v15530_v33 }
 0xa99   : > { %12606 = vmatprep.subr.bf16.mxu1 %v15365_v1 }
 0xb4e   : > { %v2847_v40 = vpop.f32.mrb[18].mxu1 }
 0xb4f   : > { %v2854_v41 = vrot.slane %v2847_v40, 6  ;;  %v2856_v42 = vrot.slane %v2847_v40, 7  ;;  %v2849_v55 = vpop.f32.mrb[19].mxu1  ;;  %v2895_v40 = vrot.slane %v15599_v15, 7 }
 0xb50   : > { %v2855_v63 = vrot.slane %v2849_v55, 6  ;;  %v2857_v7 = vrot.slane %v2849_v55, 7 }
 0xb51   : > { %v2862_v52 = vadd.f32 %v2854_v41, %v15423_v53  ;;  %v2864_v61 = vadd.f32 %v2856_v42, %v15425_v54 }
 0xb52   : > { %v2863_v60 = vadd.f32 %v2855_v63, %v15433_v0  ;;  %v2865_v4 = vadd.f32 %v2857_v7, %v15435_v2 }
 0xb53   : > { %v11154_v62 = vmul.f32 -1.442695, %v2862_v52  ;;  %v11155_v6 = vmul.f32 -1.442695, %v2864_v61 }
 0xb55   : > { %13709 = vpow2.f32 %v11154_v62  ;;  %v11156_v62 = vmul.f32 -1.442695, %v2863_v60 }
 0xb56   : > { %13711 = vpow2.f32 %v11155_v6  ;;  %v11157_v6 = vmul.f32 -1.442695, %v2865_v4 }
 0xb57   : > { %13713 = vtanh.f32 %v2863_v60 }
 0xb58   : > { %13715 = vtanh.f32 %v2865_v4 }
 0xb5f   : > { %v13710_v10 = vpop.eup %13709 }
 0xb60   : > { %v13712_v12 = vpop.eup %13711  ;;  %v2872_v11 = vadd.f32 1.0, %v13710_v10 }
 0xb61   : > { %v2873_v20 = vadd.f32 1.0, %v13712_v12  ;;  %v13714_v21 = vpop.eup %13713 }
 0xb62   : > { %13717 = vrcp.f32 %v2872_v11  ;;  %v13716_v27 = vpop.eup %13715 }
 0xb63   : > { %13719 = vrcp.f32 %v2873_v20 }
 0xb64   : > { %13721 = vpow2.f32 %v11156_v62 }
 0xb65   : > { %13723 = vpow2.f32 %v11157_v6 }
 0xb66   : > { %13725 = vpow2.f32 %v11145_v8 }
 0xb6c   : > { %v13718_v39 = vpop.eup %13717 }
 0xb6d   : > { %v13720_v41 = vpop.eup %13719  ;;  %v2900_v42 = vmul.f32 %v13718_v39, %v13714_v21  ;;  %v2898_v55 = vmul.f32 %v13718_v39, %v2894_v36 }
 0xb6e   : > { %v2901_v52 = vmul.f32 %v13720_v41, %v13716_v27  ;;  %v2899_v61 = vmul.f32 %v13720_v41, %v2895_v40  ;;  %v13722_v15 = vpop.eup %13721 }
 0xb6f   : > { %2904 = vrot.lane.b32.xlu0 %v2900_v42, %s14687_s7  ;;  %v13724_v63 = vpop.eup %13723  ;;  %v2886_v7 = vadd.f32 1.0, %v13722_v15 }
 0xb70   : > { %2906 = vrot.lane.b32.xlu1 %v2901_v52, %s14687_s7  ;;  %v2887_v10 = vadd.f32 1.0, %v13724_v63  ;;  %v13726_v12 = vpop.eup %13725 }
 0xb71   : > { %13727 = vrcp.f32 %v2886_v7 }
 0xb72   : > { %13729 = vrcp.f32 %v2887_v10 }
 0xb73   : > { %2448 = vrot.lane.b32.xlu0 %v15595_v30, %s14687_s7  ;;  %v2442_v30 = vadd.f32 1.0, %v13726_v12 }
 0xb74   : > { %2634 = vrot.lane.b32.xlu1 %v2633_v34, %s14687_s7 }
 0xb7b   : > { %v13728_v27 = vpop.eup %13727 }
 0xb7c   : > { %v13730_v36 = vpop.eup %13729 }
 0xbe1   : > { %v2905_v11 = vpop.permute.xlu0 %2904 }
 0xbe2   : > { %v2907_v20 = vpop.permute.xlu1 %2906  ;;  %v15637_v21 = vadd.f32 %v2905_v11, %v2898_v55 }
 0xbe3   : > { %v15639_v34 = vadd.f32 %v2907_v20, %v2899_v61 }
 0xbe4   : > { %13731 = vtanh.f32 %v15637_v21 }
 0xbe5   : > { %13733 = vtanh.f32 %v15639_v34  ;;  %v2449_v60 = vpop.permute.xlu0 %2448 }
 0xbe6   : > { %v15644_v4 = vadd.f32 %v2449_v60, %v2445_v56  ;;  %13735 = vrcp.f32 %v2442_v30  ;;  %v2635_v7 = vpop.permute.xlu1 %2634 }
 0xbe8   : > { %13737 = vtanh.f32 %v15644_v4 }
 0xbee   : > { %v13732_v39 = vpop.eup %13731 }
 0xbef   : > { %v13734_v40 = vpop.eup %13733  ;;  %v2914_v41 = vmul.f32 %v13732_v39, %v13728_v27 }
 0xbf0   : > { %v2915_v42 = vmul.f32 %v13734_v40, %v13730_v36  ;;  %v13736_v55 = vpop.eup %13735 }
 0xbf1   : > { %v3062_v52 = vrot.slane %v2914_v41, 2 }
 0xbf2   : > { %v13738_v61 = vpop.eup %13737  ;;  %v3063_v62 = vrot.slane %v2915_v42, 1  ;;  %v2918_v19 = vrot.slane %v2915_v42, 7 }
 0xbf3   : > { %v15647_v6 = vmul.f32 %v13738_v61, %v13736_v55 }
 0xbf4   : > { %v3064_v8 = vsel %vm2355_vm2, %v3063_v62, %v3062_v52  ;;  %v2920_v15 = vsel %vm2919_vm5, %v2918_v19, %v2914_v41 }
 0xbf5   : > { %3065 = vrot.lane.b32.xlu0 %v3064_v8, %s14687_s7  ;;  %v2637_v63 = vrot.slane %v15647_v6, 7 }
 0xbf7   : > { %v2639_v10 = vsel %vm2221_vm3, %v2635_v7, %v2637_v63 }
 0xbf8   : > { %v2641_v12 = vrot.slane %v2639_v10, 1 }
 0xbf9   : > { %2921 = vrot.lane.b32.xlu0 %v2920_v15, %s14687_s7 }
 0xbfa   : > { %2708 = vmatmul.mubr.f32.vlgmr.msra.gmra.mrb[16].mxu0 %v2641_v12 }
 0xbfb   : > { %12560 = vmatpush1.bf16.msra.mxu0 %v15373_v16  ;;  %3133 = vmatprep.mubr.f32.mxu0 %v14686_v9 }
 0xbfc   : > { %12562 = vmatprep.subr.bf16.mxu0 %v15375_v18 }
 0xbff   : > { %12564 = vmatpush1.bf16.msra.mxu0 %v15380_v23 }
 0xc00   : > { %12566 = vmatprep.subr.bf16.mxu0 %v15383_v26 }
 0xc03   : > { %12568 = vmatpush1.bf16.msra.mxu0 %v15388_v31 }
 0xc04   : > { %12570 = vmatprep.subr.bf16.mxu0 %v15392_v32 }
 0xc07   : > { %12572 = vmatpush1.bf16.msra.mxu0 %v15395_v35 }
 0xc08   : > { %12574 = vmatprep.subr.bf16.mxu0 %v15456_v22 }
 0xc67   : > { %v3066_v11 = vpop.permute.xlu0 %3065 }
 0xc68   : > { %11160 = vmatmul.mubr.msk.f32.vlgmr.msra.gmra.mrb[18].mxu0 %vm2221_vm3, %v3066_v11 }
 0xc69   : > { %12576 = vmatpush1.bf16.msra.mxu0 %v15461_v28  ;;  %3282 = vmatprep.mubr.f32.mxu0 %v14686_v9 }
 0xc6a   : > { %12578 = vmatprep.subr.bf16.mxu0 %v15463_v29 }
 0xc6d   : > { %12580 = vmatpush1.bf16.msra.mxu0 %v15472_v37 }
 0xc6e   : > { %12582 = vmatprep.subr.bf16.mxu0 %v15475_v38 }
 0xc71   : > { %12584 = vmatpush1.bf16.msra.mxu0 %v15482_v46 }
 0xc72   : > { %12586 = vmatprep.subr.bf16.mxu0 %v15485_v48 }
 0xc75   : > { %12588 = vmatpush1.bf16.msra.mxu0 %v15492_v57 }
 0xc76   : > { %12590 = vmatprep.subr.bf16.mxu0 %v15495_v58 }
 0xc79   : > { %12592 = vmatpush1.bf16.msra.mxu0 %v15502_v3 }
 0xc7a   : > { %12594 = vmatprep.subr.bf16.mxu0 %v15505_v5 }
 0xc7d   : > { %12596 = vmatpush1.bf16.msra.mxu0 %v15512_v13 }
 0xc7e   : > { %12598 = vmatprep.subr.bf16.mxu0 %v15515_v14 }
 0xc81   : > { %12600 = vmatpush1.bf16.msra.mxu0 %v15522_v24 }
 0xc82   : > { %12602 = vmatprep.subr.bf16.mxu0 %v15525_v25 }
 0xc85   : > { %12604 = vmatpush1.bf16.msra.mxu0 %v15530_v33 }
 0xc86   : > { %12654 = vmatprep.subr.bf16.mxu0 %v15365_v1 }
 0xccd   : > { %v2709_v20 = vpop.f32.mrb[16].mxu0 }
 0xcce   : > { %v2710_v30 = vadd.f32 %v2709_v20, %v15576_v17  ;;  %v2711_v56 = vpop.f32.mrb[17].mxu0 }
 0xccf   : > { %v2712_v27 = vadd.f32 %v2711_v56, %v15582_v51 }
 0xcd0   : > { %v11151_v60 = vmul.f32 -1.442695, %v2710_v30 }
 0xcd1   : > { %v11152_v12 = vmul.f32 -1.442695, %v2712_v27 }
 0xcd2   : > { %13739 = vpow2.f32 %v11151_v60 }
 0xcd3   : > { %13741 = vtanh.f32 %v2712_v27  ;;  %v3183_v27 = vrot.slane %v15639_v34, 7 }
 0xcdc   : > { %v13740_v36 = vpop.eup %13739 }
 0xcdd   : > { %v2717_v39 = vadd.f32 1.0, %v13740_v36  ;;  %v13742_v40 = vpop.eup %13741 }
 0xcdf   : > { %13743 = vrcp.f32 %v2717_v39 }
 0xce9   : > { %v13744_v41 = vpop.eup %13743 }
 0xcea   : > { %v2728_v42 = vmul.f32 %v13744_v41, %v13742_v40 }
 0xcec   : > { %2730 = vrot.lane.b32.xlu1 %v2728_v42, %s14687_s7 }
 0xd3b   : > { %v3135_v55 = vpop.f32.mrb[18].mxu0 }
 0xd3c   : > { %v3142_v52 = vrot.slane %v3135_v55, 5  ;;  %v3144_v61 = vrot.slane %v3135_v55, 6  ;;  %v3137_v62 = vpop.f32.mrb[19].mxu0  ;;  %v3182_v55 = vrot.slane %v15637_v21, 7 }
 0xd3d   : > { %v3143_v7 = vrot.slane %v3137_v62, 5  ;;  %v3145_v10 = vrot.slane %v3137_v62, 6 }
 0xd3e   : > { %v3150_v19 = vadd.f32 %v3142_v52, %v15423_v53  ;;  %v3152_v8 = vadd.f32 %v3144_v61, %v15425_v54 }
 0xd3f   : > { %v3151_v11 = vadd.f32 %v3143_v7, %v15433_v0  ;;  %v3153_v20 = vadd.f32 %v3145_v10, %v15435_v2  ;;  %v2727_v7 = vmul.f32 %v13744_v41, %v15644_v4 }
 0xd40   : > { %v11161_v15 = vmul.f32 -1.442695, %v3150_v19  ;;  %v11162_v63 = vmul.f32 -1.442695, %v3152_v8 }
 0xd41   : > { %v11163_v4 = vmul.f32 -1.442695, %v3151_v11  ;;  %v11164_v41 = vmul.f32 -1.442695, %v3153_v20 }
 0xd42   : > { %13745 = vpow2.f32 %v11161_v15 }
 0xd43   : > { %13747 = vpow2.f32 %v11162_v63 }
 0xd44   : > { %13749 = vpow2.f32 %v11152_v12 }
 0xd45   : > { %13751 = vtanh.f32 %v3151_v11 }
 0xd46   : > { %13753 = vtanh.f32 %v3153_v20 }
 0xd4c   : > { %v13746_v30 = vpop.eup %13745 }
 0xd4d   : > { %v13748_v56 = vpop.eup %13747  ;;  %v3160_v60 = vadd.f32 1.0, %v13746_v30 }
 0xd4e   : > { %v3161_v36 = vadd.f32 1.0, %v13748_v56  ;;  %v13750_v39 = vpop.eup %13749 }
 0xd4f   : > { %13755 = vrcp.f32 %v3160_v60  ;;  %v13752_v40 = vpop.eup %13751  ;;  %v2724_v63 = vadd.f32 1.0, %v13750_v39  ;;  %v2922_v60 = vpop.permute.xlu0 %2921 }
 0xd50   : > { %13757 = vrcp.f32 %v3161_v36  ;;  %v13754_v42 = vpop.eup %13753 }
 0xd51   : > { %13759 = vrcp.f32 %v2724_v63 }
 0xd59   : > { %v13756_v52 = vpop.eup %13755 }
 0xd5a   : > { %v13758_v61 = vpop.eup %13757  ;;  %v3188_v62 = vmul.f32 %v13756_v52, %v13752_v40  ;;  %v3186_v19 = vmul.f32 %v13756_v52, %v3182_v55 }
 0xd5b   : > { %v3189_v8 = vmul.f32 %v13758_v61, %v13754_v42  ;;  %v3187_v15 = vmul.f32 %v13758_v61, %v3183_v27  ;;  %v13760_v21 = vpop.eup %13759 }
 0xd5c   : > { %3192 = vrot.lane.b32.xlu1 %v3188_v62, %s14687_s7 }
 0xd5d   : > { %3194 = vrot.lane.b32.xlu0 %v3189_v8, %s14687_s7 }
 0xd5e   : > { %v2731_v10 = vpop.permute.xlu1 %2730 }
 0xd5f   : > { %v15693_v12 = vadd.f32 %v2731_v10, %v2727_v7 }
 0xd61   : > { %13761 = vtanh.f32 %v15693_v12 }
 0xd62   : > { %13763 = vpow2.f32 %v11163_v4 }
 0xd63   : > { %13765 = vpow2.f32 %v11164_v41 }
 0xd6b   : > { %v13762_v34 = vpop.eup %13761 }
 0xd6c   : > { %v15696_v30 = vmul.f32 %v13762_v34, %v13760_v21  ;;  %v13764_v40 = vpop.eup %13763 }
 0xd6d   : > { %v13766_v42 = vpop.eup %13765  ;;  %v3174_v55 = vadd.f32 1.0, %v13764_v40 }
 0xd6e   : > { %v2924_v56 = vrot.slane %v15696_v30, 6  ;;  %v3175_v52 = vadd.f32 1.0, %v13766_v42 }
 0xd6f   : > { %13767 = vrcp.f32 %v3174_v55 }
 0xd70   : > { %v2926_v36 = vsel %vm2221_vm3, %v2922_v60, %v2924_v56  ;;  %13769 = vrcp.f32 %v3175_v52 }
 0xd71   : > { %v2928_v39 = vrot.slane %v2926_v36, 2 }
 0xd73   : > { %2995 = vmatmul.mubr.f32.vlgmr.msra.gmra.mrb[20].mxu1 %v2928_v39 }
 0xd74   : > { %12608 = vmatpush1.bf16.msra.mxu1 %v15373_v16  ;;  %3421 = vmatprep.mubr.f32.mxu1 %v14686_v9 }
 0xd75   : > { %12610 = vmatprep.subr.bf16.mxu1 %v15375_v18 }
 0xd78   : > { %12612 = vmatpush1.bf16.msra.mxu1 %v15380_v23 }
 0xd79   : > { %12614 = vmatprep.subr.bf16.mxu1 %v15383_v26  ;;  %v13768_v11 = vpop.eup %13767 }
 0xd7a   : > { %v13770_v20 = vpop.eup %13769 }
 0xd7c   : > { %12616 = vmatpush1.bf16.msra.mxu1 %v15388_v31 }
 0xd7d   : > { %12618 = vmatprep.subr.bf16.mxu1 %v15392_v32 }
 0xd80   : > { %12620 = vmatpush1.bf16.msra.mxu1 %v15395_v35 }
 0xd81   : > { %12622 = vmatprep.subr.bf16.mxu1 %v15456_v22 }
 0xdce   : > { %v3193_v27 = vpop.permute.xlu1 %3192 }
 0xdcf   : > { %v3195_v61 = vpop.permute.xlu0 %3194  ;;  %v15709_v62 = vadd.f32 %v3193_v27, %v3186_v19 }
 0xdd0   : > { %v15711_v8 = vadd.f32 %v3195_v61, %v3187_v15 }
 0xdd1   : > { %13771 = vtanh.f32 %v15709_v62 }
 0xdd2   : > { %13773 = vtanh.f32 %v15711_v8 }
 0xddb   : > { %v13772_v63 = vpop.eup %13771 }
 0xddc   : > { %v13774_v7 = vpop.eup %13773  ;;  %v3202_v10 = vmul.f32 %v13772_v63, %v13768_v11 }
 0xddd   : > { %v3203_v21 = vmul.f32 %v13774_v7, %v13770_v20 }
 0xdde   : > { %v3350_v34 = vrot.slane %v3202_v10, 3 }
 0xddf   : > { %v3351_v56 = vrot.slane %v3203_v21, 2  ;;  %v3206_v60 = vrot.slane %v3203_v21, 7 }
 0xde1   : > { %v3352_v19 = vsel %vm2355_vm2, %v3351_v56, %v3350_v34  ;;  %v3208_v36 = vsel %vm3207_vm6, %v3206_v60, %v3202_v10 }
 0xde2   : > { %3353 = vrot.lane.b32.xlu1 %v3352_v19, %s14687_s7 }
 0xde6   : > { %3209 = vrot.lane.b32.xlu1 %v3208_v36, %s14687_s7 }
 0xe46   : > { %v2996_v15 = vpop.f32.mrb[20].mxu1 }
 0xe47   : > { %v2997_v39 = vadd.f32 %v2996_v15, %v15576_v17  ;;  %v2998_v4 = vpop.f32.mrb[21].mxu1 }
 0xe48   : > { %v2999_v40 = vadd.f32 %v2998_v4, %v15582_v51 }
 0xe49   : > { %v11158_v41 = vmul.f32 -1.442695, %v2997_v39 }
 0xe4a   : > { %v11159_v20 = vmul.f32 -1.442695, %v2999_v40 }
 0xe4b   : > { %13775 = vpow2.f32 %v11158_v41 }
 0xe4c   : > { %13777 = vtanh.f32 %v2999_v40 }
 0xe54   : > { %v3354_v42 = vpop.permute.xlu1 %3353 }
 0xe55   : > { %v13776_v55 = vpop.eup %13775  ;;  %11167 = vmatmul.mubr.msk.f32.vlgmr.msra.gmra.mrb[22].mxu1 %vm2221_vm3, %v3354_v42 }
 0xe56   : > { %v3004_v52 = vadd.f32 1.0, %v13776_v55  ;;  %12624 = vmatpush1.bf16.msra.mxu1 %v15461_v28  ;;  %3570 = vmatprep.mubr.f32.mxu1 %v14686_v9  ;;  %v13778_v27 = vpop.eup %13777 }
 0xe57   : > { %12626 = vmatprep.subr.bf16.mxu1 %v15463_v29 }
 0xe58   : > { %13779 = vrcp.f32 %v3004_v52  ;;  %v3210_v15 = vpop.permute.xlu1 %3209 }
 0xe59   : > { %13781 = vpow2.f32 %v11159_v20 }
 0xe5a   : > { %12628 = vmatpush1.bf16.msra.mxu1 %v15472_v37 }
 0xe5b   : > { %12630 = vmatprep.subr.bf16.mxu1 %v15475_v38 }
 0xe5e   : > { %12632 = vmatpush1.bf16.msra.mxu1 %v15482_v46 }
 0xe5f   : > { %12634 = vmatprep.subr.bf16.mxu1 %v15485_v48 }
 0xe62   : > { %v13780_v61 = vpop.eup %13779  ;;  %12636 = vmatpush1.bf16.msra.mxu1 %v15492_v57 }
 0xe63   : > { %v3015_v11 = vmul.f32 %v13780_v61, %v13778_v27  ;;  %12638 = vmatprep.subr.bf16.mxu1 %v15495_v58  ;;  %v13782_v63 = vpop.eup %13781  ;;  %v3014_v10 = vmul.f32 %v13780_v61, %v15693_v12 }
 0xe64   : > { %v3011_v7 = vadd.f32 1.0, %v13782_v63 }
 0xe65   : > { %3017 = vrot.lane.b32.xlu0 %v3015_v11, %s14687_s7 }
 0xe66   : > { %12640 = vmatpush1.bf16.msra.mxu1 %v15502_v3  ;;  %13783 = vrcp.f32 %v3011_v7 }
 0xe67   : > { %12642 = vmatprep.subr.bf16.mxu1 %v15505_v5 }
 0xe6a   : > { %12644 = vmatpush1.bf16.msra.mxu1 %v15512_v13 }
 0xe6b   : > { %12646 = vmatprep.subr.bf16.mxu1 %v15515_v14 }
 0xe6e   : > { %12648 = vmatpush1.bf16.msra.mxu1 %v15522_v24 }
 0xe6f   : > { %12650 = vmatprep.subr.bf16.mxu1 %v15525_v25 }
 0xe70   : > { %v13784_v56 = vpop.eup %13783 }
 0xe72   : > { %12652 = vmatpush1.bf16.msra.mxu1 %v15530_v33 }
 0xe73   : > { %12702 = vmatprep.subr.bf16.mxu1 %v15365_v1 }
 0xed7   : > { %v3018_v21 = vpop.permute.xlu0 %3017 }
 0xed8   : > { %v15740_v34 = vadd.f32 %v3018_v21, %v3014_v10 }
 0xeda   : > { %13785 = vtanh.f32 %v15740_v34 }
 0xee4   : > { %v13786_v60 = vpop.eup %13785 }
 0xee5   : > { %v15743_v19 = vmul.f32 %v13786_v60, %v13784_v56 }
 0xee7   : > { %v3212_v36 = vrot.slane %v15743_v19, 5 }
 0xee9   : > { %v3214_v39 = vsel %vm2221_vm3, %v3210_v15, %v3212_v36 }
 0xeea   : > { %v3216_v4 = vrot.slane %v3214_v39, 3  ;;  %v3470_v39 = vrot.slane %v15709_v62, 7 }
 0xeec   : > { %3283 = vmatmul.mubr.f32.vlgmr.msra.gmra.mrb[20].mxu0 %v3216_v4 }
 0xeed   : > { %12656 = vmatpush1.bf16.msra.mxu0 %v15373_v16  ;;  %3709 = vmatprep.mubr.f32.mxu0 %v14686_v9 }
 0xeee   : > { %12658 = vmatprep.subr.bf16.mxu0 %v15375_v18 }
 0xef1   : > { %12660 = vmatpush1.bf16.msra.mxu0 %v15380_v23 }
 0xef2   : > { %12662 = vmatprep.subr.bf16.mxu0 %v15383_v26 }
 0xef5   : > { %12664 = vmatpush1.bf16.msra.mxu0 %v15388_v31 }
 0xef6   : > { %12666 = vmatprep.subr.bf16.mxu0 %v15392_v32 }
 0xef9   : > { %12668 = vmatpush1.bf16.msra.mxu0 %v15395_v35 }
 0xefa   : > { %12670 = vmatprep.subr.bf16.mxu0 %v15456_v22 }
 0xf28   : > { %v3423_v12 = vpop.f32.mrb[22].mxu1 }
 0xf29   : > { %v3430_v41 = vrot.slane %v3423_v12, 4  ;;  %v3432_v40 = vrot.slane %v3423_v12, 5  ;;  %v3425_v42 = vpop.f32.mrb[23].mxu1  ;;  %v3471_v12 = vrot.slane %v15711_v8, 7 }
 0xf2a   : > { %v3431_v11 = vrot.slane %v3425_v42, 4  ;;  %v3433_v20 = vrot.slane %v3425_v42, 5 }
 0xf2b   : > { %v3438_v55 = vadd.f32 %v3430_v41, %v15423_v53  ;;  %v3440_v52 = vadd.f32 %v3432_v40, %v15425_v54 }
 0xf2c   : > { %v3439_v63 = vadd.f32 %v3431_v11, %v15433_v0  ;;  %v3441_v7 = vadd.f32 %v3433_v20, %v15435_v2 }
 0xf2d   : > { %v11168_v27 = vmul.f32 -1.442695, %v3438_v55  ;;  %v11169_v61 = vmul.f32 -1.442695, %v3440_v52 }
 0xf2f   : > { %13787 = vpow2.f32 %v11168_v27  ;;  %v11170_v27 = vmul.f32 -1.442695, %v3439_v63 }
 0xf30   : > { %13789 = vpow2.f32 %v11169_v61  ;;  %v11171_v61 = vmul.f32 -1.442695, %v3441_v7 }
 0xf31   : > { %13791 = vtanh.f32 %v3439_v63 }
 0xf32   : > { %13793 = vtanh.f32 %v3441_v7 }
 0xf39   : > { %v13788_v10 = vpop.eup %13787 }
 0xf3a   : > { %v13790_v21 = vpop.eup %13789  ;;  %v3448_v56 = vadd.f32 1.0, %v13788_v10 }
 0xf3b   : > { %v3449_v60 = vadd.f32 1.0, %v13790_v21  ;;  %v13792_v36 = vpop.eup %13791 }
 0xf3c   : > { %13795 = vrcp.f32 %v3448_v56  ;;  %v13794_v15 = vpop.eup %13793 }
 0xf3d   : > { %13797 = vrcp.f32 %v3449_v60 }
 0xf3e   : > { %13799 = vpow2.f32 %v11170_v27 }
 0xf3f   : > { %13801 = vpow2.f32 %v11171_v61 }
 0xf46   : > { %v13796_v4 = vpop.eup %13795 }
 0xf47   : > { %v13798_v41 = vpop.eup %13797  ;;  %v3476_v40 = vmul.f32 %v13796_v4, %v13792_v36  ;;  %v3474_v42 = vmul.f32 %v13796_v4, %v3470_v39 }
 0xf48   : > { %v3477_v55 = vmul.f32 %v13798_v41, %v13794_v15  ;;  %v3475_v52 = vmul.f32 %v13798_v41, %v3471_v12  ;;  %v13800_v11 = vpop.eup %13799 }
 0xf49   : > { %3480 = vrot.lane.b32.xlu0 %v3476_v40, %s14687_s7  ;;  %v13802_v20 = vpop.eup %13801  ;;  %v3462_v10 = vadd.f32 1.0, %v13800_v11 }
 0xf4a   : > { %3482 = vrot.lane.b32.xlu1 %v3477_v55, %s14687_s7  ;;  %v3463_v62 = vadd.f32 1.0, %v13802_v20 }
 0xf4b   : > { %13803 = vrcp.f32 %v3462_v10 }
 0xf4c   : > { %13805 = vrcp.f32 %v3463_v62 }
 0xf55   : > { %v13804_v39 = vpop.eup %13803 }
 0xf56   : > { %v13806_v4 = vpop.eup %13805 }
 0xfbb   : > { %v3481_v21 = vpop.permute.xlu0 %3480 }
 0xfbc   : > { %v3483_v8 = vpop.permute.xlu1 %3482  ;;  %v15764_v56 = vadd.f32 %v3481_v21, %v3474_v42 }
 0xfbd   : > { %v15766_v60 = vadd.f32 %v3483_v8, %v3475_v52 }
 0xfbe   : > { %13807 = vtanh.f32 %v15764_v56 }
 0xfbf   : > { %13809 = vtanh.f32 %v15766_v60  ;;  %v3284_v63 = vpop.f32.mrb[20].mxu0 }
 0xfc0   : > { %v3285_v7 = vadd.f32 %v3284_v63, %v15576_v17  ;;  %v3286_v36 = vpop.f32.mrb[21].mxu0 }
 0xfc1   : > { %v3287_v52 = vadd.f32 %v3286_v36, %v15582_v51 }
 0xfc2   : > { %v11165_v15 = vmul.f32 -1.442695, %v3285_v7 }
 0xfc3   : > { %v11166_v7 = vmul.f32 -1.442695, %v3287_v52 }
 0xfc4   : > { %13811 = vpow2.f32 %v11165_v15 }
 0xfc5   : > { %13813 = vtanh.f32 %v3287_v52 }
 0xfc8   : > { %v13808_v12 = vpop.eup %13807 }
 0xfc9   : > { %v13810_v41 = vpop.eup %13809  ;;  %v3490_v40 = vmul.f32 %v13808_v12, %v13804_v39 }
 0xfca   : > { %v3491_v42 = vmul.f32 %v13810_v41, %v13806_v4 }
 0xfcb   : > { %v3638_v55 = vrot.slane %v3490_v40, 4 }
 0xfcc   : > { %v3639_v27 = vrot.slane %v3491_v42, 3  ;;  %v3494_v61 = vrot.slane %v3491_v42, 7 }
 0xfce   : > { %v13812_v11 = vpop.eup %13811  ;;  %v3640_v20 = vsel %vm2355_vm2, %v3639_v27, %v3638_v55  ;;  %v3496_v10 = vsel %vm3495_vm7, %v3494_v61, %v3490_v40 }
 0xfcf   : > { %v3292_v62 = vadd.f32 1.0, %v13812_v11  ;;  %3641 = vrot.lane.b32.xlu0 %v3640_v20, %s14687_s7  ;;  %v13814_v21 = vpop.eup %13813 }
 0xfd1   : > { %13815 = vrcp.f32 %v3292_v62 }
 0xfd2   : > { %13817 = vpow2.f32 %v11166_v7 }
 0xfd3   : > { %3497 = vrot.lane.b32.xlu0 %v3496_v10, %s14687_s7 }
 0xfdb   : > { %v13816_v8 = vpop.eup %13815 }
 0xfdc   : > { %v3303_v63 = vmul.f32 %v13816_v8, %v13814_v21  ;;  %v13818_v15 = vpop.eup %13817  ;;  %v3302_v4 = vmul.f32 %v13816_v8, %v15740_v34 }
 0xfdd   : > { %v3299_v39 = vadd.f32 1.0, %v13818_v15 }
 0xfde   : > { %3305 = vrot.lane.b32.xlu1 %v3303_v63, %s14687_s7 }
 0xfdf   : > { %13819 = vrcp.f32 %v3299_v39 }
 0xfe9   : > { %v13820_v34 = vpop.eup %13819 }
0x1041   : > { %v3642_v36 = vpop.permute.xlu0 %3641 }
0x1042   : > { %11174 = vmatmul.mubr.msk.f32.vlgmr.msra.gmra.mrb[22].mxu0 %vm2221_vm3, %v3642_v36 }
0x1043   : > { %12672 = vmatpush1.bf16.msra.mxu0 %v15461_v28  ;;  %3858 = vmatprep.mubr.f32.mxu0 %v14686_v9 }
0x1044   : > { %12674 = vmatprep.subr.bf16.mxu0 %v15463_v29 }
0x1045   : > { %v3498_v52 = vpop.permute.xlu0 %3497 }
0x1047   : > { %12676 = vmatpush1.bf16.msra.mxu0 %v15472_v37 }
0x1048   : > { %12678 = vmatprep.subr.bf16.mxu0 %v15475_v38 }
0x104b   : > { %12680 = vmatpush1.bf16.msra.mxu0 %v15482_v46 }
0x104c   : > { %12682 = vmatprep.subr.bf16.mxu0 %v15485_v48 }
0x104f   : > { %12684 = vmatpush1.bf16.msra.mxu0 %v15492_v57 }
0x1050   : > { %v3306_v12 = vpop.permute.xlu1 %3305  ;;  %12686 = vmatprep.subr.bf16.mxu0 %v15495_v58 }
0x1051   : > { %v15787_v41 = vadd.f32 %v3306_v12, %v3302_v4 }
0x1053   : > { %13821 = vtanh.f32 %v15787_v41  ;;  %12688 = vmatpush1.bf16.msra.mxu0 %v15502_v3 }
0x1054   : > { %12690 = vmatprep.subr.bf16.mxu0 %v15505_v5 }
0x1057   : > { %12692 = vmatpush1.bf16.msra.mxu0 %v15512_v13 }
0x1058   : > { %12694 = vmatprep.subr.bf16.mxu0 %v15515_v14 }
0x105b   : > { %12696 = vmatpush1.bf16.msra.mxu0 %v15522_v24 }
0x105c   : > { %12698 = vmatprep.subr.bf16.mxu0 %v15525_v25 }
0x105d   : > { %v13822_v40 = vpop.eup %13821 }
0x105e   : > { %v15796_v42 = vmul.f32 %v13822_v40, %v13820_v34 }
0x105f   : > { %12700 = vmatpush1.bf16.msra.mxu0 %v15530_v33 }
0x1060   : > { %v3500_v55 = vrot.slane %v15796_v42, 4  ;;  %12750 = vmatprep.subr.bf16.mxu0 %v15365_v1 }
0x1062   : > { %v3502_v27 = vsel %vm2221_vm3, %v3498_v52, %v3500_v55 }
0x1063   : > { %v3504_v61 = vrot.slane %v3502_v27, 4  ;;  %v3758_v27 = vrot.slane %v15764_v56, 7 }
0x1065   : > { %3571 = vmatmul.mubr.f32.vlgmr.msra.gmra.mrb[24].mxu1 %v3504_v61 }
0x1066   : > { %12704 = vmatpush1.bf16.msra.mxu1 %v15373_v16  ;;  %3997 = vmatprep.mubr.f32.mxu1 %v14686_v9 }
0x1067   : > { %12706 = vmatprep.subr.bf16.mxu1 %v15375_v18 }
0x106a   : > { %12708 = vmatpush1.bf16.msra.mxu1 %v15380_v23 }
0x106b   : > { %12710 = vmatprep.subr.bf16.mxu1 %v15383_v26 }
0x106e   : > { %12712 = vmatpush1.bf16.msra.mxu1 %v15388_v31 }
0x106f   : > { %12714 = vmatprep.subr.bf16.mxu1 %v15392_v32 }
0x1072   : > { %12716 = vmatpush1.bf16.msra.mxu1 %v15395_v35 }
0x1073   : > { %12718 = vmatprep.subr.bf16.mxu1 %v15456_v22 }
0x1115   : > { %v3711_v1 = vpop.f32.mrb[22].mxu0 }
0x1116   : > { %v3718_v11 = vrot.slane %v3711_v1, 3  ;;  %v3720_v20 = vrot.slane %v3711_v1, 4  ;;  %v3713_v10 = vpop.f32.mrb[23].mxu0  ;;  %v3759_v1 = vrot.slane %v15766_v60, 7 }
0x1117   : > { %v3719_v7 = vrot.slane %v3713_v10, 3  ;;  %v3721_v36 = vrot.slane %v3713_v10, 4 }
0x1118   : > { %v3726_v62 = vadd.f32 %v3718_v11, %v15423_v53  ;;  %v3728_v21 = vadd.f32 %v3720_v20, %v15425_v54 }
0x1119   : > { %v3727_v15 = vadd.f32 %v3719_v7, %v15433_v0  ;;  %v3729_v39 = vadd.f32 %v3721_v36, %v15435_v2 }
0x111a   : > { %v11175_v8 = vmul.f32 -1.442695, %v3726_v62  ;;  %v11176_v63 = vmul.f32 -1.442695, %v3728_v21 }
0x111c   : > { %13823 = vpow2.f32 %v11175_v8 }
0x111d   : > { %13825 = vpow2.f32 %v11176_v63 }
0x111e   : > { %13827 = vtanh.f32 %v3727_v15 }
0x111f   : > { %13829 = vtanh.f32 %v3729_v39 }
0x1126   : > { %v13824_v4 = vpop.eup %13823 }
0x1127   : > { %v13826_v12 = vpop.eup %13825  ;;  %v3736_v34 = vadd.f32 1.0, %v13824_v4 }
0x1128   : > { %v3737_v40 = vadd.f32 1.0, %v13826_v12  ;;  %v13828_v55 = vpop.eup %13827 }
0x1129   : > { %13831 = vrcp.f32 %v3736_v34  ;;  %v13830_v52 = vpop.eup %13829 }
0x112a   : > { %13833 = vrcp.f32 %v3737_v40 }
0x1133   : > { %v13832_v61 = vpop.eup %13831 }
0x1134   : > { %v13834_v11 = vpop.eup %13833  ;;  %v3764_v20 = vmul.f32 %v13832_v61, %v13828_v55  ;;  %v3762_v10 = vmul.f32 %v13832_v61, %v3758_v27  ;;  %v11177_v55 = vmul.f32 -1.442695, %v3727_v15 }
0x1135   : > { %v3765_v62 = vmul.f32 %v13834_v11, %v13830_v52  ;;  %v3763_v21 = vmul.f32 %v13834_v11, %v3759_v1  ;;  %v11178_v52 = vmul.f32 -1.442695, %v3729_v39 }
0x1136   : > { %3768 = vrot.lane.b32.xlu1 %v3764_v20, %s14687_s7 }
0x1137   : > { %3770 = vrot.lane.b32.xlu0 %v3765_v62, %s14687_s7 }
0x1138   : > { %v3572_v8 = vpop.f32.mrb[24].mxu1 }
0x1139   : > { %v3573_v63 = vadd.f32 %v3572_v8, %v15576_v17  ;;  %v3574_v7 = vpop.f32.mrb[25].mxu1 }
0x113a   : > { %v3575_v56 = vadd.f32 %v3574_v7, %v15582_v51 }
0x113b   : > { %v11172_v36 = vmul.f32 -1.442695, %v3573_v63 }
0x113d   : > { %13835 = vpow2.f32 %v11172_v36 }
0x113e   : > { %13837 = vtanh.f32 %v3575_v56 }
0x1147   : > { %v13836_v4 = vpop.eup %13835 }
0x1148   : > { %v3580_v12 = vadd.f32 1.0, %v13836_v4  ;;  %v13838_v60 = vpop.eup %13837 }
0x114a   : > { %13839 = vrcp.f32 %v3580_v12 }
0x114b   : > { %13841 = vpow2.f32 %v11177_v55 }
0x114c   : > { %13843 = vpow2.f32 %v11178_v52 }
0x1154   : > { %v13840_v34 = vpop.eup %13839 }
0x1155   : > { %v3591_v40 = vmul.f32 %v13840_v34, %v13838_v60  ;;  %v13842_v27 = vpop.eup %13841 }
0x1156   : > { %v13844_v61 = vpop.eup %13843  ;;  %v3750_v1 = vadd.f32 1.0, %v13842_v27 }
0x1157   : > { %3593 = vrot.lane.b32.xlu0 %v3591_v40, %s14687_s7  ;;  %v3751_v11 = vadd.f32 1.0, %v13844_v61  ;;  %v3590_v61 = vmul.f32 %v13840_v34, %v15787_v41 }
0x1158   : > { %13845 = vrcp.f32 %v3750_v1 }
0x1159   : > { %13847 = vrcp.f32 %v3751_v11 }
0x1162   : > { %v13846_v15 = vpop.eup %13845 }
0x1163   : > { %v13848_v39 = vpop.eup %13847 }
0x11a8   : > { %v3769_v20 = vpop.permute.xlu1 %3768 }
0x11a9   : > { %v3771_v62 = vpop.permute.xlu0 %3770  ;;  %v15822_v8 = vadd.f32 %v3769_v20, %v3762_v10 }
0x11aa   : > { %v15824_v63 = vadd.f32 %v3771_v62, %v3763_v21  ;;  %v11173_v21 = vmul.f32 -1.442695, %v3575_v56 }
0x11ab   : > { %13849 = vtanh.f32 %v15822_v8 }
0x11ac   : > { %13851 = vtanh.f32 %v15824_v63 }
0x11ad   : > { %13853 = vpow2.f32 %v11173_v21 }
0x11b5   : > { %v13850_v7 = vpop.eup %13849 }
0x11b6   : > { %v13852_v36 = vpop.eup %13851  ;;  %v3778_v4 = vmul.f32 %v13850_v7, %v13846_v15 }
0x11b7   : > { %v3779_v12 = vmul.f32 %v13852_v36, %v13848_v39  ;;  %v13854_v1 = vpop.eup %13853 }
0x11b8   : > { %v3926_v60 = vrot.slane %v3778_v4, 5  ;;  %v3587_v20 = vadd.f32 1.0, %v13854_v1 }
0x11b9   : > { %v3927_v40 = vrot.slane %v3779_v12, 4  ;;  %v3782_v55 = vrot.slane %v3779_v12, 7 }
0x11bb   : > { %v3928_v10 = vsel %vm2355_vm2, %v3927_v40, %v3926_v60  ;;  %v3784_v52 = vsel %vm3783_vm8, %v3782_v55, %v3778_v4 }
0x11bc   : > { %3929 = vrot.lane.b32.xlu1 %v3928_v10, %s14687_s7 }
0x11c0   : > { %3785 = vrot.lane.b32.xlu1 %v3784_v52, %s14687_s7 }
0x11c9   : > { %v3594_v27 = vpop.permute.xlu0 %3593 }
0x11ca   : > { %v15832_v11 = vadd.f32 %v3594_v27, %v3590_v61 }
0x11cc   : > { %13855 = vtanh.f32 %v15832_v11 }
0x11cd   : > { %13857 = vrcp.f32 %v3587_v20 }
0x11d6   : > { %v13856_v62 = vpop.eup %13855 }
0x11d7   : > { %v13858_v15 = vpop.eup %13857 }
0x11d8   : > { %v15835_v39 = vmul.f32 %v13858_v15, %v13856_v62 }
0x11da   : > { %v3788_v41 = vrot.slane %v15835_v39, 3 }
0x122e   : > { %v3930_v7 = vpop.permute.xlu1 %3929 }
0x122f   : > { %11181 = vmatmul.mubr.msk.f32.vlgmr.msra.gmra.mrb[26].mxu1 %vm2221_vm3, %v3930_v7 }
0x1230   : > { %12720 = vmatpush1.bf16.msra.mxu1 %v15461_v28  ;;  %4146 = vmatprep.mubr.f32.mxu1 %v14686_v9 }
0x1231   : > { %12722 = vmatprep.subr.bf16.mxu1 %v15463_v29 }
0x1232   : > { %v3786_v56 = vpop.permute.xlu1 %3785 }
0x1233   : > { %v3790_v34 = vsel %vm2221_vm3, %v3786_v56, %v3788_v41 }
0x1234   : > { %v3792_v36 = vrot.slane %v3790_v34, 5  ;;  %12724 = vmatpush1.bf16.msra.mxu1 %v15472_v37  ;;  %v4046_v34 = vrot.slane %v15822_v8, 7 }
0x1235   : > { %12726 = vmatprep.subr.bf16.mxu1 %v15475_v38 }
0x1236   : > { %3859 = vmatmul.mubr.f32.vlgmr.msra.gmra.mrb[24].mxu0 %v3792_v36 }
0x1237   : > { %12752 = vmatpush1.bf16.msra.mxu0 %v15373_v16  ;;  %4285 = vmatprep.mubr.f32.mxu0 %v14686_v9 }
0x1238   : > { %12728 = vmatpush1.bf16.msra.mxu1 %v15482_v46  ;;  %12754 = vmatprep.subr.bf16.mxu0 %v15375_v18 }
0x1239   : > { %12730 = vmatprep.subr.bf16.mxu1 %v15485_v48 }
0x123b   : > { %12756 = vmatpush1.bf16.msra.mxu0 %v15380_v23 }
0x123c   : > { %12732 = vmatpush1.bf16.msra.mxu1 %v15492_v57  ;;  %12758 = vmatprep.subr.bf16.mxu0 %v15383_v26 }
0x123d   : > { %12734 = vmatprep.subr.bf16.mxu1 %v15495_v58 }
0x123f   : > { %12760 = vmatpush1.bf16.msra.mxu0 %v15388_v31 }
0x1240   : > { %12736 = vmatpush1.bf16.msra.mxu1 %v15502_v3  ;;  %12762 = vmatprep.subr.bf16.mxu0 %v15392_v32 }
0x1241   : > { %12738 = vmatprep.subr.bf16.mxu1 %v15505_v5 }
0x1243   : > { %12764 = vmatpush1.bf16.msra.mxu0 %v15395_v35 }
0x1244   : > { %12740 = vmatpush1.bf16.msra.mxu1 %v15512_v13  ;;  %12766 = vmatprep.subr.bf16.mxu0 %v15456_v22 }
0x1245   : > { %12742 = vmatprep.subr.bf16.mxu1 %v15515_v14 }
0x1248   : > { %12744 = vmatpush1.bf16.msra.mxu1 %v15522_v24 }
0x1249   : > { %12746 = vmatprep.subr.bf16.mxu1 %v15525_v25 }
0x124c   : > { %12748 = vmatpush1.bf16.msra.mxu1 %v15530_v33 }
0x1302   : > { %v3999_v16 = vpop.f32.mrb[26].mxu1 }
0x1303   : > { %v4006_v18 = vrot.slane %v3999_v16, 2  ;;  %v4008_v23 = vrot.slane %v3999_v16, 3  ;;  %v4001_v26 = vpop.f32.mrb[27].mxu1  ;;  %v4047_v16 = vrot.slane %v15824_v63, 7 }
0x1304   : > { %v4007_v40 = vrot.slane %v4001_v26, 2  ;;  %v4009_v10 = vrot.slane %v4001_v26, 3 }
0x1305   : > { %v4014_v31 = vadd.f32 %v4006_v18, %v15423_v53  ;;  %v4016_v32 = vadd.f32 %v4008_v23, %v15425_v54 }
0x1306   : > { %v4015_v52 = vadd.f32 %v4007_v40, %v15433_v0  ;;  %v4017_v21 = vadd.f32 %v4009_v10, %v15435_v2 }
0x1307   : > { %v11182_v35 = vmul.f32 -1.442695, %v4014_v31  ;;  %v11183_v4 = vmul.f32 -1.442695, %v4016_v32 }
0x1309   : > { %13859 = vpow2.f32 %v11182_v35  ;;  %v3860_v22 = vpop.f32.mrb[24].mxu0 }
0x130a   : > { %13861 = vpow2.f32 %v11183_v4  ;;  %v3861_v12 = vadd.f32 %v3860_v22, %v15576_v17  ;;  %v3862_v60 = vpop.f32.mrb[25].mxu0 }
0x130b   : > { %v3863_v62 = vadd.f32 %v3862_v60, %v15582_v51  ;;  %v11185_v60 = vmul.f32 -1.442695, %v4017_v21 }
0x130c   : > { %v11179_v55 = vmul.f32 -1.442695, %v3861_v12  ;;  %v11184_v12 = vmul.f32 -1.442695, %v4015_v52 }
0x130e   : > { %13863 = vpow2.f32 %v11179_v55 }
0x130f   : > { %13865 = vtanh.f32 %v4015_v52 }
0x1310   : > { %13867 = vtanh.f32 %v4017_v21 }
0x1313   : > { %v13860_v27 = vpop.eup %13859 }
0x1314   : > { %v13862_v61 = vpop.eup %13861  ;;  %v4024_v1 = vadd.f32 1.0, %v13860_v27 }
0x1315   : > { %v4025_v20 = vadd.f32 1.0, %v13862_v61 }
0x1316   : > { %13869 = vrcp.f32 %v4024_v1 }
0x1317   : > { %13871 = vrcp.f32 %v4025_v20 }
0x1318   : > { %v13864_v15 = vpop.eup %13863  ;;  %13873 = vtanh.f32 %v3863_v62 }
0x1319   : > { %v3868_v7 = vadd.f32 1.0, %v13864_v15  ;;  %v13866_v41 = vpop.eup %13865 }
0x131a   : > { %v13868_v56 = vpop.eup %13867 }
0x131b   : > { %13875 = vrcp.f32 %v3868_v7 }
0x131c   : > { %13877 = vpow2.f32 %v11184_v12 }
0x131d   : > { %13879 = vpow2.f32 %v11185_v60 }
0x1320   : > { %v13870_v36 = vpop.eup %13869 }
0x1321   : > { %v13872_v18 = vpop.eup %13871  ;;  %v4052_v23 = vmul.f32 %v13870_v36, %v13866_v41  ;;  %v4050_v26 = vmul.f32 %v13870_v36, %v4046_v34 }
0x1322   : > { %v4053_v31 = vmul.f32 %v13872_v18, %v13868_v56  ;;  %v4051_v32 = vmul.f32 %v13872_v18, %v4047_v16  ;;  %v13874_v35 = vpop.eup %13873 }
0x1323   : > { %4056 = vrot.lane.b32.xlu0 %v4052_v23, %s14687_s7  ;;  %v11180_v23 = vmul.f32 -1.442695, %v3863_v62 }
0x1324   : > { %4058 = vrot.lane.b32.xlu1 %v4053_v31, %s14687_s7 }
0x1325   : > { %v13876_v4 = vpop.eup %13875 }
0x1326   : > { %v3879_v22 = vmul.f32 %v13876_v4, %v13874_v35  ;;  %v13878_v8 = vpop.eup %13877  ;;  %v3878_v31 = vmul.f32 %v13876_v4, %v15832_v11 }
0x1327   : > { %v13880_v63 = vpop.eup %13879  ;;  %v4038_v40 = vadd.f32 1.0, %v13878_v8 }
0x1328   : > { %3881 = vrot.lane.b32.xlu1 %v3879_v22, %s14687_s7  ;;  %v4039_v55 = vadd.f32 1.0, %v13880_v63 }
0x1329   : > { %13881 = vrcp.f32 %v4038_v40 }
0x132a   : > { %13883 = vrcp.f32 %v4039_v55 }
0x1333   : > { %v13882_v52 = vpop.eup %13881 }
0x1334   : > { %v13884_v21 = vpop.eup %13883 }
0x1395   : > { %v4057_v10 = vpop.permute.xlu0 %4056 }
0x1396   : > { %v4059_v27 = vpop.permute.xlu1 %4058  ;;  %v15876_v61 = vadd.f32 %v4057_v10, %v4050_v26 }
0x1397   : > { %v15878_v1 = vadd.f32 %v4059_v27, %v4051_v32 }
0x1398   : > { %13885 = vtanh.f32 %v15876_v61 }
0x1399   : > { %13887 = vtanh.f32 %v15878_v1 }
0x139a   : > { %13889 = vpow2.f32 %v11180_v23  ;;  %v3882_v26 = vpop.permute.xlu1 %3881 }
0x139b   : > { %v15886_v35 = vadd.f32 %v3882_v26, %v3878_v31 }
0x139d   : > { %13891 = vtanh.f32 %v15886_v35 }
0x13a2   : > { %v13886_v20 = vpop.eup %13885 }
0x13a3   : > { %v13888_v15 = vpop.eup %13887  ;;  %v4066_v7 = vmul.f32 %v13886_v20, %v13882_v52 }
0x13a4   : > { %v4067_v41 = vmul.f32 %v13888_v15, %v13884_v21  ;;  %v13890_v32 = vpop.eup %13889 }
0x13a5   : > { %v4214_v56 = vrot.slane %v4066_v7, 6  ;;  %v3875_v22 = vadd.f32 1.0, %v13890_v32  ;;  %v4510_v32 = vld [vmem:[%s15931_s20] sm:$0xff] }
0x13a6   : > { %v4215_v34 = vrot.slane %v4067_v41, 5  ;;  %v4070_v36 = vrot.slane %v4067_v41, 7  ;;  %v4335_v41 = vrot.slane %v15878_v1, 7  ;;  %v4514_v1 = vld [vmem:[%s15931_s20 + $0x20] sm:$0xff] }
0x13a7   : > { %13893 = vrcp.f32 %v3875_v22  ;;  %v13892_v12 = vpop.eup %13891 }
0x13a8   : > { %v4216_v16 = vsel %vm2355_vm2, %v4215_v34, %v4214_v56  ;;  %v4072_v18 = vsel %vm4071_vm9, %v4070_v36, %v4066_v7 }
0x13a9   : > { %4217 = vrot.lane.b32.xlu0 %v4216_v16, %s14687_s7 }
0x13ad   : > { %4073 = vrot.lane.b32.xlu0 %v4072_v18, %s14687_s7 }
0x13b1   : > { %v13894_v60 = vpop.eup %13893 }
0x13b2   : > { %v15889_v8 = vmul.f32 %v13894_v60, %v13892_v12  ;;  %v4513_v12 = vld [vmem:[%s15931_s20 + $0x18] sm:$0xff] }
0x13b3   : > { %v4517_v60 = vld [vmem:[%s15931_s20 + $0x38] sm:$0xff] }
0x13b4   : > { %v4076_v11 = vrot.slane %v15889_v8, 2 }
0x141b   : > { %v4218_v63 = vpop.permute.xlu0 %4217 }
0x141c   : > { %11188 = vmatmul.mubr.msk.f32.vlgmr.msra.gmra.mrb[26].mxu0 %vm2221_vm3, %v4218_v63  ;;  %v4520_v63 = vld [vmem:[%s15931_s20 + $0x50] sm:$0xff] }
0x141d   : > { %12768 = vmatpush1.bf16.msra.mxu0 %v15461_v28  ;;  %4440 = vmatprep.mubr.f32.mxu0 %v14686_v9 }
0x141e   : > { %12770 = vmatprep.subr.bf16.mxu0 %v15463_v29 }
0x141f   : > { %v4074_v62 = vpop.permute.xlu0 %4073 }
0x1420   : > { %v4078_v4 = vsel %vm2221_vm3, %v4074_v62, %v4076_v11  ;;  %v12799_v11 = vpack.c.bf16 %v4513_v12, %v4510_v32  ;;  %v12801_v62 = vpack.c.bf16 %v4520_v63, %v4517_v60  ;;  %v2036_v60 = vld [vmem:[%s16947_s1] sm:$0xff] }
0x1421   : > { %v4080_v40 = vrot.slane %v4078_v4, 6  ;;  %12772 = vmatpush1.bf16.msra.mxu0 %v15472_v37  ;;  %v4516_v4 = vld [vmem:[%s15931_s20 + $0x30] sm:$0xff] }
0x1422   : > { %12774 = vmatprep.subr.bf16.mxu0 %v15475_v38 }
0x1423   : > { %4147 = vmatmul.mubr.f32.vlgmr.msra.gmra.mrb[28].mxu1 %v4080_v40  ;;  %v4519_v40 = vld [vmem:[%s15931_s20 + $0x48] sm:$0xff] }
0x1424   : > { %4627 = vmatprep.mubr.f32.mxu1 %v14686_v9 }
0x1425   : > { %12776 = vmatpush1.bf16.msra.mxu0 %v15482_v46 }
0x1426   : > { %12778 = vmatprep.subr.bf16.mxu0 %v15485_v48 }
0x1429   : > { %12780 = vmatpush1.bf16.msra.mxu0 %v15492_v57 }
0x142a   : > { %12782 = vmatprep.subr.bf16.mxu0 %v15495_v58 }
0x142d   : > { %12784 = vmatpush1.bf16.msra.mxu0 %v15502_v3 }
0x142e   : > { %12786 = vmatprep.subr.bf16.mxu0 %v15505_v5 }
0x1431   : > { %12788 = vmatpush1.bf16.msra.mxu0 %v15512_v13 }
0x1432   : > { %12790 = vmatprep.subr.bf16.mxu0 %v15515_v14 }
0x1435   : > { %12792 = vmatpush1.bf16.msra.mxu0 %v15522_v24 }
0x1436   : > { %12794 = vmatprep.subr.bf16.mxu0 %v15525_v25 }
0x1439   : > { %12796 = vmatpush1.bf16.msra.mxu0 %v15530_v33 }
0x14ef   : > { %v4287_v28 = vpop.f32.mrb[26].mxu0 }
0x14f0   : > { %v4294_v29 = vrot.slane %v4287_v28, 1  ;;  %v4296_v37 = vrot.slane %v4287_v28, 2  ;;  %v4289_v38 = vpop.f32.mrb[27].mxu0  ;;  %v4523_v28 = vld [vmem:[%s15931_s20 + $0x68] sm:$0xff] }
0x14f1   : > { %v4295_v14 = vrot.slane %v4289_v38, 1  ;;  %v4297_v25 = vrot.slane %v4289_v38, 2 }
0x14f2   : > { %v4302_v46 = vadd.f32 %v4294_v29, %v15423_v53  ;;  %v4304_v48 = vadd.f32 %v4296_v37, %v15425_v54  ;;  %v4526_v29 = vld [vmem:[%s15931_s20 + $0x80] sm:$0xff]  ;;  %v12803_v37 = vpack.c.bf16 %v4519_v40, %v4516_v4 }
0x14f3   : > { %v4303_v33 = vadd.f32 %v4295_v14, %v15433_v0  ;;  %v4305_v55 = vadd.f32 %v4297_v25, %v15435_v2  ;;  %v4334_v0 = vrot.slane %v15876_v61, 7  ;;  %v4511_v61 = vld [vmem:[%s15931_s20 + $0x8] sm:$0xff]  ;;  %v12805_v38 = vpack.c.bf16 %v4526_v29, %v4523_v28 }
0x14f4   : > { %v11189_v57 = vmul.f32 -1.442695, %v4302_v46  ;;  %v11190_v58 = vmul.f32 -1.442695, %v4304_v48  ;;  %v12797_v22 = vpack.c.bf16 %v4514_v1, %v4511_v61  ;;  %v4522_v46 = vld [vmem:[%s15931_s20 + $0x60] sm:$0xff]  ;;  %v4525_v48 = vld [vmem:[%s15931_s20 + $0x78] sm:$0xff] }
0x14f6   : > { %13895 = vpow2.f32 %v11189_v57  ;;  %v4148_v3 = vpop.f32.mrb[28].mxu1  ;;  %12798 = vmatprep.subr.bf16.mxu1 %v12797_v22  ;;  %v12807_v57 = vpack.c.bf16 %v4525_v48, %v4522_v46 }
0x14f7   : > { %13897 = vpow2.f32 %v11190_v58  ;;  %v4149_v5 = vadd.f32 %v4148_v3, %v15576_v17  ;;  %v4150_v13 = vpop.f32.mrb[29].mxu1  ;;  %12800 = vmatpush1.bf16.msra.mxu1 %v12799_v11  ;;  %v11191_v58 = vmul.f32 -1.442695, %v4303_v33  ;;  %v11192_v3 = vmul.f32 -1.442695, %v4305_v55 }
0x14f8   : > { %v4151_v52 = vadd.f32 %v4150_v13, %v15582_v51  ;;  %12802 = vmatprep.subr.bf16.mxu1 %v12801_v62 }
0x14f9   : > { %v11186_v24 = vmul.f32 -1.442695, %v4149_v5 }
0x14fa   : > { %v11187_v14 = vmul.f32 -1.442695, %v4151_v52 }
0x14fb   : > { %13899 = vpow2.f32 %v11186_v24  ;;  %12804 = vmatpush1.bf16.msra.mxu1 %v12803_v37 }
0x14fc   : > { %13901 = vtanh.f32 %v4303_v33  ;;  %12806 = vmatprep.subr.bf16.mxu1 %v12805_v38  ;;  %v14688_v33 = vmov 1966171168  }
0x14fd   : > { %13903 = vtanh.f32 %v4305_v55  ;;  %v2456_v55 = vunpack.c.l.s4 %v14688_v33  ;;  %v2038_v33 = vld [vmem:[%s16947_s1 + $0x10] sm:$0xff] }
0x14ff   : > { %12808 = vmatpush1.bf16.msra.mxu1 %v12807_v57 }
0x1500   : > { %v13896_v10 = vpop.eup %13895 }
0x1501   : > { %v13898_v53 = vpop.eup %13897  ;;  %v4312_v27 = vadd.f32 1.0, %v13896_v10 }
0x1502   : > { %v4313_v54 = vadd.f32 1.0, %v13898_v53 }
0x1503   : > { %13905 = vrcp.f32 %v4312_v27 }
0x1504   : > { %13907 = vrcp.f32 %v4313_v54 }
0x1505   : > { %v13900_v21 = vpop.eup %13899  ;;  %13909 = vtanh.f32 %v4151_v52 }
0x1506   : > { %v4156_v20 = vadd.f32 1.0, %v13900_v21  ;;  %v13902_v15 = vpop.eup %13901 }
0x1507   : > { %v13904_v7 = vpop.eup %13903 }
0x1508   : > { %13911 = vrcp.f32 %v4156_v20  ;;  %v4529_v20 = vld [vmem:[%s15931_s20 + $0x98] sm:$0xff] }
0x1509   : > { %13913 = vpow2.f32 %v11191_v58 }
0x150a   : > { %13915 = vpow2.f32 %v11192_v3 }
0x150b   : > { %13917 = vpow2.f32 %v11187_v14 }
0x150d   : > { %v13906_v2 = vpop.eup %13905 }
0x150e   : > { %v13908_v56 = vpop.eup %13907  ;;  %v4340_v34 = vmul.f32 %v13906_v2, %v13902_v15  ;;  %v4338_v36 = vmul.f32 %v13906_v2, %v4334_v0  ;;  %v4532_v15 = vld [vmem:[%s15931_s20 + $0xb0] sm:$0xff] }
0x150f   : > { %v4341_v16 = vmul.f32 %v13908_v56, %v13904_v7  ;;  %v4339_v18 = vmul.f32 %v13908_v56, %v4335_v41  ;;  %v13910_v23 = vpop.eup %13909  ;;  %v12809_v0 = vpack.c.bf16 %v4532_v15, %v4529_v20  ;;  %v4528_v2 = vld [vmem:[%s15931_s20 + $0x90] sm:$0xff]  ;;  %v4531_v41 = vld [vmem:[%s15931_s20 + $0xa8] sm:$0xff] }
0x1510   : > { %4344 = vrot.lane.b32.xlu0 %v4340_v34, %s14687_s7  ;;  %v12811_v34 = vpack.c.bf16 %v4531_v41, %v4528_v2 }
0x1511   : > { %4346 = vrot.lane.b32.xlu1 %v4341_v16, %s14687_s7  ;;  %v2457_v16 = vunpack.c.0.s8 %v2456_v55  ;;  %12810 = vmatprep.subr.bf16.mxu1 %v12809_v0  ;;  %v14043_v55 = vld [vmem:[#allocation13] ss:$0 sm:$0xff] }
0x1512   : > { %v13912_v26 = vpop.eup %13911  ;;  %12812 = vmatpush1.bf16.msra.mxu1 %v12811_v34 }
0x1513   : > { %v4167_v31 = vmul.f32 %v13912_v26, %v13910_v23  ;;  %v13914_v5 = vpop.eup %13913  ;;  %v4166_v52 = vmul.f32 %v13912_v26, %v15886_v35  ;;  %v15954_v26 = vsub.s32 %v2457_v16, %v15413_v45 }
0x1514   : > { %v13916_v13 = vpop.eup %13915  ;;  %v4326_v24 = vadd.f32 1.0, %v13914_v5 }
0x1515   : > { %4169 = vrot.lane.b32.xlu1 %v4167_v31, %s14687_s7  ;;  %v4327_v25 = vadd.f32 1.0, %v13916_v13  ;;  %v13918_v7 = vpop.eup %13917  ;;  %v2461_v12 = vrot.slane %v15647_v6, %v15954_v26  ;;  %v3030_v11 = vrot.slane %v15743_v19, %v15954_v26  ;;  %v3606_v6 = vrot.slane %v15835_v39, %v15954_v26 }
0x1516   : > { %13919 = vrcp.f32 %v4326_v24  ;;  %v4163_v23 = vadd.f32 1.0, %v13918_v7 }
0x1517   : > { %13921 = vrcp.f32 %v4327_v25  ;;  %v2469_v63 = vrot.slane %v2461_v12, %v15954_v26  ;;  %v3038_v28 = vrot.slane %v3030_v11, %v15954_v26  ;;  %v3614_v38 = vrot.slane %v3606_v6, %v15954_v26 }
0x1518   : > { %v2462_v57 = vcombine.high %v2461_v12, %v2461_v12  ;;  %v3031_v3 = vcombine.high %v3030_v11, %v3030_v11  ;;  %v3607_v14 = vcombine.high %v3606_v6, %v3606_v6 }
0x1519   : > { %v2480_v40 = vrot.slane %v2469_v63, %v15420_v50  ;;  %v3049_v37 = vrot.slane %v3038_v28, %v15420_v50  ;;  %v3625_v46 = vrot.slane %v3614_v38, %v15420_v50 }
0x151a   : > { %v2476_v58 = vrot.slane %v2462_v57, %v15954_v26  ;;  %v3045_v13 = vrot.slane %v3031_v3, %v15954_v26  ;;  %v3621_v25 = vrot.slane %v3607_v14, %v15954_v26 }
0x151c   : > { %v2484_v5 = vrot.slane %v2476_v58, %v15420_v50  ;;  %v3053_v24 = vrot.slane %v3045_v13, %v15420_v50 }
0x1582   : > { %v4345_v10 = vpop.permute.xlu0 %4344 }
0x1583   : > { %v4350_v53 = vadd.f32 %v4345_v10, %v4338_v36  ;;  %v4347_v27 = vpop.permute.xlu1 %4346  ;;  %v13920_v36 = vpop.eup %13919 }
0x1584   : > { %v4351_v54 = vadd.f32 %v4347_v27, %v4339_v18  ;;  %v13922_v18 = vpop.eup %13921 }
0x1585   : > { %13923 = vtanh.f32 %v4350_v53  ;;  %v3629_v53 = vrot.slane %v3621_v25, %v15420_v50  ;;  %v4746_v25 = vld [vmem:[%s16036_s2] sm:$0xff] }
0x1586   : > { %13925 = vtanh.f32 %v4351_v54 }
0x1587   : > { %v4170_v21 = vpop.permute.xlu1 %4169 }
0x1588   : > { %v15950_v56 = vadd.f32 %v4170_v21, %v4166_v52  ;;  %v2014_v21 = vadd.f32 %v14043_v55, %v15411_v44 }
0x158a   : > { %13927 = vtanh.f32 %v15950_v56  ;;  %v2032_v0 = vmax.f32 %v2014_v21, 0.0 }
0x158b   : > { %13929 = vrcp.f32 %v4163_v23 }
0x158f   : > { %v13924_v31 = vpop.eup %13923 }
0x1590   : > { %v13926_v61 = vpop.eup %13925  ;;  %v4354_v35 = vmul.f32 %v13924_v31, %v13920_v36 }
0x1591   : > { %v4355_v1 = vmul.f32 %v13926_v61, %v13922_v18 }
0x1593   : > { %v4358_v32 = vrot.slane %v4355_v1, 7 }
0x1594   : > { %v13928_v62 = vpop.eup %13927 }
0x1595   : > { %v13440_v22 = vpack.i.bf16 %v4358_v32, %v4354_v35  ;;  %v13930_v4 = vpop.eup %13929 }
0x1596   : > { %v4174_v29 = vmul.f32 %v13930_v4, %v13928_v62 }
0x1597   : > { %13441 = vrot.lane.b32.xlu0 %v13440_v22, %s14687_s7 }
0x1598   : > { %v4182_v19 = vrot.slane %v4174_v29, %v15954_v26  ;;  %v4365_v20 = vrot.slane %v4174_v29, 1 }
0x159a   : > { %v4190_v48 = vrot.slane %v4182_v19, %v15954_v26  ;;  %v4183_v10 = vcombine.high %v4182_v19, %v4182_v19 }
0x159b   : > { %2044 = vrot.lane.b32.xlu0 %v2036_v60, %s14689_s26 }
0x159c   : > { %v4201_v39 = vrot.slane %v4190_v48, %v15420_v50  ;;  %v4197_v27 = vrot.slane %v4183_v10, %v15954_v26  ;;  %v2037_v48 = vld [vmem:[%s16947_s1 + $0x8] sm:$0xff] }
0x159d   : > { %v4747_v10 = vld [vmem:[%s16036_s2 + $0x8] sm:$0xff] }
0x159e   : > { %v4205_v54 = vrot.slane %v4197_v27, %v15420_v50  ;;  %v12829_v55 = vpack.c.bf16 %v4747_v10, %v4746_v25 }
0x159f   : > { %2485 = vrot.lane.b32.xlu0 %v2480_v40, %s14687_s7 }
0x15a0   : > { %12830 = vmatprep.subr.bf16.mxu0 %v12829_v55 }
0x15a3   : > { %3054 = vrot.lane.b32.xlu0 %v3049_v37, %s14687_s7 }
0x15a7   : > { %3630 = vrot.lane.b32.xlu0 %v3625_v46, %s14687_s7  ;;  %v2743_v46 = vrot.slane %v15696_v30, %v15954_v26  ;;  %v3894_v30 = vrot.slane %v15889_v8, %v15954_v26  ;;  %v4512_v8 = vld [vmem:[%s15931_s20 + $0x10] sm:$0xff] }
0x15a9   : > { %v3902_v3 = vrot.slane %v3894_v30, %v15954_v26 }
0x15ab   : > { %4206 = vrot.lane.b32.xlu0 %v4201_v39, %s14687_s7 }
0x15af   : > { %2487 = vrot.lane.b32.xlu0 %v2484_v5, %s14687_s7  ;;  %v2744_v5 = vcombine.high %v2743_v46, %v2743_v46 }
0x15b1   : > { %v2758_v13 = vrot.slane %v2744_v5, %v15954_v26 }
0x15b3   : > { %3056 = vrot.lane.b32.xlu0 %v3053_v24, %s14687_s7  ;;  %v4515_v24 = vld [vmem:[%s15931_s20 + $0x28] sm:$0xff]  ;;  %v2766_v27 = vrot.slane %v2758_v13, %v15420_v50 }
0x15b7   : > { %3632 = vrot.lane.b32.xlu0 %v3629_v53, %s14687_s7  ;;  %v12813_v53 = vpack.c.bf16 %v4515_v24, %v4512_v8  ;;  %v2039_v24 = vld [vmem:[%s16947_s1 + $0x18] sm:$0xff] }
0x15b9   : > { %12814 = vmatprep.subr.bf16.mxu1 %v12813_v53 }
0x15bb   : > { %4208 = vrot.lane.b32.xlu0 %v4205_v54, %s14687_s7 }
0x15bf   : > { %2048 = vrot.lane.b32.xlu0 %v2038_v33, %s14689_s26  ;;  %v3895_v33 = vcombine.high %v3894_v30, %v3894_v30 }
0x1609   : > { %v13442_v52 = vpop.permute.xlu0 %13441 }
0x160a   : > { %v13444_v15 = vunpack.i.h.bf16 %v13442_v52  ;;  %v13443_v7 = vunpack.i.l.bf16 %v13442_v52  ;;  %v3909_v52 = vrot.slane %v3895_v33, %v15954_v26 }
0x160c   : > { %v4367_v2 = vsel %vm2221_vm3, %v13443_v7, %v4365_v20  ;;  %v4368_v41 = vsel %vm2221_vm3, %v13444_v15, %v4365_v20  ;;  %v3917_v20 = vrot.slane %v3909_v52, %v15420_v50 }
0x160d   : > { %v2045_v34 = vpop.permute.xlu0 %2044  ;;  %v4372_v36 = vrot.slane %v4367_v2, 7  ;;  %v4373_v16 = vrot.slane %v4368_v41, 7 }
0x160e   : > { %v15996_v18 = vsel %vm1433_vm0, %v2032_v0, %v2045_v34 }
0x160f   : > { %11195 = vmatmul.mubr.msk.f32.vlgmr.msra.gmra.mrb[30].mxu1 %vm2221_vm3, %v15996_v18  ;;  %v4374_v44 = vsel %vm4371_vm10, %v4372_v36, %v4373_v16  ;;  %v2033_v36 = vmax.f32 %v15409_v43, 0.0 }
0x1610   : > { %4441 = vmatmul.mubr.f32.vlgmr.msra.gmra.mrb[28].mxu0 %v4374_v44  ;;  %4633 = vmatprep.mubr.f32.mxu1 %v14686_v9 }
0x1611   : > { %v2486_v23 = vpop.permute.xlu0 %2485  ;;  %12832 = vmatpush3.bf16.msra.mxu0 %v12829_v55  ;;  %12816 = vmatpush3.bf16.msra.mxu1 %v12813_v53 }
0x1612   : > { %2492 = vst.msk [vmem:[#allocation2] sm:$0x1] %vm2491_vm11, %v2486_v23 }
0x1615   : > { %v3055_v31 = vpop.permute.xlu0 %3054 }
0x1616   : > { %3060 = vst.msk [vmem:[#allocation2 + $0x2] sm:$0x1] %vm2491_vm11, %v3055_v31  ;;  %v2034_v31 = vmax.f32 %v15417_v49, 0.0 }
0x1619   : > { %v3631_v61 = vpop.permute.xlu0 %3630 }
0x161a   : > { %3636 = vst.msk [vmem:[#allocation2 + $0x4] sm:$0x1] %vm2491_vm11, %v3631_v61  ;;  %v4748_v61 = vld [vmem:[%s16036_s2 + $0x10] sm:$0xff] }
0x161d   : > { %v4207_v35 = vpop.permute.xlu0 %4206 }
0x161e   : > { %4212 = vst.msk [vmem:[#allocation2 + $0x6] sm:$0x1] %vm2491_vm11, %v4207_v35  ;;  %v4749_v35 = vld [vmem:[%s16036_s2 + $0x18] sm:$0xff] }
0x1621   : > { %v2488_v1 = vpop.permute.xlu0 %2487 }
0x1622   : > { %2493 = vst.msk [vmem:[#allocation2 + $0x8] sm:$0x1] %vm2491_vm11, %v2488_v1  ;;  %v12833_v1 = vpack.c.bf16 %v4749_v35, %v4748_v61 }
0x1624   : > { %12834 = vmatprep.subr.bf16.mxu0 %v12833_v1 }
0x1625   : > { %v3057_v32 = vpop.permute.xlu0 %3056  ;;  %12836 = vmatpush3.bf16.msra.mxu0 %v12833_v1 }
0x1626   : > { %3061 = vst.msk [vmem:[#allocation2 + $0xa] sm:$0x1] %vm2491_vm11, %v3057_v32  ;;  %v4518_v32 = vld [vmem:[%s15931_s20 + $0x40] sm:$0xff] }
0x1629   : > { %v3633_v22 = vpop.permute.xlu0 %3632 }
0x162a   : > { %3637 = vst.msk [vmem:[#allocation2 + $0xc] sm:$0x1] %vm2491_vm11, %v3633_v22  ;;  %v4521_v22 = vld [vmem:[%s15931_s20 + $0x58] sm:$0xff] }
0x162b   : > { %v12817_v49 = vpack.c.bf16 %v4521_v22, %v4518_v32 }
0x162d   : > { %v4209_v12 = vpop.permute.xlu0 %4208  ;;  %12818 = vmatprep.subr.bf16.mxu1 %v12817_v49 }
0x162e   : > { %4213 = vst.msk [vmem:[#allocation2 + $0xe] sm:$0x1] %vm2491_vm11, %v4209_v12  ;;  %12820 = vmatpush3.bf16.msra.mxu1 %v12817_v49  ;;  %v11203_v49 = vld [vmem:[%s15294_s0] ss:$0 sm:$0xff] }
0x1631   : > { %v2049_v23 = vpop.permute.xlu0 %2048 }
0x1632   : > { %v16062_v43 = vsel %vm1433_vm0, %v2034_v31, %v2049_v23  ;;  %v4546_v31 = vsub.s32 2, %v15413_v45 }
0x16e2   : > { %v16009_v60 = vpop.f32.mrb[30].mxu1 }
0x16e3   : > { %v4442_v63 = vpop.f32.mrb[28].mxu0  ;;  %v16011_v11 = vpop.f32.mrb[31].mxu1 }
0x16e4   : > { %v4443_v62 = vadd.f32 %v4442_v63, %v15576_v17  ;;  %v4444_v4 = vpop.f32.mrb[29].mxu0  ;;  %v2751_v17 = vrot.slane %v2743_v46, %v15954_v26 }
0x16e5   : > { %v4445_v28 = vadd.f32 %v4444_v4, %v15582_v51  ;;  %v3318_v51 = vrot.slane %v15796_v42, %v15954_v26  ;;  %v3913_v42 = vrot.slane %v3902_v3, %v15420_v50  ;;  %v4751_v4 = vld [vmem:[%s16036_s2 + $0x28] sm:$0xff] }
0x16e6   : > { %v11193_v40 = vmul.f32 -1.442695, %v4443_v62  ;;  %v2762_v57 = vrot.slane %v2751_v17, %v15420_v50  ;;  %v4750_v62 = vld [vmem:[%s16036_s2 + $0x20] sm:$0xff]  ;;  %v4753_v17 = vld [vmem:[%s16036_s2 + $0x38] sm:$0xff] }
0x16e7   : > { %v3326_v39 = vrot.slane %v3318_v51, %v15954_v26  ;;  %v3319_v14 = vcombine.high %v3318_v51, %v3318_v51  ;;  %v11194_v15 = vmul.f32 -1.442695, %v4445_v28 }
0x16e8   : > { %13931 = vpow2.f32 %v11193_v40 }
0x16e9   : > { %13933 = vtanh.f32 %v4445_v28  ;;  %v3337_v58 = vrot.slane %v3326_v39, %v15420_v50  ;;  %v3333_v54 = vrot.slane %v3319_v14, %v15954_v26  ;;  %v12837_v28 = vpack.c.bf16 %v4751_v4, %v4750_v62  ;;  %v4533_v39 = vld [vmem:[%s15931_s20 + $0xb8] sm:$0xff] }
0x16eb   : > { %v3341_v21 = vrot.slane %v3333_v54, %v15420_v50  ;;  %12838 = vmatprep.subr.bf16.mxu0 %v12837_v28 }
0x16ec   : > { %12840 = vmatpush3.bf16.msra.mxu0 %v12837_v28 }
0x16f2   : > { %v13932_v6 = vpop.eup %13931 }
0x16f3   : > { %v4450_v29 = vadd.f32 1.0, %v13932_v6  ;;  %v13934_v37 = vpop.eup %13933  ;;  %v4524_v6 = vld [vmem:[%s15931_s20 + $0x70] sm:$0xff] }
0x16f5   : > { %13935 = vrcp.f32 %v4450_v29  ;;  %v4527_v29 = vld [vmem:[%s15931_s20 + $0x88] sm:$0xff] }
0x16f6   : > { %13937 = vpow2.f32 %v11194_v15 }
0x16ff   : > { %v13936_v38 = vpop.eup %13935 }
0x1700   : > { %v4461_v19 = vmul.f32 %v13936_v38, %v13934_v37  ;;  %v13938_v7 = vpop.eup %13937  ;;  %v4460_v2 = vmul.f32 %v13936_v38, %v15950_v56  ;;  %v12821_v38 = vpack.c.bf16 %v4527_v29, %v4524_v6 }
0x1701   : > { %v4457_v0 = vadd.f32 1.0, %v13938_v7 }
0x1702   : > { %4463 = vrot.lane.b32.xlu1 %v4461_v19, %s14687_s7  ;;  %12822 = vmatprep.subr.bf16.mxu1 %v12821_v38 }
0x1703   : > { %13939 = vrcp.f32 %v4457_v0  ;;  %12824 = vmatpush3.bf16.msra.mxu1 %v12821_v38 }
0x1706   : > { %2046 = vrot.lane.b32.xlu1 %v2037_v48, %s14689_s26  ;;  %v4752_v48 = vld [vmem:[%s16036_s2 + $0x30] sm:$0xff] }
0x1707   : > { %v12841_v51 = vpack.c.bf16 %v4753_v17, %v4752_v48 }
0x1709   : > { %12842 = vmatprep.subr.bf16.mxu0 %v12841_v51 }
0x170a   : > { %2767 = vrot.lane.b32.xlu1 %v2762_v57, %s14687_s7  ;;  %v4530_v57 = vld [vmem:[%s15931_s20 + $0xa0] sm:$0xff]  ;;  %12844 = vmatpush3.bf16.msra.mxu0 %v12841_v51  ;;  %s14694_s20 = smov 96  }
0x170b   : > { %v12825_v3 = vpack.c.bf16 %v4533_v39, %v4530_v57 }
0x170d   : > { %v13940_v12 = vpop.eup %13939  ;;  %12826 = vmatprep.subr.bf16.mxu1 %v12825_v3 }
0x170e   : > { %3342 = vrot.lane.b32.xlu1 %v3337_v58, %s14687_s7  ;;  %12828 = vmatpush3.bf16.msra.mxu1 %v12825_v3 }
0x1712   : > { %3918 = vrot.lane.b32.xlu1 %v3913_v42, %s14687_s7 }
0x1716   : > { %2769 = vrot.lane.b32.xlu1 %v2766_v27, %s14687_s7  ;;  %v2035_v27 = vmax.f32 %v15415_v47, 0.0  ;;  %v4534_v47 = vld [vmem:[%s1207_s29] sm:$0x7]  ;;  %s14693_s29 = smov 48  }
0x1717   : > { %v4539_v52 = vrot.slane %v4534_v47, %v15420_v50  ;;  %v4547_v1 = vrot.slane %v4534_v47, %v4546_v31 }
0x1719   : > { %v4630_v15 = vadd.f32 %v16009_v60, %v4539_v52 }
0x171a   : > { %3344 = vrot.lane.b32.xlu1 %v3341_v21, %s14687_s7 }
0x171e   : > { %3920 = vrot.lane.b32.xlu1 %v3917_v20, %s14687_s7  ;;  %v4543_v20 = vrot.slane %v4534_v47, %v15429_v59 }
0x1774   : > { %v4464_v41 = vpop.permute.xlu1 %4463 }
0x1775   : > { %v4466_v34 = vadd.f32 %v4464_v41, %v4460_v2  ;;  %v16120_v2 = vadd.f32 %v16011_v11, %v4543_v20 }
0x1777   : > { %13941 = vtanh.f32 %v4466_v34 }
0x1778   : > { %v2047_v16 = vpop.permute.xlu1 %2046 }
0x1779   : > { %v16053_v44 = vsel %vm1433_vm0, %v2033_v36, %v2047_v16 }
0x177a   : > { %11196 = vmatmul.mubr.msk.f32.gmra.mrb[32].mxu1 %vm2221_vm3, %v16053_v44 }
0x177b   : > { %4639 = vmatprep.mubr.f32.mxu1 %v14686_v9 }
0x177c   : > { %v2768_v56 = vpop.permute.xlu1 %2767 }
0x177d   : > { %2773 = vst.msk [vmem:[#allocation2 + $0x1] sm:$0x1] %vm2491_vm11, %v2768_v56 }
0x177e   : > { %11197 = vmatmul.mubr.msk.f32.gmra.mrb[34].mxu1 %vm2221_vm3, %v16062_v43 }
0x177f   : > { %4645 = vmatprep.mubr.f32.mxu1 %v14686_v9 }
0x1780   : > { %v3343_v63 = vpop.permute.xlu1 %3342 }
0x1781   : > { %v13942_v40 = vpop.eup %13941  ;;  %3348 = vst.msk [vmem:[#allocation2 + $0x3] sm:$0x1] %vm2491_vm11, %v3343_v63 }
0x1782   : > { %v4468_v37 = vmul.f32 %v13942_v40, %v13940_v12 }
0x1784   : > { %v3919_v19 = vpop.permute.xlu1 %3918  ;;  %v4476_v46 = vrot.slane %v4468_v37, %v15954_v26 }
0x1785   : > { %3924 = vst.msk [vmem:[#allocation2 + $0x5] sm:$0x1] %vm2491_vm11, %v3919_v19 }
0x1786   : > { %v4484_v30 = vrot.slane %v4476_v46, %v15954_v26  ;;  %v4477_v58 = vcombine.high %v4476_v46, %v4476_v46 }
0x1788   : > { %v2770_v5 = vpop.permute.xlu1 %2769  ;;  %v4495_v42 = vrot.slane %v4484_v30, %v15420_v50  ;;  %v4491_v13 = vrot.slane %v4477_v58, %v15954_v26  ;;  %v14690_v26 = vmov 0.0|0.0  }
0x1789   : > { %2774 = vst.msk [vmem:[#allocation2 + $0x9] sm:$0x1] %vm2491_vm11, %v2770_v5  ;;  %12845 = vmatprep.subr.bf16.mxu1 %v14690_v26  ;;  %12853 = vmatprep.subr.bf16.mxu0 %v14690_v26 }
0x178a   : > { %4500 = vrot.lane.b32.xlu1 %v4495_v42, %s14687_s7  ;;  %v4499_v8 = vrot.slane %v4491_v13, %v15420_v50 }
0x178c   : > { %v3345_v14 = vpop.permute.xlu1 %3344 }
0x178d   : > { %3349 = vst.msk [vmem:[#allocation2 + $0xb] sm:$0x1] %vm2491_vm11, %v3345_v14 }
0x178e   : > { %4502 = vrot.lane.b32.xlu1 %v4499_v8, %s14687_s7 }
0x1790   : > { %v3921_v25 = vpop.permute.xlu1 %3920 }
0x1791   : > { %3925 = vst.msk [vmem:[#allocation2 + $0xd] sm:$0x1] %vm2491_vm11, %v3921_v25 }
0x1792   : > { %2050 = vrot.lane.b32.xlu1 %v2039_v24, %s14689_s26 }
0x17fc   : > { %v4501_v10 = vpop.permute.xlu1 %4500 }
0x17fd   : > { %4506 = vst.msk [vmem:[#allocation2 + $0x7] sm:$0x1] %vm2491_vm11, %v4501_v10 }
0x1800   : > { %v4503_v53 = vpop.permute.xlu1 %4502 }
0x1801   : > { %4507 = vst.msk [vmem:[#allocation2 + $0xf] sm:$0x1] %vm2491_vm11, %v4503_v53 }
0x1804   : > { %v2051_v54 = vpop.permute.xlu1 %2050  ;;  %v16097_v33 = vld [vmem:[#allocation2] sm:$0xff] }
0x1805   : > { %v2059_v55 = vsel %vm1433_vm0, %v2035_v27, %v2051_v54  ;;  %11850 = vmatprep.mubr.msk.f32.mxu0 %vm2221_vm3, %v16097_v33 }
0x1806   : > { %11198 = vmatmul.mubr.msk.f32.gmra.mrb[36].mxu1 %vm2221_vm3, %v2059_v55 }
0x1807   : > { %11828 = vmatprep.mubr.msk.f32.mxu1 %vm2221_vm3, %v15996_v18 }
0x1808   : > { %v16105_v21 = vld [vmem:[#allocation2 + $0x8] sm:$0xff] }
0x1809   : > { %11851 = vmatmul.mubr.msk.f32.vlgmr.msra.gmra.mrb[30].mxu0 %vm2221_vm3, %v16105_v21 }
0x180a   : > { %11829 = vmatmul.mubr.msk.f32.vlgmr.msra.gmra.mrb[38].mxu1 %vm2221_vm3, %v16053_v44  ;;  %11871 = vmatprep.mubr.msk.f32.mxu0 %vm14691_vm13, %v14686_v9 }
0x180b   : > { %11831 = vmatprep.mubr.msk.f32.mxu1 %vm2221_vm3, %v16062_v43 }
0x180e   : > { %11832 = vmatmul.mubr.msk.f32.gmra.mrb[40].mxu1 %vm2221_vm3, %v2059_v55 }
0x180f   : > { %11857 = vmatprep.mubr.msk.f32.mxu1 %vm14691_vm13, %v14686_v9 }
0x184d   : > { %v4635_v18 = vpop.f32.mrb[32].mxu1 }
0x184e   : > { %v4636_v7 = vadd.f32 %v4635_v18, %v4539_v52  ;;  %v4637_v0 = vpop.f32.mrb[33].mxu1 }
0x184f   : > { %v16122_v41 = vadd.f32 %v4637_v0, %v4543_v20 }
0x1850   : > { %v12846_v36 = vpack.c.bf16 %v4636_v7, %v4630_v15  ;;  %v16130_v16 = vpack.i.bf16 %v4636_v7, %v4630_v15 }
0x1851   : > { %v4641_v44 = vpop.f32.mrb[34].mxu1  ;;  %v12934_v60 = vpack.c.bf16 %v16122_v41, %v16120_v2  ;;  %v16138_v11 = vpack.i.bf16 %v16122_v41, %v16120_v2 }
0x1852   : > { %v4643_v23 = vpop.f32.mrb[35].mxu1  ;;  %12848 = vmatpush3.bf16.xpose.msk.msra.mxu1 %vm16126_vm12, %v12846_v36  ;;  %v4642_v61 = vadd.f32 %v4641_v44, %v4539_v52 }
0x1853   : > { %12849 = vmatprep.subr.bf16.mxu1 %v14690_v26  ;;  %v16146_v32 = vadd.f32 %v4643_v23, %v4543_v20 }
0x18d9   : > { %v4647_v56 = vpop.f32.mrb[36].mxu1 }
0x18da   : > { %v4648_v35 = vadd.f32 %v4647_v56, %v4539_v52  ;;  %v4649_v43 = vpop.f32.mrb[37].mxu1 }
0x18db   : > { %v16148_v22 = vadd.f32 %v4649_v43, %v4543_v20 }
0x18dc   : > { %v11852_v12 = vpop.f32.mrb[30].mxu0  ;;  %v12850_v63 = vpack.c.bf16 %v4648_v35, %v4642_v61  ;;  %v16151_v62 = vpack.i.bf16 %v4648_v35, %v4642_v61 }
0x18dd   : > { %v11830_v4 = vpop.f32.mrb[38].mxu1  ;;  %v4833_v40 = vpop.f32.mrb[31].mxu0  ;;  %v12938_v29 = vpack.c.bf16 %v16148_v22, %v16146_v32  ;;  %v16163_v38 = vpack.i.bf16 %v16148_v22, %v16146_v32  ;;  %v16182_v39 = vadd.f32 %v11852_v12, %v11203_v49 }
0x18de   : > { %v16153_v28 = vadd.f32 %v11830_v4, %v4547_v1  ;;  %v16155_v6 = vadd.f32 %v11203_v49, %v4833_v40  ;;  %v4718_v45 = vpop.f32.mrb[39].mxu1 }
0x18df   : > { %v16159_v37 = vadd.f32 %v4718_v45, %v4547_v1 }
0x18e0   : > { %11858 = vmatmul.mubr.msk.f32.vlgmr.msra.gmra.mrb[42].mxu1 %vm1540_vm1, %v16155_v6 }
0x18e1   : > { %12852 = vmatpush3.bf16.xpose.msk.msra.mxu1 %vm16126_vm12, %v12850_v63  ;;  %v11833_v19 = vpop.f32.mrb[40].mxu1  ;;  %11864 = vmatprep.mubr.msk.f32.mxu1 %vm14691_vm13, %v14686_v9  ;;  %v13022_v46 = vpack.c.bf16 %v16153_v28, %v16159_v37  ;;  %v16175_v48 = vpack.i.bf16 %v16153_v28, %v16159_v37 }
0x18e2   : > { %v16177_v17 = vadd.f32 %v11833_v19, %v4547_v1  ;;  %v4728_v51 = vpop.f32.mrb[41].mxu1  ;;  %12859 = vmatprep.subr.bf16.mxu1 %v14690_v26 }
0x18e3   : > { %v16180_v57 = vadd.f32 %v4728_v51, %v4547_v1 }
0x18e5   : > { %v13026_v30 = vpack.c.bf16 %v16177_v17, %v16180_v57  ;;  %v16188_v58 = vpack.i.bf16 %v16177_v17, %v16180_v57 }
0x18e8   : > { %11865 = vmatmul.mubr.msk.f32.vlgmr.msra.gmra.mrb[44].mxu1 %vm1540_vm1, %v16182_v39 }
0x18e9   : > { %11885 = vmatprep.mubr.msk.f32.mxu1 %vm14691_vm13, %v14686_v9 }
0x19b3   : > { %v4917_v3 = vpop.f32.mrb[42].mxu1 }
0x19b4   : > { %v5000_v5 = vmul.f32 0.25, %v4917_v3  ;;  %v11859_v42 = vpop.f32.mrb[43].mxu1 }
0x19b6   : > { %v5002_v13 = vsel %vm1540_vm1, %v5000_v5, -inf }
0x19b7   : > { %5003 = vmax.xlane.f32.xlu0 %v5002_v13 }
0x19bb   : > { %v4996_v14 = vpop.f32.mrb[44].mxu1 }
0x19bc   : > { %v5001_v8 = vmul.f32 0.25, %v4996_v14  ;;  %v11866_v24 = vpop.f32.mrb[45].mxu1 }
0x19be   : > { %v5005_v25 = vsel %vm1540_vm1, %v5001_v8, -inf }
0x19bf   : > { %5006 = vmax.xlane.f32.xlu1 %v5005_v25 }
0x19d0   : > { %13446 = vrot.lane.b32.xlu1 %v16130_v16, %s14687_s7 }
0x19d4   : > { %13456 = vrot.lane.b32.xlu1 %v16130_v16, %s14692_s10 }
0x19d8   : > { %13461 = vrot.lane.b32.xlu1 %v16151_v62, %s14692_s10 }
0x19dc   : > { %5264 = vrot.lane.b32.xlu1 %v16182_v39, %s14692_s10 }
0x1a44   : > { %v5004_v10 = vpop.xlane.xlu0 %5003 }
0x1a45   : > { %v5008_v53 = vsub.f32 %v5000_v5, %v5004_v10 }
0x1a47   : > { %v5010_v27 = vmul.f32 1.442695, %v5008_v53 }
0x1a49   : > { %13943 = vpow2.f32 %v5010_v27 }
0x1a4c   : > { %v5007_v54 = vpop.xlane.xlu1 %5006 }
0x1a4d   : > { %v5009_v55 = vsub.f32 %v5001_v8, %v5007_v54 }
0x1a4f   : > { %v5012_v47 = vmul.f32 1.442695, %v5009_v55 }
0x1a50   : > { %v13447_v52 = vpop.permute.xlu1 %13446 }
0x1a51   : > { %13945 = vpow2.f32 %v5012_v47  ;;  %v13449_v20 = vunpack.i.h.bf16 %v13447_v52  ;;  %v13448_v18 = vunpack.i.l.bf16 %v13447_v52 }
0x1a53   : > { %v13944_v15 = vpop.eup %13943  ;;  %v12854_v7 = vpack.c.bf16 %v13449_v20, %v13448_v18 }
0x1a54   : > { %v13457_v0 = vpop.permute.xlu1 %13456  ;;  %v5014_v36 = vsel %vm1540_vm1, %v13944_v15, 0.0 }
0x1a55   : > { %v13459_v44 = vunpack.i.h.bf16 %v13457_v0  ;;  %v13458_v23 = vunpack.i.l.bf16 %v13457_v0  ;;  %12855 = vmatpush3.bf16.msra.mxu0 %v12854_v7  ;;  %5015 = vadd.xlane.f32.xlu0 %v5014_v36 }
0x1a56   : > { %12856 = vmatprep.subr.bf16.mxu0 %v14690_v26 }
0x1a57   : > { %v12860_v31 = vpack.c.bf16 %v13459_v44, %v13458_v23 }
0x1a58   : > { %v13462_v19 = vpop.permute.xlu1 %13461 }
0x1a59   : > { %12862 = vmatpush3.bf16.xpose.msk.msra.mxu1 %vm16126_vm12, %v12860_v31  ;;  %v13464_v3 = vunpack.i.h.bf16 %v13462_v19  ;;  %v13463_v5 = vunpack.i.l.bf16 %v13462_v19 }
0x1a5a   : > { %12867 = vmatprep.subr.bf16.mxu1 %v14690_v26 }
0x1a5b   : > { %v13946_v56 = vpop.eup %13945  ;;  %v12864_v13 = vpack.c.bf16 %v13464_v3, %v13463_v5 }
0x1a5c   : > { %v5017_v61 = vsel %vm1540_vm1, %v13946_v56, 0.0  ;;  %v5265_v14 = vpop.permute.xlu1 %5264 }
0x1a5d   : > { %5018 = vadd.xlane.f32.xlu0 %v5017_v61 }
0x1a73   : > { %13451 = vrot.lane.b32.xlu0 %v16151_v62, %s14687_s7 }
0x1a77   : > { %5182 = vrot.lane.b32.xlu0 %v16155_v6, %s14692_s10 }
0x1ae2   : > { %v5016_v35 = vpop.xlane.xlu0 %5015 }
0x1ae3   : > { %13947 = vrcp.f32 %v5016_v35 }
0x1aea   : > { %v5019_v43 = vpop.xlane.xlu0 %5018 }
0x1aeb   : > { %13949 = vrcp.f32 %v5019_v43 }
0x1aed   : > { %v13948_v1 = vpop.eup %13947 }
0x1aee   : > { %v13452_v49 = vpop.permute.xlu0 %13451  ;;  %v5022_v12 = vmul.f32 %v13948_v1, %v13944_v15 }
0x1aef   : > { %v13454_v63 = vunpack.i.h.bf16 %v13452_v49  ;;  %v13453_v4 = vunpack.i.l.bf16 %v13452_v49 }
0x1af0   : > { %11872 = vmatmul.mubr.msk.f32.vlgmr.msra.gmra.mrb[32].mxu0 %vm1540_vm1, %v5022_v12 }
0x1af1   : > { %v12857_v40 = vpack.c.bf16 %v13454_v63, %v13453_v4  ;;  %11878 = vmatprep.mubr.msk.f32.mxu0 %vm14691_vm13, %v14686_v9 }
0x1af2   : > { %v5183_v45 = vpop.permute.xlu0 %5182 }
0x1af3   : > { %12858 = vmatpush3.bf16.msra.mxu0 %v12857_v40  ;;  %11886 = vmatmul.mubr.msk.f32.vlgmr.msra.gmra.mrb[46].mxu1 %vm1540_vm1, %v5183_v45 }
0x1af4   : > { %12863 = vmatprep.subr.bf16.mxu0 %v14690_v26  ;;  %11899 = vmatprep.mubr.msk.f32.mxu1 %vm14691_vm13, %v14686_v9 }
0x1af5   : > { %v13950_v51 = vpop.eup %13949 }
0x1af6   : > { %v5023_v42 = vmul.f32 %v13950_v51, %v13946_v56 }
0x1af8   : > { %11879 = vmatmul.mubr.msk.f32.vlgmr.msra.gmra.mrb[34].mxu0 %vm1540_vm1, %v5023_v42 }
0x1af9   : > { %11892 = vmatprep.mubr.msk.f32.mxu0 %vm14691_vm13, %v14686_v9 }
0x1afc   : > { %12866 = vmatpush3.bf16.xpose.msk.msra.mxu0 %vm16126_vm12, %v12864_v13 }
0x1afd   : > { %12870 = vmatprep.subr.bf16.mxu0 %v14690_v26 }
0x1b03   : > { %11893 = vmatmul.mubr.msk.f32.vlgmr.msra.gmra.mrb[36].mxu0 %vm1540_vm1, %v5265_v14 }
0x1b04   : > { %11906 = vmatprep.mubr.msk.f32.mxu0 %vm14691_vm13, %v14686_v9 }
0x1bc3   : > { %v16230_v8 = vpop.f32.mrb[32].mxu0 }
0x1bc4   : > { %v11873_v24 = vpop.f32.mrb[33].mxu0 }
0x1bc6   : > { %v5260_v25 = vpop.f32.mrb[46].mxu1 }
0x1bc7   : > { %v5346_v10 = vmul.f32 0.25, %v5260_v25  ;;  %v11887_v53 = vpop.f32.mrb[47].mxu1 }
0x1bc9   : > { %v5348_v27 = vsel %vm1540_vm1, %v5346_v10, -inf }
0x1bca   : > { %5349 = vmax.xlane.f32.xlu0 %v5348_v27  ;;  %v4739_v27 = vld [vmem:[%s16263_s27 + $0x10] sm:$0xff] }
0x1bcb   : > { %v16233_v54 = vpop.f32.mrb[34].mxu0 }
0x1bcc   : > { %v11880_v55 = vpop.f32.mrb[35].mxu0 }
0x1bcd   : > { %v4740_v55 = vld [vmem:[%s16263_s27 + $0x18] sm:$0xff] }
0x1bd6   : > { %v5342_v47 = vpop.f32.mrb[36].mxu0 }
0x1bd7   : > { %v5347_v52 = vmul.f32 0.25, %v5342_v47  ;;  %v11894_v20 = vpop.f32.mrb[37].mxu0  ;;  %v12873_v47 = vpack.c.bf16 %v4740_v55, %v4739_v27 }
0x1bd8   : > { %v4738_v20 = vld [vmem:[%s16263_s27 + $0x8] sm:$0xff] }
0x1bd9   : > { %v5351_v18 = vsel %vm1540_vm1, %v5347_v52, -inf }
0x1bda   : > { %5352 = vmax.xlane.f32.xlu1 %v5351_v18 }
0x1beb   : > { %13466 = vrot.lane.b32.xlu1 %v16130_v16, %s14693_s29 }
0x1bef   : > { %13476 = vrot.lane.b32.xlu1 %v16130_v16, %s14694_s20 }
0x1bf3   : > { %13481 = vrot.lane.b32.xlu1 %v16151_v62, %s14694_s20 }
0x1bf7   : > { %5772 = vrot.lane.b32.xlu1 %v16182_v39, %s14694_s20 }
0x1c57   : > { %v5350_v15 = vpop.xlane.xlu0 %5349 }
0x1c58   : > { %v5354_v7 = vsub.f32 %v5346_v10, %v5350_v15 }
0x1c5a   : > { %v5356_v0 = vmul.f32 1.442695, %v5354_v7 }
0x1c5c   : > { %13951 = vpow2.f32 %v5356_v0 }
0x1c66   : > { %v13952_v36 = vpop.eup %13951 }
0x1c67   : > { %v5353_v44 = vpop.xlane.xlu1 %5352  ;;  %v5360_v23 = vsel %vm1540_vm1, %v13952_v36, 0.0 }
0x1c68   : > { %v5355_v31 = vsub.f32 %v5347_v52, %v5353_v44  ;;  %5361 = vadd.xlane.f32.xlu0 %v5360_v23  ;;  %v4737_v52 = vld [vmem:[%s16263_s27] sm:$0xff] }
0x1c69   : > { %v12877_v18 = vpack.c.bf16 %v4738_v20, %v4737_v52  ;;  %v4742_v52 = vld [vmem:[%s16263_s27 + $0x28] sm:$0xff] }
0x1c6a   : > { %v5358_v56 = vmul.f32 1.442695, %v5355_v31 }
0x1c6b   : > { %v13467_v61 = vpop.permute.xlu1 %13466 }
0x1c6c   : > { %13953 = vpow2.f32 %v5358_v56  ;;  %v13469_v35 = vunpack.i.h.bf16 %v13467_v61  ;;  %v13468_v43 = vunpack.i.l.bf16 %v13467_v61 }
0x1c6e   : > { %v12868_v1 = vpack.c.bf16 %v13469_v35, %v13468_v43 }
0x1c6f   : > { %v13477_v42 = vpop.permute.xlu1 %13476 }
0x1c70   : > { %12869 = vmatpush3.bf16.msra.mxu1 %v12868_v1  ;;  %v13479_v14 = vunpack.i.h.bf16 %v13477_v42  ;;  %v13478_v24 = vunpack.i.l.bf16 %v13477_v42 }
0x1c71   : > { %12874 = vmatprep.subr.bf16.mxu1 %v12873_v47 }
0x1c72   : > { %v12882_v10 = vpack.c.bf16 %v13479_v14, %v13478_v24 }
0x1c73   : > { %v13482_v44 = vpop.permute.xlu1 %13481 }
0x1c74   : > { %v13484_v23 = vunpack.i.h.bf16 %v13482_v44  ;;  %v13483_v31 = vunpack.i.l.bf16 %v13482_v44 }
0x1c76   : > { %v13954_v49 = vpop.eup %13953  ;;  %v12886_v56 = vpack.c.bf16 %v13484_v23, %v13483_v31 }
0x1c77   : > { %v5363_v12 = vsel %vm1540_vm1, %v13954_v49, 0.0 }
0x1c78   : > { %5364 = vadd.xlane.f32.xlu0 %v5363_v12 }
0x1c8e   : > { %13471 = vrot.lane.b32.xlu0 %v16151_v62, %s14693_s29 }
0x1c92   : > { %5690 = vrot.lane.b32.xlu0 %v16155_v6, %s14694_s20 }
0x1cf5   : > { %v5362_v63 = vpop.xlane.xlu0 %5361 }
0x1cf6   : > { %13955 = vrcp.f32 %v5362_v63 }
0x1d00   : > { %v13956_v4 = vpop.eup %13955 }
0x1d01   : > { %v5368_v40 = vmul.f32 %v13956_v4, %v13952_v36 }
0x1d03   : > { %11900 = vmatmul.mubr.msk.f32.vlgmr.msra.gmra.mrb[48].mxu1 %vm1540_vm1, %v5368_v40 }
0x1d04   : > { %12876 = vmatpush3.bf16.msra.mxu1 %v12873_v47  ;;  %v4741_v47 = vld [vmem:[%s16263_s27 + $0x20] sm:$0xff] }
0x1d05   : > { %v5365_v45 = vpop.xlane.xlu0 %5364  ;;  %12878 = vmatprep.subr.bf16.mxu1 %v12877_v18  ;;  %v12895_v20 = vpack.c.bf16 %v4742_v52, %v4741_v47 }
0x1d06   : > { %13957 = vrcp.f32 %v5365_v45 }
0x1d09   : > { %v13472_v19 = vpop.permute.xlu0 %13471 }
0x1d0a   : > { %v13474_v51 = vunpack.i.h.bf16 %v13472_v19  ;;  %v13473_v3 = vunpack.i.l.bf16 %v13472_v19 }
0x1d0c   : > { %v12871_v5 = vpack.c.bf16 %v13474_v51, %v13473_v3 }
0x1d0d   : > { %v5691_v53 = vpop.permute.xlu0 %5690 }
0x1d0e   : > { %12872 = vmatpush3.bf16.msra.mxu0 %v12871_v5 }
0x1d0f   : > { %12881 = vmatprep.subr.bf16.mxu0 %v14690_v26 }
0x1d10   : > { %v13958_v13 = vpop.eup %13957 }
0x1d11   : > { %v5369_v25 = vmul.f32 %v13958_v13, %v13954_v49 }
0x1d13   : > { %11907 = vmatmul.mubr.msk.f32.vlgmr.msra.gmra.mrb[38].mxu0 %vm1540_vm1, %v5369_v25 }
0x1d14   : > { %11927 = vmatprep.mubr.msk.f32.mxu0 %vm14691_vm13, %v14686_v9 }
0x1d17   : > { %12884 = vmatpush3.bf16.xpose.msk.msra.mxu0 %vm16126_vm12, %v12882_v10 }
0x1d18   : > { %12889 = vmatprep.subr.bf16.mxu0 %v14690_v26 }
0x1d1e   : > { %11928 = vmatmul.mubr.msk.f32.vlgmr.msra.gmra.mrb[40].mxu0 %vm1540_vm1, %v5691_v53 }
0x1d1f   : > { %11941 = vmatprep.mubr.msk.f32.mxu0 %vm14691_vm13, %v14686_v9 }
0x1dd6   : > { %v5445_v15 = vpop.f32.mrb[48].mxu1 }
0x1dd7   : > { %v11901_v7 = vpop.f32.mrb[49].mxu1  ;;  %11913 = vmatprep.mubr.msk.f32.mxu1 %vm1540_vm1, %v5445_v15 }
0x1de6   : > { %v5524_v0 = vpop.f32.mrb[38].mxu0 }
0x1de7   : > { %v11908_v36 = vpop.f32.mrb[39].mxu0  ;;  %11914 = vmatmul.mubr.msk.f32.vlgmr.msra.gmra.mrb[50].mxu1 %vm1540_vm1, %v5524_v0 }
0x1de8   : > { %12880 = vmatpush3.bf16.msra.mxu1 %v12877_v18  ;;  %11920 = vmatprep.mubr.msk.f32.mxu1 %vm1540_vm1, %v16230_v8  ;;  %v5773_v8 = vpop.permute.xlu1 %5772 }
0x1de9   : > { %12885 = vmatprep.subr.bf16.mxu1 %v14690_v26 }
0x1def   : > { %11921 = vmatmul.mubr.msk.f32.vlgmr.msra.gmra.mrb[50].mxu1 %vm1540_vm1, %v16233_v54 }
0x1df0   : > { %11934 = vmatprep.mubr.msk.f32.mxu1 %vm14691_vm13, %v14686_v9 }
0x1df1   : > { %12888 = vmatpush3.bf16.xpose.msk.msra.mxu1 %vm16126_vm12, %v12886_v56  ;;  %v5768_v61 = vpop.f32.mrb[40].mxu0 }
0x1df2   : > { %v5854_v35 = vmul.f32 0.25, %v5768_v61  ;;  %v11929_v43 = vpop.f32.mrb[41].mxu0  ;;  %12896 = vmatprep.subr.bf16.mxu1 %v12895_v20 }
0x1df4   : > { %v5856_v1 = vsel %vm1540_vm1, %v5854_v35, -inf }
0x1df5   : > { %5857 = vmax.xlane.f32.xlu0 %v5856_v1 }
0x1df8   : > { %11935 = vmatmul.mubr.msk.f32.vlgmr.msra.gmra.mrb[52].mxu1 %vm1540_vm1, %v5773_v8 }
0x1df9   : > { %12898 = vmatpush3.bf16.msra.mxu1 %v12895_v20 }
0x1dfa   : > { %12903 = vmatprep.subr.bf16.mxu1 %v14690_v26 }
0x1e82   : > { %v5858_v49 = vpop.xlane.xlu0 %5857 }
0x1e83   : > { %v5862_v12 = vsub.f32 %v5854_v35, %v5858_v49 }
0x1e85   : > { %v5864_v63 = vmul.f32 1.442695, %v5862_v12 }
0x1e87   : > { %13959 = vpow2.f32 %v5864_v63 }
0x1e91   : > { %v13960_v54 = vpop.eup %13959 }
0x1e92   : > { %v5868_v4 = vsel %vm1540_vm1, %v13960_v54, 0.0 }
0x1e93   : > { %5869 = vadd.xlane.f32.xlu0 %v5868_v4 }
0x1ecb   : > { %v5850_v40 = vpop.f32.mrb[52].mxu1 }
0x1ecc   : > { %v5855_v45 = vmul.f32 0.25, %v5850_v40  ;;  %v11936_v19 = vpop.f32.mrb[53].mxu1 }
0x1ece   : > { %v5859_v51 = vsel %vm1540_vm1, %v5855_v45, -inf }
0x1ecf   : > { %5860 = vmax.xlane.f32.xlu1 %v5859_v51 }
0x1ee0   : > { %13486 = vrot.lane.b32.xlu1 %v16130_v16, %s14689_s26 }
0x1ee4   : > { %13496 = vrot.lane.b32.xlu1 %v16130_v16, %s14695_s8 }
0x1ee8   : > { %13501 = vrot.lane.b32.xlu1 %v16151_v62, %s14695_s8 }
0x1eec   : > { %6201 = vrot.lane.b32.xlu1 %v16182_v39, %s14695_s8 }
0x1f20   : > { %v5870_v3 = vpop.xlane.xlu0 %5869 }
0x1f21   : > { %13961 = vrcp.f32 %v5870_v3 }
0x1f2b   : > { %v13962_v10 = vpop.eup %13961 }
0x1f2c   : > { %v5876_v27 = vmul.f32 %v13962_v10, %v13960_v54 }
0x1f5c   : > { %v5861_v5 = vpop.xlane.xlu1 %5860 }
0x1f5d   : > { %v5863_v42 = vsub.f32 %v5855_v45, %v5861_v5 }
0x1f5f   : > { %v5866_v13 = vmul.f32 1.442695, %v5863_v42 }
0x1f60   : > { %v13487_v14 = vpop.permute.xlu1 %13486 }
0x1f61   : > { %13963 = vpow2.f32 %v5866_v13  ;;  %v13489_v24 = vunpack.i.h.bf16 %v13487_v14  ;;  %v13488_v25 = vunpack.i.l.bf16 %v13487_v14 }
0x1f63   : > { %v12890_v53 = vpack.c.bf16 %v13489_v24, %v13488_v25 }
0x1f64   : > { %v13497_v44 = vpop.permute.xlu1 %13496 }
0x1f65   : > { %12891 = vmatpush3.bf16.msra.mxu0 %v12890_v53  ;;  %v13499_v31 = vunpack.i.h.bf16 %v13497_v44 }
0x1f66   : > { %12892 = vmatprep.subr.bf16.mxu0 %v14690_v26 }
0x1f68   : > { %11942 = vmatmul.mubr.msk.f32.vlgmr.msra.gmra.mrb[42].mxu0 %vm1540_vm1, %v5876_v27  ;;  %v13502_v8 = vpop.permute.xlu1 %13501 }
0x1f69   : > { %11948 = vmatprep.mubr.msk.f32.mxu0 %vm14691_vm13, %v14686_v9  ;;  %v13504_v49 = vunpack.i.h.bf16 %v13502_v8  ;;  %v13503_v12 = vunpack.i.l.bf16 %v13502_v8 }
0x1f6b   : > { %v13964_v39 = vpop.eup %13963  ;;  %v12904_v63 = vpack.c.bf16 %v13504_v49, %v13503_v12 }
0x1f6c   : > { %v5871_v55 = vsel %vm1540_vm1, %v13964_v39, 0.0  ;;  %v6202_v40 = vpop.permute.xlu1 %6201 }
0x1f6d   : > { %5872 = vadd.xlane.f32.xlu0 %v5871_v55 }
0x1f83   : > { %13491 = vrot.lane.b32.xlu0 %v16151_v62, %s14689_s26 }
0x1f87   : > { %6119 = vrot.lane.b32.xlu0 %v16155_v6, %s14695_s8  ;;  %v13498_v6 = vunpack.i.l.bf16 %v13497_v44 }
0x1f89   : > { %v12900_v61 = vpack.c.bf16 %v13499_v31, %v13498_v6  ;;  %v4743_v31 = vld [vmem:[%s16263_s27 + $0x30] sm:$0xff]  ;;  %v4744_v6 = vld [vmem:[%s16263_s27 + $0x38] sm:$0xff] }
0x1ffa   : > { %v5873_v18 = vpop.xlane.xlu0 %5872 }
0x1ffb   : > { %13965 = vrcp.f32 %v5873_v18 }
0x1ffe   : > { %v13492_v15 = vpop.permute.xlu0 %13491 }
0x1fff   : > { %v13494_v7 = vunpack.i.h.bf16 %v13492_v15  ;;  %v13493_v0 = vunpack.i.l.bf16 %v13492_v15 }
0x2001   : > { %v12893_v36 = vpack.c.bf16 %v13494_v7, %v13493_v0 }
0x2002   : > { %v6120_v35 = vpop.permute.xlu0 %6119 }
0x2003   : > { %12894 = vmatpush3.bf16.msra.mxu0 %v12893_v36 }
0x2004   : > { %12899 = vmatprep.subr.bf16.mxu0 %v14690_v26 }
0x2005   : > { %v13966_v23 = vpop.eup %13965 }
0x2006   : > { %v5877_v56 = vmul.f32 %v13966_v23, %v13964_v39 }
0x2008   : > { %11949 = vmatmul.mubr.msk.f32.vlgmr.msra.gmra.mrb[44].mxu0 %vm1540_vm1, %v5877_v56 }
0x2009   : > { %11962 = vmatprep.mubr.msk.f32.mxu0 %vm14691_vm13, %v14686_v9 }
0x200c   : > { %12902 = vmatpush3.bf16.xpose.msk.msra.mxu0 %vm16126_vm12, %v12900_v61 }
0x200d   : > { %12907 = vmatprep.subr.bf16.mxu0 %v14690_v26 }
0x2013   : > { %11963 = vmatmul.mubr.msk.f32.vlgmr.msra.gmra.mrb[46].mxu0 %vm1540_vm1, %v6120_v35 }
0x2014   : > { %11976 = vmatprep.mubr.msk.f32.mxu0 %vm14691_vm13, %v14686_v9 }
0x203b   : > { %v5953_v43 = vpop.f32.mrb[42].mxu0 }
0x203c   : > { %v11943_v1 = vpop.f32.mrb[43].mxu0  ;;  %11955 = vmatprep.mubr.msk.f32.mxu1 %vm1540_vm1, %v5953_v43  ;;  %v12913_v43 = vpack.c.bf16 %v4744_v6, %v4743_v31 }
0x20db   : > { %v6032_v54 = vpop.f32.mrb[44].mxu0 }
0x20dc   : > { %v11950_v4 = vpop.f32.mrb[45].mxu0  ;;  %11956 = vmatmul.mubr.msk.f32.vlgmr.msra.gmra.mrb[50].mxu1 %vm1540_vm1, %v6032_v54  ;;  %v11257_v54 = vld [vmem:[%s16036_s2 + $0x48] sm:$0xff] }
0x20dd   : > { %12906 = vmatpush3.bf16.xpose.msk.msra.mxu1 %vm16126_vm12, %v12904_v63  ;;  %11969 = vmatprep.mubr.msk.f32.mxu1 %vm14691_vm13, %v14686_v9  ;;  %v11256_v63 = vld [vmem:[%s16036_s2 + $0x40] sm:$0xff]  ;;  %v11258_v4 = vld [vmem:[%s16036_s2 + $0x50] sm:$0xff] }
0x20de   : > { %12910 = vmatprep.subr.bf16.mxu1 %v14690_v26 }
0x20e4   : > { %11970 = vmatmul.mubr.msk.f32.vlgmr.msra.gmra.mrb[54].mxu1 %vm1540_vm1, %v6202_v40  ;;  %v12917_v40 = vpack.c.bf16 %v11257_v54, %v11256_v63 }
0x20e5   : > { %11983 = vmatprep.mubr.msk.f32.mxu1 %vm14691_vm13, %v14686_v9 }
0x20e6   : > { %v6197_v45 = vpop.f32.mrb[46].mxu0 }
0x20e7   : > { %v6283_v19 = vmul.f32 0.25, %v6197_v45  ;;  %v11964_v51 = vpop.f32.mrb[47].mxu0  ;;  %v11259_v45 = vld [vmem:[%s16036_s2 + $0x58] sm:$0xff] }
0x20e8   : > { %v11260_v51 = vld [vmem:[%s16036_s2 + $0x60] sm:$0xff] }
0x20e9   : > { %v6285_v3 = vsel %vm1540_vm1, %v6283_v19, -inf }
0x20ea   : > { %6286 = vmax.xlane.f32.xlu0 %v6285_v3  ;;  %v11261_v3 = vld [vmem:[%s16036_s2 + $0x68] sm:$0xff] }
0x2177   : > { %v6287_v5 = vpop.xlane.xlu0 %6286 }
0x2178   : > { %v6291_v42 = vsub.f32 %v6283_v19, %v6287_v5  ;;  %v12921_v19 = vpack.c.bf16 %v11259_v45, %v11258_v4  ;;  %v12925_v5 = vpack.c.bf16 %v11261_v3, %v11260_v51 }
0x217a   : > { %v6293_v13 = vmul.f32 1.442695, %v6291_v42 }
0x217c   : > { %13967 = vpow2.f32 %v6293_v13 }
0x2186   : > { %v13968_v14 = vpop.eup %13967 }
0x2187   : > { %v6297_v24 = vsel %vm1540_vm1, %v13968_v14, 0.0 }
0x2188   : > { %6298 = vadd.xlane.f32.xlu0 %v6297_v24  ;;  %v11263_v24 = vld [vmem:[%s16036_s2 + $0x78] sm:$0xff] }
0x21b7   : > { %v6279_v25 = vpop.f32.mrb[54].mxu1 }
0x21b8   : > { %v6284_v10 = vmul.f32 0.25, %v6279_v25  ;;  %v11971_v53 = vpop.f32.mrb[55].mxu1 }
0x21b9   : > { %v11246_v53 = vld [vmem:[%s15302_s5] ss:$0 sm:$0xff] }
0x21ba   : > { %v6288_v27 = vsel %vm1540_vm1, %v6284_v10, -inf }
0x21bb   : > { %6289 = vmax.xlane.f32.xlu1 %v6288_v27 }
0x21cc   : > { %13506 = vrot.lane.b32.xlu1 %v16130_v16, %s14696_s16 }
0x2215   : > { %v6299_v39 = vpop.xlane.xlu0 %6298 }
0x2216   : > { %13969 = vrcp.f32 %v6299_v39 }
0x2220   : > { %v13970_v7 = vpop.eup %13969 }
0x2221   : > { %v6305_v36 = vmul.f32 %v13970_v7, %v13968_v14  ;;  %v11262_v14 = vld [vmem:[%s16036_s2 + $0x70] sm:$0xff] }
0x2222   : > { %v12929_v25 = vpack.c.bf16 %v11263_v24, %v11262_v14 }
0x2248   : > { %v6290_v55 = vpop.xlane.xlu1 %6289 }
0x2249   : > { %v6292_v47 = vsub.f32 %v6284_v10, %v6290_v55  ;;  %v11265_v55 = vld [vmem:[%s15294_s0 + $0x1] ss:$0 sm:$0xff] }
0x224b   : > { %v6295_v52 = vmul.f32 1.442695, %v6292_v47 }
0x224c   : > { %v13507_v20 = vpop.permute.xlu1 %13506 }
0x224d   : > { %13971 = vpow2.f32 %v6295_v52  ;;  %v13509_v18 = vunpack.i.h.bf16 %v13507_v20  ;;  %v13508_v15 = vunpack.i.l.bf16 %v13507_v20 }
0x224f   : > { %v12908_v0 = vpack.c.bf16 %v13509_v18, %v13508_v15 }
0x2251   : > { %12909 = vmatpush3.bf16.msra.mxu0 %v12908_v0 }
0x2252   : > { %12918 = vmatprep.subr.bf16.mxu0 %v12917_v40 }
0x2254   : > { %11977 = vmatmul.mubr.msk.f32.vlgmr.msra.gmra.mrb[48].mxu0 %vm1540_vm1, %v6305_v36 }
0x2255   : > { %12920 = vmatpush3.bf16.msra.mxu0 %v12917_v40 }
0x2256   : > { %12922 = vmatprep.subr.bf16.mxu0 %v12921_v19 }
0x2257   : > { %v13972_v44 = vpop.eup %13971 }
0x2258   : > { %v6300_v16 = vsel %vm1540_vm1, %v13972_v44, 0.0 }
0x2259   : > { %6301 = vadd.xlane.f32.xlu0 %v6300_v16  ;;  %12924 = vmatpush3.bf16.msra.mxu0 %v12921_v19 }
0x225a   : > { %12926 = vmatprep.subr.bf16.mxu0 %v12925_v5 }
0x225d   : > { %12928 = vmatpush3.bf16.msra.mxu0 %v12925_v5 }
0x225e   : > { %12930 = vmatprep.subr.bf16.mxu0 %v12929_v25 }
0x2261   : > { %12932 = vmatpush3.bf16.msra.mxu0 %v12929_v25 }
0x2262   : > { %12941 = vmatprep.subr.bf16.mxu0 %v14690_v26 }
0x226f   : > { %13511 = vrot.lane.b32.xlu0 %v16151_v62, %s14696_s16 }
0x22e6   : > { %v6302_v23 = vpop.xlane.xlu0 %6301 }
0x22e7   : > { %13973 = vrcp.f32 %v6302_v23 }
0x22ea   : > { %v13512_v56 = vpop.permute.xlu0 %13511 }
0x22eb   : > { %v13514_v61 = vunpack.i.h.bf16 %v13512_v56  ;;  %v13513_v35 = vunpack.i.l.bf16 %v13512_v56 }
0x22ed   : > { %v12911_v1 = vpack.c.bf16 %v13514_v61, %v13513_v35 }
0x22ef   : > { %12912 = vmatpush3.bf16.msra.mxu1 %v12911_v1 }
0x22f0   : > { %12914 = vmatprep.subr.bf16.mxu1 %v12913_v43 }
0x22f1   : > { %v13974_v8 = vpop.eup %13973 }
0x22f2   : > { %v6306_v49 = vmul.f32 %v13974_v8, %v13972_v44 }
0x22f4   : > { %11984 = vmatmul.mubr.msk.f32.vlgmr.msra.gmra.mrb[56].mxu1 %vm1540_vm1, %v6306_v49 }
0x22f5   : > { %12916 = vmatpush3.bf16.msra.mxu1 %v12913_v43 }
0x22f6   : > { %12933 = vmatprep.subr.bf16.mxu1 %v14690_v26 }
0x2327   : > { %v6382_v62 = vpop.f32.mrb[48].mxu0 }
0x2328   : > { %v11978_v12 = vpop.f32.mrb[49].mxu0  ;;  %11990 = vmatprep.mubr.msk.f32.mxu1 %vm1540_vm1, %v6382_v62 }
0x23c7   : > { %v6461_v42 = vpop.f32.mrb[56].mxu1 }
0x23c8   : > { %v11985_v13 = vpop.f32.mrb[57].mxu1  ;;  %11991 = vmatmul.mubr.msk.f32.vlgmr.msra.gmra.mrb[50].mxu1 %vm1540_vm1, %v6461_v42 }
0x23c9   : > { %12936 = vmatpush3.bf16.xpose.msk.msra.mxu1 %vm16126_vm12, %v12934_v60  ;;  %12016 = vmatprep.mubr.msk.f32.mxu1 %vm14691_vm13, %v14686_v9 }
0x23ca   : > { %12937 = vmatprep.subr.bf16.mxu1 %v14690_v26 }
0x249b   : > { %v11992_v10 = vpop.f32.mrb[50].mxu1 }
0x249c   : > { %v6549_v2 = vadd.f32 %v11992_v10, %v16105_v21  ;;  %v6537_v41 = vpop.f32.mrb[51].mxu1 }
0x249d   : > { %v6548_v60 = vadd.f32 %v6537_v41, %v16097_v33 }
0x249e   : > { %v16361_v39 = vadd.f32 %v11246_v53, %v6549_v2 }
0x249f   : > { %v16359_v27 = vadd.f32 %v11246_v53, %v6548_v60 }
0x24a1   : > { %12009 = vmatprep.mubr.msk.f32.mxu0 %vm2221_vm3, %v16359_v27 }
0x24a2   : > { %12010 = vmatmul.mubr.msk.f32.vlgmr.msra.gmra.mrb[50].mxu0 %vm2221_vm3, %v16361_v39 }
0x24a3   : > { %12030 = vmatprep.mubr.msk.f32.mxu0 %vm14691_vm13, %v14686_v9 }
0x2575   : > { %v12011_v47 = vpop.f32.mrb[50].mxu0 }
0x2576   : > { %v6658_v52 = vpop.f32.mrb[51].mxu0  ;;  %v16382_v33 = vadd.f32 %v12011_v47, %v11265_v55 }
0x2577   : > { %v16370_v21 = vadd.f32 %v11265_v55, %v6658_v52 }
0x2579   : > { %12017 = vmatmul.mubr.msk.f32.vlgmr.msra.gmra.mrb[58].mxu1 %vm1540_vm1, %v16370_v21 }
0x257a   : > { %12940 = vmatpush3.bf16.xpose.msk.msra.mxu1 %vm16126_vm12, %v12938_v29  ;;  %12023 = vmatprep.mubr.msk.f32.mxu1 %vm14691_vm13, %v14686_v9 }
0x257b   : > { %12947 = vmatprep.subr.bf16.mxu1 %v14690_v26 }
0x2581   : > { %12024 = vmatmul.mubr.msk.f32.vlgmr.msra.gmra.mrb[60].mxu1 %vm1540_vm1, %v16382_v33 }
0x2582   : > { %12044 = vmatprep.mubr.msk.f32.mxu1 %vm14691_vm13, %v14686_v9 }
0x264c   : > { %v6742_v20 = vpop.f32.mrb[58].mxu1 }
0x264d   : > { %v6825_v18 = vmul.f32 0.25, %v6742_v20  ;;  %v12018_v15 = vpop.f32.mrb[59].mxu1 }
0x264f   : > { %v6827_v32 = vsel %vm1540_vm1, %v6825_v18, -inf }
0x2650   : > { %6828 = vmax.xlane.f32.xlu1 %v6827_v32 }
0x2654   : > { %v6821_v22 = vpop.f32.mrb[60].mxu1 }
0x2655   : > { %v6826_v29 = vmul.f32 0.25, %v6821_v22  ;;  %v12025_v7 = vpop.f32.mrb[61].mxu1 }
0x2657   : > { %v6830_v0 = vsel %vm1540_vm1, %v6826_v29, -inf }
0x2658   : > { %6831 = vmax.xlane.f32.xlu0 %v6830_v0 }
0x2661   : > { %13516 = vrot.lane.b32.xlu1 %v16138_v11, %s14687_s7 }
0x26dd   : > { %v6829_v36 = vpop.xlane.xlu1 %6828 }
0x26de   : > { %v6833_v44 = vsub.f32 %v6825_v18, %v6829_v36 }
0x26e0   : > { %v6835_v16 = vmul.f32 1.442695, %v6833_v44 }
0x26e1   : > { %v13517_v23 = vpop.permute.xlu1 %13516 }
0x26e2   : > { %13975 = vpow2.f32 %v6835_v16  ;;  %v13519_v31 = vunpack.i.h.bf16 %v13517_v23  ;;  %v13518_v6 = vunpack.i.l.bf16 %v13517_v23 }
0x26e4   : > { %v12942_v56 = vpack.c.bf16 %v13519_v31, %v13518_v6 }
0x26e5   : > { %v6832_v61 = vpop.xlane.xlu0 %6831 }
0x26e6   : > { %v6834_v35 = vsub.f32 %v6826_v29, %v6832_v61  ;;  %12943 = vmatpush3.bf16.msra.mxu0 %v12942_v56 }
0x26e7   : > { %12944 = vmatprep.subr.bf16.mxu0 %v14690_v26 }
0x26e8   : > { %v6837_v43 = vmul.f32 1.442695, %v6834_v35 }
0x26ea   : > { %13977 = vpow2.f32 %v6837_v43 }
0x26ec   : > { %v13976_v1 = vpop.eup %13975 }
0x26ed   : > { %v6839_v8 = vsel %vm1540_vm1, %v13976_v1, 0.0 }
0x26ee   : > { %6840 = vadd.xlane.f32.xlu1 %v6839_v8 }
0x26f4   : > { %v13978_v49 = vpop.eup %13977 }
0x26f5   : > { %v6842_v62 = vsel %vm1540_vm1, %v13978_v49, 0.0 }
0x26f6   : > { %6843 = vadd.xlane.f32.xlu0 %v6842_v62 }
0x26ff   : > { %13526 = vrot.lane.b32.xlu1 %v16138_v11, %s14692_s10 }
0x2703   : > { %13531 = vrot.lane.b32.xlu1 %v16163_v38, %s14692_s10 }
0x2707   : > { %7089 = vrot.lane.b32.xlu1 %v16382_v33, %s14692_s10 }
0x270c   : > { %13521 = vrot.lane.b32.xlu0 %v16163_v38, %s14687_s7 }
0x2710   : > { %7007 = vrot.lane.b32.xlu0 %v16370_v21, %s14692_s10 }
0x277b   : > { %v6841_v12 = vpop.xlane.xlu1 %6840 }
0x277c   : > { %13979 = vrcp.f32 %v6841_v12 }
0x277f   : > { %v13527_v63 = vpop.permute.xlu1 %13526 }
0x2780   : > { %v13529_v54 = vunpack.i.h.bf16 %v13527_v63  ;;  %v13528_v4 = vunpack.i.l.bf16 %v13527_v63 }
0x2782   : > { %v12948_v40 = vpack.c.bf16 %v13529_v54, %v13528_v4 }
0x2783   : > { %v6844_v45 = vpop.xlane.xlu0 %6843  ;;  %v13532_v24 = vpop.permute.xlu1 %13531 }
0x2784   : > { %13981 = vrcp.f32 %v6844_v45  ;;  %12950 = vmatpush3.bf16.xpose.msk.msra.mxu1 %vm16126_vm12, %v12948_v40  ;;  %v13534_v53 = vunpack.i.h.bf16 %v13532_v24  ;;  %v13533_v2 = vunpack.i.l.bf16 %v13532_v24 }
0x2785   : > { %12955 = vmatprep.subr.bf16.mxu1 %v14690_v26 }
0x2786   : > { %v13980_v19 = vpop.eup %13979  ;;  %v12952_v41 = vpack.c.bf16 %v13534_v53, %v13533_v2  ;;  %v11249_v53 = vld [vmem:[%s16263_s27 + $0x50] sm:$0xff]  ;;  %v11250_v2 = vld [vmem:[%s16263_s27 + $0x58] sm:$0xff] }
0x2787   : > { %v6847_v51 = vmul.f32 %v13980_v19, %v13976_v1  ;;  %v13522_v3 = vpop.permute.xlu0 %13521  ;;  %v7090_v60 = vpop.permute.xlu1 %7089 }
0x2788   : > { %v13524_v5 = vunpack.i.h.bf16 %v13522_v3  ;;  %v13523_v42 = vunpack.i.l.bf16 %v13522_v3 }
0x2789   : > { %12031 = vmatmul.mubr.msk.f32.vlgmr.msra.gmra.mrb[52].mxu0 %vm1540_vm1, %v6847_v51 }
0x278a   : > { %v12945_v13 = vpack.c.bf16 %v13524_v5, %v13523_v42  ;;  %12037 = vmatprep.mubr.msk.f32.mxu0 %vm14691_vm13, %v14686_v9 }
0x278b   : > { %v7008_v14 = vpop.permute.xlu0 %7007 }
0x278c   : > { %12946 = vmatpush3.bf16.msra.mxu0 %v12945_v13  ;;  %12045 = vmatmul.mubr.msk.f32.vlgmr.msra.gmra.mrb[62].mxu1 %vm1540_vm1, %v7008_v14 }
0x278d   : > { %12951 = vmatprep.subr.bf16.mxu0 %v14690_v26  ;;  %12058 = vmatprep.mubr.msk.f32.mxu1 %vm14691_vm13, %v14686_v9 }
0x278e   : > { %v13982_v25 = vpop.eup %13981 }
0x278f   : > { %v6848_v10 = vmul.f32 %v13982_v25, %v13978_v49 }
0x2791   : > { %12038 = vmatmul.mubr.msk.f32.vlgmr.msra.gmra.mrb[54].mxu0 %vm1540_vm1, %v6848_v10 }
0x2792   : > { %12051 = vmatprep.mubr.msk.f32.mxu0 %vm14691_vm13, %v14686_v9 }
0x2795   : > { %12954 = vmatpush3.bf16.xpose.msk.msra.mxu0 %vm16126_vm12, %v12952_v41  ;;  %v12961_v41 = vpack.c.bf16 %v11250_v2, %v11249_v53 }
0x2796   : > { %12958 = vmatprep.subr.bf16.mxu0 %v14690_v26 }
0x279c   : > { %12052 = vmatmul.mubr.msk.f32.vlgmr.msra.gmra.mrb[56].mxu0 %vm1540_vm1, %v7090_v60  ;;  %v11247_v60 = vld [vmem:[%s16263_s27 + $0x40] sm:$0xff] }
0x279d   : > { %12065 = vmatprep.mubr.msk.f32.mxu0 %vm14691_vm13, %v14686_v9 }
0x285c   : > { %v16424_v55 = vpop.f32.mrb[52].mxu0 }
0x285d   : > { %v12032_v47 = vpop.f32.mrb[53].mxu0 }
0x285e   : > { %v11248_v47 = vld [vmem:[%s16263_s27 + $0x48] sm:$0xff] }
0x285f   : > { %v7085_v52 = vpop.f32.mrb[62].mxu1 }
0x2860   : > { %v7171_v20 = vmul.f32 0.25, %v7085_v52  ;;  %v12046_v18 = vpop.f32.mrb[63].mxu1  ;;  %v12965_v52 = vpack.c.bf16 %v11248_v47, %v11247_v60 }
0x2862   : > { %v7173_v15 = vsel %vm1540_vm1, %v7171_v20, -inf }
0x2863   : > { %7174 = vmax.xlane.f32.xlu0 %v7173_v15 }
0x2864   : > { %v16427_v32 = vpop.f32.mrb[54].mxu0 }
0x2865   : > { %v12039_v22 = vpop.f32.mrb[55].mxu0 }
0x286f   : > { %v7167_v29 = vpop.f32.mrb[56].mxu0 }
0x2870   : > { %v7172_v7 = vmul.f32 0.25, %v7167_v29  ;;  %v12053_v0 = vpop.f32.mrb[57].mxu0 }
0x2872   : > { %v7176_v36 = vsel %vm1540_vm1, %v7172_v7, -inf }
0x2873   : > { %7177 = vmax.xlane.f32.xlu1 %v7176_v36 }
0x2884   : > { %13536 = vrot.lane.b32.xlu1 %v16138_v11, %s14693_s29 }
0x2888   : > { %13546 = vrot.lane.b32.xlu1 %v16138_v11, %s14694_s20 }
0x288c   : > { %13551 = vrot.lane.b32.xlu1 %v16163_v38, %s14694_s20 }
0x2890   : > { %7597 = vrot.lane.b32.xlu1 %v16382_v33, %s14694_s20 }
0x28f0   : > { %v7175_v44 = vpop.xlane.xlu0 %7174 }
0x28f1   : > { %v7179_v16 = vsub.f32 %v7171_v20, %v7175_v44 }
0x28f3   : > { %v7181_v23 = vmul.f32 1.442695, %v7179_v16 }
0x28f5   : > { %13983 = vpow2.f32 %v7181_v23 }
0x28ff   : > { %v13984_v31 = vpop.eup %13983 }
0x2900   : > { %v7178_v6 = vpop.xlane.xlu1 %7177  ;;  %v7185_v56 = vsel %vm1540_vm1, %v13984_v31, 0.0 }
0x2901   : > { %v7180_v61 = vsub.f32 %v7172_v7, %v7178_v6  ;;  %7186 = vadd.xlane.f32.xlu0 %v7185_v56 }
0x2903   : > { %v7183_v35 = vmul.f32 1.442695, %v7180_v61 }
0x2904   : > { %v13537_v43 = vpop.permute.xlu1 %13536 }
0x2905   : > { %13985 = vpow2.f32 %v7183_v35  ;;  %v13539_v1 = vunpack.i.h.bf16 %v13537_v43  ;;  %v13538_v8 = vunpack.i.l.bf16 %v13537_v43 }
0x2907   : > { %v12956_v49 = vpack.c.bf16 %v13539_v1, %v13538_v8 }
0x2908   : > { %v13547_v5 = vpop.permute.xlu1 %13546 }
0x2909   : > { %12957 = vmatpush3.bf16.msra.mxu1 %v12956_v49  ;;  %v13549_v13 = vunpack.i.h.bf16 %v13547_v5  ;;  %v13548_v14 = vunpack.i.l.bf16 %v13547_v5 }
0x290a   : > { %12962 = vmatprep.subr.bf16.mxu1 %v12961_v41 }
0x290b   : > { %v12970_v25 = vpack.c.bf16 %v13549_v13, %v13548_v14  ;;  %v11252_v13 = vld [vmem:[%s16263_s27 + $0x68] sm:$0xff] }
0x290c   : > { %v13552_v29 = vpop.permute.xlu1 %13551 }
0x290d   : > { %v13554_v7 = vunpack.i.h.bf16 %v13552_v29  ;;  %v13553_v0 = vunpack.i.l.bf16 %v13552_v29 }
0x290f   : > { %v13986_v62 = vpop.eup %13985  ;;  %v12974_v36 = vpack.c.bf16 %v13554_v7, %v13553_v0 }
0x2910   : > { %v7188_v12 = vsel %vm1540_vm1, %v13986_v62, 0.0 }
0x2911   : > { %7189 = vadd.xlane.f32.xlu0 %v7188_v12 }
0x2927   : > { %13541 = vrot.lane.b32.xlu0 %v16163_v38, %s14693_s29 }
0x292b   : > { %7515 = vrot.lane.b32.xlu0 %v16370_v21, %s14694_s20 }
0x298e   : > { %v7187_v63 = vpop.xlane.xlu0 %7186 }
0x298f   : > { %13987 = vrcp.f32 %v7187_v63 }
0x2999   : > { %v13988_v54 = vpop.eup %13987 }
0x299a   : > { %v7193_v4 = vmul.f32 %v13988_v54, %v13984_v31 }
0x299c   : > { %12059 = vmatmul.mubr.msk.f32.vlgmr.msra.gmra.mrb[64].mxu1 %vm1540_vm1, %v7193_v4 }
0x299d   : > { %12964 = vmatpush3.bf16.msra.mxu1 %v12961_v41 }
0x299e   : > { %v7190_v40 = vpop.xlane.xlu0 %7189  ;;  %12966 = vmatprep.subr.bf16.mxu1 %v12965_v52 }
0x299f   : > { %13989 = vrcp.f32 %v7190_v40 }
0x29a2   : > { %v13542_v45 = vpop.permute.xlu0 %13541 }
0x29a3   : > { %v13544_v19 = vunpack.i.h.bf16 %v13542_v45  ;;  %v13543_v51 = vunpack.i.l.bf16 %v13542_v45 }
0x29a5   : > { %v12959_v3 = vpack.c.bf16 %v13544_v19, %v13543_v51 }
0x29a6   : > { %v7516_v10 = vpop.permute.xlu0 %7515 }
0x29a7   : > { %12960 = vmatpush3.bf16.msra.mxu0 %v12959_v3 }
0x29a8   : > { %12969 = vmatprep.subr.bf16.mxu0 %v14690_v26 }
0x29a9   : > { %v13990_v42 = vpop.eup %13989 }
0x29aa   : > { %v7194_v24 = vmul.f32 %v13990_v42, %v13986_v62  ;;  %v11251_v42 = vld [vmem:[%s16263_s27 + $0x60] sm:$0xff] }
0x29ab   : > { %v12983_v14 = vpack.c.bf16 %v11252_v13, %v11251_v42 }
0x29ac   : > { %12066 = vmatmul.mubr.msk.f32.vlgmr.msra.gmra.mrb[58].mxu0 %vm1540_vm1, %v7194_v24 }
0x29ad   : > { %12086 = vmatprep.mubr.msk.f32.mxu0 %vm14691_vm13, %v14686_v9 }
0x29b0   : > { %12972 = vmatpush3.bf16.xpose.msk.msra.mxu0 %vm16126_vm12, %v12970_v25 }
0x29b1   : > { %12977 = vmatprep.subr.bf16.mxu0 %v14690_v26 }
0x29b7   : > { %12087 = vmatmul.mubr.msk.f32.vlgmr.msra.gmra.mrb[60].mxu0 %vm1540_vm1, %v7516_v10 }
0x29b8   : > { %12100 = vmatprep.mubr.msk.f32.mxu0 %vm14691_vm13, %v14686_v9 }
0x2a6f   : > { %v7270_v20 = vpop.f32.mrb[64].mxu1 }
0x2a70   : > { %v12060_v18 = vpop.f32.mrb[65].mxu1  ;;  %12072 = vmatprep.mubr.msk.f32.mxu1 %vm1540_vm1, %v7270_v20 }
0x2a7f   : > { %v7349_v15 = vpop.f32.mrb[58].mxu0 }
0x2a80   : > { %v12067_v22 = vpop.f32.mrb[59].mxu0  ;;  %12073 = vmatmul.mubr.msk.f32.vlgmr.msra.gmra.mrb[66].mxu1 %vm1540_vm1, %v7349_v15 }
0x2a81   : > { %12968 = vmatpush3.bf16.msra.mxu1 %v12965_v52  ;;  %12079 = vmatprep.mubr.msk.f32.mxu1 %vm1540_vm1, %v16424_v55  ;;  %v7598_v55 = vpop.permute.xlu1 %7597 }
0x2a82   : > { %12973 = vmatprep.subr.bf16.mxu1 %v14690_v26 }
0x2a88   : > { %12080 = vmatmul.mubr.msk.f32.vlgmr.msra.gmra.mrb[66].mxu1 %vm1540_vm1, %v16427_v32 }
0x2a89   : > { %12093 = vmatprep.mubr.msk.f32.mxu1 %vm14691_vm13, %v14686_v9 }
0x2a8a   : > { %12976 = vmatpush3.bf16.xpose.msk.msra.mxu1 %vm16126_vm12, %v12974_v36  ;;  %v7593_v44 = vpop.f32.mrb[60].mxu0 }
0x2a8b   : > { %v7679_v16 = vmul.f32 0.25, %v7593_v44  ;;  %v12088_v23 = vpop.f32.mrb[61].mxu0  ;;  %12984 = vmatprep.subr.bf16.mxu1 %v12983_v14 }
0x2a8d   : > { %v7681_v31 = vsel %vm1540_vm1, %v7679_v16, -inf }
0x2a8e   : > { %7682 = vmax.xlane.f32.xlu0 %v7681_v31 }
0x2a91   : > { %12094 = vmatmul.mubr.msk.f32.vlgmr.msra.gmra.mrb[68].mxu1 %vm1540_vm1, %v7598_v55 }
0x2a92   : > { %12986 = vmatpush3.bf16.msra.mxu1 %v12983_v14  ;;  %v11253_v14 = vld [vmem:[%s16263_s27 + $0x70] sm:$0xff] }
0x2a93   : > { %12991 = vmatprep.subr.bf16.mxu1 %v14690_v26 }
0x2b1b   : > { %v7683_v6 = vpop.xlane.xlu0 %7682 }
0x2b1c   : > { %v7687_v56 = vsub.f32 %v7679_v16, %v7683_v6 }
0x2b1e   : > { %v7689_v61 = vmul.f32 1.442695, %v7687_v56 }
0x2b20   : > { %13991 = vpow2.f32 %v7689_v61 }
0x2b2a   : > { %v13992_v32 = vpop.eup %13991 }
0x2b2b   : > { %v7693_v35 = vsel %vm1540_vm1, %v13992_v32, 0.0 }
0x2b2c   : > { %7694 = vadd.xlane.f32.xlu0 %v7693_v35 }
0x2b64   : > { %v7675_v43 = vpop.f32.mrb[68].mxu1 }
0x2b65   : > { %v7680_v1 = vmul.f32 0.25, %v7675_v43  ;;  %v12095_v8 = vpop.f32.mrb[69].mxu1 }
0x2b67   : > { %v7684_v49 = vsel %vm1540_vm1, %v7680_v1, -inf }
0x2b68   : > { %7685 = vmax.xlane.f32.xlu1 %v7684_v49 }
0x2b79   : > { %13556 = vrot.lane.b32.xlu1 %v16138_v11, %s14689_s26 }
0x2b7d   : > { %13566 = vrot.lane.b32.xlu1 %v16138_v11, %s14695_s8 }
0x2b81   : > { %13571 = vrot.lane.b32.xlu1 %v16163_v38, %s14695_s8 }
0x2b85   : > { %8026 = vrot.lane.b32.xlu1 %v16382_v33, %s14695_s8 }
0x2bb9   : > { %v7695_v62 = vpop.xlane.xlu0 %7694 }
0x2bba   : > { %13993 = vrcp.f32 %v7695_v62 }
0x2bc4   : > { %v13994_v19 = vpop.eup %13993 }
0x2bc5   : > { %v7701_v3 = vmul.f32 %v13994_v19, %v13992_v32 }
0x2bf5   : > { %v7686_v12 = vpop.xlane.xlu1 %7685 }
0x2bf6   : > { %v7688_v63 = vsub.f32 %v7680_v1, %v7686_v12 }
0x2bf8   : > { %v7691_v54 = vmul.f32 1.442695, %v7688_v63 }
0x2bf9   : > { %v13557_v4 = vpop.permute.xlu1 %13556 }
0x2bfa   : > { %13995 = vpow2.f32 %v7691_v54  ;;  %v13559_v40 = vunpack.i.h.bf16 %v13557_v4  ;;  %v13558_v45 = vunpack.i.l.bf16 %v13557_v4 }
0x2bfc   : > { %v12978_v51 = vpack.c.bf16 %v13559_v40, %v13558_v45 }
0x2bfd   : > { %v13567_v41 = vpop.permute.xlu1 %13566 }
0x2bfe   : > { %12979 = vmatpush3.bf16.msra.mxu0 %v12978_v51  ;;  %v13569_v47 = vunpack.i.h.bf16 %v13567_v41 }
0x2bff   : > { %12980 = vmatprep.subr.bf16.mxu0 %v14690_v26 }
0x2c01   : > { %12101 = vmatmul.mubr.msk.f32.vlgmr.msra.gmra.mrb[62].mxu0 %vm1540_vm1, %v7701_v3  ;;  %v13572_v29 = vpop.permute.xlu1 %13571 }
0x2c02   : > { %12107 = vmatprep.mubr.msk.f32.mxu0 %vm14691_vm13, %v14686_v9  ;;  %v13574_v7 = vunpack.i.h.bf16 %v13572_v29  ;;  %v13573_v0 = vunpack.i.l.bf16 %v13572_v29 }
0x2c04   : > { %v13996_v33 = vpop.eup %13995  ;;  %v12992_v36 = vpack.c.bf16 %v13574_v7, %v13573_v0  ;;  %v11322_v7 = vld [vmem:[%s16036_s2 + $0xa0] sm:$0xff]  ;;  %v11323_v0 = vld [vmem:[%s16036_s2 + $0xa8] sm:$0xff] }
0x2c05   : > { %v7696_v5 = vsel %vm1540_vm1, %v13996_v33, 0.0  ;;  %v8027_v23 = vpop.permute.xlu1 %8026 }
0x2c06   : > { %7697 = vadd.xlane.f32.xlu0 %v7696_v5 }
0x2c1c   : > { %13561 = vrot.lane.b32.xlu0 %v16163_v38, %s14689_s26 }
0x2c20   : > { %7944 = vrot.lane.b32.xlu0 %v16370_v21, %s14695_s8  ;;  %v13568_v21 = vunpack.i.l.bf16 %v13567_v41 }
0x2c22   : > { %v12988_v20 = vpack.c.bf16 %v13569_v47, %v13568_v21 }
0x2c93   : > { %v7698_v24 = vpop.xlane.xlu0 %7697 }
0x2c94   : > { %13997 = vrcp.f32 %v7698_v24  ;;  %v11254_v24 = vld [vmem:[%s16263_s27 + $0x78] sm:$0xff] }
0x2c97   : > { %v13562_v25 = vpop.permute.xlu0 %13561 }
0x2c98   : > { %v13564_v10 = vunpack.i.h.bf16 %v13562_v25  ;;  %v13563_v53 = vunpack.i.l.bf16 %v13562_v25 }
0x2c9a   : > { %v12981_v2 = vpack.c.bf16 %v13564_v10, %v13563_v53 }
0x2c9b   : > { %v7945_v18 = vpop.permute.xlu0 %7944 }
0x2c9c   : > { %12982 = vmatpush3.bf16.msra.mxu0 %v12981_v2  ;;  %v13001_v2 = vpack.c.bf16 %v11254_v24, %v11253_v14 }
0x2c9d   : > { %12987 = vmatprep.subr.bf16.mxu0 %v14690_v26 }
0x2c9e   : > { %v13998_v60 = vpop.eup %13997 }
0x2c9f   : > { %v7702_v52 = vmul.f32 %v13998_v60, %v13996_v33 }
0x2ca1   : > { %12108 = vmatmul.mubr.msk.f32.vlgmr.msra.gmra.mrb[64].mxu0 %vm1540_vm1, %v7702_v52  ;;  %v11318_v52 = vld [vmem:[%s16036_s2 + $0x80] sm:$0xff] }
0x2ca2   : > { %12121 = vmatprep.mubr.msk.f32.mxu0 %vm14691_vm13, %v14686_v9 }
0x2ca5   : > { %12990 = vmatpush3.bf16.xpose.msk.msra.mxu0 %vm16126_vm12, %v12988_v20  ;;  %v11319_v20 = vld [vmem:[%s16036_s2 + $0x88] sm:$0xff] }
0x2ca6   : > { %12995 = vmatprep.subr.bf16.mxu0 %v14690_v26 }
0x2cac   : > { %12122 = vmatmul.mubr.msk.f32.vlgmr.msra.gmra.mrb[66].mxu0 %vm1540_vm1, %v7945_v18  ;;  %v11320_v18 = vld [vmem:[%s16036_s2 + $0x90] sm:$0xff] }
0x2cad   : > { %12135 = vmatprep.mubr.msk.f32.mxu0 %vm14691_vm13, %v14686_v9 }
0x2cd4   : > { %v7778_v15 = vpop.f32.mrb[62].mxu0 }
0x2cd5   : > { %v12102_v22 = vpop.f32.mrb[63].mxu0  ;;  %12114 = vmatprep.mubr.msk.f32.mxu1 %vm1540_vm1, %v7778_v15  ;;  %v13005_v15 = vpack.c.bf16 %v11319_v20, %v11318_v52 }
0x2cd6   : > { %v11321_v22 = vld [vmem:[%s16036_s2 + $0x98] sm:$0xff] }
0x2cd7   : > { %v13009_v29 = vpack.c.bf16 %v11321_v22, %v11320_v18 }
0x2d74   : > { %v7857_v44 = vpop.f32.mrb[64].mxu0 }
0x2d75   : > { %v12109_v16 = vpop.f32.mrb[65].mxu0  ;;  %12115 = vmatmul.mubr.msk.f32.vlgmr.msra.gmra.mrb[66].mxu1 %vm1540_vm1, %v7857_v44 }
0x2d76   : > { %12994 = vmatpush3.bf16.xpose.msk.msra.mxu1 %vm16126_vm12, %v12992_v36  ;;  %12128 = vmatprep.mubr.msk.f32.mxu1 %vm14691_vm13, %v14686_v9  ;;  %v13013_v36 = vpack.c.bf16 %v11323_v0, %v11322_v7 }
0x2d77   : > { %12998 = vmatprep.subr.bf16.mxu1 %v14690_v26 }
0x2d7d   : > { %12129 = vmatmul.mubr.msk.f32.vlgmr.msra.gmra.mrb[70].mxu1 %vm1540_vm1, %v8027_v23  ;;  %v11324_v23 = vld [vmem:[%s16036_s2 + $0xb0] sm:$0xff] }
0x2d7e   : > { %12142 = vmatprep.mubr.msk.f32.mxu1 %vm14691_vm13, %v14686_v9 }
0x2d7f   : > { %v8022_v31 = vpop.f32.mrb[66].mxu0 }
0x2d80   : > { %v8108_v55 = vmul.f32 0.25, %v8022_v31  ;;  %v12123_v6 = vpop.f32.mrb[67].mxu0  ;;  %v11325_v31 = vld [vmem:[%s16036_s2 + $0xb8] sm:$0xff]  ;;  %s11384_s2 = sshll.u32 %s15924_s28, 6 }
0x2d82   : > { %v8110_v56 = vsel %vm1540_vm1, %v8108_v55, -inf }
0x2d83   : > { %8111 = vmax.xlane.f32.xlu0 %v8110_v56  ;;  %v11308_v56 = vld [vmem:[%s15302_s5 + $0x1] ss:$0 sm:$0xff] }
0x2e10   : > { %v8112_v61 = vpop.xlane.xlu0 %8111 }
0x2e11   : > { %v8116_v32 = vsub.f32 %v8108_v55, %v8112_v61  ;;  %v13017_v55 = vpack.c.bf16 %v11325_v31, %v11324_v23 }
0x2e13   : > { %v8118_v35 = vmul.f32 1.442695, %v8116_v32 }
0x2e15   : > { %13999 = vpow2.f32 %v8118_v35  ;;  %v11327_v35 = vld [vmem:[%s15294_s0 + $0x2] ss:$0 sm:$0xff]  ;;  %s16952_s0 = sld [smem:[#allocation57_spill]] }
0x2e1f   : > { %v14000_v43 = vpop.eup %13999 }
0x2e20   : > { %v8122_v1 = vsel %vm1540_vm1, %v14000_v43, 0.0 }
0x2e21   : > { %8123 = vadd.xlane.f32.xlu0 %v8122_v1 }
0x2e50   : > { %v8104_v8 = vpop.f32.mrb[70].mxu1 }
0x2e51   : > { %v8109_v49 = vmul.f32 0.25, %v8104_v8  ;;  %v12130_v62 = vpop.f32.mrb[71].mxu1 }
0x2e53   : > { %v8113_v12 = vsel %vm1540_vm1, %v8109_v49, -inf }
0x2e54   : > { %8114 = vmax.xlane.f32.xlu1 %v8113_v12 }
0x2e65   : > { %13576 = vrot.lane.b32.xlu1 %v16138_v11, %s14696_s16 }
0x2eae   : > { %v8124_v63 = vpop.xlane.xlu0 %8123 }
0x2eaf   : > { %14001 = vrcp.f32 %v8124_v63 }
0x2eb9   : > { %v14002_v3 = vpop.eup %14001 }
0x2eba   : > { %v8130_v5 = vmul.f32 %v14002_v3, %v14000_v43 }
0x2ee1   : > { %v8115_v54 = vpop.xlane.xlu1 %8114 }
0x2ee2   : > { %v8117_v4 = vsub.f32 %v8109_v49, %v8115_v54 }
0x2ee4   : > { %v8120_v40 = vmul.f32 1.442695, %v8117_v4 }
0x2ee5   : > { %v13577_v45 = vpop.permute.xlu1 %13576 }
0x2ee6   : > { %14003 = vpow2.f32 %v8120_v40  ;;  %v13579_v19 = vunpack.i.h.bf16 %v13577_v45  ;;  %v13578_v51 = vunpack.i.l.bf16 %v13577_v45 }
0x2ee8   : > { %v12996_v33 = vpack.c.bf16 %v13579_v19, %v13578_v51 }
0x2eea   : > { %12997 = vmatpush3.bf16.msra.mxu0 %v12996_v33 }
0x2eeb   : > { %13006 = vmatprep.subr.bf16.mxu0 %v13005_v15 }
0x2eed   : > { %12136 = vmatmul.mubr.msk.f32.vlgmr.msra.gmra.mrb[68].mxu0 %vm1540_vm1, %v8130_v5 }
0x2eee   : > { %13008 = vmatpush3.bf16.msra.mxu0 %v13005_v15 }
0x2eef   : > { %13010 = vmatprep.subr.bf16.mxu0 %v13009_v29 }
0x2ef0   : > { %v14004_v42 = vpop.eup %14003 }
0x2ef1   : > { %v8125_v11 = vsel %vm1540_vm1, %v14004_v42, 0.0 }
0x2ef2   : > { %8126 = vadd.xlane.f32.xlu0 %v8125_v11  ;;  %13012 = vmatpush3.bf16.msra.mxu0 %v13009_v29 }
0x2ef3   : > { %13014 = vmatprep.subr.bf16.mxu0 %v13013_v36 }
0x2ef6   : > { %13016 = vmatpush3.bf16.msra.mxu0 %v13013_v36 }
0x2ef7   : > { %13018 = vmatprep.subr.bf16.mxu0 %v13017_v55 }
0x2efa   : > { %13020 = vmatpush3.bf16.msra.mxu0 %v13017_v55 }
0x2efb   : > { %13029 = vmatprep.subr.bf16.mxu0 %v14690_v26 }
0x2f08   : > { %13581 = vrot.lane.b32.xlu0 %v16163_v38, %s14696_s16 }
0x2f7f   : > { %v8127_v13 = vpop.xlane.xlu0 %8126 }
0x2f80   : > { %14005 = vrcp.f32 %v8127_v13 }
0x2f83   : > { %v13582_v25 = vpop.permute.xlu0 %13581 }
0x2f84   : > { %v13584_v10 = vunpack.i.h.bf16 %v13582_v25  ;;  %v13583_v53 = vunpack.i.l.bf16 %v13582_v25 }
0x2f86   : > { %v12999_v41 = vpack.c.bf16 %v13584_v10, %v13583_v53 }
0x2f88   : > { %13000 = vmatpush3.bf16.msra.mxu1 %v12999_v41 }
0x2f89   : > { %13002 = vmatprep.subr.bf16.mxu1 %v13001_v2 }
0x2f8a   : > { %v14006_v60 = vpop.eup %14005 }
0x2f8b   : > { %v8131_v47 = vmul.f32 %v14006_v60, %v14004_v42 }
0x2f8d   : > { %12143 = vmatmul.mubr.msk.f32.vlgmr.msra.gmra.mrb[72].mxu1 %vm1540_vm1, %v8131_v47 }
0x2f8e   : > { %13004 = vmatpush3.bf16.msra.mxu1 %v13001_v2 }
0x2f8f   : > { %13021 = vmatprep.subr.bf16.mxu1 %v14690_v26 }
0x2fc0   : > { %v8207_v38 = vpop.f32.mrb[68].mxu0 }
0x2fc1   : > { %v12137_v21 = vpop.f32.mrb[69].mxu0  ;;  %12149 = vmatprep.mubr.msk.f32.mxu1 %vm1540_vm1, %v8207_v38 }
0x3060   : > { %v8286_v44 = vpop.f32.mrb[72].mxu1 }
0x3061   : > { %v12144_v16 = vpop.f32.mrb[73].mxu1  ;;  %12150 = vmatmul.mubr.msk.f32.vlgmr.msra.gmra.mrb[66].mxu1 %vm1540_vm1, %v8286_v44 }
0x3062   : > { %13024 = vmatpush3.bf16.xpose.msk.msra.mxu1 %vm16126_vm12, %v13022_v46  ;;  %12175 = vmatprep.mubr.msk.f32.mxu1 %vm14691_vm13, %v14686_v9 }
0x3063   : > { %13025 = vmatprep.subr.bf16.mxu1 %v14690_v26 }
0x3134   : > { %v12151_v6 = vpop.f32.mrb[66].mxu1 }
0x3135   : > { %v8374_v28 = vadd.f32 %v12151_v6, %v16361_v39  ;;  %v8362_v37 = vpop.f32.mrb[67].mxu1 }
0x3136   : > { %v8373_v46 = vadd.f32 %v8362_v37, %v16359_v27 }
0x3137   : > { %v16551_v32 = vadd.f32 %v11308_v56, %v8374_v28 }
0x3138   : > { %v16549_v61 = vadd.f32 %v11308_v56, %v8373_v46 }
0x313a   : > { %12168 = vmatprep.mubr.msk.f32.mxu0 %vm2221_vm3, %v16549_v61 }
0x313b   : > { %12169 = vmatmul.mubr.msk.f32.vlgmr.msra.gmra.mrb[70].mxu0 %vm2221_vm3, %v16551_v32 }
0x313c   : > { %12189 = vmatprep.mubr.msk.f32.mxu0 %vm14691_vm13, %v14686_v9 }
0x320e   : > { %v12170_v43 = vpop.f32.mrb[70].mxu0 }
0x320f   : > { %v8483_v1 = vpop.f32.mrb[71].mxu0  ;;  %v16572_v27 = vadd.f32 %v12170_v43, %v11327_v35 }
0x3210   : > { %v16560_v39 = vadd.f32 %v11327_v35, %v8483_v1 }
0x3212   : > { %12176 = vmatmul.mubr.msk.f32.vlgmr.msra.gmra.mrb[74].mxu1 %vm1540_vm1, %v16560_v39 }
0x3213   : > { %13028 = vmatpush3.bf16.xpose.msk.msra.mxu1 %vm16126_vm12, %v13026_v30  ;;  %12182 = vmatprep.mubr.msk.f32.mxu1 %vm14691_vm13, %v14686_v9 }
0x3214   : > { %13035 = vmatprep.subr.bf16.mxu1 %v14690_v26 }
0x321a   : > { %12183 = vmatmul.mubr.msk.f32.vlgmr.msra.gmra.mrb[76].mxu1 %vm1540_vm1, %v16572_v27 }
0x321b   : > { %12203 = vmatprep.mubr.msk.f32.mxu1 %vm14691_vm13, %v14686_v9 }
0x32e5   : > { %v8567_v8 = vpop.f32.mrb[74].mxu1 }
0x32e6   : > { %v8650_v49 = vmul.f32 0.25, %v8567_v8  ;;  %v12177_v62 = vpop.f32.mrb[75].mxu1 }
0x32e8   : > { %v8652_v17 = vsel %vm1540_vm1, %v8650_v49, -inf }
0x32e9   : > { %8653 = vmax.xlane.f32.xlu1 %v8652_v17 }
0x32ed   : > { %v8646_v57 = vpop.f32.mrb[76].mxu1 }
0x32ee   : > { %v8651_v30 = vmul.f32 0.25, %v8646_v57  ;;  %v12184_v12 = vpop.f32.mrb[77].mxu1 }
0x32f0   : > { %v8655_v63 = vsel %vm1540_vm1, %v8651_v30, -inf }
0x32f1   : > { %8656 = vmax.xlane.f32.xlu0 %v8655_v63 }
0x32fa   : > { %13586 = vrot.lane.b32.xlu1 %v16175_v48, %s14687_s7 }
0x3376   : > { %v8654_v54 = vpop.xlane.xlu1 %8653 }
0x3377   : > { %v8658_v4 = vsub.f32 %v8650_v49, %v8654_v54 }
0x3379   : > { %v8660_v40 = vmul.f32 1.442695, %v8658_v4 }
0x337a   : > { %v13587_v45 = vpop.permute.xlu1 %13586 }
0x337b   : > { %14007 = vpow2.f32 %v8660_v40  ;;  %v13589_v19 = vunpack.i.h.bf16 %v13587_v45  ;;  %v13588_v51 = vunpack.i.l.bf16 %v13587_v45 }
0x337d   : > { %v13030_v3 = vpack.c.bf16 %v13589_v19, %v13588_v51 }
0x337e   : > { %v8657_v33 = vpop.xlane.xlu0 %8656 }
0x337f   : > { %v8659_v5 = vsub.f32 %v8651_v30, %v8657_v33  ;;  %13031 = vmatpush3.bf16.msra.mxu0 %v13030_v3 }
0x3380   : > { %13032 = vmatprep.subr.bf16.mxu0 %v14690_v26 }
0x3381   : > { %v8662_v42 = vmul.f32 1.442695, %v8659_v5 }
0x3383   : > { %14009 = vpow2.f32 %v8662_v42 }
0x3385   : > { %v14008_v11 = vpop.eup %14007 }
0x3386   : > { %v8664_v13 = vsel %vm1540_vm1, %v14008_v11, 0.0 }
0x3387   : > { %8665 = vadd.xlane.f32.xlu1 %v8664_v13 }
0x338d   : > { %v14010_v14 = vpop.eup %14009 }
0x338e   : > { %v8667_v24 = vsel %vm1540_vm1, %v14010_v14, 0.0 }
0x338f   : > { %8668 = vadd.xlane.f32.xlu0 %v8667_v24 }
0x3398   : > { %13596 = vrot.lane.b32.xlu1 %v16175_v48, %s14692_s10 }
0x339c   : > { %13601 = vrot.lane.b32.xlu1 %v16188_v58, %s14692_s10 }
0x33a0   : > { %8914 = vrot.lane.b32.xlu1 %v16572_v27, %s14692_s10 }
0x33a5   : > { %13591 = vrot.lane.b32.xlu0 %v16188_v58, %s14687_s7 }
0x33a9   : > { %8832 = vrot.lane.b32.xlu0 %v16560_v39, %s14692_s10 }
0x3414   : > { %v8666_v25 = vpop.xlane.xlu1 %8665 }
0x3415   : > { %14011 = vrcp.f32 %v8666_v25 }
0x3418   : > { %v13597_v10 = vpop.permute.xlu1 %13596 }
0x3419   : > { %v13599_v53 = vunpack.i.h.bf16 %v13597_v10  ;;  %v13598_v2 = vunpack.i.l.bf16 %v13597_v10 }
0x341b   : > { %v13036_v41 = vpack.c.bf16 %v13599_v53, %v13598_v2 }
0x341c   : > { %v8669_v60 = vpop.xlane.xlu0 %8668  ;;  %v13602_v22 = vpop.permute.xlu1 %13601 }
0x341d   : > { %14013 = vrcp.f32 %v8669_v60  ;;  %13038 = vmatpush3.bf16.xpose.msk.msra.mxu1 %vm16126_vm12, %v13036_v41  ;;  %v13604_v0 = vunpack.i.h.bf16 %v13602_v22  ;;  %v13603_v36 = vunpack.i.l.bf16 %v13602_v22 }
0x341e   : > { %13043 = vmatprep.subr.bf16.mxu1 %v14690_v26 }
0x341f   : > { %v14012_v47 = vpop.eup %14011  ;;  %v13040_v44 = vpack.c.bf16 %v13604_v0, %v13603_v36 }
0x3420   : > { %v8672_v38 = vmul.f32 %v14012_v47, %v14008_v11  ;;  %v13592_v21 = vpop.permute.xlu0 %13591  ;;  %v8915_v16 = vpop.permute.xlu1 %8914 }
0x3421   : > { %v13594_v52 = vunpack.i.h.bf16 %v13592_v21  ;;  %v13593_v20 = vunpack.i.l.bf16 %v13592_v21  ;;  %v11311_v21 = vld [vmem:[%s16263_s27 + $0x90] sm:$0xff] }
0x3422   : > { %12190 = vmatmul.mubr.msk.f32.vlgmr.msra.gmra.mrb[72].mxu0 %vm1540_vm1, %v8672_v38 }
0x3423   : > { %v13033_v18 = vpack.c.bf16 %v13594_v52, %v13593_v20  ;;  %12196 = vmatprep.mubr.msk.f32.mxu0 %vm14691_vm13, %v14686_v9  ;;  %v11312_v52 = vld [vmem:[%s16263_s27 + $0x98] sm:$0xff] }
0x3424   : > { %v8833_v15 = vpop.permute.xlu0 %8832  ;;  %v13049_v20 = vpack.c.bf16 %v11312_v52, %v11311_v21 }
0x3425   : > { %13034 = vmatpush3.bf16.msra.mxu0 %v13033_v18  ;;  %12204 = vmatmul.mubr.msk.f32.vlgmr.msra.gmra.mrb[78].mxu1 %vm1540_vm1, %v8833_v15  ;;  %v11309_v18 = vld [vmem:[%s16263_s27 + $0x80] sm:$0xff]  ;;  %v11310_v15 = vld [vmem:[%s16263_s27 + $0x88] sm:$0xff] }
0x3426   : > { %13039 = vmatprep.subr.bf16.mxu0 %v14690_v26  ;;  %12217 = vmatprep.mubr.msk.f32.mxu1 %vm14691_vm13, %v14686_v9  ;;  %v13053_v22 = vpack.c.bf16 %v11310_v15, %v11309_v18 }
0x3427   : > { %v14014_v29 = vpop.eup %14013 }
0x3428   : > { %v8673_v7 = vmul.f32 %v14014_v29, %v14010_v14 }
0x342a   : > { %12197 = vmatmul.mubr.msk.f32.vlgmr.msra.gmra.mrb[74].mxu0 %vm1540_vm1, %v8673_v7 }
0x342b   : > { %12210 = vmatprep.mubr.msk.f32.mxu0 %vm14691_vm13, %v14686_v9 }
0x342e   : > { %13042 = vmatpush3.bf16.xpose.msk.msra.mxu0 %vm16126_vm12, %v13040_v44 }
0x342f   : > { %13046 = vmatprep.subr.bf16.mxu0 %v14690_v26 }
0x3435   : > { %12211 = vmatmul.mubr.msk.f32.vlgmr.msra.gmra.mrb[76].mxu0 %vm1540_vm1, %v8915_v16 }
0x3436   : > { %12224 = vmatprep.mubr.msk.f32.mxu0 %vm14691_vm13, %v14686_v9 }
0x34f5   : > { %v16614_v23 = vpop.f32.mrb[72].mxu0 }
0x34f6   : > { %v12191_v31 = vpop.f32.mrb[73].mxu0 }
0x34f8   : > { %v8910_v55 = vpop.f32.mrb[78].mxu1 }
0x34f9   : > { %v8996_v6 = vmul.f32 0.25, %v8910_v55  ;;  %v12205_v56 = vpop.f32.mrb[79].mxu1 }
0x34fb   : > { %v8998_v28 = vsel %vm1540_vm1, %v8996_v6, -inf }
0x34fc   : > { %8999 = vmax.xlane.f32.xlu0 %v8998_v28 }
0x34fd   : > { %v16617_v37 = vpop.f32.mrb[74].mxu0 }
0x34fe   : > { %v12198_v46 = vpop.f32.mrb[75].mxu0 }
0x3508   : > { %v8992_v35 = vpop.f32.mrb[76].mxu0 }
0x3509   : > { %v8997_v43 = vmul.f32 0.25, %v8992_v35  ;;  %v12212_v1 = vpop.f32.mrb[77].mxu0 }
0x350b   : > { %v9001_v8 = vsel %vm1540_vm1, %v8997_v43, -inf }
0x350c   : > { %9002 = vmax.xlane.f32.xlu1 %v9001_v8 }
0x351d   : > { %13606 = vrot.lane.b32.xlu1 %v16175_v48, %s14693_s29 }
0x3521   : > { %13616 = vrot.lane.b32.xlu1 %v16175_v48, %s14694_s20 }
0x3525   : > { %13621 = vrot.lane.b32.xlu1 %v16188_v58, %s14694_s20 }
0x3529   : > { %9422 = vrot.lane.b32.xlu1 %v16572_v27, %s14694_s20 }
0x3589   : > { %v9000_v49 = vpop.xlane.xlu0 %8999 }
0x358a   : > { %v9004_v62 = vsub.f32 %v8996_v6, %v9000_v49 }
0x358c   : > { %v9006_v17 = vmul.f32 1.442695, %v9004_v62 }
0x358e   : > { %14015 = vpow2.f32 %v9006_v17 }
0x3598   : > { %v14016_v57 = vpop.eup %14015 }
0x3599   : > { %v9003_v30 = vpop.xlane.xlu1 %9002  ;;  %v9010_v12 = vsel %vm1540_vm1, %v14016_v57, 0.0 }
0x359a   : > { %v9005_v63 = vsub.f32 %v8997_v43, %v9003_v30  ;;  %9011 = vadd.xlane.f32.xlu0 %v9010_v12 }
0x359c   : > { %v9008_v54 = vmul.f32 1.442695, %v9005_v63 }
0x359d   : > { %v13607_v4 = vpop.permute.xlu1 %13606 }
0x359e   : > { %14017 = vpow2.f32 %v9008_v54  ;;  %v13609_v40 = vunpack.i.h.bf16 %v13607_v4  ;;  %v13608_v45 = vunpack.i.l.bf16 %v13607_v4 }
0x35a0   : > { %v13044_v19 = vpack.c.bf16 %v13609_v40, %v13608_v45 }
0x35a1   : > { %v13617_v10 = vpop.permute.xlu1 %13616 }
0x35a2   : > { %13045 = vmatpush3.bf16.msra.mxu1 %v13044_v19  ;;  %v13619_v2 = vunpack.i.h.bf16 %v13617_v10  ;;  %v13618_v41 = vunpack.i.l.bf16 %v13617_v10 }
0x35a3   : > { %13050 = vmatprep.subr.bf16.mxu1 %v13049_v20 }
0x35a4   : > { %v13058_v47 = vpack.c.bf16 %v13619_v2, %v13618_v41 }
0x35a5   : > { %v13622_v44 = vpop.permute.xlu1 %13621 }
0x35a6   : > { %v13624_v16 = vunpack.i.h.bf16 %v13622_v44  ;;  %v13623_v31 = vunpack.i.l.bf16 %v13622_v44 }
0x35a8   : > { %v14018_v51 = vpop.eup %14017  ;;  %v13062_v55 = vpack.c.bf16 %v13624_v16, %v13623_v31 }
0x35a9   : > { %v9013_v3 = vsel %vm1540_vm1, %v14018_v51, 0.0 }
0x35aa   : > { %9014 = vadd.xlane.f32.xlu0 %v9013_v3 }
0x35c0   : > { %13611 = vrot.lane.b32.xlu0 %v16188_v58, %s14693_s29  ;;  %s16955_s29 = sld [smem:[#allocation61_spill]] }
0x35c4   : > { %9340 = vrot.lane.b32.xlu0 %v16560_v39, %s14694_s20 }
0x35c6   : > { %s1418_s20 = scalar_lea.vmem %s16955_s29, %s15924_s28 }
0x3627   : > { %v9012_v33 = vpop.xlane.xlu0 %9011 }
0x3628   : > { %14019 = vrcp.f32 %v9012_v33 }
0x3632   : > { %v14020_v5 = vpop.eup %14019 }
0x3633   : > { %v9018_v42 = vmul.f32 %v14020_v5, %v14016_v57  ;;  %v11313_v5 = vld [vmem:[%s16263_s27 + $0xa0] sm:$0xff] }
0x3635   : > { %12218 = vmatmul.mubr.msk.f32.vlgmr.msra.gmra.mrb[80].mxu1 %vm1540_vm1, %v9018_v42  ;;  %v11314_v42 = vld [vmem:[%s16263_s27 + $0xa8] sm:$0xff] }
0x3636   : > { %13052 = vmatpush3.bf16.msra.mxu1 %v13049_v20 }
0x3637   : > { %v9015_v11 = vpop.xlane.xlu0 %9014  ;;  %13054 = vmatprep.subr.bf16.mxu1 %v13053_v22 }
0x3638   : > { %14021 = vrcp.f32 %v9015_v11  ;;  %v13071_v11 = vpack.c.bf16 %v11314_v42, %v11313_v5 }
0x363b   : > { %v13612_v13 = vpop.permute.xlu0 %13611 }
0x363c   : > { %v13614_v14 = vunpack.i.h.bf16 %v13612_v13  ;;  %v13613_v24 = vunpack.i.l.bf16 %v13612_v13 }
0x363e   : > { %v13047_v25 = vpack.c.bf16 %v13614_v14, %v13613_v24 }
0x363f   : > { %v9341_v38 = vpop.permute.xlu0 %9340 }
0x3640   : > { %13048 = vmatpush3.bf16.msra.mxu0 %v13047_v25 }
0x3641   : > { %13057 = vmatprep.subr.bf16.mxu0 %v14690_v26 }
0x3642   : > { %v14022_v53 = vpop.eup %14021 }
0x3643   : > { %v9019_v60 = vmul.f32 %v14022_v53, %v14018_v51 }
0x3645   : > { %12225 = vmatmul.mubr.msk.f32.vlgmr.msra.gmra.mrb[78].mxu0 %vm1540_vm1, %v9019_v60 }
0x3646   : > { %12245 = vmatprep.mubr.msk.f32.mxu0 %vm14691_vm13, %v14686_v9 }
0x3649   : > { %13060 = vmatpush3.bf16.xpose.msk.msra.mxu0 %vm16126_vm12, %v13058_v47 }
0x364a   : > { %13065 = vmatprep.subr.bf16.mxu0 %v14690_v26 }
0x3650   : > { %12246 = vmatmul.mubr.msk.f32.vlgmr.msra.gmra.mrb[80].mxu0 %vm1540_vm1, %v9341_v38 }
0x3651   : > { %12259 = vmatprep.mubr.msk.f32.mxu0 %vm14691_vm13, %v14686_v9 }
0x3708   : > { %v9095_v29 = vpop.f32.mrb[80].mxu1 }
0x3709   : > { %v12219_v7 = vpop.f32.mrb[81].mxu1  ;;  %12231 = vmatprep.mubr.msk.f32.mxu1 %vm1540_vm1, %v9095_v29 }
0x3718   : > { %v9174_v0 = vpop.f32.mrb[78].mxu0 }
0x3719   : > { %v12226_v36 = vpop.f32.mrb[79].mxu0  ;;  %12232 = vmatmul.mubr.msk.f32.vlgmr.msra.gmra.mrb[82].mxu1 %vm1540_vm1, %v9174_v0 }
0x371a   : > { %13056 = vmatpush3.bf16.msra.mxu1 %v13053_v22  ;;  %12238 = vmatprep.mubr.msk.f32.mxu1 %vm1540_vm1, %v16614_v23  ;;  %v9423_v23 = vpop.permute.xlu1 %9422 }
0x371b   : > { %13061 = vmatprep.subr.bf16.mxu1 %v14690_v26 }
0x3721   : > { %12239 = vmatmul.mubr.msk.f32.vlgmr.msra.gmra.mrb[82].mxu1 %vm1540_vm1, %v16617_v37 }
0x3722   : > { %12252 = vmatprep.mubr.msk.f32.mxu1 %vm14691_vm13, %v14686_v9 }
0x3723   : > { %13064 = vmatpush3.bf16.xpose.msk.msra.mxu1 %vm16126_vm12, %v13062_v55  ;;  %v9418_v6 = vpop.f32.mrb[80].mxu0 }
0x3724   : > { %v9504_v56 = vmul.f32 0.25, %v9418_v6  ;;  %v12247_v28 = vpop.f32.mrb[81].mxu0  ;;  %13072 = vmatprep.subr.bf16.mxu1 %v13071_v11 }
0x3726   : > { %v9506_v46 = vsel %vm1540_vm1, %v9504_v56, -inf }
0x3727   : > { %9507 = vmax.xlane.f32.xlu0 %v9506_v46 }
0x372a   : > { %12253 = vmatmul.mubr.msk.f32.vlgmr.msra.gmra.mrb[84].mxu1 %vm1540_vm1, %v9423_v23 }
0x372b   : > { %13074 = vmatpush3.bf16.msra.mxu1 %v13071_v11  ;;  %v10209_v11 = vld [vmem:[%s15310_s4 + $0x8] sm:$0xff] }
0x372c   : > { %13079 = vmatprep.subr.bf16.mxu1 %v14690_v26 }
0x37b4   : > { %v9508_v35 = vpop.xlane.xlu0 %9507 }
0x37b5   : > { %v9512_v43 = vsub.f32 %v9504_v56, %v9508_v35 }
0x37b7   : > { %v9514_v1 = vmul.f32 1.442695, %v9512_v43 }
0x37b9   : > { %14023 = vpow2.f32 %v9514_v1 }
0x37c3   : > { %v14024_v37 = vpop.eup %14023 }
0x37c4   : > { %v9518_v8 = vsel %vm1540_vm1, %v14024_v37, 0.0 }
0x37c5   : > { %9519 = vadd.xlane.f32.xlu0 %v9518_v8 }
0x37fd   : > { %v9500_v49 = vpop.f32.mrb[84].mxu1 }
0x37fe   : > { %v9505_v62 = vmul.f32 0.25, %v9500_v49  ;;  %v12254_v17 = vpop.f32.mrb[85].mxu1 }
0x3800   : > { %v9509_v57 = vsel %vm1540_vm1, %v9505_v62, -inf }
0x3801   : > { %9510 = vmax.xlane.f32.xlu1 %v9509_v57 }
0x3812   : > { %13626 = vrot.lane.b32.xlu1 %v16175_v48, %s14689_s26 }
0x3816   : > { %13636 = vrot.lane.b32.xlu1 %v16175_v48, %s14695_s8 }
0x381a   : > { %13641 = vrot.lane.b32.xlu1 %v16188_v58, %s14695_s8 }
0x381e   : > { %9851 = vrot.lane.b32.xlu1 %v16572_v27, %s14695_s8 }
0x3852   : > { %v9520_v30 = vpop.xlane.xlu0 %9519 }
0x3853   : > { %14025 = vrcp.f32 %v9520_v30 }
0x385d   : > { %v14026_v19 = vpop.eup %14025 }
0x385e   : > { %v9526_v3 = vmul.f32 %v14026_v19, %v14024_v37 }
0x388e   : > { %v9511_v12 = vpop.xlane.xlu1 %9510 }
0x388f   : > { %v9513_v63 = vsub.f32 %v9505_v62, %v9511_v12 }
0x3891   : > { %v9516_v54 = vmul.f32 1.442695, %v9513_v63 }
0x3892   : > { %v13627_v4 = vpop.permute.xlu1 %13626 }
0x3893   : > { %14027 = vpow2.f32 %v9516_v54  ;;  %v13629_v40 = vunpack.i.h.bf16 %v13627_v4  ;;  %v13628_v45 = vunpack.i.l.bf16 %v13627_v4  ;;  %v11315_v4 = vld [vmem:[%s16263_s27 + $0xb0] sm:$0xff] }
0x3895   : > { %v13066_v51 = vpack.c.bf16 %v13629_v40, %v13628_v45  ;;  %v11316_v40 = vld [vmem:[%s16263_s27 + $0xb8] sm:$0xff]  ;;  %s11382_s27 = sshll.u32 %s15924_s28, 8 }
0x3896   : > { %v13637_v53 = vpop.permute.xlu1 %13636  ;;  %s16737_s7 = scalar_lea.vmem %s16952_s0, %s11382_s27 }
0x3897   : > { %13067 = vmatpush3.bf16.msra.mxu0 %v13066_v51  ;;  %v13639_v41 = vunpack.i.h.bf16 %v13637_v53 }
0x3898   : > { %13068 = vmatprep.subr.bf16.mxu0 %v14690_v26 }
0x389a   : > { %12260 = vmatmul.mubr.msk.f32.vlgmr.msra.gmra.mrb[82].mxu0 %vm1540_vm1, %v9526_v3  ;;  %v13642_v20 = vpop.permute.xlu1 %13641  ;;  %v13089_v3 = vpack.c.bf16 %v11316_v40, %v11315_v4  ;;  %v10330_v4 = vld [vmem:[%s16737_s7 + $0x38] sm:$0xff]  ;;  %v10347_v40 = vld [vmem:[%s16737_s7 + $0xc0] sm:$0xff] }
0x389b   : > { %12266 = vmatprep.mubr.msk.f32.mxu0 %vm14691_vm13, %v14686_v9  ;;  %v13644_v18 = vunpack.i.h.bf16 %v13642_v20  ;;  %v13643_v15 = vunpack.i.l.bf16 %v13642_v20  ;;  %v10216_v20 = vld [vmem:[%s15310_s4 + $0x40] sm:$0xff] }
0x389d   : > { %v14028_v27 = vpop.eup %14027  ;;  %v13080_v22 = vpack.c.bf16 %v13644_v18, %v13643_v15  ;;  %v10218_v18 = vld [vmem:[%s15310_s4 + $0x50] sm:$0xff] }
0x389e   : > { %v9521_v33 = vsel %vm1540_vm1, %v14028_v27, 0.0  ;;  %v9852_v0 = vpop.permute.xlu1 %9851  ;;  %v13103_v15 = vpack.c.bf16 %v10218_v18, %v10216_v20  ;;  %v10353_v18 = vld [vmem:[%s16737_s7 + $0xf0] sm:$0xff] }
0x389f   : > { %9522 = vadd.xlane.f32.xlu0 %v9521_v33 }
0x38b5   : > { %13631 = vrot.lane.b32.xlu0 %v16188_v58, %s14689_s26 }
0x38b9   : > { %9769 = vrot.lane.b32.xlu0 %v16560_v39, %s14695_s8  ;;  %v13638_v39 = vunpack.i.l.bf16 %v13637_v53  ;;  %v10215_v53 = vld [vmem:[%s15310_s4 + $0x38] sm:$0xff]  ;;  %s1424_s8 = scvt.s32.f32 %s16927_s23 }
0x38bb   : > { %v13076_v47 = vpack.c.bf16 %v13639_v41, %v13638_v39  ;;  %v10212_v39 = vld [vmem:[%s15310_s4 + $0x20] sm:$0xff] }
0x392c   : > { %v9523_v13 = vpop.xlane.xlu0 %9522 }
0x392d   : > { %14029 = vrcp.f32 %v9523_v13  ;;  %v10211_v13 = vld [vmem:[%s15310_s4 + $0x18] sm:$0xff] }
0x3930   : > { %v13632_v14 = vpop.permute.xlu0 %13631 }
0x3931   : > { %v13634_v24 = vunpack.i.h.bf16 %v13632_v14  ;;  %v13633_v25 = vunpack.i.l.bf16 %v13632_v14  ;;  %v10208_v14 = vld [vmem:[%s15310_s4] sm:$0xff] }
0x3933   : > { %v13069_v10 = vpack.c.bf16 %v13634_v24, %v13633_v25  ;;  %v13093_v24 = vpack.c.bf16 %v10211_v13, %v10209_v11  ;;  %v10210_v25 = vld [vmem:[%s15310_s4 + $0x10] sm:$0xff]  ;;  %v10333_v11 = vld [vmem:[%s16737_s7 + $0x50] sm:$0xff] }
0x3934   : > { %v9770_v38 = vpop.permute.xlu0 %9769  ;;  %v10334_v13 = vld [vmem:[%s16737_s7 + $0x58] sm:$0xff] }
0x3935   : > { %13070 = vmatpush3.bf16.msra.mxu0 %v13069_v10  ;;  %v10213_v10 = vld [vmem:[%s15310_s4 + $0x28] sm:$0xff] }
0x3936   : > { %13075 = vmatprep.subr.bf16.mxu0 %v14690_v26  ;;  %v13097_v41 = vpack.c.bf16 %v10215_v53, %v10213_v10 }
0x3937   : > { %v14030_v2 = vpop.eup %14029 }
0x3938   : > { %v9527_v60 = vmul.f32 %v14030_v2, %v14028_v27  ;;  %v13095_v2 = vpack.c.bf16 %v10210_v25, %v10208_v14  ;;  %v10351_v14 = vld [vmem:[%s16737_s7 + $0xe0] sm:$0xff]  ;;  %v13131_v25 = vpack.c.bf16 %v10334_v13, %v10333_v11 }
0x393a   : > { %12267 = vmatmul.mubr.msk.f32.vlgmr.msra.gmra.mrb[84].mxu0 %vm1540_vm1, %v9527_v60  ;;  %v10214_v60 = vld [vmem:[%s15310_s4 + $0x30] sm:$0xff] }
0x393b   : > { %12280 = vmatprep.mubr.msk.f32.mxu0 %vm14691_vm13, %v14686_v9 }
0x393e   : > { %13078 = vmatpush3.bf16.xpose.msk.msra.mxu0 %vm16126_vm12, %v13076_v47  ;;  %v10217_v47 = vld [vmem:[%s15310_s4 + $0x48] sm:$0xff] }
0x393f   : > { %13083 = vmatprep.subr.bf16.mxu0 %v14690_v26 }
0x3945   : > { %12281 = vmatmul.mubr.msk.f32.vlgmr.msra.gmra.mrb[86].mxu0 %vm1540_vm1, %v9770_v38  ;;  %v10219_v38 = vld [vmem:[%s15310_s4 + $0x58] sm:$0xff] }
0x3946   : > { %12294 = vmatprep.mubr.msk.f32.mxu0 %vm14691_vm13, %v14686_v9 }
0x396d   : > { %v9603_v21 = vpop.f32.mrb[82].mxu0 }
0x396e   : > { %v12261_v52 = vpop.f32.mrb[83].mxu0  ;;  %12273 = vmatprep.mubr.msk.f32.mxu1 %vm1540_vm1, %v9603_v21  ;;  %v13099_v21 = vpack.c.bf16 %v10214_v60, %v10212_v39 }
0x396f   : > { %v13101_v52 = vpack.c.bf16 %v10219_v38, %v10217_v47 }
0x3a0d   : > { %v9682_v29 = vpop.f32.mrb[84].mxu0 }
0x3a0e   : > { %v12268_v7 = vpop.f32.mrb[85].mxu0  ;;  %12274 = vmatmul.mubr.msk.f32.vlgmr.msra.gmra.mrb[82].mxu1 %vm1540_vm1, %v9682_v29 }
0x3a0f   : > { %13082 = vmatpush3.bf16.xpose.msk.msra.mxu1 %vm16126_vm12, %v13080_v22  ;;  %12287 = vmatprep.mubr.msk.f32.mxu1 %vm14691_vm13, %v14686_v9  ;;  %v10221_v7 = vld [vmem:[%s15310_s4 + $0x68] sm:$0xff] }
0x3a10   : > { %13086 = vmatprep.subr.bf16.mxu1 %v14690_v26 }
0x3a16   : > { %12288 = vmatmul.mubr.msk.f32.vlgmr.msra.gmra.mrb[86].mxu1 %vm1540_vm1, %v9852_v0  ;;  %v10223_v0 = vld [vmem:[%s15310_s4 + $0x78] sm:$0xff] }
0x3a17   : > { %12301 = vmatprep.mubr.msk.f32.mxu1 %vm14691_vm13, %v14686_v9 }
0x3a18   : > { %v9847_v36 = vpop.f32.mrb[86].mxu0 }
0x3a19   : > { %v9933_v44 = vmul.f32 0.25, %v9847_v36  ;;  %v12282_v16 = vpop.f32.mrb[87].mxu0  ;;  %v13105_v36 = vpack.c.bf16 %v10223_v0, %v10221_v7 }
0x3a1a   : > { %v10222_v16 = vld [vmem:[%s15310_s4 + $0x70] sm:$0xff] }
0x3a1b   : > { %v9935_v31 = vsel %vm1540_vm1, %v9933_v44, -inf }
0x3a1c   : > { %9936 = vmax.xlane.f32.xlu0 %v9935_v31 }
0x3aa9   : > { %v9937_v55 = vpop.xlane.xlu0 %9936 }
0x3aaa   : > { %v9941_v34 = vsub.f32 %v9933_v44, %v9937_v55  ;;  %v10220_v44 = vld [vmem:[%s15310_s4 + $0x60] sm:$0xff]  ;;  %v10339_v55 = vld [vmem:[%s16737_s7 + $0x80] sm:$0xff]  ;;  %s16953_s4 = sld [smem:[#allocation59_spill]] }
0x3aab   : > { %v13107_v31 = vpack.c.bf16 %v10222_v16, %v10220_v44 }
0x3aac   : > { %v9943_v6 = vmul.f32 1.442695, %v9941_v34  ;;  %v10340_v34 = vld [vmem:[%s16737_s7 + $0x88] sm:$0xff] }
0x3aae   : > { %14031 = vpow2.f32 %v9943_v6  ;;  %v10323_v6 = vld [vmem:[%s16737_s7] sm:$0xff] }
0x3ab8   : > { %v14032_v56 = vpop.eup %14031 }
0x3ab9   : > { %v9947_v28 = vsel %vm1540_vm1, %v14032_v56, 0.0 }
0x3aba   : > { %9948 = vadd.xlane.f32.xlu0 %v9947_v28  ;;  %v10324_v28 = vld [vmem:[%s16737_s7 + $0x8] sm:$0xff] }
0x3ae9   : > { %v9929_v26 = vpop.f32.mrb[86].mxu1 }
0x3aea   : > { %v9934_v46 = vmul.f32 0.25, %v9929_v26  ;;  %v12289_v23 = vpop.f32.mrb[87].mxu1  ;;  %v10341_v26 = vld [vmem:[%s16737_s7 + $0x90] sm:$0xff] }
0x3aeb   : > { %v13111_v23 = vpack.c.bf16 %v10324_v28, %v10323_v6 }
0x3aec   : > { %v9938_v35 = vsel %vm1540_vm1, %v9934_v46, -inf }
0x3aed   : > { %9939 = vmax.xlane.f32.xlu1 %v9938_v35 }
0x3afe   : > { %13646 = vrot.lane.b32.xlu1 %v16175_v48, %s14696_s16 }
0x3b47   : > { %v9949_v43 = vpop.xlane.xlu0 %9948 }
0x3b48   : > { %14033 = vrcp.f32 %v9949_v43  ;;  %v10325_v43 = vld [vmem:[%s16737_s7 + $0x10] sm:$0xff] }
0x3b52   : > { %v14034_v57 = vpop.eup %14033 }
0x3b53   : > { %v9955_v12 = vmul.f32 %v14034_v57, %v14032_v56  ;;  %v13109_v56 = vpack.c.bf16 %v10340_v34, %v10339_v55  ;;  %v10328_v57 = vld [vmem:[%s16737_s7 + $0x28] sm:$0xff] }
0x3b7a   : > { %v9940_v1 = vpop.xlane.xlu1 %9939 }
0x3b7b   : > { %v9942_v37 = vsub.f32 %v9934_v46, %v9940_v1  ;;  %v10342_v46 = vld [vmem:[%s16737_s7 + $0x98] sm:$0xff] }
0x3b7c   : > { %v13113_v35 = vpack.c.bf16 %v10342_v46, %v10341_v26  ;;  %v10326_v1 = vld [vmem:[%s16737_s7 + $0x18] sm:$0xff] }
0x3b7d   : > { %v9945_v8 = vmul.f32 1.442695, %v9942_v37  ;;  %v10343_v37 = vld [vmem:[%s16737_s7 + $0xa0] sm:$0xff] }
0x3b7e   : > { %v13647_v49 = vpop.permute.xlu1 %13646 }
0x3b7f   : > { %14035 = vpow2.f32 %v9945_v8  ;;  %v13649_v62 = vunpack.i.h.bf16 %v13647_v49  ;;  %v13648_v17 = vunpack.i.l.bf16 %v13647_v49  ;;  %v10344_v8 = vld [vmem:[%s16737_s7 + $0xa8] sm:$0xff]  ;;  %v13115_v49 = vpack.c.bf16 %v10326_v1, %v10325_v43 }
0x3b81   : > { %v13084_v30 = vpack.c.bf16 %v13649_v62, %v13648_v17  ;;  %v13117_v62 = vpack.c.bf16 %v10344_v8, %v10343_v37  ;;  %v10327_v17 = vld [vmem:[%s16737_s7 + $0x20] sm:$0xff] }
0x3b83   : > { %13085 = vmatpush3.bf16.msra.mxu0 %v13084_v30  ;;  %v10345_v30 = vld [vmem:[%s16737_s7 + $0xb0] sm:$0xff] }
0x3b84   : > { %13094 = vmatprep.subr.bf16.mxu0 %v13093_v24  ;;  %v10352_v24 = vld [vmem:[%s16737_s7 + $0xe8] sm:$0xff] }
0x3b85   : > { %v13133_v10 = vpack.c.bf16 %v10352_v24, %v10351_v14 }
0x3b86   : > { %12295 = vmatmul.mubr.msk.f32.vlgmr.msra.gmra.mrb[88].mxu0 %vm1540_vm1, %v9955_v12  ;;  %v10346_v12 = vld [vmem:[%s16737_s7 + $0xb8] sm:$0xff] }
0x3b87   : > { %10306 = vmatprep.mubr.f32.mxu0 %v14686_v9  ;;  %13096 = vmatpush1.bf16.msra.mxu0 %v13095_v2  ;;  %v11370_v2 = vld [vmem:[%s15302_s5 + $0x2] ss:$0 sm:$0xff]  ;;  %s11383_s5 = sshll.u32 %s15924_s28, 7 }
0x3b88   : > { %13098 = vmatprep.subr.bf16.mxu0 %v13097_v41  ;;  %s16779_s26 = scalar_lea.vmem %s16953_s4, %s11383_s5 }
0x3b89   : > { %v14036_v48 = vpop.eup %14035  ;;  %v10440_v7 = vld [vmem:[%s16779_s26 + $0x8] sm:$0xff]  ;;  %v10441_v0 = vld [vmem:[%s16779_s26 + $0x10] sm:$0xff]  ;;  %v10442_v44 = vld [vmem:[%s16779_s26 + $0x18] sm:$0xff] }
0x3b8a   : > { %v9950_v63 = vsel %vm1540_vm1, %v14036_v48, 0.0  ;;  %v13145_v16 = vpack.c.bf16 %v10442_v44, %v10441_v0  ;;  %v10444_v55 = vld [vmem:[%s16779_s26 + $0x28] sm:$0xff]  ;;  %v10445_v6 = vld [vmem:[%s16779_s26 + $0x30] sm:$0xff]  ;;  %v10447_v26 = vld [vmem:[%s16779_s26 + $0x40] sm:$0xff] }
0x3b8b   : > { %9951 = vadd.xlane.f32.xlu0 %v9950_v63  ;;  %13100 = vmatpush1.bf16.msra.mxu0 %v13099_v21  ;;  %v13121_v63 = vpack.c.bf16 %v10346_v12, %v10345_v30  ;;  %v10335_v21 = vld [vmem:[%s16737_s7 + $0x60] sm:$0xff]  ;;  %v10448_v46 = vld [vmem:[%s16779_s26 + $0x48] sm:$0xff] }
0x3b8c   : > { %13102 = vmatprep.subr.bf16.mxu0 %v13101_v52  ;;  %v10336_v52 = vld [vmem:[%s16737_s7 + $0x68] sm:$0xff] }
0x3b8d   : > { %v13135_v20 = vpack.c.bf16 %v10336_v52, %v10335_v21 }
0x3b8f   : > { %13104 = vmatpush1.bf16.msra.mxu0 %v13103_v15  ;;  %v10354_v15 = vld [vmem:[%s16737_s7 + $0xf8] sm:$0xff] }
0x3b90   : > { %13106 = vmatprep.subr.bf16.mxu0 %v13105_v36 }
0x3b93   : > { %13108 = vmatpush1.bf16.msra.mxu0 %v13107_v31  ;;  %v10443_v31 = vld [vmem:[%s16779_s26 + $0x20] sm:$0xff] }
0x3b94   : > { %v13149_v34 = vpack.c.bf16 %v10444_v55, %v10443_v31 }
0x3ba1   : > { %13651 = vrot.lane.b32.xlu0 %v16188_v58, %s14696_s16  ;;  %s11385_s16 = sshll.u32 %s15924_s28, 4 }
0x3c18   : > { %v9952_v54 = vpop.xlane.xlu0 %9951 }
0x3c19   : > { %14037 = vrcp.f32 %v9952_v54  ;;  %v10329_v54 = vld [vmem:[%s16737_s7 + $0x30] sm:$0xff] }
0x3c1c   : > { %v13652_v45 = vpop.permute.xlu0 %13651 }
0x3c1d   : > { %v13654_v19 = vunpack.i.h.bf16 %v13652_v45  ;;  %v13653_v51 = vunpack.i.l.bf16 %v13652_v45  ;;  %v10348_v45 = vld [vmem:[%s16737_s7 + $0xc8] sm:$0xff] }
0x3c1f   : > { %v13087_v27 = vpack.c.bf16 %v13654_v19, %v13653_v51  ;;  %v13123_v19 = vpack.c.bf16 %v10330_v4, %v10329_v54  ;;  %v13125_v51 = vpack.c.bf16 %v10348_v45, %v10347_v40  ;;  %v10449_v54 = vld [vmem:[%s16779_s26 + $0x50] sm:$0xff]  ;;  %v10450_v4 = vld [vmem:[%s16779_s26 + $0x58] sm:$0xff]  ;;  %v10451_v45 = vld [vmem:[%s16779_s26 + $0x60] sm:$0xff] }
0x3c20   : > { %v13161_v40 = vpack.c.bf16 %v10450_v4, %v10449_v54 }
0x3c21   : > { %13088 = vmatpush3.bf16.msra.mxu1 %v13087_v27  ;;  %v10332_v27 = vld [vmem:[%s16737_s7 + $0x48] sm:$0xff] }
0x3c22   : > { %13090 = vmatprep.subr.bf16.mxu1 %v13089_v3 }
0x3c23   : > { %v14038_v33 = vpop.eup %14037 }
0x3c24   : > { %v9956_v58 = vmul.f32 %v14038_v33, %v14036_v48  ;;  %v13119_v48 = vpack.c.bf16 %v10328_v57, %v10327_v17  ;;  %v10349_v33 = vld [vmem:[%s16737_s7 + $0xd0] sm:$0xff] }
0x3c26   : > { %12302 = vmatmul.mubr.msk.f32.vlgmr.msra.gmra.mrb[88].mxu1 %vm1540_vm1, %v9956_v58  ;;  %v10350_v58 = vld [vmem:[%s16737_s7 + $0xd8] sm:$0xff] }
0x3c27   : > { %13092 = vmatpush3.bf16.msra.mxu1 %v13089_v3  ;;  %v10331_v3 = vld [vmem:[%s16737_s7 + $0x40] sm:$0xff] }
0x3c28   : > { %13110 = vmatprep.subr.bf16.mxu1 %v13109_v56  ;;  %v10446_v56 = vld [vmem:[%s16779_s26 + $0x38] sm:$0xff] }
0x3c29   : > { %v13153_v28 = vpack.c.bf16 %v10446_v56, %v10445_v6 }
0x3c59   : > { %v10032_v5 = vpop.f32.mrb[88].mxu0 }
0x3c5a   : > { %v12296_v42 = vpop.f32.mrb[89].mxu0  ;;  %12308 = vmatprep.mubr.msk.f32.mxu1 %vm1540_vm1, %v10032_v5  ;;  %v13127_v5 = vpack.c.bf16 %v10332_v27, %v10331_v3  ;;  %v10453_v3 = vld [vmem:[%s16779_s26 + $0x70] sm:$0xff]  ;;  %v10454_v27 = vld [vmem:[%s16779_s26 + $0x78] sm:$0xff] }
0x3c5b   : > { %v13129_v42 = vpack.c.bf16 %v10350_v58, %v10349_v33  ;;  %v13169_v33 = vpack.c.bf16 %v10454_v27, %v10453_v3 }
0x3cf9   : > { %v10111_v22 = vpop.f32.mrb[88].mxu1 }
0x3cfa   : > { %v12303_v29 = vpop.f32.mrb[89].mxu1  ;;  %12309 = vmatmul.mubr.msk.f32.vlgmr.msra.gmra.mrb[82].mxu1 %vm1540_vm1, %v10111_v22  ;;  %v13137_v22 = vpack.c.bf16 %v10354_v15, %v10353_v18 }
0x3cfb   : > { %13112 = vmatpush3.bf16.msra.mxu1 %v13111_v23  ;;  %v10338_v29 = vld [vmem:[%s16737_s7 + $0x78] sm:$0xff]  ;;  %v13157_v23 = vpack.c.bf16 %v10448_v46, %v10447_v26 }
0x3cfc   : > { %13114 = vmatprep.subr.bf16.mxu1 %v13113_v35  ;;  %v10224_v35 = vld [vmem:[%s15312_s6] sm:$0x3]  ;;  %s16954_s6 = sld [smem:[#allocation60_spill]] }
0x3cfd   : > { %v10229_v43 = vrot.slane %v10224_v35, %v15420_v50  ;;  %v10233_v1 = vrot.slane %v10224_v35, %v15429_v59 }
0x3cff   : > { %13116 = vmatpush3.bf16.msra.mxu1 %v13115_v49 }
0x3d00   : > { %13118 = vmatprep.subr.bf16.mxu1 %v13117_v62 }
0x3d02   : > { %s1415_s10 = scalar_lea.vmem %s16954_s6, %s11384_s2 }
0x3d03   : > { %13120 = vmatpush3.bf16.msra.mxu1 %v13119_v48  ;;  %v10539_v58 = vld [vmem:[%s1415_s10] sm:$0xff]  ;;  %v10542_v13 = vld [vmem:[%s1415_s10 + $0x18] sm:$0xff]  ;;  %v10545_v15 = vld [vmem:[%s1415_s10 + $0x30] sm:$0xff] }
0x3d04   : > { %13122 = vmatprep.subr.bf16.mxu1 %v13121_v63  ;;  %v10543_v24 = vld [vmem:[%s1415_s10 + $0x20] sm:$0xff] }
0x3d07   : > { %13124 = vmatpush3.bf16.msra.mxu1 %v13123_v19  ;;  %v10452_v19 = vld [vmem:[%s16779_s26 + $0x68] sm:$0xff] }
0x3d08   : > { %13126 = vmatprep.subr.bf16.mxu1 %v13125_v51  ;;  %v13165_v51 = vpack.c.bf16 %v10452_v19, %v10451_v45 }
0x3d0b   : > { %13128 = vmatpush3.bf16.msra.mxu1 %v13127_v5  ;;  %v10540_v5 = vld [vmem:[%s1415_s10 + $0x8] sm:$0xff] }
0x3d0c   : > { %13130 = vmatprep.subr.bf16.mxu1 %v13129_v42  ;;  %v10541_v42 = vld [vmem:[%s1415_s10 + $0x10] sm:$0xff]  ;;  %v13173_v11 = vpack.c.bf16 %v10540_v5, %v10539_v58 }
0x3d0d   : > { %v13177_v14 = vpack.c.bf16 %v10542_v13, %v10541_v42 }
0x3d0f   : > { %13132 = vmatpush3.bf16.msra.mxu1 %v13131_v25  ;;  %v10544_v25 = vld [vmem:[%s1415_s10 + $0x28] sm:$0xff] }
0x3d10   : > { %13134 = vmatprep.subr.bf16.mxu1 %v13133_v10  ;;  %v13181_v10 = vpack.c.bf16 %v10544_v25, %v10543_v24 }
0x3d13   : > { %13136 = vmatpush3.bf16.msra.mxu1 %v13135_v20 }
0x3d14   : > { %13138 = vmatprep.subr.bf16.mxu1 %v13137_v22  ;;  %v10546_v22 = vld [vmem:[%s1415_s10 + $0x38] sm:$0xff] }
0x3dcd   : > { %v12310_v53 = vpop.f32.mrb[82].mxu1 }
0x3dce   : > { %v10187_v41 = vpop.f32.mrb[83].mxu1  ;;  %v10199_v60 = vadd.f32 %v12310_v53, %v16551_v32 }
0x3dcf   : > { %v10198_v39 = vadd.f32 %v10187_v41, %v16549_v61  ;;  %v10337_v61 = vld [vmem:[%s16737_s7 + $0x70] sm:$0xff] }
0x3dd0   : > { %v10207_v38 = vadd.f32 %v11370_v2, %v10199_v60  ;;  %v13139_v32 = vpack.c.bf16 %v10338_v29, %v10337_v61  ;;  %v13185_v61 = vpack.c.bf16 %v10546_v22, %v10545_v15 }
0x3dd1   : > { %v10206_v47 = vadd.f32 %v11370_v2, %v10198_v39  ;;  %v11373_v2 = vld [vmem:[%s1242_s11] ss:$0 sm:$0xff]  ;;  %s16956_s11 = scalar_lea.vmem [#allocation29], %s15288_s30  ;;  %s16957_s30 = sld [smem:[#allocation62_spill]] }
0x3dd2   : > { %13140 = vmatpush3.bf16.msra.mxu1 %v13139_v32  ;;  %v11374_v29 = vld [vmem:[%s16956_s11] ss:$0 sm:$0xff] }
0x3dd3   : > { %11371 = vmatmul.mubr.msk.f32.vlgmr.msra.gmra.mrb[90].mxu0 %vm2221_vm3, %v10206_v47  ;;  %13174 = vmatprep.subr.bf16.mxu1 %v13173_v11 }
0x3dd4   : > { %10312 = vmatprep.mubr.f32.mxu0 %v14686_v9  ;;  %v10439_v9 = vld [vmem:[%s16779_s26] sm:$0xff] }
0x3dd5   : > { %v13141_v36 = vpack.c.bf16 %v10440_v7, %v10439_v9 }
0x3dd7   : > { %11372 = vmatmul.mubr.msk.f32.gmra.mrb[92].mxu0 %vm2221_vm3, %v10207_v38  ;;  %13142 = vmatprep.subr.bf16.mxu0 %v13141_v36  ;;  %s1423_s0 = scalar_lea.vmem %s16957_s30, %s11385_s16 }
0x3dd8   : > { %13144 = vmatpush3.bf16.msra.mxu0 %v13141_v36 }
0x3dd9   : > { %13146 = vmatprep.subr.bf16.mxu0 %v13145_v16 }
0x3ddc   : > { %13148 = vmatpush3.bf16.msra.mxu0 %v13145_v16  ;;  %v11375_v16 = vld [vmem:[%s1418_s20] ss:$0 sm:$0xff] }
0x3ddd   : > { %13150 = vmatprep.subr.bf16.mxu0 %v13149_v34 }
0x3de0   : > { %13152 = vmatpush3.bf16.msra.mxu0 %v13149_v34 }
0x3de1   : > { %13154 = vmatprep.subr.bf16.mxu0 %v13153_v28 }
0x3de4   : > { %13156 = vmatpush3.bf16.msra.mxu0 %v13153_v28 }
0x3de5   : > { %13158 = vmatprep.subr.bf16.mxu0 %v13157_v23 }
0x3de8   : > { %13160 = vmatpush3.bf16.msra.mxu0 %v13157_v23 }
0x3de9   : > { %13162 = vmatprep.subr.bf16.mxu0 %v13161_v40 }
0x3dec   : > { %13164 = vmatpush3.bf16.msra.mxu0 %v13161_v40 }
0x3ded   : > { %13166 = vmatprep.subr.bf16.mxu0 %v13165_v51 }
0x3df0   : > { %13168 = vmatpush3.bf16.msra.mxu0 %v13165_v51 }
0x3df1   : > { %13170 = vmatprep.subr.bf16.mxu0 %v13169_v33 }
0x3df4   : > { %13172 = vmatpush3.bf16.msra.mxu0 %v13169_v33 }
0x3ea6   : > { %v10308_v37 = vpop.f32.mrb[90].mxu0 }
0x3ea7   : > { %v10309_v8 = vadd.f32 %v10308_v37, %v10229_v43  ;;  %v10310_v49 = vpop.f32.mrb[91].mxu0 }
0x3ea8   : > { %v10311_v62 = vadd.f32 %v10310_v49, %v10233_v1 }
0x3ea9   : > { %v10319_v30 = vmax.f32 %v10309_v8, 0.0 }
0x3eaa   : > { %v10320_v17 = vmax.f32 %v10311_v62, 0.0  ;;  %v10314_v57 = vpop.f32.mrb[92].mxu0 }
0x3eab   : > { %v10315_v12 = vadd.f32 %v10314_v57, %v10229_v43  ;;  %v10316_v48 = vpop.f32.mrb[93].mxu0 }
0x3eac   : > { %v10317_v63 = vadd.f32 %v10316_v48, %v10233_v1  ;;  %10426 = vmatprep.mubr.f32.mxu1 %v10320_v17  ;;  %v10645_v1 = vstv %s1424_s8 }
0x3ead   : > { %10427 = vmatmul.mubr.f32.vlgmr.msra.gmra.mrb[90].mxu1 %v10319_v30  ;;  %v10321_v59 = vmax.f32 %v10315_v12, 0.0 }
0x3eae   : > { %v10322_v50 = vmax.f32 %v10317_v63, 0.0  ;;  %13176 = vmatpush3.bf16.msra.mxu1 %v13173_v11 }
0x3eaf   : > { %13178 = vmatprep.subr.bf16.mxu1 %v13177_v14 }
0x3eb0   : > { %10431 = vmatprep.mubr.f32.mxu1 %v10322_v50 }
0x3eb1   : > { %10432 = vmatmul.mubr.f32.gmra.mrb[92].mxu1 %v10321_v59 }
0x3eb2   : > { %13180 = vmatpush3.bf16.msra.mxu1 %v13177_v14 }
0x3eb3   : > { %13182 = vmatprep.subr.bf16.mxu1 %v13181_v10 }
0x3eb6   : > { %13184 = vmatpush3.bf16.msra.mxu1 %v13181_v10 }
0x3eb7   : > { %13186 = vmatprep.subr.bf16.mxu1 %v13185_v61 }
0x3eba   : > { %13188 = vmatpush3.bf16.msra.mxu1 %v13185_v61 }
0x3f80   : > { %v11698_v53 = vpop.f32.mrb[90].mxu1 }
0x3f81   : > { %v11699_v41 = vpop.f32.mrb[91].mxu1 }
0x3f82   : > { %v11700_v39 = vadd.f32 %v11699_v41, %v11698_v53 }
0x3f84   : > { %v10429_v60 = vadd.f32 %v11700_v39, %v11373_v2  ;;  %v11701_v47 = vpop.f32.mrb[92].mxu1 }
0x3f85   : > { %v11702_v38 = vpop.f32.mrb[93].mxu1 }
0x3f86   : > { %v10437_v21 = vmax.f32 %v10429_v60, 0.0  ;;  %v11703_v52 = vadd.f32 %v11702_v38, %v11701_v47 }
0x3f88   : > { %v10434_v20 = vadd.f32 %v11703_v52, %v11373_v2  ;;  %12343 = vmatprep.mubr.f32.mxu0 %v10437_v21 }
0x3f8a   : > { %v10438_v18 = vmax.f32 %v10434_v20, 0.0 }
0x3f8c   : > { %12344 = vmatmul.mubr.f32.vlgmr.msra.gmra.mrb[94].mxu0 %v10438_v18 }
0x405f   : > { %v12345_v32 = vpop.f32.mrb[94].mxu0 }
0x4060   : > { %v10534_v9 = vadd.f32 %v12345_v32, %v11374_v29  ;;  %v10528_v7 = vpop.f32.mrb[95].mxu0 }
0x4061   : > { %v10529_v0 = vadd.f32 %v11374_v29, %v10528_v7 }
0x4062   : > { %v10538_v44 = vmax.f32 %v10534_v9, 0.0 }
0x4063   : > { %v10537_v36 = vmax.f32 %v10529_v0, 0.0 }
0x4065   : > { %12362 = vmatprep.mubr.msk.f32.mxu1 %vm2221_vm3, %v10537_v36 }
0x4066   : > { %12363 = vmatmul.mubr.msk.f32.vlgmr.msra.gmra.mrb[94].mxu1 %vm2221_vm3, %v10538_v44 }
0x4139   : > { %v12364_v31 = vpop.f32.mrb[94].mxu1 }
0x413a   : > { %v10632_v55 = vadd.f32 %v12364_v31, %v11375_v16  ;;  %v10626_v34 = vpop.f32.mrb[95].mxu1 }
0x413b   : > { %v10627_v6 = vadd.f32 %v11375_v16, %v10626_v34 }
0x413c   : > { %14039 = vtanh.f32 %v10632_v55 }
0x413d   : > { %14041 = vtanh.f32 %v10627_v6 }
0x4146   : > { %v14040_v56 = vpop.eup %14039 }
0x4147   : > { %v14042_v28 = vpop.eup %14041  ;;  %v10638_v26 = vadd.f32 1.0, %v14040_v56 }
0x4148   : > { %v10637_v46 = vadd.f32 1.0, %v14042_v28 }
0x4149   : > { %v10640_v23 = vmul.f32 3.5, %v10638_v26 }
0x414a   : > { %v10639_v35 = vmul.f32 3.5, %v10637_v46 }
0x414b   : > { %v10642_v43 = vadd.f32 -5.0, %v10640_v23 }
0x414c   : > { %v10641_v37 = vadd.f32 -5.0, %v10639_v35 }
0x414d   : > { %v10644_v8 = vsub.f32 %v10642_v43, %v10632_v55 }
0x414e   : > { %v10643_v49 = vsub.f32 %v10641_v37, %v10627_v6 }
0x414f   : > { %v10647_v62 = vmul.f32 %v10645_v1, %v10644_v8 }
0x4150   : > { %v10646_v17 = vmul.f32 %v10645_v1, %v10643_v49 }
0x4151   : > { %v10649_v57 = vadd.f32 %v10647_v62, %v10632_v55 }
0x4152   : > { %v10648_v30 = vadd.f32 %v10646_v17, %v10627_v6 }
0x4153   : > { %10652 = vst.msk [vmem:[%s1423_s0 + $0x8] sm:$0xff] %vm10650_vm14, %v10649_v57 }
0x4154   : > { %10651 = vst.msk [vmem:[%s1423_s0] sm:$0xff] %vm10650_vm14, %v10648_v30 }
0x4155 PF: > { %s16958_s11 = sld [smem:[#allocation66_spill]]  ;;  %s16959_s7 = sld [smem:[#allocation63_spill]] }
0x4156   : > { %s16960_s10 = sld [smem:[#allocation64_spill]]  ;;  %s16961_s0 = sld [smem:[#allocation67_spill]] }
0x415b   : > { %p84_p8 = scmp.ge.s32.totalorder %s16958_s11, 4  }
0x415d   :  { %86 = sbr.rel (!%p84_p8) target bundleno = 72 (0x48), region = 351 }
0x4164   :  { %10674 = vsyncpa [#allocation4], 1 }
0x4165   :  { %10676 = vsyncpa [#allocation4 + $0x1], 1 }
0x4166   :  { %10677 = vsyncpa [#allocation6], 1 }
0x4167   :  { %10678 = vsyncpa [#allocation9], 1 }
0x4168   :  { %10679 = vsyncpa [#allocation12], 1 }
0x4169   :  { %10680 = vsyncpa [#allocation15], 1 }
0x416a   :  { %10681 = vsyncpa [#allocation18], 1 }
0x416b   :  { %10682 = vsyncpa [#allocation21], 1 }
0x416c   :  { %10684 = vsyncpa [#allocation21 + $0x1], 1 }
0x416d   :  { %10685 = vsyncpa [#allocation24], 1 }
0x416e   :  { %10687 = vsyncpa [#allocation24 + $0x1], 1 }
0x416f   :  { %10688 = vsyncpa [#allocation27], 1 }
0x4170   :  { %10690 = vsyncpa [#allocation27 + $0x1], 1 }
0x4171   :  { %10691 = vsyncpa [#allocation30], 1 }
0x4172   :  { %10693 = vsyncpa [#allocation30 + $0x1], 1 }

</bundles_post_ra>
